<compile_context>
chip_gen: v6e
topology: v6e:2x2x1
jax: 0.10.0
libtpu: 0.0.40
codegen_flags: <defaults>
</compile_context>

<pallas_src>
import numpy as np
import jax
import jax.numpy as jnp
from jax import lax
from jax.experimental import pallas as pl
from jax.experimental.pallas import tpu as pltpu


def sk_kernel(x_ref, w_ref, s_ref, b_ref, wt_ref, st_ref, bt_ref,
              wa1_ref, ba1_ref, wa2_ref, ba2_ref, out_ref,
              pad_ref, acc_ref):
    B, H, W, Cin = x_ref.shape
    HW = H * W
    M = B * HW
    Cout = out_ref.shape[1]
    Hp, Wp = H + 4, W + 4

    # ---- padded input: zero ONLY the 2-wide border (megacore-safe), then ---
    # ---- overwrite the interior with this step's samples -------------------
    zrow = jnp.zeros((B, 2, Wp, Cin), pad_ref.dtype)
    zcol = jnp.zeros((B, H, 2, Cin), pad_ref.dtype)
    pad_ref[:, 0:2, :, :] = zrow                 # top rows
    pad_ref[:, H + 2:Hp, :, :] = zrow            # bottom rows
    pad_ref[:, 2:2 + H, 0:2, :] = zcol           # left cols
    pad_ref[:, 2:2 + H, W + 2:Wp, :] = zcol      # right cols
    pad_ref[:, 2:2 + H, 2:2 + W, :] = x_ref[...]   # input already bf16

    # ---- both grouped convs as K-chunked accumulating bf16 MXU dots --------
    # Chunk c covers 2 taps -> 256 contraction columns laid out as
    # [b1 tap-t Cin | b2 tap-t Cin | b1 tap-(t+1) Cin | b2 tap-(t+1) Cin],
    # matching the row order of the block-diagonal weight w_ref.
    TAPS = 9
    taps_per_chunk = 2        # K=256/pass (v6e/v7x); 1-tap K=128 also fine on v5e
    tap = 0
    while tap < TAPS:
        nt = min(taps_per_chunk, TAPS - tap)
        slabs = []
        for t in range(tap, tap + nt):
            kh, kw = t // 3, t % 3
            # branch 1: padding=1, dilation=1 (margin-2 buffer -> offset 1+k)
            sl1 = pad_ref[:, 1 + kh:1 + kh + H, 1 + kw:1 + kw + W, :].reshape(M, Cin)
            # branch 2: padding=2, dilation=2 (offset 2*k)
            sl2 = pad_ref[:, 2 * kh:2 * kh + H, 2 * kw:2 * kw + W, :].reshape(M, Cin)
            slabs += [sl1, sl2]
        lhs = jnp.concatenate(slabs, axis=1)                      # (M, nt*2*Cin)
        part = jnp.dot(lhs, w_ref[2 * Cin * tap:2 * Cin * (tap + nt), :],
                       preferred_element_type=jnp.float32)
        if tap == 0:
            acc_ref[...] = part
        else:
            acc_ref[...] += part
        tap += nt

    # fused (conv bias + BatchNorm2d eval) affine + ReLU; [:, :Cout] = branch1
    o = jnp.maximum(acc_ref[...] * s_ref[...] + b_ref[...], 0.0)  # (M, 2*Cout)

    # ---- per-sample pooling / attention / recombination (B is static) ------
    for b in range(B):
        ob = o[b * HW:(b + 1) * HW, :]                            # (HW, 2*Cout)

        # AdaptiveAvgPool2d((1,1)) on (o1 + o2)
        pooled_f = jnp.mean(ob, axis=0, keepdims=True)            # (1, 2*Cout)
        pooled = pooled_f[:, :Cout] + pooled_f[:, Cout:]          # (1, Cout)

        # transform: Linear + BatchNorm1d(eval) + ReLU
        z = jnp.dot(pooled, wt_ref[...], preferred_element_type=jnp.float32)
        z = jnp.maximum(z * st_ref[...] + bt_ref[...], 0.0)       # (1, d)

        # attention logits + softmax over the 2 branches
        a1 = jnp.dot(z, wa1_ref[...], preferred_element_type=jnp.float32) + ba1_ref[...]
        a2 = jnp.dot(z, wa2_ref[...], preferred_element_type=jnp.float32) + ba2_ref[...]
        mx = jnp.maximum(a1, a2)
        e1 = jnp.exp(a1 - mx)
        e2 = jnp.exp(a2 - mx)
        inv = 1.0 / (e1 + e2)
        att = jnp.concatenate([e1 * inv, e2 * inv], axis=1)       # (1, 2*Cout)

        # weighted recombination; sum the branches BEFORE the transpose so the
        # XLU transpose payload is (HW, Cout), not (HW, 2*Cout)
        weighted = ob * att                                       # (HW, 2*Cout)
        combined = weighted[:, :Cout] + weighted[:, Cout:]        # (HW, Cout)
        out_ref[b] = jnp.transpose(combined).astype(out_ref.dtype)


def sk_forward(x_nchw, p, samples_per_step=None):
    N, Cin, H, W = x_nchw.shape
    Cout = p["ba1"].shape[1]
    HW = H * W
    if samples_per_step is None:
        # keep >=2 grid steps when possible so both v7x TensorCores get work;
        # on single-TC v5e/v6e batching samples amortizes the per-step cost.
        samples_per_step = max(1, N // 2)
    B = samples_per_step
    assert N % B == 0, "batch must be divisible by samples_per_step"

    # channels-last + bf16: Cin sits on the lane dim for the in-kernel window
    # slices, and the per-step input DMA is halved (conv path is bf16 anyway).
    x_nhwc = jnp.transpose(x_nchw, (0, 2, 3, 1)).astype(jnp.bfloat16)

    params = [p["w_cat"], p["s_cat"], p["b_cat"], p["wt"], p["st"], p["bt"],
              p["wa1"], p["ba1"], p["wa2"], p["ba2"]]
    param_specs = [pl.BlockSpec(q.shape, lambda n: (0, 0)) for q in params]

    grid_spec = pltpu.PrefetchScalarGridSpec(
        num_scalar_prefetch=0,
        grid=(N // B,),
        in_specs=[pl.BlockSpec((B, H, W, Cin), lambda n: (n, 0, 0, 0))] + param_specs,
        out_specs=pl.BlockSpec((B, Cout, HW), lambda n: (n, 0, 0)),
        scratch_shapes=[
            pltpu.VMEM((B, H + 4, W + 4, Cin), jnp.bfloat16),   # zero-padded input
            pltpu.VMEM((B * HW, 2 * Cout), jnp.float32),        # conv f32 accumulator
        ],
    )

    flops = 2 * N * HW * (18 * Cin) * (2 * Cout)
    bytes_accessed = (int(x_nhwc.size) * 2
                      + sum(int(q.size) * q.dtype.itemsize for q in params)
                      + N * Cout * HW * 4)

    out = pl.pallas_call(
        sk_kernel,
        out_shape=jax.ShapeDtypeStruct((N, Cout, HW), jnp.float32),
        grid_spec=grid_spec,
        compiler_params=pltpu.CompilerParams(
            dimension_semantics=("parallel",)),
        cost_estimate=pl.CostEstimate(
            flops=flops, transcendentals=2 * N * Cout,
            bytes_accessed=bytes_accessed),
    )(x_nhwc, *params)
    return out.reshape(N, Cout, H, W)     # already NCHW-ordered -> free reshape


def build_cat_weight(w1_g, w2_g, groups):
    """(Cout, Cin/groups, 3, 3) torch-layout grouped weights -> one block-diag
    dense (18*Cin, 2*Cout) matrix.  Row block t = 128 contraction columns:
    [branch1 tap-t channels | branch2 tap-t channels]; output columns are
    [branch1 Cout | branch2 Cout]."""
    w1 = np.asarray(w1_g, np.float32)
    w2 = np.asarray(w2_g, np.float32)
    Cout, cin_g, KH, KW = w1.shape
    Cin = cin_g * groups
    out_g = Cout // groups
    taps = KH * KW
    wcat = np.zeros((taps * 2 * Cin, 2 * Cout), np.float32)
    for co in range(Cout):
        g = co // out_g
        for kh in range(KH):
            for kw in range(KW):
                t = kh * KW + kw
                base = t * 2 * Cin
                wcat[base + g * cin_g: base + (g + 1) * cin_g, co] = w1[co, :, kh, kw]
                wcat[base + Cin + g * cin_g: base + Cin + (g + 1) * cin_g, Cout + co] = \
                    w2[co, :, kh, kw]
    return jnp.asarray(wcat, jnp.bfloat16)


def make_params(key, in_channel, out_channel, groups=32, reduction=16):
    d = max(out_channel // reduction, 32)
    cin_g = in_channel // groups
    eps = 1e-5
    ks = list(jax.random.split(key, 22))

    def u(k, shape, lo=-0.3, hi=0.3):
        return jax.random.uniform(k, shape, jnp.float32, lo, hi)

    # grouped conv weights (torch layout) + bias
    w1_g, b1_c = u(ks[0], (out_channel, cin_g, 3, 3)), u(ks[1], (out_channel,))
    w2_g, b2_c = u(ks[2], (out_channel, cin_g, 3, 3)), u(ks[3], (out_channel,))
    # BatchNorm2d params (gamma, beta, running_mean, running_var)
    g1, be1 = u(ks[4], (out_channel,), 0.5, 1.5), u(ks[5], (out_channel,))
    m1, v1 = u(ks[6], (out_channel,)), u(ks[7], (out_channel,), 0.5, 1.5)
    g2, be2 = u(ks[8], (out_channel,), 0.5, 1.5), u(ks[9], (out_channel,))
    m2, v2 = u(ks[10], (out_channel,)), u(ks[11], (out_channel,), 0.5, 1.5)
    # transform Linear (math layout: (in, out)) + BatchNorm1d
    wt, bt_lin = u(ks[12], (out_channel, d)), u(ks[13], (d,))
    gt, bet = u(ks[14], (d,), 0.5, 1.5), u(ks[15], (d,))
    mt, vt = u(ks[16], (d,)), u(ks[17], (d,), 0.5, 1.5)
    # attention heads
    wa1, ba1 = u(ks[18], (d, out_channel)), u(ks[19], (out_channel,))
    wa2, ba2 = u(ks[20], (d, out_channel)), u(ks[21], (out_channel,))

    # fold conv/linear bias + eval-mode BN into per-channel scale / bias
    s1 = g1 / jnp.sqrt(v1 + eps); b1 = be1 + (b1_c - m1) * s1
    s2 = g2 / jnp.sqrt(v2 + eps); b2 = be2 + (b2_c - m2) * s2
    st = gt / jnp.sqrt(vt + eps); bt = bet + (bt_lin - mt) * st

    return dict(
        groups=groups, w1_g=w1_g, w2_g=w2_g,
        # fused kernel-side parameters
        w_cat=build_cat_weight(w1_g, w2_g, groups),
        s_cat=jnp.concatenate([s1, s2]).reshape(1, -1),
        b_cat=jnp.concatenate([b1, b2]).reshape(1, -1),
        # per-branch affines (reference) + MLP / attention params
        s1=s1.reshape(1, -1), b1=b1.reshape(1, -1),
        s2=s2.reshape(1, -1), b2=b2.reshape(1, -1),
        wt=wt, st=st.reshape(1, -1), bt=bt.reshape(1, -1),
        wa1=wa1, ba1=ba1.reshape(1, -1),
        wa2=wa2, ba2=ba2.reshape(1, -1),
    )


def sk_reference(x_nchw, p):
    dn = ("NCHW", "OIHW", "NCHW")
    o1 = lax.conv_general_dilated(x_nchw, p["w1_g"], (1, 1), ((1, 1), (1, 1)),
                                  dimension_numbers=dn, feature_group_count=p["groups"])
    o1 = jnp.maximum(o1 * p["s1"][0][None, :, None, None]
                     + p["b1"][0][None, :, None, None], 0.0)
    o2 = lax.conv_general_dilated(x_nchw, p["w2_g"], (1, 1), ((2, 2), (2, 2)),
                                  rhs_dilation=(2, 2),
                                  dimension_numbers=dn, feature_group_count=p["groups"])
    o2 = jnp.maximum(o2 * p["s2"][0][None, :, None, None]
                     + p["b2"][0][None, :, None, None], 0.0)
    pooled = jnp.mean(o1 + o2, axis=(2, 3))                        # (N, C)
    z = jnp.maximum(pooled @ p["wt"] * p["st"][0] + p["bt"][0], 0.0)
    a1 = z @ p["wa1"] + p["ba1"][0]
    a2 = z @ p["wa2"] + p["ba2"][0]
    att = jax.nn.softmax(jnp.stack([a1, a2], axis=-1), axis=-1)
    att1, att2 = att[..., 0], att[..., 1]
    return o1 * att1[:, :, None, None] + o2 * att2[:, :, None, None]


if __name__ == "__main__":
    key = jax.random.PRNGKey(0)
    kx, kp = jax.random.split(key)
    # groups=32 requires channels divisible by 32 -> 64 channels, 16x16 spatial
    N, Cin, H, W = 2, 64, 16, 16
    Cout = 64
    x = jax.random.normal(kx, (N, Cin, H, W), jnp.float32)
    params = make_params(kp, Cin, Cout)

    # conv operands are bf16 in-kernel (f32 accumulation on the MXU), so the
    # comparison against the pure-f32 reference uses a relaxed tolerance.
    out = jax.block_until_ready(sk_forward(x, params))        # grid=(2,), B=1
    assert out.shape == (N, Cout, H, W)
    np.testing.assert_allclose(np.asarray(out), np.asarray(sk_reference(x, params)),
                               rtol=2e-2, atol=2e-2)

    # also exercise multi-sample-per-step batching (grid=(2,), B=2)
    x4 = jax.random.normal(jax.random.PRNGKey(1), (4, Cin, H, W), jnp.float32)
    out4 = jax.block_until_ready(sk_forward(x4, params, samples_per_step=2))
    assert out4.shape == (4, Cout, H, W)
    np.testing.assert_allclose(np.asarray(out4), np.asarray(sk_reference(x4, params)),
                               rtol=2e-2, atol=2e-2)

    print("KERNEL_OK")
</pallas_src>

<mosaic_0001>
module attributes {stable_mosaic.version = 11 : i64} {
  func.func @sk_kernel(%arg0: i32, %arg1: memref<1x16x16x64xbf16, #tpu.memory_space<vmem>>, %arg2: memref<1152x128xbf16, #tpu.memory_space<vmem>>, %arg3: memref<1x128xf32, #tpu.memory_space<vmem>>, %arg4: memref<1x128xf32, #tpu.memory_space<vmem>>, %arg5: memref<64x32xf32, #tpu.memory_space<vmem>>, %arg6: memref<1x32xf32, #tpu.memory_space<vmem>>, %arg7: memref<1x32xf32, #tpu.memory_space<vmem>>, %arg8: memref<32x64xf32, #tpu.memory_space<vmem>>, %arg9: memref<1x64xf32, #tpu.memory_space<vmem>>, %arg10: memref<32x64xf32, #tpu.memory_space<vmem>>, %arg11: memref<1x64xf32, #tpu.memory_space<vmem>>, %arg12: memref<1x64x256xf32, #tpu.memory_space<vmem>>, %arg13: memref<1x20x20x64xbf16, #tpu.memory_space<vmem>>, %arg14: memref<256x128xf32, #tpu.memory_space<vmem>>) attributes {dimension_semantics = [#tpu.dimension_semantics<parallel>], iteration_bounds = array<i64: 2>, scalar_prefetch = 0 : i64, scratch_operands = 2 : i64, tpu.core_type = #tpu.core_type<tc>, window_params = [{transform_indices = @transform_0, window_bounds = array<i64: 1, 16, 16, 64>}, {pipeline_mode = #tpu.pipeline_mode<synchronous>, transform_indices = @transform_1, window_bounds = array<i64: 1152, 128>}, {pipeline_mode = #tpu.pipeline_mode<synchronous>, transform_indices = @transform_2, window_bounds = array<i64: 1, 128>}, {pipeline_mode = #tpu.pipeline_mode<synchronous>, transform_indices = @transform_3, window_bounds = array<i64: 1, 128>}, {pipeline_mode = #tpu.pipeline_mode<synchronous>, transform_indices = @transform_4, window_bounds = array<i64: 64, 32>}, {pipeline_mode = #tpu.pipeline_mode<synchronous>, transform_indices = @transform_5, window_bounds = array<i64: 1, 32>}, {pipeline_mode = #tpu.pipeline_mode<synchronous>, transform_indices = @transform_6, window_bounds = array<i64: 1, 32>}, {pipeline_mode = #tpu.pipeline_mode<synchronous>, transform_indices = @transform_7, window_bounds = array<i64: 32, 64>}, {pipeline_mode = #tpu.pipeline_mode<synchronous>, transform_indices = @transform_8, window_bounds = array<i64: 1, 64>}, {pipeline_mode = #tpu.pipeline_mode<synchronous>, transform_indices = @transform_9, window_bounds = array<i64: 32, 64>}, {pipeline_mode = #tpu.pipeline_mode<synchronous>, transform_indices = @transform_10, window_bounds = array<i64: 1, 64>}, {transform_indices = @transform_11, window_bounds = array<i64: 1, 64, 256>}]} {
    %cst = arith.constant 0.000000e+00 : bf16
    %0 = vector.broadcast %cst : bf16 to vector<1x2x20x64xbf16>
    %cst_0 = arith.constant 0.000000e+00 : bf16
    %1 = vector.broadcast %cst_0 : bf16 to vector<1x16x2x64xbf16>
    %c0 = arith.constant 0 : index
    %c0_1 = arith.constant 0 : index
    %c0_2 = arith.constant 0 : index
    %c0_3 = arith.constant 0 : index
    %2 = vector.load %arg13[%c0, %c0_1, %c0_2, %c0_3] : memref<1x20x20x64xbf16, #tpu.memory_space<vmem>>, vector<1x2x20x64xbf16>
    tpu.vector_store %arg13[%c0, %c0_1, %c0_2, %c0_3], %0 {strides = array<i32>} : memref<1x20x20x64xbf16, #tpu.memory_space<vmem>>, vector<1x2x20x64xbf16>,
    %c0_4 = arith.constant 0 : index
    %c18 = arith.constant 18 : index
    %c0_5 = arith.constant 0 : index
    %c0_6 = arith.constant 0 : index
    %3 = vector.load %arg13[%c0_4, %c18, %c0_5, %c0_6] : memref<1x20x20x64xbf16, #tpu.memory_space<vmem>>, vector<1x2x20x64xbf16>
    tpu.vector_store %arg13[%c0_4, %c18, %c0_5, %c0_6], %0 {strides = array<i32>} : memref<1x20x20x64xbf16, #tpu.memory_space<vmem>>, vector<1x2x20x64xbf16>,
    %c0_7 = arith.constant 0 : index
    %c2 = arith.constant 2 : index
    %c0_8 = arith.constant 0 : index
    %c0_9 = arith.constant 0 : index
    %4 = vector.load %arg13[%c0_7, %c2, %c0_8, %c0_9] : memref<1x20x20x64xbf16, #tpu.memory_space<vmem>>, vector<1x16x2x64xbf16>
    tpu.vector_store %arg13[%c0_7, %c2, %c0_8, %c0_9], %1 {strides = array<i32>} : memref<1x20x20x64xbf16, #tpu.memory_space<vmem>>, vector<1x16x2x64xbf16>,
    %c0_10 = arith.constant 0 : index
    %c2_11 = arith.constant 2 : index
    %c18_12 = arith.constant 18 : index
    %c0_13 = arith.constant 0 : index
    %5 = vector.load %arg13[%c0_10, %c2_11, %c18_12, %c0_13] : memref<1x20x20x64xbf16, #tpu.memory_space<vmem>>, vector<1x16x2x64xbf16>
    tpu.vector_store %arg13[%c0_10, %c2_11, %c18_12, %c0_13], %1 {strides = array<i32>} : memref<1x20x20x64xbf16, #tpu.memory_space<vmem>>, vector<1x16x2x64xbf16>,
    %c0_14 = arith.constant 0 : index
    %c0_15 = arith.constant 0 : index
    %c0_16 = arith.constant 0 : index
    %c0_17 = arith.constant 0 : index
    %6 = vector.load %arg1[%c0_14, %c0_15, %c0_16, %c0_17] : memref<1x16x16x64xbf16, #tpu.memory_space<vmem>>, vector<1x16x16x64xbf16>
    %c0_18 = arith.constant 0 : index
    %c2_19 = arith.constant 2 : index
    %c2_20 = arith.constant 2 : index
    %c0_21 = arith.constant 0 : index
    %7 = vector.load %arg13[%c0_18, %c2_19, %c2_20, %c0_21] : memref<1x20x20x64xbf16, #tpu.memory_space<vmem>>, vector<1x16x16x64xbf16>
    tpu.vector_store %arg13[%c0_18, %c2_19, %c2_20, %c0_21], %6 {strides = array<i32>} : memref<1x20x20x64xbf16, #tpu.memory_space<vmem>>, vector<1x16x16x64xbf16>,
    %c0_22 = arith.constant 0 : index
    %c1 = arith.constant 1 : index
    %c1_23 = arith.constant 1 : index
    %c0_24 = arith.constant 0 : index
    %8 = vector.load %arg13[%c0_22, %c1, %c1_23, %c0_24] : memref<1x20x20x64xbf16, #tpu.memory_space<vmem>>, vector<1x16x16x64xbf16>
    %9 = vector.shape_cast %8 : vector<1x16x16x64xbf16> to vector<256x64xbf16>
    %c0_25 = arith.constant 0 : index
    %c0_26 = arith.constant 0 : index
    %c0_27 = arith.constant 0 : index
    %c0_28 = arith.constant 0 : index
    %10 = vector.load %arg13[%c0_25, %c0_26, %c0_27, %c0_28] : memref<1x20x20x64xbf16, #tpu.memory_space<vmem>>, vector<1x16x16x64xbf16>
    %11 = vector.shape_cast %10 : vector<1x16x16x64xbf16> to vector<256x64xbf16>
    %c0_29 = arith.constant 0 : index
    %c1_30 = arith.constant 1 : index
    %c2_31 = arith.constant 2 : index
    %c0_32 = arith.constant 0 : index
    %12 = vector.load %arg13[%c0_29, %c1_30, %c2_31, %c0_32] : memref<1x20x20x64xbf16, #tpu.memory_space<vmem>>, vector<1x16x16x64xbf16>
    %13 = vector.shape_cast %12 : vector<1x16x16x64xbf16> to vector<256x64xbf16>
    %c0_33 = arith.constant 0 : index
    %c0_34 = arith.constant 0 : index
    %c2_35 = arith.constant 2 : index
    %c0_36 = arith.constant 0 : index
    %14 = vector.load %arg13[%c0_33, %c0_34, %c2_35, %c0_36] : memref<1x20x20x64xbf16, #tpu.memory_space<vmem>>, vector<1x16x16x64xbf16>
    %15 = vector.shape_cast %14 : vector<1x16x16x64xbf16> to vector<256x64xbf16>
    %16 = tpu.concatenate %9, %11, %13, %15 in 1 : vector<256x64xbf16>, vector<256x64xbf16>, vector<256x64xbf16>, vector<256x64xbf16> -> vector<256x256xbf16>
    %c0_37 = arith.constant 0 : index
    %c0_38 = arith.constant 0 : index
    %17 = vector.load %arg2[%c0_37, %c0_38] : memref<1152x128xbf16, #tpu.memory_space<vmem>>, vector<256x128xbf16>
    %cst_39 = arith.constant dense<0.000000e+00> : vector<256x128xf32>
    %18 = tpu.matmul %16, %17, %cst_39 {dimension_numbers = #tpu.dot_dimension_numbers<[1], [0], [0], [1], [0, 0, 1, 1], [], []>} : vector<256x256xbf16>, vector<256x128xbf16>, vector<256x128xf32> -> vector<256x128xf32>
    %c0_40 = arith.constant 0 : index
    %c0_41 = arith.constant 0 : index
    %19 = vector.load %arg14[%c0_40, %c0_41] : memref<256x128xf32, #tpu.memory_space<vmem>>, vector<256x128xf32>
    tpu.vector_store %arg14[%c0_40, %c0_41], %18 {strides = array<i32>} : memref<256x128xf32, #tpu.memory_space<vmem>>, vector<256x128xf32>,
    %c0_42 = arith.constant 0 : index
    %c1_43 = arith.constant 1 : index
    %c3 = arith.constant 3 : index
    %c0_44 = arith.constant 0 : index
    %20 = vector.load %arg13[%c0_42, %c1_43, %c3, %c0_44] : memref<1x20x20x64xbf16, #tpu.memory_space<vmem>>, vector<1x16x16x64xbf16>
    %21 = vector.shape_cast %20 : vector<1x16x16x64xbf16> to vector<256x64xbf16>
    %c0_45 = arith.constant 0 : index
    %c0_46 = arith.constant 0 : index
    %c4 = arith.constant 4 : index
    %c0_47 = arith.constant 0 : index
    %22 = vector.load %arg13[%c0_45, %c0_46, %c4, %c0_47] : memref<1x20x20x64xbf16, #tpu.memory_space<vmem>>, vector<1x16x16x64xbf16>
    %23 = vector.shape_cast %22 : vector<1x16x16x64xbf16> to vector<256x64xbf16>
    %c0_48 = arith.constant 0 : index
    %c2_49 = arith.constant 2 : index
    %c1_50 = arith.constant 1 : index
    %c0_51 = arith.constant 0 : index
    %24 = vector.load %arg13[%c0_48, %c2_49, %c1_50, %c0_51] : memref<1x20x20x64xbf16, #tpu.memory_space<vmem>>, vector<1x16x16x64xbf16>
    %25 = vector.shape_cast %24 : vector<1x16x16x64xbf16> to vector<256x64xbf16>
    %c0_52 = arith.constant 0 : index
    %c2_53 = arith.constant 2 : index
    %c0_54 = arith.constant 0 : index
    %c0_55 = arith.constant 0 : index
    %26 = vector.load %arg13[%c0_52, %c2_53, %c0_54, %c0_55] : memref<1x20x20x64xbf16, #tpu.memory_space<vmem>>, vector<1x16x16x64xbf16>
    %27 = vector.shape_cast %26 : vector<1x16x16x64xbf16> to vector<256x64xbf16>
    %28 = tpu.concatenate %21, %23, %25, %27 in 1 : vector<256x64xbf16>, vector<256x64xbf16>, vector<256x64xbf16>, vector<256x64xbf16> -> vector<256x256xbf16>
    %c256 = arith.constant 256 : index
    %c0_56 = arith.constant 0 : index
    %29 = vector.load %arg2[%c256, %c0_56] : memref<1152x128xbf16, #tpu.memory_space<vmem>>, vector<256x128xbf16>
    %cst_57 = arith.constant dense<0.000000e+00> : vector<256x128xf32>
    %30 = tpu.matmul %28, %29, %cst_57 {dimension_numbers = #tpu.dot_dimension_numbers<[1], [0], [0], [1], [0, 0, 1, 1], [], []>} : vector<256x256xbf16>, vector<256x128xbf16>, vector<256x128xf32> -> vector<256x128xf32>
    %c0_58 = arith.constant 0 : index
    %c0_59 = arith.constant 0 : index
    %31 = vector.load %arg14[%c0_58, %c0_59] : memref<256x128xf32, #tpu.memory_space<vmem>>, vector<256x128xf32>
    %32 = arith.addf %31, %30 : vector<256x128xf32>
    %c0_60 = arith.constant 0 : index
    %c0_61 = arith.constant 0 : index
    %33 = vector.load %arg14[%c0_60, %c0_61] : memref<256x128xf32, #tpu.memory_space<vmem>>, vector<256x128xf32>
    tpu.vector_store %arg14[%c0_60, %c0_61], %32 {strides = array<i32>} : memref<256x128xf32, #tpu.memory_space<vmem>>, vector<256x128xf32>,
    %c0_62 = arith.constant 0 : index
    %c2_63 = arith.constant 2 : index
    %c2_64 = arith.constant 2 : index
    %c0_65 = arith.constant 0 : index
    %34 = vector.load %arg13[%c0_62, %c2_63, %c2_64, %c0_65] : memref<1x20x20x64xbf16, #tpu.memory_space<vmem>>, vector<1x16x16x64xbf16>
    %35 = vector.shape_cast %34 : vector<1x16x16x64xbf16> to vector<256x64xbf16>
    %c0_66 = arith.constant 0 : index
    %c2_67 = arith.constant 2 : index
    %c2_68 = arith.constant 2 : index
    %c0_69 = arith.constant 0 : index
    %36 = vector.load %arg13[%c0_66, %c2_67, %c2_68, %c0_69] : memref<1x20x20x64xbf16, #tpu.memory_space<vmem>>, vector<1x16x16x64xbf16>
    %37 = vector.shape_cast %36 : vector<1x16x16x64xbf16> to vector<256x64xbf16>
    %c0_70 = arith.constant 0 : index
    %c2_71 = arith.constant 2 : index
    %c3_72 = arith.constant 3 : index
    %c0_73 = arith.constant 0 : index
    %38 = vector.load %arg13[%c0_70, %c2_71, %c3_72, %c0_73] : memref<1x20x20x64xbf16, #tpu.memory_space<vmem>>, vector<1x16x16x64xbf16>
    %39 = vector.shape_cast %38 : vector<1x16x16x64xbf16> to vector<256x64xbf16>
    %c0_74 = arith.constant 0 : index
    %c2_75 = arith.constant 2 : index
    %c4_76 = arith.constant 4 : index
    %c0_77 = arith.constant 0 : index
    %40 = vector.load %arg13[%c0_74, %c2_75, %c4_76, %c0_77] : memref<1x20x20x64xbf16, #tpu.memory_space<vmem>>, vector<1x16x16x64xbf16>
    %41 = vector.shape_cast %40 : vector<1x16x16x64xbf16> to vector<256x64xbf16>
    %42 = tpu.concatenate %35, %37, %39, %41 in 1 : vector<256x64xbf16>, vector<256x64xbf16>, vector<256x64xbf16>, vector<256x64xbf16> -> vector<256x256xbf16>
    %c512 = arith.constant 512 : index
    %c0_78 = arith.constant 0 : index
    %43 = vector.load %arg2[%c512, %c0_78] : memref<1152x128xbf16, #tpu.memory_space<vmem>>, vector<256x128xbf16>
    %cst_79 = arith.constant dense<0.000000e+00> : vector<256x128xf32>
    %44 = tpu.matmul %42, %43, %cst_79 {dimension_numbers = #tpu.dot_dimension_numbers<[1], [0], [0], [1], [0, 0, 1, 1], [], []>} : vector<256x256xbf16>, vector<256x128xbf16>, vector<256x128xf32> -> vector<256x128xf32>
    %c0_80 = arith.constant 0 : index
    %c0_81 = arith.constant 0 : index
    %45 = vector.load %arg14[%c0_80, %c0_81] : memref<256x128xf32, #tpu.memory_space<vmem>>, vector<256x128xf32>
    %46 = arith.addf %45, %44 : vector<256x128xf32>
    %c0_82 = arith.constant 0 : index
    %c0_83 = arith.constant 0 : index
    %47 = vector.load %arg14[%c0_82, %c0_83] : memref<256x128xf32, #tpu.memory_space<vmem>>, vector<256x128xf32>
    tpu.vector_store %arg14[%c0_82, %c0_83], %46 {strides = array<i32>} : memref<256x128xf32, #tpu.memory_space<vmem>>, vector<256x128xf32>,
    %c0_84 = arith.constant 0 : index
    %c3_85 = arith.constant 3 : index
    %c1_86 = arith.constant 1 : index
    %c0_87 = arith.constant 0 : index
    %48 = vector.load %arg13[%c0_84, %c3_85, %c1_86, %c0_87] : memref<1x20x20x64xbf16, #tpu.memory_space<vmem>>, vector<1x16x16x64xbf16>
    %49 = vector.shape_cast %48 : vector<1x16x16x64xbf16> to vector<256x64xbf16>
    %c0_88 = arith.constant 0 : index
    %c4_89 = arith.constant 4 : index
    %c0_90 = arith.constant 0 : index
    %c0_91 = arith.constant 0 : index
    %50 = vector.load %arg13[%c0_88, %c4_89, %c0_90, %c0_91] : memref<1x20x20x64xbf16, #tpu.memory_space<vmem>>, vector<1x16x16x64xbf16>
    %51 = vector.shape_cast %50 : vector<1x16x16x64xbf16> to vector<256x64xbf16>
    %c0_92 = arith.constant 0 : index
    %c3_93 = arith.constant 3 : index
    %c2_94 = arith.constant 2 : index
    %c0_95 = arith.constant 0 : index
    %52 = vector.load %arg13[%c0_92, %c3_93, %c2_94, %c0_95] : memref<1x20x20x64xbf16, #tpu.memory_space<vmem>>, vector<1x16x16x64xbf16>
    %53 = vector.shape_cast %52 : vector<1x16x16x64xbf16> to vector<256x64xbf16>
    %c0_96 = arith.constant 0 : index
    %c4_97 = arith.constant 4 : index
    %c2_98 = arith.constant 2 : index
    %c0_99 = arith.constant 0 : index
    %54 = vector.load %arg13[%c0_96, %c4_97, %c2_98, %c0_99] : memref<1x20x20x64xbf16, #tpu.memory_space<vmem>>, vector<1x16x16x64xbf16>
    %55 = vector.shape_cast %54 : vector<1x16x16x64xbf16> to vector<256x64xbf16>
    %56 = tpu.concatenate %49, %51, %53, %55 in 1 : vector<256x64xbf16>, vector<256x64xbf16>, vector<256x64xbf16>, vector<256x64xbf16> -> vector<256x256xbf16>
    %c768 = arith.constant 768 : index
    %c0_100 = arith.constant 0 : index
    %57 = vector.load %arg2[%c768, %c0_100] : memref<1152x128xbf16, #tpu.memory_space<vmem>>, vector<256x128xbf16>
    %cst_101 = arith.constant dense<0.000000e+00> : vector<256x128xf32>
    %58 = tpu.matmul %56, %57, %cst_101 {dimension_numbers = #tpu.dot_dimension_numbers<[1], [0], [0], [1], [0, 0, 1, 1], [], []>} : vector<256x256xbf16>, vector<256x128xbf16>, vector<256x128xf32> -> vector<256x128xf32>
    %c0_102 = arith.constant 0 : index
    %c0_103 = arith.constant 0 : index
    %59 = vector.load %arg14[%c0_102, %c0_103] : memref<256x128xf32, #tpu.memory_space<vmem>>, vector<256x128xf32>
    %60 = arith.addf %59, %58 : vector<256x128xf32>
    %c0_104 = arith.constant 0 : index
    %c0_105 = arith.constant 0 : index
    %61 = vector.load %arg14[%c0_104, %c0_105] : memref<256x128xf32, #tpu.memory_space<vmem>>, vector<256x128xf32>
    tpu.vector_store %arg14[%c0_104, %c0_105], %60 {strides = array<i32>} : memref<256x128xf32, #tpu.memory_space<vmem>>, vector<256x128xf32>,
    %c0_106 = arith.constant 0 : index
    %c3_107 = arith.constant 3 : index
    %c3_108 = arith.constant 3 : index
    %c0_109 = arith.constant 0 : index
    %62 = vector.load %arg13[%c0_106, %c3_107, %c3_108, %c0_109] : memref<1x20x20x64xbf16, #tpu.memory_space<vmem>>, vector<1x16x16x64xbf16>
    %63 = vector.shape_cast %62 : vector<1x16x16x64xbf16> to vector<256x64xbf16>
    %c0_110 = arith.constant 0 : index
    %c4_111 = arith.constant 4 : index
    %c4_112 = arith.constant 4 : index
    %c0_113 = arith.constant 0 : index
    %64 = vector.load %arg13[%c0_110, %c4_111, %c4_112, %c0_113] : memref<1x20x20x64xbf16, #tpu.memory_space<vmem>>, vector<1x16x16x64xbf16>
    %65 = vector.shape_cast %64 : vector<1x16x16x64xbf16> to vector<256x64xbf16>
    %66 = tpu.concatenate %63, %65 in 1 : vector<256x64xbf16>, vector<256x64xbf16> -> vector<256x128xbf16>
    %c1024 = arith.constant 1024 : index
    %c0_114 = arith.constant 0 : index
    %67 = vector.load %arg2[%c1024, %c0_114] : memref<1152x128xbf16, #tpu.memory_space<vmem>>, vector<128x128xbf16>
    %cst_115 = arith.constant dense<0.000000e+00> : vector<256x128xf32>
    %68 = tpu.matmul %66, %67, %cst_115 {dimension_numbers = #tpu.dot_dimension_numbers<[1], [0], [0], [1], [0, 0, 1, 1], [], []>} : vector<256x128xbf16>, vector<128x128xbf16>, vector<256x128xf32> -> vector<256x128xf32>
    %c0_116 = arith.constant 0 : index
    %c0_117 = arith.constant 0 : index
    %69 = vector.load %arg14[%c0_116, %c0_117] : memref<256x128xf32, #tpu.memory_space<vmem>>, vector<256x128xf32>
    %70 = arith.addf %69, %68 : vector<256x128xf32>
    %c0_118 = arith.constant 0 : index
    %c0_119 = arith.constant 0 : index
    %71 = vector.load %arg14[%c0_118, %c0_119] : memref<256x128xf32, #tpu.memory_space<vmem>>, vector<256x128xf32>
    tpu.vector_store %arg14[%c0_118, %c0_119], %70 {strides = array<i32>} : memref<256x128xf32, #tpu.memory_space<vmem>>, vector<256x128xf32>,
    %c0_120 = arith.constant 0 : index
    %c0_121 = arith.constant 0 : index
    %72 = vector.load %arg14[%c0_120, %c0_121] : memref<256x128xf32, #tpu.memory_space<vmem>>, vector<256x128xf32>
    %c0_122 = arith.constant 0 : index
    %c0_123 = arith.constant 0 : index
    %73 = vector.load %arg3[%c0_122, %c0_123] : memref<1x128xf32, #tpu.memory_space<vmem>>, vector<1x128xf32>
    %74 = vector.broadcast %73 : vector<1x128xf32> to vector<256x128xf32>
    %75 = arith.mulf %72, %74 : vector<256x128xf32>
    %c0_124 = arith.constant 0 : index
    %c0_125 = arith.constant 0 : index
    %76 = vector.load %arg4[%c0_124, %c0_125] : memref<1x128xf32, #tpu.memory_space<vmem>>, vector<1x128xf32>
    %77 = vector.broadcast %76 : vector<1x128xf32> to vector<256x128xf32>
    %78 = arith.addf %75, %77 : vector<256x128xf32>
    %cst_126 = arith.constant 0.000000e+00 : f32
    %79 = vector.broadcast %cst_126 : f32 to vector<256x128xf32>
    %80 = arith.maximumf %78, %79 : vector<256x128xf32>
    %cst_127 = arith.constant dense<0.000000e+00> : vector<128xf32>
    %81 = vector.multi_reduction <add>, %80, %cst_127 [0] : vector<256x128xf32> to vector<128xf32>
    %82 = vector.shape_cast %81 : vector<128xf32> to vector<1x128xf32>
    %cst_128 = arith.constant 2.560000e+02 : f32
    %83 = vector.broadcast %cst_128 : f32 to vector<1x128xf32>
    %84 = arith.divf %82, %83 : vector<1x128xf32>
    %85 = vector.extract_strided_slice %84 {offsets = [0, 0], sizes = [1, 64], strides = [1, 1]} : vector<1x128xf32> to vector<1x64xf32>
    %86 = vector.extract_strided_slice %84 {offsets = [0, 64], sizes = [1, 64], strides = [1, 1]} : vector<1x128xf32> to vector<1x64xf32>
    %87 = arith.addf %85, %86 : vector<1x64xf32>
    %c0_129 = arith.constant 0 : index
    %c0_130 = arith.constant 0 : index
    %88 = vector.load %arg5[%c0_129, %c0_130] : memref<64x32xf32, #tpu.memory_space<vmem>>, vector<64x32xf32>
    %cst_131 = arith.constant dense<0.000000e+00> : vector<1x32xf32>
    %89 = tpu.matmul %87, %88, %cst_131 {dimension_numbers = #tpu.dot_dimension_numbers<[1], [0], [0], [1], [0, 0, 1, 1], [], []>} : vector<1x64xf32>, vector<64x32xf32>, vector<1x32xf32> -> vector<1x32xf32>
    %c0_132 = arith.constant 0 : index
    %c0_133 = arith.constant 0 : index
    %90 = vector.load %arg6[%c0_132, %c0_133] : memref<1x32xf32, #tpu.memory_space<vmem>>, vector<1x32xf32>
    %91 = arith.mulf %89, %90 : vector<1x32xf32>
    %c0_134 = arith.constant 0 : index
    %c0_135 = arith.constant 0 : index
    %92 = vector.load %arg7[%c0_134, %c0_135] : memref<1x32xf32, #tpu.memory_space<vmem>>, vector<1x32xf32>
    %93 = arith.addf %91, %92 : vector<1x32xf32>
    %cst_136 = arith.constant 0.000000e+00 : f32
    %94 = vector.broadcast %cst_136 : f32 to vector<1x32xf32>
    %95 = arith.maximumf %93, %94 : vector<1x32xf32>
    %c0_137 = arith.constant 0 : index
    %c0_138 = arith.constant 0 : index
    %96 = vector.load %arg8[%c0_137, %c0_138] : memref<32x64xf32, #tpu.memory_space<vmem>>, vector<32x64xf32>
    %cst_139 = arith.constant dense<0.000000e+00> : vector<1x64xf32>
    %97 = tpu.matmul %95, %96, %cst_139 {dimension_numbers = #tpu.dot_dimension_numbers<[1], [0], [0], [1], [0, 0, 1, 1], [], []>} : vector<1x32xf32>, vector<32x64xf32>, vector<1x64xf32> -> vector<1x64xf32>
    %c0_140 = arith.constant 0 : index
    %c0_141 = arith.constant 0 : index
    %98 = vector.load %arg9[%c0_140, %c0_141] : memref<1x64xf32, #tpu.memory_space<vmem>>, vector<1x64xf32>
    %99 = arith.addf %97, %98 : vector<1x64xf32>
    %c0_142 = arith.constant 0 : index
    %c0_143 = arith.constant 0 : index
    %100 = vector.load %arg10[%c0_142, %c0_143] : memref<32x64xf32, #tpu.memory_space<vmem>>, vector<32x64xf32>
    %cst_144 = arith.constant dense<0.000000e+00> : vector<1x64xf32>
    %101 = tpu.matmul %95, %100, %cst_144 {dimension_numbers = #tpu.dot_dimension_numbers<[1], [0], [0], [1], [0, 0, 1, 1], [], []>} : vector<1x32xf32>, vector<32x64xf32>, vector<1x64xf32> -> vector<1x64xf32>
    %c0_145 = arith.constant 0 : index
    %c0_146 = arith.constant 0 : index
    %102 = vector.load %arg11[%c0_145, %c0_146] : memref<1x64xf32, #tpu.memory_space<vmem>>, vector<1x64xf32>
    %103 = arith.addf %101, %102 : vector<1x64xf32>
    %104 = arith.maximumf %99, %103 : vector<1x64xf32>
    %105 = arith.subf %99, %104 : vector<1x64xf32>
    %106 = math.exp %105 : vector<1x64xf32>
    %107 = arith.subf %103, %104 : vector<1x64xf32>
    %108 = math.exp %107 : vector<1x64xf32>
    %109 = arith.addf %106, %108 : vector<1x64xf32>
    %cst_147 = arith.constant 1.000000e+00 : f32
    %110 = vector.broadcast %cst_147 : f32 to vector<1x64xf32>
    %111 = arith.divf %110, %109 : vector<1x64xf32>
    %112 = arith.mulf %106, %111 : vector<1x64xf32>
    %113 = arith.mulf %108, %111 : vector<1x64xf32>
    %114 = tpu.concatenate %112, %113 in 1 : vector<1x64xf32>, vector<1x64xf32> -> vector<1x128xf32>
    %115 = vector.broadcast %114 : vector<1x128xf32> to vector<256x128xf32>
    %116 = arith.mulf %80, %115 : vector<256x128xf32>
    %117 = vector.extract_strided_slice %116 {offsets = [0, 0], sizes = [256, 64], strides = [1, 1]} : vector<256x128xf32> to vector<256x64xf32>
    %118 = vector.extract_strided_slice %116 {offsets = [0, 64], sizes = [256, 64], strides = [1, 1]} : vector<256x128xf32> to vector<256x64xf32>
    %119 = arith.addf %117, %118 : vector<256x64xf32>
    %120 = tpu.transpose %119, [1, 0] : vector<256x64xf32> -> vector<64x256xf32>
    %c0_148 = arith.constant 0 : index
    %c0_149 = arith.constant 0 : index
    %c0_150 = arith.constant 0 : index
    %121 = vector.load %arg12[%c0_148, %c0_149, %c0_150] : memref<1x64x256xf32, #tpu.memory_space<vmem>>, vector<1x64x256xf32>
    %122 = vector.shape_cast %121 : vector<1x64x256xf32> to vector<64x256xf32>
    %123 = vector.shape_cast %120 : vector<64x256xf32> to vector<1x64x256xf32>
    tpu.vector_store %arg12[%c0_148, %c0_149, %c0_150], %123 {strides = array<i32>} : memref<1x64x256xf32, #tpu.memory_space<vmem>>, vector<1x64x256xf32>,
    return
  }
  func.func @transform_0(%arg0: i32) -> (i32, i32, i32, i32) {
    %c0_i32 = arith.constant 0 : i32
    %c0_i32_0 = arith.constant 0 : i32
    %c0_i32_1 = arith.constant 0 : i32
    %c0_i32_2 = arith.constant 0 : i32
    return %arg0, %c0_i32, %c0_i32_0, %c0_i32_1 : i32, i32, i32, i32
  }
  func.func @transform_1(%arg0: i32) -> (i32, i32) {
    %c0_i32 = arith.constant 0 : i32
    %c0_i32_0 = arith.constant 0 : i32
    %c0_i32_1 = arith.constant 0 : i32
    return %c0_i32, %c0_i32_0 : i32, i32
  }
  func.func @transform_2(%arg0: i32) -> (i32, i32) {
    %c0_i32 = arith.constant 0 : i32
    %c0_i32_0 = arith.constant 0 : i32
    %c0_i32_1 = arith.constant 0 : i32
    return %c0_i32, %c0_i32_0 : i32, i32
  }
  func.func @transform_3(%arg0: i32) -> (i32, i32) {
    %c0_i32 = arith.constant 0 : i32
    %c0_i32_0 = arith.constant 0 : i32
    %c0_i32_1 = arith.constant 0 : i32
    return %c0_i32, %c0_i32_0 : i32, i32
  }
  func.func @transform_4(%arg0: i32) -> (i32, i32) {
    %c0_i32 = arith.constant 0 : i32
    %c0_i32_0 = arith.constant 0 : i32
    %c0_i32_1 = arith.constant 0 : i32
    return %c0_i32, %c0_i32_0 : i32, i32
  }
  func.func @transform_5(%arg0: i32) -> (i32, i32) {
    %c0_i32 = arith.constant 0 : i32
    %c0_i32_0 = arith.constant 0 : i32
    %c0_i32_1 = arith.constant 0 : i32
    return %c0_i32, %c0_i32_0 : i32, i32
  }
  func.func @transform_6(%arg0: i32) -> (i32, i32) {
    %c0_i32 = arith.constant 0 : i32
    %c0_i32_0 = arith.constant 0 : i32
    %c0_i32_1 = arith.constant 0 : i32
    return %c0_i32, %c0_i32_0 : i32, i32
  }
  func.func @transform_7(%arg0: i32) -> (i32, i32) {
    %c0_i32 = arith.constant 0 : i32
    %c0_i32_0 = arith.constant 0 : i32
    %c0_i32_1 = arith.constant 0 : i32
    return %c0_i32, %c0_i32_0 : i32, i32
  }
  func.func @transform_8(%arg0: i32) -> (i32, i32) {
    %c0_i32 = arith.constant 0 : i32
    %c0_i32_0 = arith.constant 0 : i32
    %c0_i32_1 = arith.constant 0 : i32
    return %c0_i32, %c0_i32_0 : i32, i32
  }
  func.func @transform_9(%arg0: i32) -> (i32, i32) {
    %c0_i32 = arith.constant 0 : i32
    %c0_i32_0 = arith.constant 0 : i32
    %c0_i32_1 = arith.constant 0 : i32
    return %c0_i32, %c0_i32_0 : i32, i32
  }
  func.func @transform_10(%arg0: i32) -> (i32, i32) {
    %c0_i32 = arith.constant 0 : i32
    %c0_i32_0 = arith.constant 0 : i32
    %c0_i32_1 = arith.constant 0 : i32
    return %c0_i32, %c0_i32_0 : i32, i32
  }
  func.func @transform_11(%arg0: i32) -> (i32, i32, i32) {
    %c0_i32 = arith.constant 0 : i32
    %c0_i32_0 = arith.constant 0 : i32
    %c0_i32_1 = arith.constant 0 : i32
    return %arg0, %c0_i32, %c0_i32_0 : i32, i32, i32
  }
}

</mosaic_0001>

<bundles_post_ra>
// kernel: tpu_custom_call.1
= control target key start
LH: loop header
LB: loop body
LE: loop exit
PB: predicated region body
PF: predicated region fallthrough
CT: control target
= control target key end

     0   :  { %s15237_s0 = inlined_call_operand.hbm [shape: bf16[2,16,16,64], index: 0, kind: input, shape index: {}]   ;;  %s15238_s1 = inlined_call_operand.hbm [shape: bf16[1152,128], index: 1, kind: input, shape index: {}]   ;;  %s15239_s2 = inlined_call_operand.vmem [shape: f32[1,128], index: 2, kind: input, shape index: {}]   ;;  %s15240_s3 = inlined_call_operand.vmem [shape: f32[1,128], index: 3, kind: input, shape index: {}]   ;;  %s15241_s4 = inlined_call_operand.vmem [shape: f32[64,32], index: 4, kind: input, shape index: {}]   ;;  %s15242_s5 = inlined_call_operand.vmem [shape: f32[1,32], index: 5, kind: input, shape index: {}]   ;;  %s15243_s6 = inlined_call_operand.vmem [shape: f32[1,32], index: 6, kind: input, shape index: {}]   ;;  %s15244_s7 = inlined_call_operand.vmem [shape: f32[32,64], index: 7, kind: input, shape index: {}]   ;;  %s15245_s8 = inlined_call_operand.vmem [shape: f32[1,64], index: 8, kind: input, shape index: {}]   ;;  %s15246_s9 = inlined_call_operand.vmem [shape: f32[32,64], index: 9, kind: input, shape index: {}]   ;;  %s15247_s10 = inlined_call_operand.vmem [shape: f32[1,64], index: 10, kind: input, shape index: {}]   ;;  %s15248_s11 = inlined_call_operand.hbm [shape: f32[2,64,256], index: 11, kind: output, shape index: {}]  }
   0x1   :  { %15329 = sst [smem:[#allocation192_spill]] %s15238_s1 }
   0x2   :  { %15330 = sst [smem:[#allocation193_spill]] %s15248_s11 }
   0x3   :  { %16 = vsyncpa [#allocation5], 0 }
   0x4   :  { %18 = vsyncpa [#allocation5 + $0x1], 0 }
   0x5   :  { %19 = vsyncpa [#allocation8], 0 }
   0x6   :  { %20 = vsyncpa [#allocation6], 0 }
   0x7   :  { %22 = vsyncpa [#allocation6 + $0x1], 0  ;;  %s10929_s17 = smov 0   ;;  %s10931_s18 = smov 0  }
   0x8   :  { %s10933_s19 = smov 0   ;;  %s10935_s20 = smov 0  }
   0x9 LB: > { %15331 = sst [smem:[#allocation13_spill]] %s10844_s17  ;;  %s10950_s21 = sadd.s32 4294967295, %s10856_s20   ;;  %s10856_s20 = sphi %s10935_s20, %s15905_s20   ;;  %s10852_s19 = sphi %s10933_s19, %s15908_s19   ;;  %s10848_s18 = sphi %s10931_s18, %s15907_s18   ;;  %s10844_s17 = sphi %s10929_s17, %s15906_s17  }
   0xa   : > { %s9424_s22 = sadd.s32 4294967294, %s10856_s20   ;;  %p48_p0 = scmp.ne.s32.totalorder %s10848_s18, %s10844_s17 }
   0xb   : > { %p15255_p1 = scmp.eq.s32.totalorder %s10950_s21, 0  ;;  %p288_p3 = scmp.eq.s32.totalorder %s9424_s22, 1 }
   0xc   : > { %p9425_p5 = scmp.ge.s32.totalorder %s10856_s20, 1  ;;  %p295_p7 = scmp.lt.s32.totalorder %s10856_s20, 3 }
   0xd   : > { %p10959_p4 = por %p15255_p1, %p48_p0  ;;  %p10964_p6 = por %p288_p3, %p48_p0 }
   0xe   : > { %p10969_p8 = pnand %p9425_p5, %p295_p7  ;;  %s10858_s26 = smov [#allocation7]  }
   0xf   : > { %s15332_s23 = scalar_select %p10959_p4, 1, 0 }
  0x10   : > { %s15333_s24 = scalar_select %p10964_p6, 1, 0 }
  0x11   : > { %s15335_s25 = scalar_select %p10969_p8, 1, 0 }
  0x12   : > { %15334 = sst [smem:[#allocation14_spill]] %s15333_s24  ;;  %s307_s27 = sshll.u32 %s10858_s26, 4  ;;  %s308_s27 = int_to_ptr.vmem [resolvable:$true] %s307_s27 }
  0x13   : > { %p10523_p9 = pneg %p10969_p8  ;;  %s10983_s29 = sadd.s32 1, %s10856_s20  }
  0x14   : > { %15337 = sst [smem:[#allocation15_spill]] %s10983_s29  ;;  %s35_s30 = sadd.s32 1, %s10852_s19 }
  0x15   : > { %p10978_p11 = pnand %p10523_p9, %p15255_p1  ;;  %s32_s12 = ssub.s32 %s10856_s20, %s10983_s29 }
  0x16   : > { %s10745_s13 = scalar_lea.vmem %s308_s27, 9216  ;;  %p10753_p5 = scmp.lt.s32.totalorder %s308_s27, %s308_s27 }
  0x17   : > { %p10736_p12 = pneg %p10978_p11  ;;  %p10746_p13 = scmp.ne.s32.totalorder %s308_s27, %s10745_s13 }
  0x18   : > { %p10754_p7 = scmp.lt.s32.totalorder %s10745_s13, %s10745_s13 }
  0x19   : > { %p10748_p0 = pnand %p10746_p13, %p10736_p12 }
  0x1a   : > { %p10755_p10 = por %p10754_p7, %p10753_p5 }
  0x1b   : > { %p10749_p3 = pneg %p10748_p0 }
  0x1d   : > { %p10756_p2 = pnand %p10755_p10, %p10749_p3 }
  0x1f   : > { %10759 = shalt.err (!%p10756_p2)
}
  0x20   : > { %s15254_s14 = smov 64   ;;  %s15256_s15 = smov 4  }
  0x21   : > { %s15338_s1 = sld [smem:[#allocation192_spill]]  ;;  %p33_p2 = scmp.eq.s32.totalorder %s32_s12, 0 }
  0x22   : > { %p42_p9 = scmp.ne.s32.totalorder %s10852_s19, %s10848_s18  ;;  %p43_p10 = scmp.eq.s32.totalorder %s10856_s20, 0 }
  0x23   : > { %p10536_p12 = scmp.lt.s32.totalorder %s10856_s20, 2  ;;  %p15339_p0 = scmp.eq.s32.totalorder %s10950_s21, 1 }
  0x24   : > { %s11003_s26 = scalar_select %p33_p2, %s10852_s19, %s35_s30  }
  0x25   : > { %p44_p13 = por %p43_p10, %p42_p9  ;;  %p11007_p3 = por %p15339_p0, %p42_p9 }
  0x26   : > { %s348_s28 = sand.u32 1, %s10852_s19   ;;  %s9917_s29 = sshll.u32 %s10856_s20, 11 }
  0x27   : > { %10526 = dma.hbm_to_vmem [thread:$0]  (!%p10978_p11), %s15338_s1, 9216, %s308_s27, [#allocation8], %s15254_s14, %s15254_s14, %s15256_s15  }
  0x28   : > { %s15340_s13 = scalar_select %p11007_p3, 1, 0 }
  0x29   : > { %s9428_s24 = sshll.u32 %s348_s28, 7  ;;  %s11016_s16 = scalar_lea.hbm %s15237_s0, %s9917_s29 }
  0x2a   : > { %s352_s27 = scalar_lea.vmem [#allocation4], %s9428_s24  ;;  %p11018_p11 = pnand %p10536_p12, %p44_p13 }
  0x2b   : > { %s359_s30 = sshll.u32 %s352_s27, 4  ;;  %s11024_s22 = scalar_lea.sflag [#allocation5], %s348_s28  ;;  %s11022_s30 = int_to_ptr.vmem [resolvable:$true] %s359_s30 }
  0x2c   : > { %s10760_s14 = scalar_lea.hbm %s11016_s16, 2048  ;;  %p10762_p7 = pneg %p11018_p11 }
  0x2d   : > { %p10761_p5 = scmp.ne.s32.totalorder %s11016_s16, %s10760_s14  ;;  %s10765_s24 = scalar_lea.hbm %s15237_s0, 4096 }
  0x2e   : > { %p10766_p10 = scmp.lt.s32.totalorder %s11016_s16, %s15237_s0  ;;  %p10767_p12 = scmp.lt.s32.totalorder %s10765_s24, %s10760_s14 }
  0x2f   : > { %p10763_p2 = pnand %p10762_p7, %p10761_p5 }
  0x30   : > { %p10768_p13 = por %p10767_p12, %p10766_p10 }
  0x31   : > { %p10764_p9 = pneg %p10763_p2 }
  0x33   : > { %p10769_p0 = pnand %p10768_p13, %p10764_p9 }
  0x35   : > { %10772 = shalt.err (!%p10769_p0)
}
  0x36   : > { %s10773_s28 = scalar_lea.vmem %s11022_s30, 2048  ;;  %s10861_s15 = smov [#allocation4]  }
  0x37   : > { %p10774_p1 = scmp.ne.s32.totalorder %s11022_s30, %s10773_s28  ;;  %s10778_s1 = sshll.u32 %s10861_s15, 4  ;;  %s10779_s1 = int_to_ptr.vmem [resolvable:$false] %s10778_s1 }
  0x38   : > { %s10780_s11 = scalar_lea.vmem %s10779_s1, 4096  ;;  %p10781_p2 = scmp.lt.s32.totalorder %s11022_s30, %s10779_s1 }
  0x39   : > { %p10776_p6 = pnand %p10774_p1, %p10762_p7  ;;  %p10782_p3 = scmp.lt.s32.totalorder %s10780_s11, %s10773_s28 }
  0x3b   : > { %p10777_p5 = pneg %p10776_p6  ;;  %p10783_p4 = por %p10782_p3, %p10781_p2 }
  0x3d   : > { %p10784_p8 = pnand %p10783_p4, %p10777_p5 }
  0x3f   : > { %10787 = shalt.err (!%p10784_p8)
}
  0x40   : > { %s15342_s14 = smov 4   ;;  %s15343_s17 = smov 64  }
  0x41   : > { %10530 = dma.hbm_to_vmem [thread:$0]  (!%p11018_p11), %s11016_s16, 2048, %s11022_s30, %s11024_s22, %s15343_s17, %s15343_s17, %s15342_s14  }
  0x42   : > { %p15344_p1 = scmp.ne.s32.totalorder %s15335_s25, 0 }
  0x44   : > { %371 = sbr.rel (%p15344_p1) target bundleno = 2069 (0x815), region = 64 }
  0x49   : > { %s11051_s15 = sand.u32 1, %s10848_s18   ;;  %p15345_p4 = scmp.ne.s32.totalorder %s15332_s23, 0 }
  0x4a   : > { %s9432_s1 = sshll.u32 %s11051_s15, 7  ;;  %s374_s24 = scalar_lea.sflag [#allocation5], %s11051_s15 }
  0x4b   : > { %s11057_s12 = scalar_lea.vmem [#allocation4], %s9432_s1 }
  0x4c   : > { %10831 = dma.done.wait (%p15345_p4), %s374_s24, 2048  }
  0x4d   : > { %10833 = vsyncadd (%p15345_p4), %s374_s24, 4294965248  ;;  %p15346_p6 = scmp.eq.s32.totalorder %s10950_s21, 0 }
  0x4f   : > { %10835 = dma.done.wait (%p15346_p6), [#allocation8], 9216   ;;  %p15347_p8 = pmov %p15346_p6 }
  0x50   : > { %vm421_vm0 = vcmask 519168   ;;  %vm424_vm1 = vcmask 517120   ;;  %v10862_v0 = vmov 0   ;;  %vm437_vm2 = vcmask 516096   ;;  %v471_v2 = vld [vmem:[%s11057_s12] sm:$0xf] }
  0x51   : > { %10837 = vsyncadd (%p15347_p8), [#allocation8], 4294958080  ;;  %426 = vst.msk [vmem:[#allocation2 + $0xc] sm:$0xf] %vm421_vm0, %v10862_v0  ;;  %vm454_vm3 = vcmask 517121   ;;  %vm1247_vm4 = vcmask 1042432  }
  0x52   : > { %427 = vst.msk [vmem:[#allocation2 + $0x10] sm:$0xf] %vm421_vm0, %v10862_v0  ;;  %422 = vst.msk [vmem:[#allocation2] sm:$0xf] %vm421_vm0, %v10862_v0  ;;  %vm1248_vm5 = vcmask 1046532   ;;  %vm535_vm6 = vcmask 1040384  }
  0x53   : > { %428 = vst.msk [vmem:[#allocation2 + $0x14] sm:$0x3] %vm424_vm1, %v10862_v0  ;;  %425 = vst.msk [vmem:[#allocation2 + $0x8] sm:$0x3] %vm424_vm1, %v10862_v0  ;;  %v472_v3 = vld [vmem:[%s11057_s12 + $0x4] sm:$0xf] }
  0x54   : > { %423 = vst.msk [vmem:[#allocation2 + $0x4] sm:$0xf] %vm421_vm0, %v10862_v0  ;;  %430 = vst.msk [vmem:[#allocation2 + $0xd8] sm:$0xf] %vm421_vm0, %v10862_v0  ;;  %vm536_vm8 = vcmask 1044484   ;;  %vm666_vm9 = vcmask 519169  }
  0x55   : > { %431 = vst.msk [vmem:[#allocation2 + $0xdc] sm:$0xf] %vm421_vm0, %v10862_v0  ;;  %433 = vst.msk [vmem:[#allocation2 + $0xe4] sm:$0xf] %vm421_vm0, %v10862_v0  ;;  %v473_v7 = vld [vmem:[%s11057_s12 + $0x8] sm:$0xf] }
  0x56   : > { %432 = vst.msk [vmem:[#allocation2 + $0xe0] sm:$0x3] %vm424_vm1, %v10862_v0  ;;  %435 = vst.msk [vmem:[#allocation2 + $0xec] sm:$0x3] %vm424_vm1, %v10862_v0  ;;  %v538_v12 = vrot.slane %v471_v2, 7  ;;  %v540_v16 = vrot.slane %v472_v3, 7 }
  0x57   : > { %434 = vst.msk [vmem:[#allocation2 + $0xe8] sm:$0xf] %vm421_vm0, %v10862_v0  ;;  %vm11107_vm7 = vmor %vm1247_vm4, %vm1248_vm5  ;;  %v10600_v23 = vld [vmem:[#allocation7 + $0x78] sm:$0xff]   ;;  %v474_v31 = vld [vmem:[%s11057_s12 + $0xc] sm:$0xf]  ;;  %v543_v32 = vrot.slane %v473_v7, 7 }
  0x58   : > { %438 = vst.msk [vmem:[#allocation2 + $0x18] sm:$0x1] %vm437_vm2, %v10862_v0  ;;  %439 = vst.msk [vmem:[#allocation2 + $0x24] sm:$0x1] %vm437_vm2, %v10862_v0  ;;  %v1364_v5 = vld [vmem:[#allocation2 + $0xc] sm:$0xe]  ;;  %9919 = vmatprep.subr.bf16.mxu0 %v10600_v23 }
  0x59   : > { %440 = vst.msk [vmem:[#allocation2 + $0x30] sm:$0x1] %vm437_vm2, %v10862_v0  ;;  %441 = vst.msk [vmem:[#allocation2 + $0x3c] sm:$0x1] %vm437_vm2, %v10862_v0  ;;  %v11113_v4 = vld [vmem:[#allocation2 + $0x10] sm:$0xf] }
  0x5a   : > { %442 = vst.msk [vmem:[#allocation2 + $0x48] sm:$0x1] %vm437_vm2, %v10862_v0  ;;  %443 = vst.msk [vmem:[#allocation2 + $0x54] sm:$0x1] %vm437_vm2, %v10862_v0  ;;  %v1365_v6 = vld [vmem:[#allocation2 + $0x14] sm:$0x1] }
  0x5b   : > { %444 = vst.msk [vmem:[#allocation2 + $0x60] sm:$0x1] %vm437_vm2, %v10862_v0  ;;  %445 = vst.msk [vmem:[#allocation2 + $0x6c] sm:$0x1] %vm437_vm2, %v10862_v0  ;;  %v9452_v8 = vrot.slane %v1364_v5, 9  ;;  %v1451_v9 = vrot.slane %v11113_v4, 5 }
  0x5c   : > { %446 = vst.msk [vmem:[#allocation2 + $0x78] sm:$0x1] %vm437_vm2, %v10862_v0  ;;  %447 = vst.msk [vmem:[#allocation2 + $0x84] sm:$0x1] %vm437_vm2, %v10862_v0  ;;  %v1454_v10 = vrot.slane %v1365_v6, 5  ;;  %v539_v26 = vrot.slane %v538_v12, 4 }
  0x5d   : > { %448 = vst.msk [vmem:[#allocation2 + $0x90] sm:$0x1] %vm437_vm2, %v10862_v0  ;;  %449 = vst.msk [vmem:[#allocation2 + $0x9c] sm:$0x1] %vm437_vm2, %v10862_v0  ;;  %v11117_v11 = vld [vmem:[#allocation2 + $0x4] sm:$0xf]  ;;  %v1452_v17 = vsel %vm11107_vm7, %v9452_v8, %v1451_v9 }
  0x5e   : > { %450 = vst.msk [vmem:[#allocation2 + $0xa8] sm:$0x1] %vm437_vm2, %v10862_v0  ;;  %451 = vst.msk [vmem:[#allocation2 + $0xb4] sm:$0x1] %vm437_vm2, %v10862_v0  ;;  %v1362_v13 = vld [vmem:[#allocation2] sm:$0xe] }
  0x5f   : > { %452 = vst.msk [vmem:[#allocation2 + $0xc0] sm:$0x1] %vm437_vm2, %v10862_v0  ;;  %453 = vst.msk [vmem:[#allocation2 + $0xcc] sm:$0x1] %vm437_vm2, %v10862_v0  ;;  %v1363_v14 = vld [vmem:[#allocation2 + $0x8] sm:$0x1] }
  0x60   : > { %455 = vst.msk [vmem:[#allocation2 + $0x20] sm:$0x2] %vm454_vm3, %v10862_v0  ;;  %456 = vst.msk [vmem:[#allocation2 + $0x2c] sm:$0x2] %vm454_vm3, %v10862_v0  ;;  %v1444_v15 = vrot.slane %v11117_v11, 5  ;;  %v1453_v18 = vrot.slane %v1451_v9, 4 }
  0x61   : > { %457 = vst.msk [vmem:[#allocation2 + $0x38] sm:$0x2] %vm454_vm3, %v10862_v0  ;;  %458 = vst.msk [vmem:[#allocation2 + $0x44] sm:$0x2] %vm454_vm3, %v10862_v0  ;;  %v9451_v19 = vrot.slane %v1362_v13, 9  ;;  %v1447_v20 = vrot.slane %v1363_v14, 5 }
  0x62   : > { %459 = vst.msk [vmem:[#allocation2 + $0x50] sm:$0x2] %vm454_vm3, %v10862_v0  ;;  %460 = vst.msk [vmem:[#allocation2 + $0x5c] sm:$0x2] %vm454_vm3, %v10862_v0  ;;  %v1153_v21 = vld [vmem:[#allocation2 + $0xc] sm:$0xf]  ;;  %v1455_v29 = vsel %vm11107_vm7, %v1453_v18, %v1454_v10 }
  0x63   : > { %461 = vst.msk [vmem:[#allocation2 + $0x68] sm:$0x2] %vm454_vm3, %v10862_v0  ;;  %462 = vst.msk [vmem:[#allocation2 + $0x74] sm:$0x2] %vm454_vm3, %v10862_v0  ;;  %v1446_v24 = vrot.slane %v1444_v15, 4  ;;  %v542_v27 = vrot.slane %v540_v16, 4  ;;  %v1445_v30 = vsel %vm11107_vm7, %v9451_v19, %v1444_v15  ;;  %v9516_v35 = vcombine.low %v1452_v17, %v1455_v29 }
  0x64   : > { %463 = vst.msk [vmem:[#allocation2 + $0x80] sm:$0x2] %vm454_vm3, %v10862_v0  ;;  %464 = vst.msk [vmem:[#allocation2 + $0x8c] sm:$0x2] %vm454_vm3, %v10862_v0  ;;  %v1151_v25 = vld [vmem:[#allocation2] sm:$0xf]  ;;  %v9484_v48 = vcombine.low %v1153_v21, %v11113_v4 }
  0x65   : > { %465 = vst.msk [vmem:[#allocation2 + $0x98] sm:$0x2] %vm454_vm3, %v10862_v0  ;;  %466 = vst.msk [vmem:[#allocation2 + $0xa4] sm:$0x2] %vm454_vm3, %v10862_v0  ;;  %v10601_v28 = vld [vmem:[#allocation7 + $0x38] sm:$0xff]   ;;  %v10604_v34 = vld [vmem:[#allocation7 + $0x70] sm:$0xff]   ;;  %v1448_v36 = vsel %vm11107_vm7, %v1446_v24, %v1447_v20  ;;  %v9483_v52 = vcombine.low %v1151_v25, %v11117_v11 }
  0x66   : > { %467 = vst.msk [vmem:[#allocation2 + $0xb0] sm:$0x2] %vm454_vm3, %v10862_v0  ;;  %468 = vst.msk [vmem:[#allocation2 + $0xbc] sm:$0x2] %vm454_vm3, %v10862_v0  ;;  %v475_v33 = vld [vmem:[%s11057_s12 + $0x10] sm:$0xf]  ;;  %9920 = vmatpush3.bf16.msra.mxu0 %v10601_v28  ;;  %v9515_v42 = vcombine.low %v1445_v30, %v1448_v36 }
  0x67   : > { %469 = vst.msk [vmem:[#allocation2 + $0xc8] sm:$0x2] %vm454_vm3, %v10862_v0  ;;  %470 = vst.msk [vmem:[#allocation2 + $0xd4] sm:$0x2] %vm454_vm3, %v10862_v0  ;;  %v545_v38 = vrot.slane %v474_v31, 7  ;;  %v10605_v41 = vld [vmem:[#allocation7 + $0x30] sm:$0xff]   ;;  %9921 = vmatprep.subr.bf16.mxu0 %v10604_v34 }
  0x68   : > { %vm11124_vm10 = vmor %vm535_vm6, %vm536_vm8  ;;  %667 = vst.msk [vmem:[#allocation2 + $0x18] sm:$0xe] %vm666_vm9, %v538_v12  ;;  %v476_v39 = vld [vmem:[%s11057_s12 + $0x14] sm:$0xf]  ;;  %v477_v40 = vld [vmem:[%s11057_s12 + $0x18] sm:$0xf] }
  0x69   : > { %v541_v37 = vsel %vm11124_vm10, %v539_v26, %v540_v16  ;;  %669 = vst.msk [vmem:[#allocation2 + $0x20] sm:$0x1] %vm437_vm2, %v542_v27  ;;  %v544_v43 = vrot.slane %v543_v32, 4  ;;  %v548_v44 = vrot.slane %v475_v33, 7  ;;  %v550_v45 = vrot.slane %v476_v39, 7  ;;  %v10606_v47 = vld [vmem:[#allocation7 + $0x68] sm:$0xff]  }
  0x6a   : > { %668 = vst.msk [vmem:[#allocation2 + $0x1c] sm:$0xf] %vm421_vm0, %v541_v37  ;;  %v478_v46 = vld [vmem:[%s11057_s12 + $0x1c] sm:$0xf]  ;;  %s10863_s23 = smov 64   ;;  %v547_v49 = vrot.slane %v545_v38, 4  ;;  %9922 = vmatpush3.bf16.msra.mxu0 %v10605_v41 }
  0x6b   : > { %670 = vst.msk [vmem:[#allocation2 + $0x24] sm:$0xe] %vm666_vm9, %v543_v32  ;;  %1796 = vrot.lane.b32.xlu1 %v9516_v35, %s10863_s23  ;;  %v553_v50 = vrot.slane %v477_v40, 7  ;;  %v555_v51 = vrot.slane %v478_v46, 7  ;;  %1794 = vrot.lane.b32.xlu0 %v9515_v42, %s10863_s23  ;;  %v546_v53 = vsel %vm11124_vm10, %v544_v43, %v545_v38  ;;  %v549_v54 = vrot.slane %v548_v44, 4  ;;  %v10607_v59 = vld [vmem:[#allocation7 + $0x28] sm:$0xff]  }
  0x6c   : > { %v552_v55 = vrot.slane %v550_v45, 4  ;;  %673 = vst.msk [vmem:[#allocation2 + $0x30] sm:$0xe] %vm666_vm9, %v548_v44  ;;  %v2775_v61 = vld [vmem:[#allocation2] sm:$0xc]  ;;  %9923 = vmatprep.subr.bf16.mxu0 %v10606_v47  ;;  %v10610_v63 = vld [vmem:[#allocation7 + $0x60] sm:$0xff]  }
  0x6d   : > { %671 = vst.msk [vmem:[#allocation2 + $0x28] sm:$0xf] %vm421_vm0, %v546_v53  ;;  %v554_v57 = vrot.slane %v553_v50, 4  ;;  %v557_v58 = vrot.slane %v555_v51, 4  ;;  %v551_v60 = vsel %vm11124_vm10, %v549_v54, %v550_v45  ;;  %v2776_v62 = vld [vmem:[#allocation2 + $0x4] sm:$0xf] }
  0x6e   : > { %672 = vst.msk [vmem:[#allocation2 + $0x2c] sm:$0x1] %vm437_vm2, %v547_v49  ;;  %675 = vst.msk [vmem:[#allocation2 + $0x38] sm:$0x1] %vm437_vm2, %v552_v55  ;;  %vm2871_vm11 = vcmask 1041408   ;;  %vm2872_vm12 = vcmask 1045508   ;;  %9924 = vmatpush3.bf16.msra.mxu0 %v10607_v59 }
  0x6f   : > { %v1366_v56 = vld [vmem:[#allocation2 + $0x18] sm:$0xe]  ;;  %676 = vst.msk [vmem:[#allocation2 + $0x3c] sm:$0xe] %vm666_vm9, %v553_v50  ;;  %1668 = vrot.lane.b32.xlu1 %v9484_v48, %s10863_s23  ;;  %v556_v2 = vsel %vm11124_vm10, %v554_v57, %v555_v51  ;;  %v11164_v3 = vld [vmem:[%s11057_s12 + $0x20] sm:$0xf]  ;;  %1666 = vrot.lane.b32.xlu0 %v9483_v52, %s10863_s23  ;;  %vm11181_vm13 = vmor %vm2871_vm11, %vm2872_vm12 }
  0x70   : > { %v1155_v0 = vld [vmem:[#allocation2 + $0x18] sm:$0xf]  ;;  %674 = vst.msk [vmem:[#allocation2 + $0x34] sm:$0xf] %vm421_vm0, %v551_v60  ;;  %v1367_v4 = vld [vmem:[#allocation2 + $0x20] sm:$0x1]  ;;  %9925 = vmatprep.subr.bf16.mxu0 %v10610_v63 }
  0x71   : > { %678 = vst.msk [vmem:[#allocation2 + $0x44] sm:$0x1] %vm437_vm2, %v557_v58  ;;  %v9453_v5 = vrot.slane %v1366_v56, 9  ;;  %v11168_v6 = vld [vmem:[#allocation2 + $0x18] sm:$0xf]  ;;  %v558_v7 = vrot.slane %v11164_v3, 7 }
  0x72   : > { %677 = vst.msk [vmem:[#allocation2 + $0x40] sm:$0xf] %vm421_vm0, %v556_v2  ;;  %v1156_v8 = vld [vmem:[#allocation2 + $0x1c] sm:$0xf]  ;;  %v11171_v9 = vld [vmem:[#allocation2 + $0x8] sm:$0x3] }
  0x73   : > { %v9547_v10 = vrot.slane %v2775_v61, 10  ;;  %v2876_v11 = vrot.slane %v2776_v62, 6  ;;  %v10611_v12 = vld [vmem:[#allocation7 + $0x20] sm:$0xff]   ;;  %v1458_v13 = vrot.slane %v1156_v8, 5  ;;  %v9485_v14 = vcombine.low %v1155_v0, %v1156_v8  ;;  %v1157_v15 = vld [vmem:[#allocation2 + $0x24] sm:$0xf] }
  0x74   : > { %v1461_v16 = vrot.slane %v1367_v4, 5  ;;  %v1368_v17 = vld [vmem:[#allocation2 + $0x24] sm:$0xe]  ;;  %679 = vst.msk [vmem:[#allocation2 + $0x48] sm:$0xe] %vm666_vm9, %v558_v7  ;;  %v3035_v20 = vshrl.u32 %v11168_v6, 16  ;;  %9926 = vmatpush3.bf16.msra.mxu0 %v10611_v12 }
  0x75   : > { %v1159_v18 = vld [vmem:[#allocation2 + $0x30] sm:$0xf]  ;;  %v3038_v21 = vshll.u32 %v11168_v6, 16  ;;  %v1460_v23 = vrot.slane %v1458_v13, 4  ;;  %1670 = vrot.lane.b32.xlu1 %v9485_v14, %s10863_s23  ;;  %v1158_v24 = vld [vmem:[#allocation2 + $0x28] sm:$0xf]  ;;  %v1459_v25 = vsel %vm11107_vm7, %v9453_v5, %v1458_v13  ;;  %v11190_v45 = vsel %vm11181_vm13, %v9547_v10, %v2876_v11 }
  0x76   : > { %v1370_v19 = vld [vmem:[#allocation2 + $0x30] sm:$0xe]  ;;  %v1369_v26 = vld [vmem:[#allocation2 + $0x2c] sm:$0x1]  ;;  %v9454_v27 = vrot.slane %v1368_v17, 9  ;;  %v1465_v29 = vrot.slane %v1158_v24, 5  ;;  %v9486_v30 = vcombine.low %v1157_v15, %v1158_v24 }
  0x77   : > { %v1468_v31 = vrot.slane %v1369_v26, 5  ;;  %v1371_v32 = vld [vmem:[#allocation2 + $0x38] sm:$0x1]  ;;  %v9455_v33 = vrot.slane %v1370_v19, 9  ;;  %v1462_v34 = vsel %vm11107_vm7, %v1460_v23, %v1461_v16  ;;  %v1160_v35 = vld [vmem:[#allocation2 + $0x34] sm:$0xf] }
  0x78   : > { %v1475_v36 = vrot.slane %v1371_v32, 5  ;;  %v2878_v37 = vrot.slane %v2876_v11, 4  ;;  %v2879_v38 = vrot.slane %v11171_v9, 6  ;;  %v10612_v39 = vld [vmem:[#allocation7 + $0x58] sm:$0xff]   ;;  %v1467_v40 = vrot.slane %v1465_v29, 4  ;;  %v10615_v26 = vld [vmem:[#allocation7 + $0x50] sm:$0xff]  }
  0x79   : > { %v9517_v41 = vcombine.low %v1459_v25, %v1462_v34  ;;  %v1472_v42 = vrot.slane %v1160_v35, 5  ;;  %v1162_v43 = vld [vmem:[#allocation2 + $0x40] sm:$0xf]  ;;  %v1372_v44 = vld [vmem:[#allocation2 + $0x3c] sm:$0xe]  ;;  %1672 = vrot.lane.b32.xlu1 %v9486_v30, %s10863_s23  ;;  %v9487_v46 = vcombine.low %v1159_v18, %v1160_v35  ;;  %v1466_v47 = vsel %vm11107_vm7, %v9454_v27, %v1465_v29  ;;  %9927 = vmatprep.subr.bf16.mxu0 %v10612_v39  ;;  %v10613_v62 = vld [vmem:[#allocation7 + $0x18] sm:$0xff]  }
  0x7a   : > { %v1479_v48 = vrot.slane %v1162_v43, 5  ;;  %v11195_v49 = vrot.slane %v3035_v20, 4  ;;  %v1373_v50 = vld [vmem:[#allocation2 + $0x44] sm:$0x1]  ;;  %v480_v51 = vld [vmem:[%s11057_s12 + $0x24] sm:$0xf]  ;;  %v1469_v53 = vsel %vm11107_vm7, %v1467_v40, %v1468_v31  ;;  %v11215_v8 = vsel %vm11181_vm13, %v2878_v37, %v2879_v38  ;;  %9928 = vmatpush3.bf16.msra.mxu0 %v10613_v62 }
  0x7b   : > { %1798 = vrot.lane.b32.xlu0 %v9517_v41, %s10863_s23  ;;  %v1474_v52 = vrot.slane %v1472_v42, 4  ;;  %v1161_v54 = vld [vmem:[#allocation2 + $0x3c] sm:$0xf]  ;;  %v1473_v55 = vsel %vm11107_vm7, %v9455_v33, %v1472_v42  ;;  %v9456_v56 = vrot.slane %v1372_v44, 9  ;;  %v9518_v57 = vcombine.low %v1466_v47, %v1469_v53  ;;  %v11210_v4 = vld [vmem:[#allocation2 + $0x24] sm:$0xf]  ;;  %9929 = vmatprep.subr.bf16.mxu0 %v10615_v26 }
  0x7c   : > { %v1481_v58 = vrot.slane %v1479_v48, 4  ;;  %v11203_v59 = vld [vmem:[#allocation2 + $0x1c] sm:$0xf]  ;;  %v1482_v60 = vrot.slane %v1373_v50, 5  ;;  %v559_v61 = vrot.slane %v558_v7, 4  ;;  %v11207_v0 = vrot.slane %v3038_v21, 5 }
  0x7d   : > { %v1476_v63 = vsel %vm11107_vm7, %v1474_v52, %v1475_v36  ;;  %v3044_v2 = vshll.u32 %v11203_v59, 16  ;;  %v560_v3 = vrot.slane %v480_v51, 7  ;;  %1674 = vrot.lane.b32.xlu1 %v9487_v46, %s10863_s23  ;;  %v9488_v5 = vcombine.low %v1161_v54, %v1162_v43  ;;  %v11217_v7 = vld [vmem:[#allocation2 + $0x28] sm:$0xf]  ;;  %v11221_v11 = vld [vmem:[#allocation2 + $0x10] sm:$0xf] }
  0x7e   : > { %v3059_v9 = vshrl.u32 %v11210_v4, 16  ;;  %v3062_v10 = vshll.u32 %v11210_v4, 16  ;;  %v9519_v12 = vcombine.low %v1473_v55, %v1476_v63  ;;  %v3068_v15 = vshll.u32 %v11217_v7, 16  ;;  %v481_v16 = vld [vmem:[%s11057_s12 + $0x28] sm:$0xf]  ;;  %v10616_v36 = vld [vmem:[#allocation7 + $0x10] sm:$0xff]  }
  0x7f   : > { %1800 = vrot.lane.b32.xlu0 %v9518_v57, %s10863_s23  ;;  %v561_v13 = vsel %vm11124_vm10, %v559_v61, %v560_v3  ;;  %v562_v14 = vrot.slane %v560_v3, 4  ;;  %v482_v17 = vld [vmem:[%s11057_s12 + $0x2c] sm:$0xf]  ;;  %v9611_v18 = vcombine.low %v11168_v6, %v11203_v59  ;;  %v1480_v19 = vsel %vm11107_vm7, %v9456_v56, %v1479_v48  ;;  %v11236_v21 = vld [vmem:[#allocation2 + $0x48] sm:$0xe]  ;;  %9930 = vmatpush3.bf16.msra.mxu0 %v10616_v36  ;;  %v10623_v36 = vld [vmem:[#allocation7] sm:$0xff]  }
  0x80   : > { %v1483_v20 = vsel %vm11107_vm7, %v1481_v58, %v1482_v60  ;;  %680 = vst.msk [vmem:[#allocation2 + $0x4c] sm:$0xf] %vm421_vm0, %v561_v13  ;;  %v3072_v23 = vshrl.u32 %v11217_v7, 16  ;;  %v2778_v24 = vld [vmem:[#allocation2 + $0xc] sm:$0xc]  ;;  %v3048_v27 = vshrl.u32 %v11203_v59, 16  ;;  %v9579_v51 = vcombine.low %v11190_v45, %v11215_v8 }
  0x81   : > { %v2780_v25 = vld [vmem:[#allocation2 + $0x14] sm:$0x3]  ;;  %681 = vst.msk [vmem:[#allocation2 + $0x50] sm:$0x1] %vm437_vm2, %v562_v14  ;;  %v11241_v6 = vrot.slane %v3059_v9, 4  ;;  %v11243_v29 = vrot.slane %v3062_v10, 5  ;;  %1676 = vrot.lane.b32.xlu1 %v9488_v5, %s10863_s23  ;;  %v9520_v37 = vcombine.low %v1480_v19, %v1483_v20  ;;  %v9612_v63 = vcombine.low %v11210_v4, %v11217_v7 }
  0x82   : > { %v2883_v30 = vrot.slane %v11221_v11, 6  ;;  %v11246_v31 = vld [vmem:[#allocation2 + $0x30] sm:$0xf]  ;;  %v11249_v32 = vrot.slane %v3068_v15, 5  ;;  %v3074_v33 = vrot.slane %v3072_v23, 4  ;;  %v563_v34 = vrot.slane %v481_v16, 7 }
  0x83   : > { %v565_v35 = vrot.slane %v482_v17, 7  ;;  %1802 = vrot.lane.b32.xlu0 %v9519_v12, %s10863_s23  ;;  %v9548_v38 = vrot.slane %v2778_v24, 10  ;;  %v2886_v39 = vrot.slane %v2780_v25, 6  ;;  %v11252_v40 = vld [vmem:[#allocation2 + $0x34] sm:$0xf]  ;;  %v3083_v41 = vshrl.u32 %v11246_v31, 16 }
  0x84   : > { %v10618_v42 = vld [vmem:[#allocation7 + $0x48] sm:$0xff]   ;;  %v2885_v43 = vrot.slane %v2883_v30, 4  ;;  %v564_v44 = vrot.slane %v563_v34, 4  ;;  %682 = vst.msk [vmem:[#allocation2 + $0x54] sm:$0xe] %vm666_vm9, %v563_v34  ;;  %v3086_v47 = vshll.u32 %v11246_v31, 16  ;;  %v3065_v56 = vor.u32 %v11243_v29, %v11241_v6 }
  0x85   : > { %v567_v46 = vrot.slane %v565_v35, 4  ;;  %v10619_v48 = vld [vmem:[#allocation7 + $0x8] sm:$0xff]   ;;  %v11257_v50 = vrot.slane %v3044_v2, 5  ;;  %v9457_v52 = vrot.slane %v11236_v21, 9  ;;  %v3092_v53 = vshll.u32 %v11252_v40, 16  ;;  %9931 = vmatprep.subr.bf16.mxu0 %v10618_v42  ;;  %v10620_v55 = vld [vmem:[#allocation7 + $0xf8] sm:$0xff]   ;;  %3674 = vrot.lane.b32.xlu1 %v9611_v18, %s10863_s23 }
  0x86   : > { %v11263_v54 = vld [vmem:[#allocation2 + $0x1c] sm:$0xf]  ;;  %v3075_v57 = vor.u32 %v3074_v33, %v11249_v32  ;;  %v566_v58 = vsel %vm11124_vm10, %v564_v44, %v565_v35  ;;  %v3096_v45 = vshrl.u32 %v11252_v40, 16  ;;  %v2781_v59 = vld [vmem:[#allocation2 + $0x18] sm:$0xc]  ;;  %v11274_v61 = vrot.slane %v3048_v27, 4  ;;  %10031 = vmatprep.subr.bf16.mxu1 %v10620_v55  ;;  %9932 = vmatpush3.bf16.msra.mxu0 %v10619_v48 }
  0x87   : > { %684 = vst.msk [vmem:[#allocation2 + $0x5c] sm:$0x1] %vm437_vm2, %v567_v46  ;;  %v483_v60 = vld [vmem:[%s11057_s12 + $0x30] sm:$0xf]  ;;  %1804 = vrot.lane.b32.xlu0 %v9520_v37, %s10863_s23  ;;  %v11277_v62 = vld [vmem:[#allocation2 + $0x4c] sm:$0xf]  ;;  %v11283_v2 = vsel %vm11181_vm13, %v9548_v38, %v2883_v30  ;;  %v11291_v10 = vsel %vm11181_vm13, %v2885_v43, %v2886_v39 }
  0x88   : > { %683 = vst.msk [vmem:[#allocation2 + $0x58] sm:$0xf] %vm421_vm0, %v566_v58  ;;  %v11286_v3 = vrot.slane %v3083_v41, 4  ;;  %v2783_v5 = vld [vmem:[#allocation2 + $0x20] sm:$0x3]  ;;  %v1486_v9 = vrot.slane %v11277_v62, 5  ;;  %v9580_v30 = vcombine.low %v11283_v2, %v11291_v10  ;;  %v9613_v58 = vcombine.low %v11246_v31, %v11252_v40 }
  0x89   : > { %v1375_v8 = vld [vmem:[#allocation2 + $0x50] sm:$0x1]  ;;  %v3088_v11 = vrot.slane %v3086_v47, 5  ;;  %v2890_v4 = vrot.slane %v11263_v54, 6  ;;  %v10621_v7 = vld [vmem:[#allocation7 + $0xb8] sm:$0xff]   ;;  %v11294_v13 = vrot.slane %v3092_v53, 5  ;;  %3514 = vrot.lane.b32.xlu1 %v9579_v51, %s10863_s23 }
  0x8a   : > { %v1489_v12 = vrot.slane %v1375_v8, 5  ;;  %v3098_v14 = vrot.slane %v3096_v45, 4  ;;  %v484_v15 = vld [vmem:[%s11057_s12 + $0x34] sm:$0xf]  ;;  %v568_v16 = vrot.slane %v483_v60, 7  ;;  %v1487_v17 = vsel %vm11107_vm7, %v9457_v52, %v1486_v9  ;;  %10032 = vmatpush3.bf16.msra.mxu1 %v10621_v7  ;;  %v10622_v23 = vld [vmem:[#allocation7 + $0x40] sm:$0xff]  }
  0x8b   : > { %v1488_v18 = vrot.slane %v1486_v9, 4  ;;  %v11300_v19 = vrot.slane %v3065_v56, 4  ;;  %v11302_v20 = vrot.slane %v3075_v57, 4  ;;  %v1163_v21 = vld [vmem:[#allocation2 + $0x48] sm:$0xf]  ;;  %v9549_v25 = vrot.slane %v2781_v59, 10  ;;  %9933 = vmatprep.subr.bf16.mxu0 %v10622_v23 }
  0x8c   : > { %v1376_v24 = vld [vmem:[#allocation2 + $0x54] sm:$0xe]  ;;  %v2892_v26 = vrot.slane %v2890_v4, 4  ;;  %v2893_v27 = vrot.slane %v2783_v5, 6  ;;  %v569_v6 = vrot.slane %v568_v16, 4  ;;  %v3089_v33 = vor.u32 %v3088_v11, %v11286_v3  ;;  %9934 = vmatpush3.bf16.msra.mxu0 %v10623_v36  ;;  %v10624_v57 = vld [vmem:[#allocation7 + $0xf0] sm:$0xff]  }
  0x8d   : > { %685 = vst.msk [vmem:[#allocation2 + $0x60] sm:$0xe] %vm666_vm9, %v568_v16  ;;  %v1490_v29 = vsel %vm11107_vm7, %v1488_v18, %v1489_v12  ;;  %v570_v34 = vrot.slane %v484_v15, 7  ;;  %v11310_v35 = vld [vmem:[#allocation2 + $0x3c] sm:$0xf]  ;;  %v9489_v38 = vcombine.low %v1163_v21, %v11277_v62  ;;  %v9458_v41 = vrot.slane %v1376_v24, 9  ;;  %3676 = vrot.lane.b32.xlu1 %v9612_v63, %s10863_s23  ;;  %10033 = vmatprep.subr.bf16.mxu1 %v10624_v57 }
  0x8e   : > { %v9521_v37 = vcombine.low %v1487_v17, %v1490_v29  ;;  %v1377_v39 = vld [vmem:[#allocation2 + $0x5c] sm:$0x1]  ;;  %v3099_v42 = vor.u32 %v3098_v14, %v11294_v13  ;;  %v11314_v43 = vld [vmem:[#allocation2 + $0x40] sm:$0xf]  ;;  %v3107_v48 = vshrl.u32 %v11310_v35, 16  ;;  %v3110_v51 = vshll.u32 %v11310_v35, 16 }
  0x8f   : > { %v11317_v44 = vld [vmem:[#allocation2 + $0x58] sm:$0xf]  ;;  %v571_v46 = vsel %vm11124_vm10, %v569_v6, %v570_v34  ;;  %v572_v47 = vrot.slane %v570_v34, 4  ;;  %v1496_v53 = vrot.slane %v1377_v39, 5  ;;  %v11327_v54 = vsel %vm11181_vm13, %v9549_v25, %v2890_v4  ;;  %v2784_v56 = vld [vmem:[#allocation2 + $0x24] sm:$0xc] }
  0x90   : > { %1806 = vrot.lane.b32.xlu0 %v9521_v37, %s10863_s23  ;;  %v1493_v52 = vrot.slane %v11317_v44, 5  ;;  %v11331_v55 = vsel %vm11181_vm13, %v2892_v26, %v2893_v27  ;;  %686 = vst.msk [vmem:[#allocation2 + $0x64] sm:$0xf] %vm421_vm0, %v571_v46  ;;  %v2785_v45 = vld [vmem:[#allocation2 + $0x28] sm:$0xf]  ;;  %v11342_v2 = vrot.slane %v3089_v33, 4  ;;  %v9614_v5 = vcombine.low %v11310_v35, %v11314_v43 }
  0x91   : > { %687 = vst.msk [vmem:[#allocation2 + $0x68] sm:$0x1] %vm437_vm2, %v572_v47  ;;  %v11337_v59 = vld [vmem:[#allocation2 + $0x2c] sm:$0x3]  ;;  %v485_v60 = vld [vmem:[%s11057_s12 + $0x38] sm:$0xf]  ;;  %3516 = vrot.lane.b32.xlu1 %v9580_v30, %s10863_s23  ;;  %v9581_v40 = vcombine.low %v11327_v54, %v11331_v55 }
  0x92   : > { %v1494_v62 = vsel %vm11107_vm7, %v9458_v41, %v1493_v52  ;;  %v1495_v63 = vrot.slane %v1493_v52, 4  ;;  %v11344_v3 = vld [vmem:[#allocation2 + $0x54] sm:$0xf]  ;;  %v486_v8 = vld [vmem:[%s11057_s12 + $0x3c] sm:$0xf]  ;;  %v11350_v31 = vrot.slane %v3099_v42, 4 }
  0x93   : > { %v3109_v10 = vrot.slane %v3107_v48, 4  ;;  %v3112_v11 = vrot.slane %v3110_v51, 5  ;;  %v3116_v7 = vshll.u32 %v11314_v43, 16  ;;  %v3120_v12 = vshrl.u32 %v11314_v43, 16  ;;  %v11359_v15 = vld [vmem:[#allocation2 + $0x48] sm:$0xf] }
  0x94   : > { %v1378_v9 = vld [vmem:[#allocation2 + $0x60] sm:$0xe]  ;;  %1678 = vrot.lane.b32.xlu0 %v9489_v38, %s10863_s23  ;;  %v1497_v4 = vsel %vm11107_vm7, %v1495_v63, %v1496_v53  ;;  %v2897_v14 = vrot.slane %v2785_v45, 6  ;;  %v9550_v18 = vrot.slane %v2784_v56, 10  ;;  %v573_v21 = vrot.slane %v485_v60, 7  ;;  %v10627_v33 = vld [vmem:[#allocation7 + $0x178] sm:$0xff]  }
  0x95   : > { %v10626_v16 = vld [vmem:[#allocation7 + $0xb0] sm:$0xff]   ;;  %v9522_v17 = vcombine.low %v1494_v62, %v1497_v4  ;;  %v575_v23 = vrot.slane %v486_v8, 7  ;;  %v11361_v24 = vld [vmem:[#allocation2 + $0x4c] sm:$0xf]  ;;  %v9490_v25 = vcombine.low %v11344_v3, %v11317_v44  ;;  %v9459_v26 = vrot.slane %v1378_v9, 9  ;;  %3678 = vrot.lane.b32.xlu1 %v9613_v58, %s10863_s23  ;;  %v10628_v41 = vld [vmem:[#allocation7 + $0xe8] sm:$0xff]   ;;  %10143 = vmatprep.subr.bf16.mxu0 %v10627_v33 }
  0x96   : > { %v2900_v27 = vrot.slane %v11337_v59, 6  ;;  %v3131_v6 = vshrl.u32 %v11359_v15, 16  ;;  %v11367_v29 = vld [vmem:[#allocation2 + $0x34] sm:$0xf]  ;;  %v487_v30 = vld [vmem:[%s11057_s12 + $0x40] sm:$0xf]  ;;  %10034 = vmatpush3.bf16.msra.mxu1 %v10626_v16  ;;  %v3113_v36 = vor.u32 %v3112_v11, %v3109_v10  ;;  %v11383_v52 = vsel %vm11181_vm13, %v9550_v18, %v2897_v14 }
  0x97   : > { %v11371_v34 = vld [vmem:[#allocation2 + $0x64] sm:$0xf]  ;;  %v574_v37 = vrot.slane %v573_v21, 4  ;;  %v577_v38 = vrot.slane %v575_v23, 4  ;;  %688 = vst.msk [vmem:[#allocation2 + $0x6c] sm:$0xe] %vm666_vm9, %v573_v21  ;;  %v9615_v54 = vcombine.low %v11359_v15, %v11361_v24  ;;  %10035 = vmatprep.subr.bf16.mxu1 %v10628_v41 }
  0x98   : > { %v3134_v39 = vshll.u32 %v11359_v15, 16  ;;  %1808 = vrot.lane.b32.xlu0 %v9522_v17, %s10863_s23  ;;  %v1379_v42 = vld [vmem:[#allocation2 + $0x68] sm:$0x1]  ;;  %v1500_v44 = vrot.slane %v11371_v34, 5  ;;  %v11377_v46 = vrot.slane %v3116_v7, 5  ;;  %v11379_v47 = vrot.slane %v3120_v12, 4 }
  0x99   : > { %v2899_v48 = vrot.slane %v2897_v14, 4  ;;  %v1503_v51 = vrot.slane %v1379_v42, 5  ;;  %v576_v53 = vsel %vm11124_vm10, %v574_v37, %v575_v23  ;;  %690 = vst.msk [vmem:[#allocation2 + $0x74] sm:$0x1] %vm437_vm2, %v577_v38  ;;  %v2787_v55 = vld [vmem:[#allocation2 + $0x30] sm:$0xc]  ;;  %3518 = vrot.lane.b32.xlu1 %v9581_v40, %s10863_s23 }
  0x9a   : > { %v488_v56 = vld [vmem:[%s11057_s12 + $0x44] sm:$0xf]  ;;  %v10630_v57 = vld [vmem:[#allocation7 + $0xa8] sm:$0xff]   ;;  %v1501_v58 = vsel %vm11107_vm7, %v9459_v26, %v1500_v44  ;;  %v1502_v45 = vrot.slane %v1500_v44, 4  ;;  %689 = vst.msk [vmem:[#allocation2 + $0x70] sm:$0xf] %vm421_vm0, %v576_v53 }
  0x9b   : > { %v3133_v59 = vrot.slane %v3131_v6, 4  ;;  %v3140_v60 = vshll.u32 %v11361_v24, 16  ;;  %v2789_v62 = vld [vmem:[#allocation2 + $0x38] sm:$0x3]  ;;  %v3136_v63 = vrot.slane %v3134_v39, 5  ;;  %v3144_v3 = vshrl.u32 %v11361_v24, 16  ;;  %10036 = vmatpush3.bf16.msra.mxu1 %v10630_v57 }
  0x9c   : > { %v2904_v8 = vrot.slane %v11367_v29, 6  ;;  %v578_v9 = vrot.slane %v487_v30, 7  ;;  %1680 = vrot.lane.b32.xlu0 %v9490_v25, %s10863_s23  ;;  %v1504_v10 = vsel %vm11107_vm7, %v1502_v45, %v1503_v51  ;;  %v11401_v11 = vrot.slane %v3113_v36, 4  ;;  %v1167_v4 = vld [vmem:[#allocation2 + $0x60] sm:$0xf]  ;;  %v10631_v40 = vld [vmem:[#allocation7 + $0xe0] sm:$0xff]  }
  0x9d   : > { %v2901_v7 = vsel %vm11181_vm13, %v2899_v48, %v2900_v27  ;;  %v580_v12 = vrot.slane %v488_v56, 7  ;;  %v9523_v14 = vcombine.low %v1501_v58, %v1504_v10  ;;  %v9551_v16 = vrot.slane %v2787_v55, 10  ;;  %v11406_v21 = vld [vmem:[#allocation2 + $0x54] sm:$0xf]  ;;  %v11410_v30 = vld [vmem:[#allocation2 + $0x58] sm:$0xf]  ;;  %10037 = vmatprep.subr.bf16.mxu1 %v10631_v40  ;;  %3680 = vrot.lane.b32.xlu1 %v9614_v5, %s10863_s23 }
  0x9e   : > { %v2906_v17 = vrot.slane %v2904_v8, 4  ;;  %v2907_v18 = vrot.slane %v2789_v62, 6  ;;  %691 = vst.msk [vmem:[#allocation2 + $0x78] sm:$0xe] %vm666_vm9, %v578_v9  ;;  %v10633_v23 = vld [vmem:[#allocation7 + $0xa0] sm:$0xff]   ;;  %v3123_v25 = vor.u32 %v11379_v47, %v11377_v46  ;;  %v579_v6 = vrot.slane %v578_v9, 4 }
  0x9f   : > { %v1380_v26 = vld [vmem:[#allocation2 + $0x6c] sm:$0xe]  ;;  %v582_v29 = vrot.slane %v580_v12, 4  ;;  %v3155_v27 = vshrl.u32 %v11406_v21, 16  ;;  %v9582_v33 = vcombine.low %v11383_v52, %v2901_v7  ;;  %v3137_v36 = vor.u32 %v3136_v63, %v3133_v59  ;;  %v11422_v39 = vld [vmem:[#allocation2 + $0x40] sm:$0xf]  ;;  %10038 = vmatpush3.bf16.msra.mxu1 %v10633_v23 }
  0xa0   : > { %v11418_v37 = vrot.slane %v3140_v60, 5  ;;  %v11420_v38 = vrot.slane %v3144_v3, 4  ;;  %v10634_v41 = vld [vmem:[#allocation7 + $0xd8] sm:$0xff]   ;;  %1810 = vrot.lane.b32.xlu0 %v9523_v14, %s10863_s23  ;;  %v9491_v42 = vcombine.low %v1167_v4, %v11371_v34  ;;  %v1381_v44 = vld [vmem:[#allocation2 + $0x74] sm:$0x1]  ;;  %v9460_v35 = vrot.slane %v1380_v26, 9 }
  0xa1   : > { %v581_v43 = vsel %vm11124_vm10, %v579_v6, %v580_v12  ;;  %693 = vst.msk [vmem:[#allocation2 + $0x80] sm:$0x1] %vm437_vm2, %v582_v29  ;;  %v3158_v5 = vshll.u32 %v11406_v21, 16  ;;  %v489_v47 = vld [vmem:[%s11057_s12 + $0x48] sm:$0xf]  ;;  %v11435_v51 = vsel %vm11181_vm13, %v9551_v16, %v2904_v8  ;;  %v11439_v52 = vsel %vm11181_vm13, %v2906_v17, %v2907_v18  ;;  %10039 = vmatprep.subr.bf16.mxu1 %v10634_v41  ;;  %v10635_v60 = vld [vmem:[#allocation7 + $0x98] sm:$0xff]  }
  0xa2   : > { %v11431_v48 = vld [vmem:[#allocation2 + $0x70] sm:$0xf]  ;;  %692 = vst.msk [vmem:[#allocation2 + $0x7c] sm:$0xf] %vm421_vm0, %v581_v43  ;;  %v3164_v34 = vshll.u32 %v11410_v30, 16  ;;  %v3168_v53 = vshrl.u32 %v11410_v30, 16  ;;  %3520 = vrot.lane.b32.xlu1 %v9582_v33, %s10863_s23  ;;  %v3147_v3 = vor.u32 %v11420_v38, %v11418_v37  ;;  %v9616_v8 = vcombine.low %v11406_v21, %v11410_v30 }
  0xa3   : > { %v11444_v55 = vld [vmem:[#allocation2 + $0x3c] sm:$0xc]  ;;  %v1507_v57 = vrot.slane %v11431_v48, 5  ;;  %v1510_v58 = vrot.slane %v1381_v44, 5  ;;  %v3157_v45 = vrot.slane %v3155_v27, 4  ;;  %v3160_v59 = vrot.slane %v3158_v5, 5  ;;  %10040 = vmatpush3.bf16.msra.mxu1 %v10635_v60 }
  0xa4   : > { %v490_v56 = vld [vmem:[%s11057_s12 + $0x4c] sm:$0xf]  ;;  %v11448_v62 = vrot.slane %v3123_v25, 4  ;;  %v11451_v63 = vrot.slane %v3137_v36, 4  ;;  %v2792_v9 = vld [vmem:[#allocation2 + $0x44] sm:$0x3]  ;;  %1682 = vrot.lane.b32.xlu0 %v9491_v42, %s10863_s23  ;;  %v9583_v16 = vcombine.low %v11435_v51, %v11439_v52 }
  0xa5   : > { %v10636_v10 = vld [vmem:[#allocation7 + $0xd0] sm:$0xff]   ;;  %v1508_v4 = vsel %vm11107_vm7, %v9460_v35, %v1507_v57  ;;  %v1509_v7 = vrot.slane %v1507_v57, 4  ;;  %v1382_v12 = vld [vmem:[#allocation2 + $0x78] sm:$0xe]  ;;  %v2911_v40 = vrot.slane %v11422_v39, 6  ;;  %v583_v14 = vrot.slane %v489_v47, 7 }
  0xa6   : > { %v11463_v17 = vrot.slane %v3164_v34, 5  ;;  %v3170_v18 = vrot.slane %v3168_v53, 4  ;;  %v585_v23 = vrot.slane %v490_v56, 7  ;;  %v11465_v25 = vld [vmem:[#allocation2 + $0x60] sm:$0xf]  ;;  %10041 = vmatprep.subr.bf16.mxu1 %v10636_v10  ;;  %v3161_v29 = vor.u32 %v3160_v59, %v3157_v45  ;;  %3682 = vrot.lane.b32.xlu1 %v9615_v54, %s10863_s23  ;;  %s9328_s16 = scalar_lea.sflag [#allocation6], %s11051_s15 }
  0xa7   : > { %v1511_v26 = vsel %vm11107_vm7, %v1509_v7, %v1510_v58  ;;  %v1169_v6 = vld [vmem:[#allocation2 + $0x6c] sm:$0xf]  ;;  %v9552_v27 = vrot.slane %v11444_v55, 10  ;;  %v584_v33 = vrot.slane %v583_v14, 4  ;;  %694 = vst.msk [vmem:[#allocation2 + $0x84] sm:$0xe] %vm666_vm9, %v583_v14 }
  0xa8   : > { %v11471_v36 = vld [vmem:[#allocation2 + $0x4c] sm:$0xf]  ;;  %v9524_v38 = vcombine.low %v1508_v4, %v1511_v26  ;;  %v1383_v39 = vld [vmem:[#allocation2 + $0x80] sm:$0x1]  ;;  %v9461_v41 = vrot.slane %v1382_v12, 9  ;;  %v587_v42 = vrot.slane %v585_v23, 4  ;;  %v9492_v24 = vcombine.low %v1169_v6, %v11431_v48 }
  0xa9   : > { %v11477_v44 = vld [vmem:[#allocation2 + $0x64] sm:$0xf]  ;;  %v3179_v35 = vshrl.u32 %v11465_v25, 16  ;;  %v11480_v5 = vld [vmem:[#allocation2 + $0x7c] sm:$0xf]  ;;  %v2913_v47 = vrot.slane %v2911_v40, 4  ;;  %v586_v52 = vsel %vm11124_vm10, %v584_v33, %v585_v23  ;;  %v3171_v55 = vor.u32 %v3170_v18, %v11463_v17 }
  0xaa   : > { %v10638_v43 = vld [vmem:[#allocation7 + $0x90] sm:$0xff]   ;;  %v2914_v51 = vrot.slane %v2792_v9, 6  ;;  %v3182_v34 = vshll.u32 %v11465_v25, 16  ;;  %v2793_v15 = vld [vmem:[#allocation2 + $0x48] sm:$0xc]  ;;  %1812 = vrot.lane.b32.xlu0 %v9524_v38, %s10863_s23  ;;  %v1514_v54 = vrot.slane %v11480_v5, 5  ;;  %3522 = vrot.lane.b32.xlu1 %v9583_v16, %s10863_s23 }
  0xab   : > { %v1517_v53 = vrot.slane %v1383_v39, 5  ;;  %695 = vst.msk [vmem:[#allocation2 + $0x88] sm:$0xf] %vm421_vm0, %v586_v52  ;;  %v2795_v56 = vld [vmem:[#allocation2 + $0x50] sm:$0x3]  ;;  %10042 = vmatpush3.bf16.msra.mxu1 %v10638_v43  ;;  %v10640_v58 = vld [vmem:[#allocation7 + $0xc8] sm:$0xff]  }
  0xac   : > { %696 = vst.msk [vmem:[#allocation2 + $0x8c] sm:$0x1] %vm437_vm2, %v587_v42  ;;  %v491_v57 = vld [vmem:[%s11057_s12 + $0x50] sm:$0xf]  ;;  %v11492_v45 = vrot.slane %v3147_v3, 4  ;;  %v11494_v59 = vrot.slane %v3161_v29, 4  ;;  %v1515_v10 = vsel %vm11107_vm7, %v9461_v41, %v1514_v54  ;;  %10043 = vmatprep.subr.bf16.mxu1 %v10640_v58  ;;  %v2912_v3 = vsel %vm11181_vm13, %v9552_v27, %v2911_v40 }
  0xad   : > { %v3188_v60 = vshll.u32 %v11477_v44, 16  ;;  %v2918_v48 = vrot.slane %v11471_v36, 6  ;;  %v492_v9 = vld [vmem:[%s11057_s12 + $0x54] sm:$0xf]  ;;  %v1516_v4 = vrot.slane %v1514_v54, 4  ;;  %v11502_v12 = vrot.slane %v3179_v35, 4 }
  0xae   : > { %v1171_v7 = vld [vmem:[#allocation2 + $0x78] sm:$0xf]  ;;  %v3192_v14 = vshrl.u32 %v11477_v44, 16  ;;  %v2915_v18 = vsel %vm11181_vm13, %v2913_v47, %v2914_v51  ;;  %v3184_v23 = vrot.slane %v3182_v34, 5  ;;  %v588_v26 = vrot.slane %v491_v57, 7  ;;  %1684 = vrot.lane.b32.xlu0 %v9492_v24, %s10863_s23  ;;  %3684 = vrot.lane.b32.xlu1 %v9616_v8, %s10863_s23  ;;  %p15900_p11 = scmp.ne.s32.totalorder %s15340_s13, 0 }
  0xaf   : > { %v1518_v16 = vsel %vm11107_vm7, %v1516_v4, %v1517_v53  ;;  %v11512_v6 = vrot.slane %v3171_v55, 4  ;;  %v1384_v29 = vld [vmem:[#allocation2 + $0x84] sm:$0xe]  ;;  %v9553_v33 = vrot.slane %v2793_v15, 10  ;;  %v590_v36 = vrot.slane %v492_v9, 7  ;;  %v10642_v15 = vld [vmem:[#allocation7 + $0x88] sm:$0xff]  }
  0xb0   : > { %v9525_v38 = vcombine.low %v1515_v10, %v1518_v16  ;;  %v9617_v40 = vcombine.low %v11465_v25, %v11477_v44  ;;  %v2920_v27 = vrot.slane %v2918_v48, 4  ;;  %v2921_v39 = vrot.slane %v2795_v56, 6  ;;  %697 = vst.msk [vmem:[#allocation2 + $0x90] sm:$0xe] %vm666_vm9, %v588_v26  ;;  %v11517_v41 = vld [vmem:[#allocation2 + $0x58] sm:$0xf]  ;;  %10044 = vmatpush3.bf16.msra.mxu1 %v10642_v15 }
  0xb1   : > { %v9584_v42 = vcombine.low %v2912_v3, %v2915_v18  ;;  %v9462_v35 = vrot.slane %v1384_v29, 9  ;;  %v589_v43 = vrot.slane %v588_v26, 4  ;;  %v592_v47 = vrot.slane %v590_v36, 4  ;;  %v11523_v51 = vld [vmem:[#allocation2 + $0x6c] sm:$0xf]  ;;  %v10643_v18 = vld [vmem:[#allocation7 + $0xc0] sm:$0xff]  }
  0xb2   : > { %v11525_v52 = vld [vmem:[#allocation2 + $0x70] sm:$0xf]  ;;  %v2796_v25 = vld [vmem:[#allocation2 + $0x54] sm:$0xc]  ;;  %v2798_v44 = vld [vmem:[#allocation2 + $0x5c] sm:$0x3]  ;;  %v9493_v24 = vcombine.low %v1171_v7, %v11480_v5  ;;  %v3185_v21 = vor.u32 %v3184_v23, %v11502_v12  ;;  %1814 = vrot.lane.b32.xlu0 %v9525_v38, %s10863_s23  ;;  %v2919_v57 = vsel %vm11181_vm13, %v9553_v33, %v2918_v48  ;;  %10045 = vmatprep.subr.bf16.mxu1 %v10643_v18 }
  0xb3   : > { %v493_v34 = vld [vmem:[%s11057_s12 + $0x58] sm:$0xf]  ;;  %v1385_v53 = vld [vmem:[#allocation2 + $0x8c] sm:$0x1]  ;;  %v11532_v30 = vrot.slane %v3188_v60, 5  ;;  %v3194_v8 = vrot.slane %v3192_v14, 4  ;;  %v591_v58 = vsel %vm11124_vm10, %v589_v43, %v590_v36  ;;  %v2922_v60 = vsel %vm11181_vm13, %v2920_v27, %v2921_v39  ;;  %3524 = vrot.lane.b32.xlu1 %v9584_v42, %s10863_s23 }
  0xb4   : > { %v11529_v54 = vld [vmem:[#allocation2 + $0x88] sm:$0xf]  ;;  %v1524_v56 = vrot.slane %v1385_v53, 5  ;;  %699 = vst.msk [vmem:[#allocation2 + $0x98] sm:$0x1] %vm437_vm2, %v592_v47  ;;  %v3203_v9 = vshrl.u32 %v11523_v51, 16 }
  0xb5   : > { %v1521_v55 = vrot.slane %v11529_v54, 5  ;;  %v494_v5 = vld [vmem:[%s11057_s12 + $0x5c] sm:$0xf]  ;;  %698 = vst.msk [vmem:[#allocation2 + $0x94] sm:$0xf] %vm421_vm0, %v591_v58  ;;  %v3206_v10 = vshll.u32 %v11523_v51, 16  ;;  %v3195_v23 = vor.u32 %v3194_v8, %v11532_v30 }
  0xb6   : > { %v3212_v4 = vshll.u32 %v11525_v52, 16  ;;  %v1173_v12 = vld [vmem:[#allocation2 + $0x84] sm:$0xf]  ;;  %v3216_v14 = vshrl.u32 %v11525_v52, 16  ;;  %v2925_v3 = vrot.slane %v11517_v41, 6  ;;  %v9554_v26 = vrot.slane %v2796_v25, 10  ;;  %1686 = vrot.lane.b32.xlu0 %v9493_v24, %s10863_s23 }
  0xb7   : > { %v1522_v48 = vsel %vm11107_vm7, %v9462_v35, %v1521_v55  ;;  %v1523_v7 = vrot.slane %v1521_v55, 4  ;;  %v2928_v16 = vrot.slane %v2798_v44, 6  ;;  %v593_v29 = vrot.slane %v493_v34, 7  ;;  %v10645_v33 = vld [vmem:[#allocation7 + $0x80] sm:$0xff]   ;;  %v11564_v25 = vld [vmem:[#allocation2 + $0x78] sm:$0xf]  ;;  %3686 = vrot.lane.b32.xlu1 %v9617_v40, %s10863_s23 }
  0xb8   : > { %v11557_v38 = vrot.slane %v3185_v21, 4  ;;  %v1386_v27 = vld [vmem:[#allocation2 + $0x90] sm:$0xe]  ;;  %v2927_v39 = vrot.slane %v2925_v3, 4  ;;  %v595_v42 = vrot.slane %v494_v5, 7  ;;  %v9585_v41 = vcombine.low %v2919_v57, %v2922_v60  ;;  %10046 = vmatpush3.bf16.msra.mxu1 %v10645_v33 }
  0xb9   : > { %v1525_v36 = vsel %vm11107_vm7, %v1523_v7, %v1524_v56  ;;  %v11559_v43 = vrot.slane %v3203_v9, 4  ;;  %v11561_v47 = vrot.slane %v3206_v10, 5  ;;  %700 = vst.msk [vmem:[#allocation2 + $0x9c] sm:$0xe] %vm666_vm9, %v593_v29  ;;  %v11567_v44 = vrot.slane %v3212_v4, 5 }
  0xba   : > { %v9526_v35 = vcombine.low %v1522_v48, %v1525_v36  ;;  %v11569_v34 = vrot.slane %v3216_v14, 4  ;;  %v594_v15 = vrot.slane %v593_v29, 4  ;;  %v597_v24 = vrot.slane %v595_v42, 4  ;;  %v11571_v53 = vld [vmem:[#allocation2 + $0x7c] sm:$0xf] }
  0xbb   : > { %v9494_v21 = vcombine.low %v1173_v12, %v11529_v54  ;;  %v1387_v8 = vld [vmem:[#allocation2 + $0x98] sm:$0x1]  ;;  %v9463_v55 = vrot.slane %v1386_v27, 9  ;;  %v11576_v56 = vsel %vm11181_vm13, %v9554_v26, %v2925_v3  ;;  %v11580_v40 = vsel %vm11181_vm13, %v2927_v39, %v2928_v16  ;;  %v11582_v57 = vld [vmem:[#allocation2 + $0x64] sm:$0xf]  ;;  %3526 = vrot.lane.b32.xlu1 %v9585_v41, %s10863_s23 }
  0xbc   : > { %1816 = vrot.lane.b32.xlu0 %v9526_v35, %s10863_s23  ;;  %v11585_v58 = vld [vmem:[#allocation2 + $0x94] sm:$0xf]  ;;  %v596_v54 = vsel %vm11124_vm10, %v594_v15, %v595_v42  ;;  %702 = vst.msk [vmem:[#allocation2 + $0xa4] sm:$0x1] %vm437_vm2, %v597_v24  ;;  %v3227_v5 = vshrl.u32 %v11564_v25, 16  ;;  %v3230_v60 = vshll.u32 %v11564_v25, 16  ;;  %v3209_v3 = vor.u32 %v11561_v47, %v11559_v43 }
  0xbd   : > { %v3236_v9 = vshll.u32 %v11571_v53, 16  ;;  %v11593_v10 = vrot.slane %v3195_v23, 4  ;;  %v1528_v4 = vrot.slane %v11585_v58, 5  ;;  %v1531_v48 = vrot.slane %v1387_v8, 5  ;;  %v1175_v7 = vld [vmem:[#allocation2 + $0x90] sm:$0xf] }
  0xbe   : > { %701 = vst.msk [vmem:[#allocation2 + $0xa0] sm:$0xf] %vm421_vm0, %v596_v54  ;;  %v3240_v12 = vshrl.u32 %v11571_v53, 16  ;;  %v495_v14 = vld [vmem:[%s11057_s12 + $0x60] sm:$0xf]  ;;  %v3219_v18 = vor.u32 %v11569_v34, %v11567_v44  ;;  %v9618_v23 = vcombine.low %v11523_v51, %v11525_v52  ;;  %v9586_v27 = vcombine.low %v11576_v56, %v11580_v40 }
  0xbf   : > { %v2799_v26 = vld [vmem:[#allocation2 + $0x60] sm:$0xc]  ;;  %v2801_v16 = vld [vmem:[#allocation2 + $0x68] sm:$0x3]  ;;  %v496_v29 = vld [vmem:[%s11057_s12 + $0x64] sm:$0xf]  ;;  %v1529_v33 = vsel %vm11107_vm7, %v9463_v55, %v1528_v4  ;;  %v9495_v8 = vcombine.low %v1175_v7, %v11585_v58 }
  0xc0   : > { %v1530_v36 = vrot.slane %v1528_v4, 4  ;;  %v2932_v39 = vrot.slane %v11582_v57, 6  ;;  %1688 = vrot.lane.b32.xlu0 %v9494_v21, %s10863_s23  ;;  %v1388_v42 = vld [vmem:[#allocation2 + $0x9c] sm:$0xe]  ;;  %v3229_v35 = vrot.slane %v3227_v5, 4  ;;  %v3232_v41 = vrot.slane %v3230_v60, 5  ;;  %3688 = vrot.lane.b32.xlu1 %v9618_v23, %s10863_s23 }
  0xc1   : > { %v11613_v43 = vrot.slane %v3236_v9, 5  ;;  %v598_v51 = vrot.slane %v495_v14, 7  ;;  %v3242_v47 = vrot.slane %v3240_v12, 4  ;;  %v9555_v34 = vrot.slane %v2799_v26, 10  ;;  %v11620_v21 = vld [vmem:[#allocation2 + $0x84] sm:$0xf] }
  0xc2   : > { %v1532_v52 = vsel %vm11107_vm7, %v1530_v36, %v1531_v48  ;;  %v600_v15 = vrot.slane %v496_v29, 7  ;;  %v2935_v55 = vrot.slane %v2801_v16, 6  ;;  %v9464_v57 = vrot.slane %v1388_v42, 9  ;;  %v11628_v7 = vld [vmem:[#allocation2 + $0x88] sm:$0xf] }
  0xc3   : > { %v9527_v24 = vcombine.low %v1529_v33, %v1532_v52  ;;  %v599_v56 = vrot.slane %v598_v51, 4  ;;  %703 = vst.msk [vmem:[#allocation2 + $0xa8] sm:$0xe] %vm666_vm9, %v598_v51  ;;  %v1389_v40 = vld [vmem:[#allocation2 + $0xa4] sm:$0x1]  ;;  %v2934_v54 = vrot.slane %v2932_v39, 4  ;;  %v3233_v48 = vor.u32 %v3232_v41, %v3229_v35 }
  0xc4   : > { %v602_v5 = vrot.slane %v600_v15, 4  ;;  %v3251_v60 = vshrl.u32 %v11620_v21, 16  ;;  %v1538_v4 = vrot.slane %v1389_v40, 5  ;;  %v3254_v12 = vshll.u32 %v11620_v21, 16  ;;  %3528 = vrot.lane.b32.xlu1 %v9586_v27, %s10863_s23  ;;  %v1177_v51 = vld [vmem:[#allocation2 + $0x9c] sm:$0xf] }
  0xc5   : > { %1818 = vrot.lane.b32.xlu0 %v9527_v24, %s10863_s23  ;;  %v11624_v9 = vld [vmem:[#allocation2 + $0xa0] sm:$0xf]  ;;  %v601_v58 = vsel %vm11124_vm10, %v599_v56, %v600_v15  ;;  %v3260_v26 = vshll.u32 %v11628_v7, 16  ;;  %v3264_v16 = vshrl.u32 %v11628_v7, 16  ;;  %v11636_v29 = vrot.slane %v3209_v3, 4 }
  0xc6   : > { %v1535_v14 = vrot.slane %v11624_v9, 5  ;;  %704 = vst.msk [vmem:[#allocation2 + $0xac] sm:$0xf] %vm421_vm0, %v601_v58  ;;  %v3253_v23 = vrot.slane %v3251_v60, 4  ;;  %v3243_v33 = vor.u32 %v3242_v47, %v11613_v43  ;;  %v9619_v36 = vcombine.low %v11564_v25, %v11571_v53  ;;  %v2802_v15 = vld [vmem:[#allocation2 + $0x6c] sm:$0xc] }
  0xc7   : > { %705 = vst.msk [vmem:[#allocation2 + $0xb0] sm:$0x1] %vm437_vm2, %v602_v5  ;;  %v3256_v42 = vrot.slane %v3254_v12, 5  ;;  %v2933_v52 = vsel %vm11181_vm13, %v9555_v34, %v2932_v39  ;;  %v2936_v3 = vsel %vm11181_vm13, %v2934_v54, %v2935_v55  ;;  %v11648_v24 = vrot.slane %v3219_v18, 4  ;;  %v2803_v27 = vld [vmem:[#allocation2 + $0x70] sm:$0xf] }
  0xc8   : > { %v1536_v35 = vsel %vm11107_vm7, %v9464_v57, %v1535_v14  ;;  %v1537_v41 = vrot.slane %v1535_v14, 4  ;;  %v11651_v25 = vrot.slane %v3233_v48, 4  ;;  %v2804_v47 = vld [vmem:[#allocation2 + $0x74] sm:$0x3]  ;;  %v11655_v39 = vrot.slane %v3260_v26, 5  ;;  %3690 = vrot.lane.b32.xlu1 %v9619_v36, %s10863_s23 }
  0xc9   : > { %1690 = vrot.lane.b32.xlu0 %v9495_v8, %s10863_s23  ;;  %v3257_v53 = vor.u32 %v3256_v42, %v3253_v23  ;;  %v3266_v34 = vrot.slane %v3264_v16, 4  ;;  %v2939_v55 = vrot.slane %v2803_v27, 6  ;;  %v11657_v18 = vrot.slane %v3243_v33, 4  ;;  %v497_v5 = vld [vmem:[%s11057_s12 + $0x68] sm:$0xf] }
  0xca   : > { %15354 = vst [vmem:[#allocation16_spill] sm:$0xff] %v11651_v25  ;;  %v1539_v56 = vsel %vm11107_vm7, %v1537_v41, %v1538_v4  ;;  %v1390_v40 = vld [vmem:[#allocation2 + $0xa8] sm:$0xe]  ;;  %15355 = vst [vmem:[#allocation17_spill] sm:$0xff] %v11655_v39  ;;  %v9587_v8 = vcombine.low %v2933_v52, %v2936_v3  ;;  %v9556_v54 = vrot.slane %v2802_v15, 10  ;;  %v2942_v12 = vrot.slane %v2804_v47, 6 }
  0xcb   : > { %v9528_v57 = vcombine.low %v1536_v35, %v1539_v56  ;;  %15356 = vst [vmem:[#allocation18_spill] sm:$0xff] %v11657_v18  ;;  %v498_v60 = vld [vmem:[%s11057_s12 + $0x6c] sm:$0xf]  ;;  %v9465_v48 = vrot.slane %v1390_v40, 9  ;;  %v2941_v58 = vrot.slane %v2939_v55, 4  ;;  %v603_v14 = vrot.slane %v497_v5, 7 }
  0xcc   : > { %v9496_v4 = vcombine.low %v1177_v51, %v11624_v9  ;;  %v11664_v16 = vrot.slane %v3257_v53, 4  ;;  %v605_v33 = vrot.slane %v498_v60, 7  ;;  %v3267_v36 = vor.u32 %v3266_v34, %v11655_v39  ;;  %3530 = vrot.lane.b32.xlu1 %v9587_v8, %s10863_s23  ;;  %v1179_v53 = vld [vmem:[#allocation2 + $0xa8] sm:$0xf]  ;;  %v4891_v34 = vld [vmem:[#allocation2 + $0x18] sm:$0xc] }
  0xcd   : > { %1820 = vrot.lane.b32.xlu0 %v9528_v57, %s10863_s23  ;;  %v1180_v23 = vld [vmem:[#allocation2 + $0xac] sm:$0xf]  ;;  %706 = vst.msk [vmem:[#allocation2 + $0xb4] sm:$0xe] %vm666_vm9, %v603_v14  ;;  %v3041_v41 = vor.u32 %v11207_v0, %v11195_v49  ;;  %v9620_v52 = vcombine.low %v11620_v21, %v11628_v7  ;;  %v604_v9 = vrot.slane %v603_v14, 4  ;;  %v2940_v27 = vsel %vm11181_vm13, %v9556_v54, %v2939_v55 }
  0xce   : > { %v1391_v26 = vld [vmem:[#allocation2 + $0xb0] sm:$0x1]  ;;  %15357 = vst [vmem:[#allocation19_spill] sm:$0xff] %v11664_v16  ;;  %v1542_v42 = vrot.slane %v1180_v23, 5  ;;  %v607_v51 = vrot.slane %v605_v33, 4  ;;  %v2943_v47 = vsel %vm11181_vm13, %v2941_v58, %v2942_v12  ;;  %v3051_v7 = vor.u32 %v11274_v61, %v11257_v50 }
  0xcf   : > { %v1545_v35 = vrot.slane %v1391_v26, 5  ;;  %v606_v49 = vsel %vm11124_vm10, %v604_v9, %v605_v33  ;;  %v4220_v0 = vld [vmem:[#allocation2 + $0x1c] sm:$0xf]  ;;  %v11683_v21 = vld [vmem:[#allocation2 + $0x20] sm:$0x3]  ;;  %v11689_v40 = vrot.slane %v3267_v36, 4  ;;  %v9588_v54 = vcombine.low %v2940_v27, %v2943_v47 }
  0xd0   : > { %v1543_v3 = vsel %vm11107_vm7, %v9465_v48, %v1542_v42  ;;  %v1544_v15 = vrot.slane %v1542_v42, 4  ;;  %708 = vst.msk [vmem:[#allocation2 + $0xbc] sm:$0x1] %vm437_vm2, %v607_v51  ;;  %15358 = vst [vmem:[#allocation20_spill] sm:$0xff] %v11683_v21  ;;  %v4941_v55 = vrot.slane %v4220_v0, 6  ;;  %v11692_v57 = vrot.slane %v3041_v41, 4  ;;  %3692 = vrot.lane.b32.xlu1 %v9620_v52, %s10863_s23 }
  0xd1   : > { %1692 = vrot.lane.b32.xlu0 %v9496_v4, %s10863_s23  ;;  %15359 = vst [vmem:[#allocation21_spill] sm:$0xff] %v11689_v40  ;;  %707 = vst.msk [vmem:[#allocation2 + $0xb8] sm:$0xf] %vm421_vm0, %v606_v49  ;;  %v9659_v5 = vrot.slane %v4891_v34, 10  ;;  %v4944_v60 = vrot.slane %v11683_v21, 6  ;;  %v9497_v26 = vcombine.low %v1179_v53, %v1180_v23  ;;  %v4317_v36 = vrot.slane %v4220_v0, 5 }
  0xd2   : > { %v1546_v56 = vsel %vm11107_vm7, %v1544_v15, %v1545_v35  ;;  %v11696_v48 = vld [vmem:[#allocation2 + $0x90] sm:$0xf]  ;;  %v11698_v61 = vld [vmem:[#allocation2 + $0x94] sm:$0xf]  ;;  %v4943_v58 = vrot.slane %v4941_v55, 4  ;;  %v11716_v34 = vrot.slane %v3051_v7, 4 }
  0xd3   : > { %v9529_v8 = vcombine.low %v1543_v3, %v1546_v56  ;;  %v3275_v12 = vshrl.u32 %v11696_v48, 16  ;;  %v3278_v14 = vshll.u32 %v11696_v48, 16  ;;  %v3284_v4 = vshll.u32 %v11698_v61, 16  ;;  %v11714_v0 = vld [vmem:[#allocation2 + $0x18] sm:$0xe] }
  0xd4   : > { %v1392_v33 = vld [vmem:[#allocation2 + $0xb4] sm:$0xe]  ;;  %v4942_v42 = vsel %vm11181_vm13, %v9659_v5, %v4941_v55  ;;  %v3288_v35 = vshrl.u32 %v11698_v61, 16  ;;  %v4945_v52 = vsel %vm11181_vm13, %v4943_v58, %v4944_v60  ;;  %3532 = vrot.lane.b32.xlu1 %v9588_v54, %s10863_s23  ;;  %15361 = vst [vmem:[#allocation23_spill] sm:$0xff] %v11714_v0  ;;  %v4319_v56 = vrot.slane %v4317_v36, 4 }
  0xd5   : > { %1822 = vrot.lane.b32.xlu0 %v9529_v8, %s10863_s23  ;;  %v9466_v41 = vrot.slane %v1392_v33, 9  ;;  %v3277_v9 = vrot.slane %v3275_v12, 4  ;;  %v3280_v51 = vrot.slane %v3278_v14, 5  ;;  %v9707_v3 = vcombine.low %v4942_v42, %v4945_v52  ;;  %v4221_v5 = vld [vmem:[#allocation2 + $0x20] sm:$0x1] }
  0xd6   : > { %v11710_v15 = vrot.slane %v3284_v4, 5  ;;  %v3290_v27 = vrot.slane %v3288_v35, 4  ;;  %v9643_v60 = vrot.slane %v11714_v0, 9  ;;  %v1181_v58 = vld [vmem:[#allocation2 + $0xb4] sm:$0xf]  ;;  %vm1826_vm14 = vcmask 523264  }
  0xd7   : > { %v1393_v23 = vld [vmem:[#allocation2 + $0xbc] sm:$0x1]  ;;  %v3281_v53 = vor.u32 %v3280_v51, %v3277_v9  ;;  %v2805_v33 = vld [vmem:[#allocation2 + $0x78] sm:$0xc]  ;;  %v2807_v51 = vld [vmem:[#allocation2 + $0x80] sm:$0x3] }
  0xd8   : > { %15360 = vst [vmem:[#allocation22_spill] sm:$0xff] %v11710_v15  ;;  %v1182_v47 = vld [vmem:[#allocation2 + $0xb8] sm:$0xf]  ;;  %v3291_v49 = vor.u32 %v3290_v27, %v11710_v15  ;;  %v1552_v8 = vrot.slane %v1393_v23, 5  ;;  %5227 = vrot.lane.b32.xlu1 %v9707_v3, %s10863_s23  ;;  %v4318_v35 = vsel %vm11107_vm7, %v9643_v60, %v4317_v36  ;;  %v2806_v9 = vld [vmem:[#allocation2 + $0x7c] sm:$0xf] }
  0xd9   : > { %1694 = vrot.lane.b32.xlu0 %v9497_v26, %s10863_s23  ;;  %v1549_v55 = vrot.slane %v1182_v47, 5  ;;  %v11722_v14 = vrot.slane %v3281_v53, 4  ;;  %v4320_v26 = vrot.slane %v4221_v5, 5  ;;  %v9557_v27 = vrot.slane %v2805_v33, 10  ;;  %v4223_v36 = vld [vmem:[#allocation2 + $0x28] sm:$0xf] }
  0xda   : > { %v11724_v4 = vrot.slane %v3291_v49, 4  ;;  %v2946_v23 = vrot.slane %v2806_v9, 6  ;;  %v9498_v12 = vcombine.low %v1181_v58, %v1182_v47  ;;  %v11739_v60 = vld [vmem:[#allocation2 + $0x2c] sm:$0x3]  ;;  %v4892_v33 = vld [vmem:[#allocation2 + $0x24] sm:$0xc] }
  0xdb   : > { %15362 = vst [vmem:[#allocation24_spill] sm:$0xff] %v11722_v14  ;;  %v1550_v7 = vsel %vm11107_vm7, %v9466_v41, %v1549_v55  ;;  %v1551_v42 = vrot.slane %v1549_v55, 4  ;;  %v4321_v3 = vsel %vm11107_vm7, %v4319_v56, %v4320_v26  ;;  %v2949_v55 = vrot.slane %v2807_v51, 6  ;;  %15365 = vst [vmem:[#allocation27_spill] sm:$0xff] %v11739_v60  ;;  %v11750_v9 = vld [vmem:[#allocation2 + $0x10] sm:$0xf] }
  0xdc   : > { %15363 = vst [vmem:[#allocation25_spill] sm:$0xff] %v11724_v4  ;;  %v11735_v49 = vcombine.low %v4318_v35, %v4321_v3  ;;  %v2948_v41 = vrot.slane %v2946_v23, 4  ;;  %v2947_v47 = vsel %vm11181_vm13, %v9557_v27, %v2946_v23  ;;  %v9660_v58 = vrot.slane %v4892_v33, 10  ;;  %v11752_v51 = vld [vmem:[#allocation2 + $0x14] sm:$0x1] }
  0xdd   : > { %v1553_v53 = vsel %vm11107_vm7, %v1551_v42, %v1552_v8  ;;  %v9621_v42 = vcombine.low %v11696_v48, %v11698_v61  ;;  %v4951_v35 = vrot.slane %v11739_v60, 6  ;;  %v1183_v8 = vld [vmem:[#allocation2 + $0xc] sm:$0xe]  ;;  %v1252_v26 = vrot.slane %v11750_v9, 5  ;;  %v11762_v33 = vld [vmem:[#allocation2 + $0x9c] sm:$0xf] }
  0xde   : > { %15364 = vst [vmem:[#allocation26_spill] sm:$0xff] %v11735_v49  ;;  %v9530_v5 = vcombine.low %v1550_v7, %v1553_v53  ;;  %5099 = vrot.lane.b32.xlu1 %v11735_v49, %s10863_s23  ;;  %v4948_v7 = vrot.slane %v4223_v36, 6  ;;  %v2950_v48 = vsel %vm11181_vm13, %v2948_v41, %v2949_v55  ;;  %v9435_v27 = vrot.slane %v1183_v8, 9  ;;  %v11764_v54 = vld [vmem:[#allocation2 + $0xa0] sm:$0xf]  ;;  %v1795_v53 = vpop.permute.xlu0 %1794 }
  0xdf   : > { %v1255_v23 = vrot.slane %v11752_v51, 5  ;;  %v1254_v52 = vrot.slane %v1252_v26, 4  ;;  %v3302_v41 = vshll.u32 %v11762_v33, 16  ;;  %v4224_v4 = vld [vmem:[#allocation2 + $0x2c] sm:$0x1] }
  0xe0   : > { %1824 = vrot.lane.b32.xlu0 %v9530_v5, %s10863_s23  ;;  %v4950_v3 = vrot.slane %v4948_v7, 4  ;;  %v4949_v61 = vsel %vm11181_vm13, %v9660_v58, %v4948_v7  ;;  %v3299_v5 = vshrl.u32 %v11762_v33, 16  ;;  %v1253_v8 = vsel %vm11107_vm7, %v9435_v27, %v1252_v26  ;;  %v11857_v39 = vld [vmem:[#allocation2 + $0x30] sm:$0xe] }
  0xe1   : > { %v3308_v7 = vshll.u32 %v11764_v54, 16  ;;  %v3312_v58 = vshrl.u32 %v11764_v54, 16  ;;  %v3304_v21 = vrot.slane %v3302_v41, 5  ;;  %v9622_v27 = vcombine.low %v11762_v33, %v11764_v54  ;;  %v3022_v54 = vld [vmem:[#allocation2 + $0xa8] sm:$0xf]  ;;  %15377 = vst [vmem:[#allocation35_spill] sm:$0xff] %v11857_v39 }
  0xe2   : > { %v4952_v56 = vsel %vm11181_vm13, %v4950_v3, %v4951_v35  ;;  %v3301_v60 = vrot.slane %v3299_v5, 4  ;;  %v9589_v35 = vcombine.low %v2947_v47, %v2950_v48  ;;  %v4324_v5 = vrot.slane %v4223_v36, 5 }
  0xe3   : > { %v9708_v55 = vcombine.low %v4949_v61, %v4952_v56  ;;  %v11778_v0 = vrot.slane %v3308_v7, 5  ;;  %v3314_v56 = vrot.slane %v3312_v58, 4  ;;  %v11780_v61 = vld [vmem:[#allocation2 + $0x24] sm:$0xe]  ;;  %v4327_v41 = vrot.slane %v4224_v4, 5 }
  0xe4   : > { %1696 = vrot.lane.b32.xlu0 %v9498_v12, %s10863_s23  ;;  %v1256_v12 = vsel %vm11107_vm7, %v1254_v52, %v1255_v23  ;;  %15367 = vst [vmem:[#allocation29_spill] sm:$0xff] %v11780_v61  ;;  %v3305_v26 = vor.u32 %v3304_v21, %v3301_v60  ;;  %v9644_v52 = vrot.slane %v11780_v61, 9  ;;  %v10651_v23 = vld [vmem:[#allocation7 + $0x1f8] sm:$0xff]   ;;  %v4326_v60 = vrot.slane %v4324_v5, 4  ;;  %v11848_v61 = vld [vmem:[#allocation2 + $0x20] sm:$0x1] }
  0xe5   : > { %5229 = vrot.lane.b32.xlu1 %v9708_v55, %s10863_s23  ;;  %v9499_v3 = vcombine.low %v1253_v8, %v1256_v12  ;;  %15366 = vst [vmem:[#allocation28_spill] sm:$0xff] %v11778_v0  ;;  %v3315_v48 = vor.u32 %v3314_v56, %v11778_v0  ;;  %v2808_v8 = vld [vmem:[#allocation2 + $0x84] sm:$0xc]  ;;  %v2809_v7 = vld [vmem:[#allocation2 + $0x88] sm:$0xf]  ;;  %10255 = vmatprep.subr.bf16.mxu1 %v10651_v23  ;;  %v777_v4 = vshll.u32 %v11750_v9, 16 }
  0xe6   : > { %v4325_v21 = vsel %vm11107_vm7, %v9644_v52, %v4324_v5  ;;  %v9558_v33 = vrot.slane %v2808_v8, 10  ;;  %v11792_v36 = vrot.slane %v3305_v26, 4  ;;  %v716_v12 = vld [vmem:[#allocation2 + $0xc] sm:$0xf]  ;;  %vm764_vm15 = vsmask.f32 3328 }
  0xe7   : > { %v1893_v47 = vsel %vm1826_vm14, %v9499_v3, %v1795_v53  ;;  %v2953_v53 = vrot.slane %v2809_v7, 6  ;;  %v4328_v3 = vsel %vm11107_vm7, %v4326_v60, %v4327_v41  ;;  %vm765_vm1 = vsmask.f32 7440 }
  0xe8   : > { %3694 = vrot.lane.b32.xlu0 %v9621_v42, %s10863_s23  ;;  %2115 = vmatprep.mubr.bf16.mxu0 %v1893_v47  ;;  %v2810_v42 = vld [vmem:[#allocation2 + $0x8c] sm:$0x3]  ;;  %15368 = vst [vmem:[#allocation30_spill] sm:$0xff] %v11792_v36  ;;  %v768_v56 = vshrl.u32 %v716_v12, 16  ;;  %v11798_v52 = vcombine.low %v4325_v21, %v4328_v3  ;;  %v771_v23 = vshll.u32 %v716_v12, 16  ;;  %vm11802_vm3 = vmor %vm764_vm15, %vm765_vm1  ;;  %v779_v7 = vrot.slane %v777_v4, 5 }
  0xe9   : > { %v2956_v58 = vrot.slane %v2810_v42, 6  ;;  %v2954_v5 = vsel %vm11181_vm13, %v9558_v33, %v2953_v53  ;;  %v2955_v26 = vrot.slane %v2953_v53, 4  ;;  %v15373_v41 = vshll.u32 %v11752_v51, 16  ;;  %v11823_v4 = vld [vmem:[#allocation2 + $0x34] sm:$0xf] }
  0xea   : > { %15369 = vst [vmem:[#allocation31_spill] sm:$0xff] %v11798_v52  ;;  %v770_v8 = vrot.slane %v768_v56, 4  ;;  %5101 = vrot.lane.b32.xlu1 %v11798_v52, %s10863_s23  ;;  %v773_v33 = vrot.slane %v771_v23, 5  ;;  %v11825_v3 = vld [vmem:[#allocation2 + $0x38] sm:$0x3]  ;;  %v4331_v55 = vrot.slane %v11823_v4, 5 }
  0xeb   : > { %v789_v60 = vrot.slane %v15373_v41, 5  ;;  %v2957_v21 = vsel %vm11181_vm13, %v2955_v26, %v2956_v58  ;;  %15374 = vst [vmem:[#allocation32_spill] sm:$0xff] %v11825_v3  ;;  %v11835_v26 = vrot.slane %v3315_v48, 4  ;;  %v3023_v53 = vld [vmem:[#allocation2 + $0xac] sm:$0xf]  ;;  %v3323_v52 = vshrl.u32 %v3022_v54, 16 }
  0xec   : > { %3534 = vrot.lane.b32.xlu0 %v9589_v35, %s10863_s23  ;;  %v15372_v35 = vshrl.u32 %v11750_v9, 16  ;;  %v9590_v51 = vcombine.low %v2954_v5, %v2957_v21  ;;  %v774_v23 = vor.u32 %v773_v33, %v770_v8  ;;  %v4893_v5 = vld [vmem:[#allocation2 + $0x30] sm:$0xc]  ;;  %v4958_v21 = vrot.slane %v11825_v3, 6  ;;  %v10629_v8 = vld [vmem:[#allocation7 + $0x138] sm:$0xff]  }
  0xed   : > { %15375 = vst [vmem:[#allocation33_spill] sm:$0xff] %v11835_v26  ;;  %v9661_v41 = vrot.slane %v4893_v5, 10  ;;  %v3326_v56 = vshll.u32 %v3022_v54, 16  ;;  %v3336_v5 = vshrl.u32 %v3023_v53, 16  ;;  %v3325_v26 = vrot.slane %v3323_v52, 4 }
  0xee   : > { %v783_v42 = vrot.slane %v15372_v35, 4  ;;  %v4955_v35 = vrot.slane %v11823_v4, 6  ;;  %v775_v58 = vrot.slane %v774_v23, 4  ;;  %v1667_v4 = vpop.permute.xlu0 %1666  ;;  %v9623_v49 = vcombine.low %v3022_v54, %v3023_v53 }
  0xef   : > { %v3328_v36 = vrot.slane %v3326_v56, 5  ;;  %v9645_v56 = vrot.slane %v11857_v39, 9  ;;  %vm2324_vm4 = vsmask.f32 2304  ;;  %vm2325_vm5 = vsmask.f32 6416 }
  0xf0   : > { %3696 = vrot.lane.b32.xlu0 %v9622_v27, %s10863_s23  ;;  %v784_v12 = vor.u32 %v783_v42, %v779_v7  ;;  %v4957_v9 = vrot.slane %v4955_v35, 4  ;;  %v4956_v33 = vsel %vm11181_vm13, %v9661_v41, %v4955_v35  ;;  %v11846_v27 = vld [vmem:[#allocation2 + $0x1c] sm:$0xf]  ;;  %v780_v23 = vsel %vm11802_vm3, %v775_v58, %v779_v7  ;;  %v4227_v58 = vld [vmem:[#allocation2 + $0x38] sm:$0x1]  ;;  %vm12034_vm6 = vmor %vm2324_vm4, %vm2325_vm5 }
  0xf1   : > { %v3338_v41 = vrot.slane %v3336_v5, 4  ;;  %v3329_v15 = vor.u32 %v3328_v36, %v3325_v26  ;;  %v1259_v16 = vrot.slane %v11846_v27, 5  ;;  %v2812_v26 = vld [vmem:[#allocation2 + $0x94] sm:$0xf]  ;;  %v4334_v5 = vrot.slane %v4227_v58, 5 }
  0xf2   : > { %v785_v42 = vrot.slane %v784_v12, 4  ;;  %v3332_v12 = vshll.u32 %v3023_v53, 16 }
  0xf3   : > { %v1261_v53 = vrot.slane %v1259_v16, 4 }
  0xf4   : > { %3536 = vrot.lane.b32.xlu0 %v9590_v51, %s10863_s23  ;;  %v790_v48 = vsel %vm11802_vm3, %v785_v42, %v789_v60  ;;  %v4959_v51 = vsel %vm11181_vm13, %v4957_v9, %v4958_v21  ;;  %v1184_v60 = vld [vmem:[#allocation2 + $0x18] sm:$0xe]  ;;  %v10639_v42 = vld [vmem:[#allocation7 + $0x170] sm:$0xff]   ;;  %v11854_v35 = vrot.slane %v3332_v12, 5  ;;  %v1262_v9 = vrot.slane %v11848_v61, 5 }
  0xf5   : > { %v9467_v0 = vcombine.low %v780_v23, %v790_v48  ;;  %v9709_v14 = vcombine.low %v4956_v33, %v4959_v51  ;;  %v9436_v40 = vrot.slane %v1184_v60, 9  ;;  %v2811_v21 = vld [vmem:[#allocation2 + $0x90] sm:$0xc]  ;;  %v11868_v48 = vrot.slane %v3329_v15, 4  ;;  %v10641_v23 = vld [vmem:[#allocation7 + $0x130] sm:$0xff]  }
  0xf6   : > { %15376 = vst [vmem:[#allocation34_spill] sm:$0xff] %v11854_v35  ;;  %v3339_v52 = vor.u32 %v3338_v41, %v11854_v35  ;;  %v4332_v12 = vsel %vm11107_vm7, %v9645_v56, %v4331_v55  ;;  %v2960_v51 = vrot.slane %v2812_v26, 6  ;;  %v719_v60 = vld [vmem:[#allocation2 + $0x18] sm:$0xf] }
  0xf7   : > { %v1829_v7 = vsel %vm1826_vm14, %v9467_v0, %v1667_v4  ;;  %5231 = vrot.lane.b32.xlu1 %v9709_v14, %s10863_s23  ;;  %v1260_v36 = vsel %vm11107_vm7, %v9436_v40, %v1259_v16  ;;  %v4333_v0 = vrot.slane %v4331_v55, 4  ;;  %v1797_v14 = vpop.permute.xlu1 %1796  ;;  %15378 = vst [vmem:[#allocation36_spill] sm:$0xff] %v11868_v48  ;;  %v2813_v4 = vld [vmem:[#allocation2 + $0x98] sm:$0x3]  ;;  %v9559_v16 = vrot.slane %v2811_v21, 10 }
  0xf8   : > { %2116 = vmatmul.mubr.bf16.vlgmr.msra.gmra.mxu0 %v1829_v7  ;;  %3698 = vrot.lane.b32.xlu0 %v9623_v49, %s10863_s23  ;;  %v11870_v33 = vrot.slane %v3339_v52, 4  ;;  %v1263_v49 = vsel %vm11107_vm7, %v1261_v53, %v1262_v9  ;;  %v2963_v7 = vrot.slane %v2813_v4, 6  ;;  %v792_v52 = vshrl.u32 %v719_v60, 16  ;;  %v10648_v55 = vld [vmem:[#allocation7 + $0x128] sm:$0xff]  }
  0xf9   : > { %10144 = vmatpush3.bf16.msra.mxu0 %v10629_v8  ;;  %v10647_v8 = vld [vmem:[#allocation7 + $0x168] sm:$0xff]   ;;  %v9500_v15 = vcombine.low %v1260_v36, %v1263_v49  ;;  %v4335_v41 = vsel %vm11107_vm7, %v4333_v0, %v4334_v5  ;;  %v2961_v56 = vsel %vm11181_vm13, %v9559_v16, %v2960_v51  ;;  %v2962_v9 = vrot.slane %v2960_v51, 4  ;;  %v11886_v49 = vld [vmem:[#allocation2 + $0x40] sm:$0xf]  ;;  %v10650_v0 = vld [vmem:[#allocation7 + $0x160] sm:$0xff]  }
  0xfa   : > { %15379 = vst [vmem:[#allocation37_spill] sm:$0xff] %v11870_v33  ;;  %10145 = vmatprep.subr.bf16.mxu0 %v10639_v42  ;;  %v11879_v58 = vcombine.low %v4332_v12, %v4335_v41  ;;  %v795_v53 = vshll.u32 %v719_v60, 16  ;;  %v794_v26 = vrot.slane %v792_v52, 4  ;;  %v801_v42 = vshll.u32 %v11846_v27, 16  ;;  %v4894_v16 = vld [vmem:[#allocation2 + $0x3c] sm:$0xc] }
  0xfb   : > { %v1897_v21 = vsel %vm1826_vm14, %v9500_v15, %v1797_v14  ;;  %v805_v36 = vshrl.u32 %v11846_v27, 16  ;;  %v2964_v12 = vsel %vm11181_vm13, %v2962_v9, %v2963_v7  ;;  %v811_v4 = vshll.u32 %v11848_v61, 16  ;;  %v11893_v14 = vld [vmem:[#allocation2 + $0x44] sm:$0x3]  ;;  %v3026_v61 = vld [vmem:[#allocation2 + $0xb8] sm:$0xf] }
  0xfc   : > { %15380 = vst [vmem:[#allocation38_spill] sm:$0xff] %v11879_v58  ;;  %2123 = vmatprep.mubr.bf16.mxu0 %v1897_v21  ;;  %5103 = vrot.lane.b32.xlu1 %v11879_v58, %s10863_s23  ;;  %v797_v5 = vrot.slane %v795_v53, 5  ;;  %15381 = vst [vmem:[#allocation39_spill] sm:$0xff] %v11893_v14  ;;  %v9591_v60 = vcombine.low %v2961_v56, %v2964_v12  ;;  %v803_v15 = vrot.slane %v801_v42, 5  ;;  %v9662_v9 = vrot.slane %v4894_v16, 10  ;;  %v10654_v58 = vld [vmem:[#allocation7 + $0x120] sm:$0xff]  }
  0xfd   : > { %10146 = vmatpush3.bf16.msra.mxu0 %v10641_v23  ;;  %v1669_v23 = vpop.permute.xlu1 %1668  ;;  %v807_v41 = vrot.slane %v805_v36, 4  ;;  %v813_v7 = vrot.slane %v811_v4, 5  ;;  %v3025_v53 = vld [vmem:[#allocation2 + $0xb4] sm:$0xf]  ;;  %v4962_v54 = vrot.slane %v11886_v49, 6  ;;  %v4965_v40 = vrot.slane %v11893_v14, 6 }
  0xfe   : > { %10147 = vmatprep.subr.bf16.mxu0 %v10647_v8  ;;  %v798_v52 = vor.u32 %v797_v5, %v794_v26  ;;  %3538 = vrot.lane.b32.xlu0 %v9591_v60, %s10863_s23  ;;  %v3347_v27 = vshrl.u32 %v3025_v53, 16  ;;  %v3350_v56 = vshll.u32 %v3025_v53, 16  ;;  %v3356_v42 = vshll.u32 %v3026_v61, 16  ;;  %v11905_v4 = vld [vmem:[#allocation2 + $0x28] sm:$0xf] }
  0xff   : > { %v808_v21 = vor.u32 %v807_v41, %v803_v15  ;;  %v3360_v36 = vshrl.u32 %v3026_v61, 16  ;;  %v4963_v26 = vsel %vm11181_vm13, %v9662_v9, %v4962_v54  ;;  %v4964_v12 = vrot.slane %v4962_v54, 4  ;;  %v1185_v9 = vld [vmem:[#allocation2 + $0x24] sm:$0xe]  ;;  %v11924_v33 = vld [vmem:[#allocation2 + $0x3c] sm:$0xe] }
 0x100   : > { %v799_v51 = vrot.slane %v798_v52, 4  ;;  %v3349_v5 = vrot.slane %v3347_v27, 4  ;;  %v3352_v60 = vrot.slane %v3350_v56, 5  ;;  %v11909_v41 = vrot.slane %v3356_v42, 5  ;;  %v11913_v52 = vld [vmem:[#allocation2 + $0x2c] sm:$0x1] }
 0x101   : > { %10148 = vmatpush3.bf16.msra.mxu0 %v10648_v55  ;;  %v809_v8 = vrot.slane %v808_v21, 4  ;;  %v11911_v55 = vrot.slane %v3360_v36, 4  ;;  %v11915_v3 = vpop.permute.xlu1 %1670  ;;  %v4966_v54 = vsel %vm11181_vm13, %v4964_v12, %v4965_v40  ;;  %v9624_v27 = vcombine.low %v3025_v53, %v3026_v61  ;;  %15383 = vst [vmem:[#allocation41_spill] sm:$0xff] %v11924_v33  ;;  %v4233_v14 = vld [vmem:[#allocation2 + $0x50] sm:$0x1] }
 0x102   : > { %10149 = vmatprep.subr.bf16.mxu0 %v10650_v0  ;;  %v804_v16 = vsel %vm11802_vm3, %v799_v51, %v803_v15  ;;  %15382 = vst [vmem:[#allocation40_spill] sm:$0xff] %v11909_v41  ;;  %v1266_v21 = vrot.slane %v11905_v4, 5  ;;  %v9710_v15 = vcombine.low %v4963_v26, %v4966_v54  ;;  %v3353_v56 = vor.u32 %v3352_v60, %v3349_v5 }
 0x103   : > { %v814_v0 = vsel %vm11802_vm3, %v809_v8, %v813_v7  ;;  %3700 = vrot.lane.b32.xlu0 %v9624_v27, %s10863_s23  ;;  %v9437_v42 = vrot.slane %v1185_v9, 9  ;;  %v1269_v39 = vrot.slane %v11913_v52, 5  ;;  %v4338_v7 = vrot.slane %v11886_v49, 5  ;;  %v2816_v9 = vld [vmem:[#allocation2 + $0xa4] sm:$0x3] }
 0x104   : > { %v9468_v51 = vcombine.low %v804_v16, %v814_v0  ;;  %v1268_v36 = vrot.slane %v1266_v21, 4  ;;  %5233 = vrot.lane.b32.xlu1 %v9710_v15, %s10863_s23  ;;  %v9646_v8 = vrot.slane %v11924_v33, 9  ;;  %v2814_v16 = vld [vmem:[#allocation2 + $0x9c] sm:$0xc]  ;;  %v11936_v60 = vrot.slane %v3353_v56, 4  ;;  %v10656_v56 = vld [vmem:[#allocation7 + $0x158] sm:$0xff]  }
 0x105   : > { %10150 = vmatpush3.bf16.msra.mxu0 %v10654_v58  ;;  %v4230_v58 = vld [vmem:[#allocation2 + $0x44] sm:$0x1]  ;;  %v1267_v26 = vsel %vm11107_vm7, %v9437_v42, %v1266_v21  ;;  %v4340_v5 = vrot.slane %v4338_v7, 4  ;;  %v3363_v0 = vor.u32 %v11911_v55, %v11909_v41  ;;  %v11942_v15 = vpop.permute.xlu1 %1672  ;;  %v1799_v21 = vpop.permute.xlu0 %1798  ;;  %v9560_v42 = vrot.slane %v2814_v16, 10  ;;  %v10653_v41 = vld [vmem:[#allocation7 + $0x1b8] sm:$0xff]  }
 0x106   : > { %v1833_v40 = vsel %vm1826_vm14, %v9468_v51, %v1669_v23  ;;  %v1270_v12 = vsel %vm11107_vm7, %v1268_v36, %v1269_v39  ;;  %v4341_v49 = vrot.slane %v4230_v58, 5  ;;  %v2815_v23 = vld [vmem:[#allocation2 + $0xa0] sm:$0xf]  ;;  %15384 = vst [vmem:[#allocation42_spill] sm:$0xff] %v11936_v60  ;;  %v4339_v27 = vsel %vm11107_vm7, %v9646_v8, %v4338_v7  ;;  %v722_v51 = vld [vmem:[#allocation2 + $0x24] sm:$0xf]  ;;  %10151 = vmatprep.subr.bf16.mxu0 %v10656_v56 }
 0x107   : > { %2124 = vmatmul.mubr.bf16.gmra.mxu0 %v1833_v40  ;;  %v9501_v54 = vcombine.low %v1267_v26, %v1270_v12  ;;  %v2967_v36 = vrot.slane %v2815_v23, 6  ;;  %v2970_v40 = vrot.slane %v2816_v9, 6  ;;  %v816_v55 = vshrl.u32 %v722_v51, 16 }
 0x108   : > { %v4342_v39 = vsel %vm11107_vm7, %v4340_v5, %v4341_v49  ;;  %v819_v26 = vshll.u32 %v722_v51, 16  ;;  %v825_v12 = vshll.u32 %v11905_v4, 16  ;;  %v829_v53 = vshrl.u32 %v11905_v4, 16  ;;  %v4232_v4 = vld [vmem:[#allocation2 + $0x4c] sm:$0xf] }
 0x109   : > { %v1901_v58 = vsel %vm1826_vm14, %v9501_v54, %v1799_v21  ;;  %v11947_v61 = vcombine.low %v4339_v27, %v4342_v39  ;;  %v2968_v7 = vsel %vm11181_vm13, %v9560_v42, %v2967_v36  ;;  %v2969_v8 = vrot.slane %v2967_v36, 4  ;;  %v11964_v42 = vld [vmem:[#allocation2 + $0x50] sm:$0x3]  ;;  %v11966_v56 = vpop.permute.xlu1 %1674 }
 0x10a   : > { %2131 = vmatprep.mubr.bf16.mxu0 %v1901_v58  ;;  %v818_v5 = vrot.slane %v816_v55, 4  ;;  %v821_v49 = vrot.slane %v819_v26, 5  ;;  %v835_v16 = vshll.u32 %v11913_v52, 16  ;;  %v827_v27 = vrot.slane %v825_v12, 5  ;;  %15387 = vst [vmem:[#allocation45_spill] sm:$0xff] %v11964_v42 }
 0x10b   : > { %15385 = vst [vmem:[#allocation43_spill] sm:$0xff] %v11947_v61  ;;  %5105 = vrot.lane.b32.xlu1 %v11947_v61, %s10863_s23  ;;  %v2971_v54 = vsel %vm11181_vm13, %v2969_v8, %v2970_v40  ;;  %v831_v9 = vrot.slane %v829_v53, 4  ;;  %v11962_v51 = vrot.slane %v3363_v0, 4  ;;  %v4895_v52 = vld [vmem:[#allocation2 + $0x48] sm:$0xc]  ;;  %v4969_v36 = vrot.slane %v4232_v4, 6 }
 0x10c   : > { %v9592_v21 = vcombine.low %v2968_v7, %v2971_v54  ;;  %v822_v39 = vor.u32 %v821_v49, %v818_v5  ;;  %v837_v26 = vrot.slane %v835_v16, 5  ;;  %v9663_v23 = vrot.slane %v4895_v52, 10  ;;  %v499_v40 = vld [vmem:[%s11057_s12 + $0x70] sm:$0xf]  ;;  %v500_v7 = vld [vmem:[%s11057_s12 + $0x74] sm:$0xf] }
 0x10d   : > { %15386 = vst [vmem:[#allocation44_spill] sm:$0xff] %v11962_v51  ;;  %v832_v55 = vor.u32 %v831_v9, %v827_v27  ;;  %v4971_v0 = vrot.slane %v4969_v36, 4  ;;  %v4972_v8 = vrot.slane %v11964_v42, 6  ;;  %v608_v12 = vrot.slane %v499_v40, 7  ;;  %v11990_v61 = vld [vmem:[#allocation2 + $0x48] sm:$0xe] }
 0x10e   : > { %3540 = vrot.lane.b32.xlu0 %v9592_v21, %s10863_s23  ;;  %v823_v53 = vrot.slane %v822_v39, 4  ;;  %v4970_v49 = vsel %vm11181_vm13, %v9663_v23, %v4969_v36  ;;  %v610_v54 = vrot.slane %v500_v7, 7  ;;  %v11980_v21 = vld [vmem:[#allocation2 + $0x34] sm:$0xf]  ;;  %v11982_v39 = vld [vmem:[#allocation2 + $0x38] sm:$0x1] }
 0x10f   : > { %v833_v5 = vrot.slane %v832_v55, 4  ;;  %v4973_v16 = vsel %vm11181_vm13, %v4971_v0, %v4972_v8  ;;  %v609_v9 = vrot.slane %v608_v12, 4  ;;  %709 = vst.msk [vmem:[#allocation2 + $0xc0] sm:$0xe] %vm666_vm9, %v608_v12  ;;  %v4345_v52 = vrot.slane %v4232_v4, 5  ;;  %15388 = vst [vmem:[#allocation46_spill] sm:$0xff] %v11990_v61  ;;  %v11992_v4 = vpop.permute.xlu1 %1676 }
 0x110   : > { %v828_v58 = vsel %vm11802_vm3, %v823_v53, %v827_v27  ;;  %v9711_v40 = vcombine.low %v4970_v49, %v4973_v16  ;;  %v612_v23 = vrot.slane %v610_v54, 4  ;;  %v1186_v36 = vld [vmem:[#allocation2 + $0x30] sm:$0xe]  ;;  %v1273_v7 = vrot.slane %v11980_v21, 5  ;;  %v2988_v27 = vld [vmem:[#allocation2 + $0x20] sm:$0x1] }
 0x111   : > { %v838_v55 = vsel %vm11802_vm3, %v833_v5, %v837_v26  ;;  %v611_v0 = vsel %vm11124_vm10, %v609_v9, %v610_v54  ;;  %v9438_v8 = vrot.slane %v1186_v36, 9  ;;  %v1276_v12 = vrot.slane %v11982_v39, 5  ;;  %v2276_v36 = vld [vmem:[#allocation2 + $0xc] sm:$0xe] }
 0x112   : > { %v9469_v53 = vcombine.low %v828_v58, %v838_v55  ;;  %5235 = vrot.lane.b32.xlu1 %v9711_v40, %s10863_s23  ;;  %710 = vst.msk [vmem:[#allocation2 + $0xc4] sm:$0xf] %vm421_vm0, %v611_v0  ;;  %v1275_v26 = vrot.slane %v1273_v7, 4  ;;  %v3054_v5 = vshll.u32 %v2988_v27, 16  ;;  %v9647_v58 = vrot.slane %v11990_v61, 9  ;;  %v10660_v42 = vld [vmem:[#allocation7 + $0x118] sm:$0xff]  }
 0x113   : > { %711 = vst.msk [vmem:[#allocation2 + $0xc8] sm:$0x1] %vm437_vm2, %v612_v23  ;;  %v4347_v49 = vrot.slane %v4345_v52, 4  ;;  %v1274_v9 = vsel %vm11107_vm7, %v9438_v8, %v1273_v7  ;;  %v4348_v55 = vrot.slane %v4233_v14, 5  ;;  %v2277_v14 = vld [vmem:[#allocation2 + $0x10] sm:$0xf]  ;;  %10152 = vmatpush3.bf16.msra.mxu0 %v10660_v42 }
 0x114   : > { %v1837_v16 = vsel %vm1826_vm14, %v9469_v53, %v11915_v3  ;;  %v1277_v23 = vsel %vm11107_vm7, %v1275_v26, %v1276_v12  ;;  %v3056_v27 = vrot.slane %v3054_v5, 5  ;;  %v4346_v0 = vsel %vm11107_vm7, %v9647_v58, %v4345_v52  ;;  %v1801_v53 = vpop.permute.xlu0 %1800  ;;  %v2278_v26 = vld [vmem:[#allocation2 + $0x14] sm:$0x3] }
 0x115   : > { %2132 = vmatmul.mubr.bf16.gmra.mxu0 %v1837_v16  ;;  %v9502_v33 = vcombine.low %v1274_v9, %v1277_v23  ;;  %v4349_v3 = vsel %vm11107_vm7, %v4347_v49, %v4348_v55  ;;  %v2328_v5 = vshrl.u32 %v2276_v36, 16  ;;  %v2331_v52 = vshll.u32 %v2276_v36, 16  ;;  %v3675_v23 = vpop.permute.xlu1 %3674  ;;  %v2817_v36 = vld [vmem:[#allocation2 + $0xa8] sm:$0xc] }
 0x116   : > { %v3028_v8 = vld [vmem:[#allocation2 + $0xc0] sm:$0xf]  ;;  %v3057_v16 = vsel %vm11802_vm3, %v11716_v34, %v3056_v27  ;;  %v12015_v12 = vcombine.low %v4346_v0, %v4349_v3  ;;  %v15390_v49 = vsel %vm11802_vm3, %v11692_v57, %v11257_v50  ;;  %v2337_v0 = vshrl.u32 %v2277_v14, 16  ;;  %v2819_v57 = vld [vmem:[#allocation2 + $0xb0] sm:$0x3] }
 0x117   : > { %v3371_v58 = vshrl.u32 %v3028_v8, 16  ;;  %v3374_v54 = vshll.u32 %v3028_v8, 16  ;;  %v1905_v9 = vsel %vm1826_vm14, %v9502_v33, %v1801_v53  ;;  %v9595_v55 = vcombine.low %v15390_v49, %v3057_v16  ;;  %v2818_v53 = vld [vmem:[#allocation2 + $0xac] sm:$0xf] }
 0x118   : > { %15389 = vst [vmem:[#allocation47_spill] sm:$0xff] %v12015_v12  ;;  %2139 = vmatprep.mubr.bf16.mxu0 %v1905_v9  ;;  %5107 = vrot.lane.b32.xlu1 %v12015_v12, %s10863_s23  ;;  %v2330_v34 = vrot.slane %v2328_v5, 5  ;;  %v2333_v27 = vrot.slane %v2331_v52, 6  ;;  %v2340_v3 = vshll.u32 %v2277_v14, 16  ;;  %v2347_v33 = vshrl.u32 %v2278_v26, 16 }
 0x119   : > { %v3029_v40 = vld [vmem:[#allocation2 + $0xc4] sm:$0xf]  ;;  %v3772_v7 = vsel %vm1826_vm14, %v9595_v55, %v3675_v23  ;;  %v12026_v16 = vrot.slane %v3371_v58, 4  ;;  %v12028_v9 = vrot.slane %v3374_v54, 5  ;;  %v2339_v5 = vrot.slane %v2337_v0, 5 }
 0x11a   : > { %v9625_v51 = vcombine.low %v3028_v8, %v3029_v40  ;;  %3994 = vmatprep.mubr.bf16.mxu1 %v3772_v7  ;;  %v2334_v50 = vor.u32 %v2333_v27, %v2330_v34  ;;  %v2342_v52 = vrot.slane %v2340_v3, 6  ;;  %v725_v14 = vld [vmem:[#allocation2 + $0x30] sm:$0xf]  ;;  %v2349_v23 = vrot.slane %v2347_v33, 5 }
 0x11b   : > { %v2350_v8 = vshll.u32 %v2278_v26, 16  ;;  %v3380_v7 = vshll.u32 %v3029_v40, 16  ;;  %v9561_v58 = vrot.slane %v2817_v36, 10  ;;  %v2974_v27 = vrot.slane %v2818_v53, 6  ;;  %v12044_v53 = vld [vmem:[#allocation2 + $0x58] sm:$0xf] }
 0x11c   : > { %3702 = vrot.lane.b32.xlu0 %v9625_v51, %s10863_s23  ;;  %v2335_v55 = vrot.slane %v2334_v50, 4  ;;  %v2343_v54 = vor.u32 %v2342_v52, %v2339_v5  ;;  %v3384_v0 = vshrl.u32 %v3029_v40, 16  ;;  %v2977_v42 = vrot.slane %v2819_v57, 6 }
 0x11d   : > { %v2352_v3 = vrot.slane %v2350_v8, 6  ;;  %v840_v12 = vshrl.u32 %v725_v14, 16  ;;  %v2975_v26 = vsel %vm11181_vm13, %v9561_v58, %v2974_v27  ;;  %v2976_v33 = vrot.slane %v2974_v27, 4  ;;  %v4896_v58 = vld [vmem:[#allocation2 + $0x54] sm:$0xc] }
 0x11e   : > { %v2345_v50 = vrot.slane %v2343_v54, 4  ;;  %v2344_v49 = vsel %vm12034_vm6, %v2335_v55, %v2343_v54  ;;  %v843_v36 = vshll.u32 %v725_v14, 16  ;;  %v849_v57 = vshll.u32 %v11980_v21, 16  ;;  %v3515_v55 = vpop.permute.xlu1 %3514  ;;  %v12055_v54 = vld [vmem:[#allocation2 + $0x5c] sm:$0x3] }
 0x11f   : > { %v2353_v61 = vor.u32 %v2352_v3, %v2349_v23  ;;  %v842_v5 = vrot.slane %v840_v12, 4  ;;  %v2978_v40 = vsel %vm11181_vm13, %v2976_v33, %v2977_v42  ;;  %v853_v52 = vshrl.u32 %v11980_v21, 16  ;;  %v501_v3 = vld [vmem:[%s11057_s12 + $0x78] sm:$0xf]  ;;  %v502_v21 = vld [vmem:[%s11057_s12 + $0x7c] sm:$0xf] }
 0x120   : > { %v859_v8 = vshll.u32 %v11982_v39, 16  ;;  %v12051_v27 = vrot.slane %v3380_v7, 5  ;;  %v9593_v14 = vcombine.low %v2975_v26, %v2978_v40  ;;  %v845_v23 = vrot.slane %v843_v36, 5  ;;  %v10657_v26 = vld [vmem:[#allocation7 + $0x1f0] sm:$0xff]   ;;  %s15899_s12 = sld [smem:[#allocation193_spill]] }
 0x121   : > { %v2354_v12 = vsel %vm12034_vm6, %v2345_v50, %v2353_v61  ;;  %v12058_v42 = vrot.slane %v3384_v0, 4  ;;  %v851_v51 = vrot.slane %v849_v57, 5  ;;  %v855_v60 = vrot.slane %v853_v52, 4  ;;  %v12063_v61 = vld [vmem:[#allocation2 + $0x40] sm:$0xf] }
 0x122   : > { %v9563_v33 = vcombine.low %v2344_v49, %v2354_v12  ;;  %3542 = vrot.lane.b32.xlu0 %v9593_v14, %s10863_s23  ;;  %v846_v39 = vor.u32 %v845_v23, %v842_v5  ;;  %v861_v7 = vrot.slane %v859_v8, 5  ;;  %v9664_v48 = vrot.slane %v4896_v58, 10  ;;  %v1187_v50 = vld [vmem:[#allocation2 + $0x3c] sm:$0xe]  ;;  %v12067_v57 = vld [vmem:[#allocation2 + $0x44] sm:$0x1] }
 0x123   : > { %v4976_v35 = vrot.slane %v12044_v53, 6  ;;  %v856_v0 = vor.u32 %v855_v60, %v851_v51  ;;  %v4979_v49 = vrot.slane %v12055_v54, 6  ;;  %v613_v40 = vrot.slane %v501_v3, 7  ;;  %v2991_v52 = vld [vmem:[#allocation2 + $0x2c] sm:$0x1]  ;;  %v10659_v23 = vld [vmem:[#allocation7 + $0x1b0] sm:$0xff]  }
 0x124   : > { %v3708_v36 = vsel %vm1826_vm14, %v9563_v33, %v3515_v55  ;;  %v847_v12 = vrot.slane %v846_v39, 4  ;;  %v615_v58 = vrot.slane %v502_v21, 7  ;;  %v12071_v14 = vld [vmem:[#allocation2 + $0x54] sm:$0xe]  ;;  %v9439_v60 = vrot.slane %v1187_v50, 9 }
 0x125   : > { %3995 = vmatmul.mubr.bf16.vlgmr.msra.gmra.mxu1 %v3708_v36  ;;  %v4977_v5 = vsel %vm11181_vm13, %v9664_v48, %v4976_v35  ;;  %v4978_v8 = vrot.slane %v4976_v35, 4  ;;  %v857_v18 = vrot.slane %v856_v0, 4  ;;  %v614_v25 = vrot.slane %v613_v40, 4  ;;  %712 = vst.msk [vmem:[#allocation2 + $0xcc] sm:$0xe] %vm666_vm9, %v613_v40 }
 0x126   : > { %v1280_v55 = vrot.slane %v12063_v61, 5  ;;  %10256 = vmatpush3.bf16.msra.mxu1 %v10653_v41  ;;  %v852_v3 = vsel %vm11802_vm3, %v847_v12, %v851_v51  ;;  %v617_v48 = vrot.slane %v615_v58, 4  ;;  %v1283_v35 = vrot.slane %v12067_v57, 5  ;;  %v4236_v21 = vld [vmem:[#allocation2 + $0x5c] sm:$0x1] }
 0x127   : > { %v4980_v33 = vsel %vm11181_vm13, %v4978_v8, %v4979_v49  ;;  %10257 = vmatprep.subr.bf16.mxu1 %v10657_v26  ;;  %v862_v39 = vsel %vm11802_vm3, %v857_v18, %v861_v7  ;;  %v616_v50 = vsel %vm11124_vm10, %v614_v25, %v615_v58  ;;  %v2279_v0 = vld [vmem:[#allocation2 + $0x18] sm:$0xe]  ;;  %v3078_v40 = vshll.u32 %v2991_v52, 16 }
 0x128   : > { %v9712_v36 = vcombine.low %v4977_v5, %v4980_v33  ;;  %v1281_v41 = vsel %vm11107_vm7, %v9439_v60, %v1280_v55  ;;  %v9470_v51 = vcombine.low %v852_v3, %v862_v39  ;;  %713 = vst.msk [vmem:[#allocation2 + $0xd0] sm:$0xf] %vm421_vm0, %v616_v50  ;;  %v1282_v49 = vrot.slane %v1280_v55, 4  ;;  %v2280_v5 = vld [vmem:[#allocation2 + $0x1c] sm:$0xf]  ;;  %v1803_v3 = vpop.permute.xlu0 %1802 }
 0x129   : > { %714 = vst.msk [vmem:[#allocation2 + $0xd4] sm:$0x1] %vm437_vm2, %v617_v48  ;;  %v9648_v26 = vrot.slane %v12071_v14, 9  ;;  %v15393_v18 = vor.u32 %v12028_v9, %v12026_v16  ;;  %v3387_v22 = vor.u32 %v12058_v42, %v12051_v27  ;;  %v4352_v25 = vrot.slane %v12044_v53, 5 }
 0x12a   : > { %5237 = vrot.lane.b32.xlu1 %v9712_v36, %s10863_s23  ;;  %v4355_v12 = vrot.slane %v4236_v21, 5  ;;  %10258 = vmatpush3.bf16.msra.mxu1 %v10659_v23  ;;  %v1841_v52 = vsel %vm1826_vm14, %v9470_v51, %v11942_v15  ;;  %v1284_v8 = vsel %vm11107_vm7, %v1282_v49, %v1283_v35  ;;  %v3080_v58 = vrot.slane %v3078_v40, 5  ;;  %v10662_v21 = vld [vmem:[#allocation7 + $0x150] sm:$0xff]  }
 0x12b   : > { %v12092_v7 = vrot.slane %v15393_v18, 4  ;;  %v2356_v16 = vshrl.u32 %v2279_v0, 16  ;;  %2140 = vmatmul.mubr.bf16.gmra.mxu0 %v1841_v52  ;;  %v9503_v9 = vcombine.low %v1281_v41, %v1284_v8  ;;  %v4353_v42 = vsel %vm11107_vm7, %v9648_v26, %v4352_v25  ;;  %10153 = vmatprep.subr.bf16.mxu0 %v10662_v21  ;;  %v10663_v18 = vld [vmem:[#allocation7 + $0x1e8] sm:$0xff]   ;;  %v2820_v8 = vld [vmem:[#allocation2 + $0xb4] sm:$0xc] }
 0x12c   : > { %v4354_v60 = vrot.slane %v4352_v25, 4  ;;  %v2359_v55 = vshll.u32 %v2279_v0, 16  ;;  %v3031_v53 = vld [vmem:[#allocation2 + $0xcc] sm:$0xf]  ;;  %v3081_v23 = vsel %vm11802_vm3, %v11302_v20, %v3080_v58  ;;  %v2365_v15 = vshrl.u32 %v2280_v5, 16  ;;  %v3677_v0 = vpop.permute.xlu1 %3676  ;;  %10259 = vmatprep.subr.bf16.mxu1 %v10663_v18  ;;  %v10666_v58 = vld [vmem:[#allocation7 + $0x110] sm:$0xff]  }
 0x12d   : > { %v2358_v33 = vrot.slane %v2356_v16, 5  ;;  %v2368_v48 = vshll.u32 %v2280_v5, 16  ;;  %v3395_v35 = vshrl.u32 %v3031_v53, 16  ;;  %v3398_v39 = vshll.u32 %v3031_v53, 16  ;;  %v2281_v20 = vld [vmem:[#allocation2 + $0x20] sm:$0x3]  ;;  %10154 = vmatpush3.bf16.msra.mxu0 %v10666_v58 }
 0x12e   : > { %v1909_v36 = vsel %vm1826_vm14, %v9503_v9, %v1803_v3  ;;  %v15394_v50 = vsel %vm11802_vm3, %v11300_v19, %v11249_v32  ;;  %v4356_v51 = vsel %vm11107_vm7, %v4354_v60, %v4355_v12  ;;  %v2361_v49 = vrot.slane %v2359_v55, 6  ;;  %v2821_v60 = vld [vmem:[#allocation2 + $0xb8] sm:$0xf]  ;;  %v4897_v16 = vld [vmem:[#allocation2 + $0x60] sm:$0xc] }
 0x12f   : > { %v9596_v41 = vcombine.low %v15394_v50, %v3081_v23  ;;  %2147 = vmatprep.mubr.bf16.mxu0 %v1909_v36  ;;  %v2367_v40 = vrot.slane %v2365_v15, 5  ;;  %v2370_v26 = vrot.slane %v2368_v48, 6  ;;  %v12115_v25 = vrot.slane %v3387_v22, 4  ;;  %v12118_v52 = vld [vmem:[#allocation2 + $0xd0] sm:$0xf] }
 0x130   : > { %v12121_v19 = vcombine.low %v4353_v42, %v4356_v51  ;;  %v9626_v12 = vcombine.low %v3031_v53, %v12118_v52  ;;  %v2362_v9 = vor.u32 %v2361_v49, %v2358_v33  ;;  %v2375_v3 = vshrl.u32 %v2281_v20, 16  ;;  %v2822_v23 = vld [vmem:[#allocation2 + $0xbc] sm:$0x3]  ;;  %v12153_v22 = vld [vmem:[#allocation2 + $0x68] sm:$0x3] }
 0x131   : > { %v3776_v32 = vsel %vm1826_vm14, %v9596_v41, %v3677_v0  ;;  %v2371_v55 = vor.u32 %v2370_v26, %v2367_v40  ;;  %v2378_v42 = vshll.u32 %v2281_v20, 16  ;;  %v12129_v15 = vrot.slane %v3395_v35, 4  ;;  %v728_v33 = vld [vmem:[#allocation2 + $0x3c] sm:$0xf] }
 0x132   : > { %15395 = vst [vmem:[#allocation48_spill] sm:$0xff] %v12121_v19  ;;  %4002 = vmatprep.mubr.bf16.mxu1 %v3776_v32  ;;  %5109 = vrot.lane.b32.xlu1 %v12121_v19, %s10863_s23  ;;  %v12131_v48 = vrot.slane %v3398_v39, 5  ;;  %v2363_v53 = vrot.slane %v2362_v9, 4  ;;  %v9562_v21 = vrot.slane %v2820_v8, 10  ;;  %v3404_v36 = vshll.u32 %v12118_v52, 16  ;;  %v10665_v8 = vld [vmem:[#allocation7 + $0x1a8] sm:$0xff]  }
 0x133   : > { %3704 = vrot.lane.b32.xlu0 %v9626_v12, %s10863_s23  ;;  %v2373_v50 = vrot.slane %v2371_v55, 4  ;;  %v2377_v41 = vrot.slane %v2375_v3, 5  ;;  %v2380_v0 = vrot.slane %v2378_v42, 6  ;;  %v3408_v51 = vshrl.u32 %v12118_v52, 16  ;;  %v12139_v32 = vld [vmem:[#allocation2 + $0x34] sm:$0xf]  ;;  %v3517_v42 = vpop.permute.xlu1 %3516  ;;  %10260 = vmatpush3.bf16.msra.mxu1 %v10665_v8 }
 0x134   : > { %v2372_v20 = vsel %vm12034_vm6, %v2363_v53, %v2371_v55  ;;  %v2981_v49 = vrot.slane %v2821_v60, 6  ;;  %v2984_v35 = vrot.slane %v2822_v23, 6  ;;  %v864_v39 = vshrl.u32 %v728_v33, 16  ;;  %v6414_v55 = vld [vmem:[#allocation2 + $0x30] sm:$0xe] }
 0x135   : > { %v2381_v40 = vor.u32 %v2380_v0, %v2377_v41  ;;  %v867_v26 = vshll.u32 %v728_v33, 16  ;;  %v873_v18 = vshll.u32 %v12063_v61, 16  ;;  %v877_v3 = vshrl.u32 %v12063_v61, 16  ;;  %v6415_v60 = vld [vmem:[#allocation2 + $0x38] sm:$0x1] }
 0x136   : > { %v2982_v9 = vsel %vm11181_vm13, %v9562_v21, %v2981_v49  ;;  %v2983_v52 = vrot.slane %v2981_v49, 4  ;;  %v866_v53 = vrot.slane %v864_v39, 4  ;;  %v12148_v0 = vld [vmem:[#allocation2 + $0x64] sm:$0xf]  ;;  %v883_v61 = vshll.u32 %v12067_v57, 16 }
 0x137   : > { %v2382_v23 = vsel %vm12034_vm6, %v2373_v50, %v2381_v40  ;;  %v869_v33 = vrot.slane %v867_v26, 5  ;;  %v875_v41 = vrot.slane %v873_v18, 5  ;;  %v879_v49 = vrot.slane %v877_v3, 4  ;;  %v1188_v12 = vld [vmem:[#allocation2 + $0x48] sm:$0xe] }
 0x138   : > { %v9564_v5 = vcombine.low %v2372_v20, %v2382_v23  ;;  %v2985_v21 = vsel %vm11181_vm13, %v2983_v52, %v2984_v35  ;;  %v9755_v40 = vrot.slane %v6414_v55, 9  ;;  %v6496_v39 = vrot.slane %v12139_v32, 5  ;;  %v12162_v52 = vld [vmem:[#allocation2 + $0x50] sm:$0x1] }
 0x139   : > { %v9594_v19 = vcombine.low %v2982_v9, %v2985_v21  ;;  %v870_v50 = vor.u32 %v869_v33, %v866_v53  ;;  %v880_v18 = vor.u32 %v879_v49, %v875_v41  ;;  %v885_v20 = vrot.slane %v883_v61, 5  ;;  %v6206_v21 = vld [vmem:[#allocation2 + $0x30] sm:$0xf]  ;;  %v2282_v49 = vld [vmem:[#allocation2 + $0x24] sm:$0xe] }
 0x13a   : > { %v3712_v26 = vsel %vm1826_vm14, %v9564_v5, %v3517_v42  ;;  %v6499_v8 = vrot.slane %v6415_v60, 5  ;;  %v12157_v23 = vrot.slane %v3404_v36, 5  ;;  %v6497_v35 = vsel %vm11107_vm7, %v9755_v40, %v6496_v39  ;;  %v12167_v42 = vld [vmem:[#allocation2 + $0x4c] sm:$0xf]  ;;  %v2994_v36 = vld [vmem:[#allocation2 + $0x38] sm:$0x1] }
 0x13b   : > { %4003 = vmatmul.mubr.bf16.gmra.mxu1 %v3712_v26  ;;  %3544 = vrot.lane.b32.xlu0 %v9594_v19, %s10863_s23  ;;  %v871_v57 = vrot.slane %v870_v50, 4  ;;  %v6498_v9 = vrot.slane %v6496_v39, 4  ;;  %v12164_v3 = vrot.slane %v3408_v51, 4  ;;  %v881_v58 = vrot.slane %v880_v18, 4  ;;  %v2283_v18 = vld [vmem:[#allocation2 + $0x28] sm:$0xf] }
 0x13c   : > { %v9665_v55 = vrot.slane %v4897_v16, 10  ;;  %v4983_v5 = vrot.slane %v12148_v0, 6  ;;  %v4986_v53 = vrot.slane %v12153_v22, 6  ;;  %v9440_v33 = vrot.slane %v1188_v12, 9 }
 0x13d   : > { %v876_v60 = vsel %vm11802_vm3, %v871_v57, %v875_v41  ;;  %v6500_v19 = vsel %vm11107_vm7, %v6498_v9, %v6499_v8  ;;  %v886_v51 = vsel %vm11802_vm3, %v881_v58, %v885_v20  ;;  %v1287_v39 = vrot.slane %v12167_v42, 5  ;;  %v2284_v20 = vld [vmem:[#allocation2 + $0x2c] sm:$0x3] }
 0x13e   : > { %v9819_v16 = vcombine.low %v6497_v35, %v6500_v19  ;;  %v4984_v61 = vsel %vm11181_vm13, %v9665_v55, %v4983_v5  ;;  %v4985_v50 = vrot.slane %v4983_v5, 4  ;;  %v9471_v40 = vcombine.low %v876_v60, %v886_v51 }
 0x13f   : > { %v1290_v41 = vrot.slane %v12162_v52, 5  ;;  %v3102_v26 = vshll.u32 %v2994_v36, 16  ;;  %v9787_v8 = vcombine.low %v6206_v21, %v12139_v32  ;;  %v2384_v57 = vshrl.u32 %v2282_v49, 16 }
 0x140   : > { %6846 = vrot.lane.b32.xlu1 %v9819_v16, %s10863_s23  ;;  %v4987_v12 = vsel %vm11181_vm13, %v4985_v50, %v4986_v53  ;;  %v2387_v35 = vshll.u32 %v2282_v49, 16  ;;  %v1845_v9 = vsel %vm1826_vm14, %v9471_v40, %v11966_v56  ;;  %v1288_v55 = vsel %vm11107_vm7, %v9440_v33, %v1287_v39  ;;  %v12191_v16 = vld [vmem:[#allocation2 + $0x60] sm:$0xe]  ;;  %v4239_v40 = vld [vmem:[#allocation2 + $0x68] sm:$0x1] }
 0x141   : > { %v9713_v58 = vcombine.low %v4984_v61, %v4987_v12  ;;  %v1289_v5 = vrot.slane %v1287_v39, 4  ;;  %2148 = vmatmul.mubr.bf16.gmra.mxu0 %v1845_v9  ;;  %v3104_v36 = vrot.slane %v3102_v26, 5  ;;  %v2386_v60 = vrot.slane %v2384_v57, 5  ;;  %v1805_v39 = vpop.permute.xlu0 %1804  ;;  %v3679_v26 = vpop.permute.xlu1 %3678 }
 0x142   : > { %v2389_v19 = vrot.slane %v2387_v35, 6  ;;  %v2393_v51 = vshrl.u32 %v2283_v18, 16  ;;  %v2396_v53 = vshll.u32 %v2283_v18, 16  ;;  %v2403_v21 = vshrl.u32 %v2284_v20, 16 }
 0x143   : > { %5239 = vrot.lane.b32.xlu0 %v9713_v58, %s10863_s23  ;;  %v1291_v32 = vsel %vm11107_vm7, %v1289_v5, %v1290_v41  ;;  %v2406_v49 = vshll.u32 %v2284_v20, 16  ;;  %v3105_v33 = vsel %vm11802_vm3, %v11350_v31, %v3104_v36  ;;  %v15396_v41 = vsel %vm11802_vm3, %v11342_v2, %v11294_v13  ;;  %v731_v58 = vld [vmem:[#allocation2 + $0x48] sm:$0xf] }
 0x144   : > { %v9504_v56 = vcombine.low %v1288_v55, %v1291_v32  ;;  %6718 = vrot.lane.b32.xlu1 %v9787_v8, %s10863_s23  ;;  %v2390_v61 = vor.u32 %v2389_v19, %v2386_v60  ;;  %v2395_v50 = vrot.slane %v2393_v51, 5  ;;  %v9597_v18 = vcombine.low %v15396_v41, %v3105_v33  ;;  %v12215_v32 = vld [vmem:[#allocation2 + $0x40] sm:$0xf]  ;;  %v6416_v33 = vld [vmem:[#allocation2 + $0x3c] sm:$0xe] }
 0x145   : > { %v2398_v12 = vrot.slane %v2396_v53, 6  ;;  %v2405_v20 = vrot.slane %v2403_v21, 5  ;;  %v2408_v57 = vrot.slane %v2406_v49, 6  ;;  %v9649_v31 = vrot.slane %v12191_v16, 9 }
 0x146   : > { %v1913_v35 = vsel %vm1826_vm14, %v9504_v56, %v1805_v39  ;;  %v2391_v9 = vrot.slane %v2390_v61, 4  ;;  %v4359_v8 = vrot.slane %v12148_v0, 5  ;;  %v3780_v55 = vsel %vm1826_vm14, %v9597_v18, %v3679_v26 }
 0x147   : > { %2155 = vmatprep.mubr.bf16.mxu0 %v1913_v35  ;;  %v2399_v5 = vor.u32 %v2398_v12, %v2395_v50  ;;  %v2409_v36 = vor.u32 %v2408_v57, %v2405_v20  ;;  %v4362_v60 = vrot.slane %v4239_v40, 5  ;;  %v15397_v13 = vor.u32 %v12131_v48, %v12129_v15  ;;  %4010 = vmatprep.mubr.bf16.mxu1 %v3780_v55  ;;  %v6417_v50 = vld [vmem:[#allocation2 + $0x44] sm:$0x1]  ;;  %v3519_v40 = vpop.permute.xlu1 %3518  ;;  %v12228_v12 = vld [vmem:[#allocation2 + $0x70] sm:$0xf] }
 0x148   : > { %v3411_v19 = vor.u32 %v12164_v3, %v12157_v23  ;;  %v4360_v51 = vsel %vm11107_vm7, %v9649_v31, %v4359_v8  ;;  %v4361_v0 = vrot.slane %v4359_v8, 4  ;;  %v888_v49 = vshrl.u32 %v731_v58, 16  ;;  %v12230_v20 = vld [vmem:[#allocation2 + $0x74] sm:$0x3]  ;;  %v4898_v31 = vld [vmem:[#allocation2 + $0x6c] sm:$0xc] }
 0x149   : > { %v12209_v2 = vrot.slane %v15397_v13, 4  ;;  %v2400_v53 = vsel %vm12034_vm6, %v2391_v9, %v2399_v5  ;;  %v2401_v21 = vrot.slane %v2399_v5, 4  ;;  %v891_v56 = vshll.u32 %v731_v58, 16  ;;  %v1189_v5 = vld [vmem:[#allocation2 + $0x54] sm:$0xe] }
 0x14a   : > { %v4363_v15 = vsel %vm11107_vm7, %v4361_v0, %v4362_v60  ;;  %v897_v48 = vshll.u32 %v12167_v42, 16  ;;  %v901_v3 = vshrl.u32 %v12167_v42, 16  ;;  %v907_v61 = vshll.u32 %v12162_v52, 16  ;;  %v12241_v0 = vld [vmem:[#allocation2 + $0x5c] sm:$0x1] }
 0x14b   : > { %v2410_v39 = vsel %vm12034_vm6, %v2401_v21, %v2409_v36  ;;  %v12226_v26 = vcombine.low %v4360_v51, %v4363_v15  ;;  %v890_v41 = vrot.slane %v888_v49, 4  ;;  %v893_v18 = vrot.slane %v891_v56, 5  ;;  %v12239_v51 = vld [vmem:[#allocation2 + $0x58] sm:$0xf] }
 0x14c   : > { %v12232_v57 = vrot.slane %v3411_v19, 4  ;;  %v9565_v35 = vcombine.low %v2400_v53, %v2410_v39  ;;  %v899_v9 = vrot.slane %v897_v48, 5  ;;  %v903_v42 = vrot.slane %v901_v3, 4 }
 0x14d   : > { %5111 = vrot.lane.b32.xlu0 %v12226_v26, %s10863_s23  ;;  %v894_v52 = vor.u32 %v893_v18, %v890_v41  ;;  %v9756_v8 = vrot.slane %v6416_v33, 9  ;;  %v6503_v58 = vrot.slane %v12215_v32, 5  ;;  %v6506_v55 = vrot.slane %v6417_v50, 5  ;;  %v10668_v33 = vld [vmem:[#allocation7 + $0x148] sm:$0xff]  }
 0x14e   : > { %v3716_v60 = vsel %vm1826_vm14, %v9565_v35, %v3519_v40  ;;  %v904_v13 = vor.u32 %v903_v42, %v899_v9  ;;  %v909_v19 = vrot.slane %v907_v61, 5  ;;  %v9666_v56 = vrot.slane %v4898_v31, 10  ;;  %v2997_v40 = vld [vmem:[#allocation2 + $0x44] sm:$0x1]  ;;  %v6208_v35 = vld [vmem:[#allocation2 + $0x3c] sm:$0xf]  ;;  %10155 = vmatprep.subr.bf16.mxu0 %v10668_v33 }
 0x14f   : > { %4011 = vmatmul.mubr.bf16.gmra.mxu1 %v3716_v60  ;;  %v895_v53 = vrot.slane %v894_v52, 4  ;;  %v6504_v21 = vsel %vm11107_vm7, %v9756_v8, %v6503_v58  ;;  %v6505_v49 = vrot.slane %v6503_v58, 4  ;;  %v4990_v48 = vrot.slane %v12228_v12, 6  ;;  %v2285_v42 = vld [vmem:[#allocation2 + $0x30] sm:$0xe] }
 0x150   : > { %v905_v15 = vrot.slane %v904_v13, 4  ;;  %v4993_v3 = vrot.slane %v12230_v20, 6  ;;  %v9441_v50 = vrot.slane %v1189_v5, 9  ;;  %v1294_v41 = vrot.slane %v12239_v51, 5  ;;  %v10669_v5 = vld [vmem:[#allocation7 + $0x1e0] sm:$0xff]  }
 0x151   : > { %v900_v61 = vsel %vm11802_vm3, %v895_v53, %v899_v9  ;;  %v6507_v39 = vsel %vm11107_vm7, %v6505_v49, %v6506_v55  ;;  %v1297_v18 = vrot.slane %v12241_v0, 5  ;;  %v4991_v8 = vsel %vm11181_vm13, %v9666_v56, %v4990_v48  ;;  %v2286_v53 = vld [vmem:[#allocation2 + $0x34] sm:$0xf]  ;;  %v12263_v56 = vld [vmem:[#allocation2 + $0x6c] sm:$0xe]  ;;  %10261 = vmatprep.subr.bf16.mxu1 %v10669_v5 }
 0x152   : > { %v910_v31 = vsel %vm11802_vm3, %v905_v15, %v909_v19  ;;  %v9820_v52 = vcombine.low %v6504_v21, %v6507_v39  ;;  %v4992_v58 = vrot.slane %v4990_v48, 4  ;;  %v1295_v55 = vsel %vm11107_vm7, %v9441_v50, %v1294_v41  ;;  %v2287_v21 = vld [vmem:[#allocation2 + $0x38] sm:$0x3]  ;;  %v4242_v39 = vld [vmem:[#allocation2 + $0x74] sm:$0x1] }
 0x153   : > { %v9472_v9 = vcombine.low %v900_v61, %v910_v31  ;;  %v1296_v60 = vrot.slane %v1294_v41, 4  ;;  %v3126_v13 = vshll.u32 %v2997_v40, 16  ;;  %v9788_v19 = vcombine.low %v6208_v35, %v12215_v32  ;;  %v1807_v35 = vpop.permute.xlu0 %1806 }
 0x154   : > { %6848 = vrot.lane.b32.xlu1 %v9820_v52, %s10863_s23  ;;  %v4994_v49 = vsel %vm11181_vm13, %v4992_v58, %v4993_v3  ;;  %v2412_v33 = vshrl.u32 %v2285_v42, 16  ;;  %v2415_v15 = vshll.u32 %v2285_v42, 16  ;;  %v2421_v32 = vshrl.u32 %v2286_v53, 16  ;;  %v10671_v58 = vld [vmem:[#allocation7 + $0x108] sm:$0xff]  }
 0x155   : > { %v1849_v48 = vsel %vm1826_vm14, %v9472_v9, %v11992_v4  ;;  %v9714_v50 = vcombine.low %v4991_v8, %v4994_v49  ;;  %v1298_v40 = vsel %vm11107_vm7, %v1296_v60, %v1297_v18  ;;  %v3128_v61 = vrot.slane %v3126_v13, 5  ;;  %v10672_v13 = vld [vmem:[#allocation7 + $0x1a0] sm:$0xff]   ;;  %v3681_v49 = vpop.permute.xlu1 %3680  ;;  %10156 = vmatpush3.bf16.msra.mxu0 %v10671_v58 }
 0x156   : > { %2156 = vmatmul.mubr.bf16.gmra.mxu0 %v1849_v48  ;;  %v9505_v41 = vcombine.low %v1295_v55, %v1298_v40  ;;  %v2414_v3 = vrot.slane %v2412_v33, 5  ;;  %v2417_v31 = vrot.slane %v2415_v15, 6  ;;  %v2424_v52 = vshll.u32 %v2286_v53, 16  ;;  %v734_v15 = vld [vmem:[#allocation2 + $0x54] sm:$0xf]  ;;  %10262 = vmatpush3.bf16.msra.mxu1 %v10672_v13 }
 0x157   : > { %5241 = vrot.lane.b32.xlu0 %v9714_v50, %s10863_s23  ;;  %v3129_v42 = vsel %vm11802_vm3, %v11448_v62, %v3128_v61  ;;  %v2431_v4 = vshrl.u32 %v2287_v21, 16  ;;  %v2434_v8 = vshll.u32 %v2287_v21, 16  ;;  %v15398_v5 = vsel %vm11802_vm3, %v11401_v11, %v11377_v46  ;;  %v6419_v58 = vld [vmem:[#allocation2 + $0x50] sm:$0x1]  ;;  %v4899_v13 = vld [vmem:[#allocation2 + $0x78] sm:$0xc] }
 0x158   : > { %v1917_v18 = vsel %vm1826_vm14, %v9505_v41, %v1807_v35  ;;  %v9598_v9 = vcombine.low %v15398_v5, %v3129_v42  ;;  %6720 = vrot.lane.b32.xlu1 %v9788_v19, %s10863_s23  ;;  %v2418_v55 = vor.u32 %v2417_v31, %v2414_v3  ;;  %v2423_v60 = vrot.slane %v2421_v32, 5  ;;  %v12287_v42 = vld [vmem:[#allocation2 + $0x4c] sm:$0xf]  ;;  %v12407_v40 = vld [vmem:[#allocation2 + $0x84] sm:$0xe] }
 0x159   : > { %2163 = vmatprep.mubr.bf16.mxu0 %v1917_v18  ;;  %v2426_v62 = vrot.slane %v2424_v52, 6  ;;  %v2433_v53 = vrot.slane %v2431_v4, 5  ;;  %v2436_v33 = vrot.slane %v2434_v8, 6  ;;  %v9650_v21 = vrot.slane %v12263_v56, 9  ;;  %v6418_v52 = vld [vmem:[#allocation2 + $0x48] sm:$0xe] }
 0x15a   : > { %v3784_v48 = vsel %vm1826_vm14, %v9598_v9, %v3681_v49  ;;  %v2419_v50 = vrot.slane %v2418_v55, 4  ;;  %v4366_v46 = vrot.slane %v12228_v12, 5  ;;  %v4369_v11 = vrot.slane %v4242_v39, 5  ;;  %v3521_v49 = vpop.permute.xlu1 %3520 }
 0x15b   : > { %4018 = vmatprep.mubr.bf16.mxu1 %v3784_v48  ;;  %v2427_v61 = vor.u32 %v2426_v62, %v2423_v60  ;;  %v2437_v41 = vor.u32 %v2436_v33, %v2433_v53  ;;  %v912_v32 = vshrl.u32 %v734_v15, 16  ;;  %v915_v35 = vshll.u32 %v734_v15, 16  ;;  %v12296_v60 = vld [vmem:[#allocation2 + $0x7c] sm:$0xf] }
 0x15c   : > { %v4367_v3 = vsel %vm11107_vm7, %v9650_v21, %v4366_v46  ;;  %v4368_v31 = vrot.slane %v4366_v46, 4  ;;  %v921_v4 = vshll.u32 %v12239_v51, 16  ;;  %v925_v8 = vshrl.u32 %v12239_v51, 16  ;;  %v12303_v46 = vld [vmem:[#allocation2 + $0x80] sm:$0x3] }
 0x15d   : > { %v2428_v12 = vsel %vm12034_vm6, %v2419_v50, %v2427_v61  ;;  %v2429_v39 = vrot.slane %v2427_v61, 4  ;;  %v914_v5 = vrot.slane %v912_v32, 4  ;;  %v917_v9 = vrot.slane %v915_v35, 5  ;;  %v2289_v32 = vld [vmem:[#allocation2 + $0x40] sm:$0xf] }
 0x15e   : > { %v4370_v18 = vsel %vm11107_vm7, %v4368_v31, %v4369_v11  ;;  %v931_v55 = vshll.u32 %v12241_v0, 16  ;;  %v923_v33 = vrot.slane %v921_v4, 5  ;;  %v927_v21 = vrot.slane %v925_v8, 4  ;;  %v12305_v11 = vld [vmem:[#allocation2 + $0x64] sm:$0xf] }
 0x15f   : > { %v2438_v62 = vsel %vm12034_vm6, %v2429_v39, %v2437_v41  ;;  %v12300_v53 = vcombine.low %v4367_v3, %v4370_v18  ;;  %v918_v48 = vor.u32 %v917_v9, %v914_v5  ;;  %v9757_v50 = vrot.slane %v6418_v52, 9  ;;  %v1190_v31 = vld [vmem:[#allocation2 + $0x60] sm:$0xe]  ;;  %v12312_v52 = vld [vmem:[#allocation2 + $0x68] sm:$0x1] }
 0x160   : > { %v9566_v15 = vcombine.low %v2428_v12, %v2438_v62  ;;  %v928_v0 = vor.u32 %v927_v21, %v923_v33  ;;  %v933_v61 = vrot.slane %v931_v55, 5  ;;  %v6510_v41 = vrot.slane %v12287_v42, 5  ;;  %v3000_v9 = vld [vmem:[#allocation2 + $0x50] sm:$0x1]  ;;  %v1679_v21 = vpop.permute.xlu0 %1678 }
 0x161   : > { %5113 = vrot.lane.b32.xlu0 %v12300_v53, %s10863_s23  ;;  %v6513_v3 = vrot.slane %v6419_v58, 5  ;;  %v919_v12 = vrot.slane %v918_v48, 4  ;;  %v9667_v39 = vrot.slane %v4899_v13, 10  ;;  %v4997_v5 = vrot.slane %v12296_v60, 6  ;;  %v6210_v13 = vld [vmem:[#allocation2 + $0x48] sm:$0xf] }
 0x162   : > { %v3720_v35 = vsel %vm1826_vm14, %v9566_v15, %v3521_v49  ;;  %v929_v4 = vrot.slane %v928_v0, 4  ;;  %v6511_v8 = vsel %vm11107_vm7, %v9757_v50, %v6510_v41  ;;  %v6512_v18 = vrot.slane %v6510_v41, 4  ;;  %v2288_v41 = vld [vmem:[#allocation2 + $0x3c] sm:$0xe]  ;;  %v2293_v51 = vld [vmem:[#allocation2 + $0x50] sm:$0x3] }
 0x163   : > { %4019 = vmatmul.mubr.bf16.gmra.mxu1 %v3720_v35  ;;  %v924_v58 = vsel %vm11802_vm3, %v919_v12, %v923_v33  ;;  %v5000_v55 = vrot.slane %v12303_v46, 6  ;;  %v9442_v62 = vrot.slane %v1190_v31, 9  ;;  %v1301_v49 = vrot.slane %v12305_v11, 5 }
 0x164   : > { %v934_v15 = vsel %vm11802_vm3, %v929_v4, %v933_v61  ;;  %v6514_v48 = vsel %vm11107_vm7, %v6512_v18, %v6513_v3  ;;  %v4998_v50 = vsel %vm11181_vm13, %v9667_v39, %v4997_v5  ;;  %v4999_v0 = vrot.slane %v4997_v5, 4  ;;  %v2290_v18 = vld [vmem:[#allocation2 + $0x44] sm:$0x3] }
 0x165   : > { %v9473_v35 = vcombine.low %v924_v58, %v934_v15  ;;  %v9821_v33 = vcombine.low %v6511_v8, %v6514_v48  ;;  %v1302_v31 = vsel %vm11107_vm7, %v9442_v62, %v1301_v49  ;;  %v1303_v12 = vrot.slane %v1301_v49, 4 }
 0x166   : > { %v5001_v19 = vsel %vm11181_vm13, %v4999_v0, %v5000_v55  ;;  %v1304_v61 = vrot.slane %v12312_v52, 5  ;;  %v3150_v4 = vshll.u32 %v3000_v9, 16  ;;  %v9789_v3 = vcombine.low %v6210_v13, %v12287_v42  ;;  %v12338_v0 = vld [vmem:[#allocation2 + $0x78] sm:$0xe] }
 0x167   : > { %v1853_v39 = vsel %vm1826_vm14, %v9473_v35, %v1679_v21  ;;  %6850 = vrot.lane.b32.xlu1 %v9821_v33, %s10863_s23  ;;  %v9715_v5 = vcombine.low %v4998_v50, %v5001_v19  ;;  %v2440_v8 = vshrl.u32 %v2288_v41, 16  ;;  %v2443_v58 = vshll.u32 %v2288_v41, 16  ;;  %v1809_v21 = vpop.permute.xlu0 %1808  ;;  %v3683_v35 = vpop.permute.xlu1 %3682 }
 0x168   : > { %2164 = vmatmul.mubr.bf16.gmra.mxu0 %v1853_v39  ;;  %v1305_v62 = vsel %vm11107_vm7, %v1303_v12, %v1304_v61  ;;  %v3152_v49 = vrot.slane %v3150_v4, 5  ;;  %v2449_v15 = vshrl.u32 %v2289_v32, 16  ;;  %v2452_v55 = vshll.u32 %v2289_v32, 16  ;;  %v4245_v12 = vld [vmem:[#allocation2 + $0x80] sm:$0x1] }
 0x169   : > { %5243 = vrot.lane.b32.xlu0 %v9715_v5, %s10863_s23  ;;  %v9506_v9 = vcombine.low %v1302_v31, %v1305_v62  ;;  %v2442_v48 = vrot.slane %v2440_v8, 5  ;;  %v2445_v42 = vrot.slane %v2443_v58, 6  ;;  %v2459_v13 = vshrl.u32 %v2290_v18, 16  ;;  %v737_v58 = vld [vmem:[#allocation2 + $0x60] sm:$0xf] }
 0x16a   : > { %v3153_v19 = vsel %vm11802_vm3, %v11492_v45, %v3152_v49  ;;  %v2451_v50 = vrot.slane %v2449_v15, 5  ;;  %v2454_v41 = vrot.slane %v2452_v55, 6  ;;  %v2462_v33 = vshll.u32 %v2290_v18, 16 }
 0x16b   : > { %v1921_v32 = vsel %vm1826_vm14, %v9506_v9, %v1809_v21  ;;  %v15399_v31 = vsel %vm11802_vm3, %v11451_v63, %v11418_v37  ;;  %6722 = vrot.lane.b32.xlu1 %v9789_v3, %s10863_s23  ;;  %v2446_v4 = vor.u32 %v2445_v42, %v2442_v48  ;;  %v2461_v39 = vrot.slane %v2459_v13, 5  ;;  %v12356_v48 = vld [vmem:[#allocation2 + $0x58] sm:$0xf]  ;;  %v10676_v42 = vld [vmem:[#allocation7 + $0x198] sm:$0xff]  }
 0x16c   : > { %v9599_v61 = vcombine.low %v15399_v31, %v3153_v19  ;;  %2171 = vmatprep.mubr.bf16.mxu0 %v1921_v32  ;;  %v2455_v5 = vor.u32 %v2454_v41, %v2451_v50  ;;  %v2464_v8 = vrot.slane %v2462_v33, 6  ;;  %v9651_v45 = vrot.slane %v12338_v0, 9  ;;  %v6420_v19 = vld [vmem:[#allocation2 + $0x54] sm:$0xe]  ;;  %v6421_v32 = vld [vmem:[#allocation2 + $0x5c] sm:$0x1] }
 0x16d   : > { %v4373_v18 = vrot.slane %v12296_v60, 5  ;;  %v2447_v15 = vrot.slane %v2446_v4, 4  ;;  %v4376_v55 = vrot.slane %v4245_v12, 5  ;;  %v936_v13 = vshrl.u32 %v737_v58, 16  ;;  %v4900_v31 = vld [vmem:[#allocation2 + $0x84] sm:$0xc] }
 0x16e   : > { %v3788_v49 = vsel %vm1826_vm14, %v9599_v61, %v3683_v35  ;;  %v2457_v37 = vrot.slane %v2455_v5, 4  ;;  %v2465_v63 = vor.u32 %v2464_v8, %v2461_v39  ;;  %v939_v21 = vshll.u32 %v737_v58, 16  ;;  %v3523_v35 = vpop.permute.xlu1 %3522  ;;  %v12369_v8 = vld [vmem:[#allocation2 + $0x88] sm:$0xf] }
 0x16f   : > { %4026 = vmatprep.mubr.bf16.mxu1 %v3788_v49  ;;  %v4374_v3 = vsel %vm11107_vm7, %v9651_v45, %v4373_v18  ;;  %v4375_v9 = vrot.slane %v4373_v18, 4  ;;  %v2456_v60 = vsel %vm12034_vm6, %v2447_v15, %v2455_v5  ;;  %v945_v33 = vshll.u32 %v12305_v11, 16  ;;  %v12371_v45 = vld [vmem:[#allocation2 + $0x8c] sm:$0x3] }
 0x170   : > { %v2466_v50 = vsel %vm12034_vm6, %v2457_v37, %v2465_v63  ;;  %v949_v12 = vshrl.u32 %v12305_v11, 16  ;;  %v938_v39 = vrot.slane %v936_v13, 4  ;;  %v941_v5 = vrot.slane %v939_v21, 5  ;;  %v1191_v18 = vld [vmem:[#allocation2 + $0x6c] sm:$0xe] }
 0x171   : > { %v4377_v41 = vsel %vm11107_vm7, %v4375_v9, %v4376_v55  ;;  %v9567_v61 = vcombine.low %v2456_v60, %v2466_v50  ;;  %v947_v58 = vrot.slane %v945_v33, 5  ;;  %v955_v15 = vshll.u32 %v12312_v52, 16  ;;  %v12374_v37 = vld [vmem:[#allocation2 + $0x70] sm:$0xf]  ;;  %v12382_v52 = vld [vmem:[#allocation2 + $0x74] sm:$0x1] }
 0x172   : > { %v12367_v4 = vcombine.low %v4374_v3, %v4377_v41  ;;  %v951_v49 = vrot.slane %v949_v12, 4  ;;  %v9758_v55 = vrot.slane %v6420_v19, 9  ;;  %v942_v63 = vor.u32 %v941_v5, %v938_v39  ;;  %v10674_v19 = vld [vmem:[#allocation7 + $0x140] sm:$0xff]   ;;  %v10675_v39 = vld [vmem:[#allocation7 + $0x1d8] sm:$0xff]  }
 0x173   : > { %v3724_v11 = vsel %vm1826_vm14, %v9567_v61, %v3523_v35  ;;  %v6517_v3 = vrot.slane %v12356_v48, 5  ;;  %v6520_v9 = vrot.slane %v6421_v32, 5  ;;  %v957_v50 = vrot.slane %v955_v15, 5  ;;  %v3003_v61 = vld [vmem:[#allocation2 + $0x5c] sm:$0x1]  ;;  %10157 = vmatprep.subr.bf16.mxu0 %v10674_v19  ;;  %10263 = vmatprep.subr.bf16.mxu1 %v10675_v39 }
 0x174   : > { %5115 = vrot.lane.b32.xlu0 %v12367_v4, %s10863_s23  ;;  %4027 = vmatmul.mubr.bf16.gmra.mxu1 %v3724_v11  ;;  %v952_v21 = vor.u32 %v951_v49, %v947_v58  ;;  %v943_v41 = vrot.slane %v942_v63, 4  ;;  %v9668_v12 = vrot.slane %v4900_v31, 10  ;;  %v5004_v32 = vrot.slane %v12369_v8, 6  ;;  %v6212_v11 = vld [vmem:[#allocation2 + $0x54] sm:$0xf]  ;;  %v1681_v49 = vpop.permute.xlu0 %1680 }
 0x175   : > { %v6518_v35 = vsel %vm11107_vm7, %v9758_v55, %v6517_v3  ;;  %v6519_v33 = vrot.slane %v6517_v3, 4  ;;  %v5007_v62 = vrot.slane %v12371_v45, 6  ;;  %v9443_v13 = vrot.slane %v1191_v18, 9  ;;  %v2291_v3 = vld [vmem:[#allocation2 + $0x48] sm:$0xe]  ;;  %10264 = vmatpush3.bf16.msra.mxu1 %v10676_v42 }
 0x176   : > { %v953_v5 = vrot.slane %v952_v21, 4  ;;  %v948_v15 = vsel %vm11802_vm3, %v943_v41, %v947_v58  ;;  %v1308_v55 = vrot.slane %v12374_v37, 5  ;;  %v1311_v31 = vrot.slane %v12382_v52, 5 }
 0x177   : > { %v6521_v63 = vsel %vm11107_vm7, %v6519_v33, %v6520_v9  ;;  %v5005_v18 = vsel %vm11181_vm13, %v9668_v12, %v5004_v32  ;;  %v5006_v19 = vrot.slane %v5004_v32, 4  ;;  %v3174_v41 = vshll.u32 %v3003_v61, 16  ;;  %v2292_v33 = vld [vmem:[#allocation2 + $0x4c] sm:$0xf]  ;;  %v10678_v61 = vld [vmem:[#allocation7 + $0x100] sm:$0xff]  }
 0x178   : > { %v958_v21 = vsel %vm11802_vm3, %v953_v5, %v957_v50  ;;  %v9822_v60 = vcombine.low %v6518_v35, %v6521_v63  ;;  %v1309_v58 = vsel %vm11107_vm7, %v9443_v13, %v1308_v55  ;;  %v1310_v9 = vrot.slane %v1308_v55, 4  ;;  %10158 = vmatpush3.bf16.msra.mxu0 %v10678_v61 }
 0x179   : > { %v9474_v36 = vcombine.low %v948_v15, %v958_v21  ;;  %v5008_v39 = vsel %vm11181_vm13, %v5006_v19, %v5007_v62  ;;  %v9790_v50 = vcombine.low %v6212_v11, %v12356_v48  ;;  %v2468_v35 = vshrl.u32 %v2291_v3, 16  ;;  %v1811_v62 = vpop.permute.xlu0 %1810 }
 0x17a   : > { %6852 = vrot.lane.b32.xlu1 %v9822_v60, %s10863_s23  ;;  %v2471_v5 = vshll.u32 %v2291_v3, 16  ;;  %v9716_v32 = vcombine.low %v5005_v18, %v5008_v39  ;;  %v1312_v13 = vsel %vm11107_vm7, %v1310_v9, %v1311_v31  ;;  %v3176_v15 = vrot.slane %v3174_v41, 5  ;;  %v3685_v9 = vpop.permute.xlu1 %3684  ;;  %v740_v39 = vld [vmem:[#allocation2 + $0x6c] sm:$0xf] }
 0x17b   : > { %v1857_v12 = vsel %vm1826_vm14, %v9474_v36, %v1681_v49  ;;  %v9507_v63 = vcombine.low %v1309_v58, %v1312_v13  ;;  %v2470_v55 = vrot.slane %v2468_v35, 5  ;;  %v2477_v21 = vshrl.u32 %v2292_v33, 16  ;;  %v4248_v49 = vld [vmem:[#allocation2 + $0x8c] sm:$0x1] }
 0x17c   : > { %2172 = vmatmul.mubr.bf16.gmra.mxu0 %v1857_v12  ;;  %v2473_v60 = vrot.slane %v2471_v5, 6  ;;  %5245 = vrot.lane.b32.xlu0 %v9716_v32, %s10863_s23  ;;  %v3177_v36 = vsel %vm11802_vm3, %v11512_v6, %v3176_v15  ;;  %v2480_v48 = vshll.u32 %v2292_v33, 16  ;;  %v2487_v42 = vshrl.u32 %v2293_v51, 16 }
 0x17d   : > { %v2490_v11 = vshll.u32 %v2293_v51, 16  ;;  %v1925_v31 = vsel %vm1826_vm14, %v9507_v63, %v1811_v62  ;;  %v15400_v3 = vsel %vm11802_vm3, %v11494_v59, %v11463_v17  ;;  %v2479_v58 = vrot.slane %v2477_v21, 5 }
 0x17e   : > { %v9600_v18 = vcombine.low %v15400_v3, %v3177_v36  ;;  %6724 = vrot.lane.b32.xlu1 %v9790_v50, %s10863_s23  ;;  %v2474_v19 = vor.u32 %v2473_v60, %v2470_v55  ;;  %2179 = vmatprep.mubr.bf16.mxu0 %v1925_v31  ;;  %v2482_v6 = vrot.slane %v2480_v48, 6  ;;  %v2489_v41 = vrot.slane %v2487_v42, 5  ;;  %v12427_v60 = vld [vmem:[#allocation2 + $0x64] sm:$0xf]  ;;  %v6422_v48 = vld [vmem:[#allocation2 + $0x60] sm:$0xe] }
 0x17f   : > { %v2492_v33 = vrot.slane %v2490_v11, 6  ;;  %v9652_v51 = vrot.slane %v12407_v40, 9  ;;  %v4380_v12 = vrot.slane %v12369_v8, 5  ;;  %v4383_v32 = vrot.slane %v4248_v49, 5  ;;  %v6423_v3 = vld [vmem:[#allocation2 + $0x68] sm:$0x1] }
 0x180   : > { %v3792_v35 = vsel %vm1826_vm14, %v9600_v18, %v3685_v9  ;;  %v2475_v5 = vrot.slane %v2474_v19, 4  ;;  %v2483_v50 = vor.u32 %v2482_v6, %v2479_v58  ;;  %v960_v63 = vshrl.u32 %v740_v39, 16  ;;  %v3525_v18 = vpop.permute.xlu1 %3524 }
 0x181   : > { %4034 = vmatprep.mubr.bf16.mxu1 %v3792_v35  ;;  %v2493_v13 = vor.u32 %v2492_v33, %v2489_v41  ;;  %v4381_v15 = vsel %vm11107_vm7, %v9652_v51, %v4380_v12  ;;  %v4382_v61 = vrot.slane %v4380_v12, 4  ;;  %v963_v55 = vshll.u32 %v740_v39, 16  ;;  %v12440_v41 = vld [vmem:[#allocation2 + $0x94] sm:$0xf]  ;;  %v12443_v12 = vld [vmem:[#allocation2 + $0x7c] sm:$0xf] }
 0x182   : > { %v2484_v21 = vsel %vm12034_vm6, %v2475_v5, %v2483_v50  ;;  %v2485_v8 = vrot.slane %v2483_v50, 4  ;;  %v969_v62 = vshll.u32 %v12374_v37, 16  ;;  %v973_v36 = vshrl.u32 %v12374_v37, 16  ;;  %v4901_v37 = vld [vmem:[#allocation2 + $0x90] sm:$0xc] }
 0x183   : > { %v4384_v42 = vsel %vm11107_vm7, %v4382_v61, %v4383_v32  ;;  %v962_v11 = vrot.slane %v960_v63, 4  ;;  %v965_v49 = vrot.slane %v963_v55, 5  ;;  %v979_v31 = vshll.u32 %v12382_v52, 16  ;;  %v4437_v5 = vld [vmem:[#allocation2 + $0x98] sm:$0x3] }
 0x184   : > { %v2494_v19 = vsel %vm12034_vm6, %v2485_v8, %v2493_v13  ;;  %v12438_v58 = vcombine.low %v4381_v15, %v4384_v42  ;;  %v971_v9 = vrot.slane %v969_v62, 5  ;;  %v975_v6 = vrot.slane %v973_v36, 4  ;;  %v1192_v15 = vld [vmem:[#allocation2 + $0x78] sm:$0xe]  ;;  %v12453_v42 = vld [vmem:[#allocation2 + $0x80] sm:$0x1] }
 0x185   : > { %v9568_v51 = vcombine.low %v2484_v21, %v2494_v19  ;;  %v966_v39 = vor.u32 %v965_v49, %v962_v11  ;;  %v9759_v35 = vrot.slane %v6422_v48, 9  ;;  %v981_v32 = vrot.slane %v979_v31, 5  ;;  %v1683_v19 = vpop.permute.xlu0 %1682  ;;  %v2297_v61 = vld [vmem:[#allocation2 + $0x60] sm:$0xe] }
 0x186   : > { %5117 = vrot.lane.b32.xlu0 %v12438_v58, %s10863_s23  ;;  %v976_v52 = vor.u32 %v975_v6, %v971_v9  ;;  %v6524_v50 = vrot.slane %v12427_v60, 5  ;;  %v6527_v13 = vrot.slane %v6423_v3, 5  ;;  %v9669_v21 = vrot.slane %v4901_v37, 10 }
 0x187   : > { %v3728_v63 = vsel %vm1826_vm14, %v9568_v51, %v3525_v18  ;;  %v967_v55 = vrot.slane %v966_v39, 4  ;;  %v5011_v48 = vrot.slane %v12440_v41, 6  ;;  %v5014_v49 = vrot.slane %v4437_v5, 6  ;;  %v3006_v18 = vld [vmem:[#allocation2 + $0x68] sm:$0x1] }
 0x188   : > { %4035 = vmatmul.mubr.bf16.gmra.mxu1 %v3728_v63  ;;  %v977_v8 = vrot.slane %v976_v52, 4  ;;  %v6525_v62 = vsel %vm11107_vm7, %v9759_v35, %v6524_v50  ;;  %v6526_v36 = vrot.slane %v6524_v50, 4  ;;  %v9444_v31 = vrot.slane %v1192_v15, 9  ;;  %v6214_v35 = vld [vmem:[#allocation2 + $0x60] sm:$0xf] }
 0x189   : > { %v972_v11 = vsel %vm11802_vm3, %v967_v55, %v971_v9  ;;  %v1315_v3 = vrot.slane %v12443_v12, 5  ;;  %v5012_v51 = vsel %vm11181_vm13, %v9669_v21, %v5011_v48  ;;  %v5013_v39 = vrot.slane %v5011_v48, 4  ;;  %v2294_v52 = vld [vmem:[#allocation2 + $0x54] sm:$0xe]  ;;  %v2295_v63 = vld [vmem:[#allocation2 + $0x58] sm:$0xf] }
 0x18a   : > { %v982_v6 = vsel %vm11802_vm3, %v977_v8, %v981_v32  ;;  %v6528_v37 = vsel %vm11107_vm7, %v6526_v36, %v6527_v13  ;;  %v1318_v32 = vrot.slane %v12453_v42, 5  ;;  %v3191_v13 = vsel %vm11802_vm3, %v11557_v38, %v11532_v30  ;;  %v2296_v8 = vld [vmem:[#allocation2 + $0x5c] sm:$0x3] }
 0x18b   : > { %v9475_v50 = vcombine.low %v972_v11, %v982_v6  ;;  %v9823_v9 = vcombine.low %v6525_v62, %v6528_v37  ;;  %v1316_v5 = vsel %vm11107_vm7, %v9444_v31, %v1315_v3  ;;  %v1317_v15 = vrot.slane %v1315_v3, 4  ;;  %v12476_v31 = vld [vmem:[#allocation2 + $0x90] sm:$0xe] }
 0x18c   : > { %v5015_v55 = vsel %vm11181_vm13, %v5013_v39, %v5014_v49  ;;  %v3198_v21 = vshll.u32 %v3006_v18, 16  ;;  %v9791_v48 = vcombine.low %v6214_v35, %v12427_v60  ;;  %v2496_v11 = vshrl.u32 %v2294_v52, 16  ;;  %v1813_v39 = vpop.permute.xlu0 %1812 }
 0x18d   : > { %v1861_v36 = vsel %vm1826_vm14, %v9475_v50, %v1683_v19  ;;  %6854 = vrot.lane.b32.xlu1 %v9823_v9, %s10863_s23  ;;  %v9717_v62 = vcombine.low %v5012_v51, %v5015_v55  ;;  %v1319_v49 = vsel %vm11107_vm7, %v1317_v15, %v1318_v32  ;;  %v2499_v6 = vshll.u32 %v2294_v52, 16  ;;  %v4251_v9 = vld [vmem:[#allocation2 + $0x98] sm:$0x1]  ;;  %v3687_v55 = vpop.permute.xlu1 %3686 }
 0x18e   : > { %2180 = vmatmul.mubr.bf16.gmra.mxu0 %v1861_v36  ;;  %v3200_v3 = vrot.slane %v3198_v21, 5  ;;  %v2505_v37 = vshrl.u32 %v2295_v63, 16  ;;  %v9508_v30 = vcombine.low %v1316_v5, %v1319_v49  ;;  %v2498_v38 = vrot.slane %v2496_v11, 5 }
 0x18f   : > { %5247 = vrot.lane.b32.xlu0 %v9717_v62, %s10863_s23  ;;  %v2508_v18 = vshll.u32 %v2295_v63, 16  ;;  %v2515_v19 = vshrl.u32 %v2296_v8, 16  ;;  %v2501_v51 = vrot.slane %v2499_v6, 6  ;;  %v2518_v50 = vshll.u32 %v2296_v8, 16 }
 0x190   : > { %v3201_v60 = vsel %vm11802_vm3, %v11593_v10, %v3200_v3  ;;  %v2507_v35 = vrot.slane %v2505_v37, 5  ;;  %v1929_v15 = vsel %vm1826_vm14, %v9508_v30, %v1813_v39  ;;  %v9653_v36 = vrot.slane %v12476_v31, 9  ;;  %v743_v10 = vld [vmem:[#allocation2 + $0x78] sm:$0xf]  ;;  %v4252_v30 = vld [vmem:[#allocation2 + $0x9c] sm:$0xe] }
 0x191   : > { %v9601_v52 = vcombine.low %v3191_v13, %v3201_v60  ;;  %6726 = vrot.lane.b32.xlu1 %v9791_v48, %s10863_s23  ;;  %v2510_v32 = vrot.slane %v2508_v18, 6  ;;  %v2517_v5 = vrot.slane %v2515_v19, 5  ;;  %2187 = vmatprep.mubr.bf16.mxu0 %v1929_v15  ;;  %v2502_v63 = vor.u32 %v2501_v51, %v2498_v38  ;;  %v3527_v15 = vpop.permute.xlu1 %3526 }
 0x192   : > { %v2520_v21 = vrot.slane %v2518_v50, 6  ;;  %v4387_v62 = vrot.slane %v12440_v41, 5  ;;  %v4390_v3 = vrot.slane %v4251_v9, 5  ;;  %v984_v18 = vshrl.u32 %v743_v10, 16  ;;  %v12493_v41 = vld [vmem:[#allocation2 + $0x70] sm:$0xf] }
 0x193   : > { %v3796_v8 = vsel %vm1826_vm14, %v9601_v52, %v3687_v55  ;;  %v2511_v49 = vor.u32 %v2510_v32, %v2507_v35  ;;  %v2503_v13 = vrot.slane %v2502_v63, 4  ;;  %v987_v19 = vshll.u32 %v743_v10, 16  ;;  %v6424_v50 = vld [vmem:[#allocation2 + $0x6c] sm:$0xe]  ;;  %v6425_v9 = vld [vmem:[#allocation2 + $0x74] sm:$0x1]  ;;  %v12501_v55 = vpop.permute.xlu0 %1684 }
 0x194   : > { %4042 = vmatprep.mubr.bf16.mxu1 %v3796_v8  ;;  %v2521_v6 = vor.u32 %v2520_v21, %v2517_v5  ;;  %v4388_v48 = vsel %vm11107_vm7, %v9653_v36, %v4387_v62  ;;  %v4389_v37 = vrot.slane %v4387_v62, 4  ;;  %v993_v51 = vshll.u32 %v12443_v12, 16  ;;  %v12507_v21 = vld [vmem:[#allocation2 + $0xa0] sm:$0xf] }
 0x195   : > { %v2513_v38 = vrot.slane %v2511_v49, 4  ;;  %v2512_v39 = vsel %vm12034_vm6, %v2503_v13, %v2511_v49  ;;  %v997_v35 = vshrl.u32 %v12443_v12, 16  ;;  %v986_v5 = vrot.slane %v984_v18, 4  ;;  %v4438_v12 = vld [vmem:[#allocation2 + $0xa4] sm:$0x3] }
 0x196   : > { %v4391_v60 = vsel %vm11107_vm7, %v4389_v37, %v4390_v3  ;;  %v989_v63 = vrot.slane %v987_v19, 5  ;;  %v995_v62 = vrot.slane %v993_v51, 5  ;;  %v1003_v8 = vshll.u32 %v12453_v42, 16  ;;  %v10680_v37 = vld [vmem:[#allocation7 + $0x1d0] sm:$0xff]  }
 0x197   : > { %v2522_v52 = vsel %vm12034_vm6, %v2513_v38, %v2521_v6  ;;  %v12505_v32 = vcombine.low %v4388_v48, %v4391_v60  ;;  %v999_v10 = vrot.slane %v997_v35, 4  ;;  %v9760_v3 = vrot.slane %v6424_v50, 9  ;;  %v4902_v48 = vld [vmem:[#allocation2 + $0x9c] sm:$0xc]  ;;  %v12515_v60 = vld [vmem:[#allocation2 + $0x88] sm:$0xf]  ;;  %10265 = vmatprep.subr.bf16.mxu1 %v10680_v37 }
 0x198   : > { %v9569_v36 = vcombine.low %v2512_v39, %v2522_v52  ;;  %v990_v49 = vor.u32 %v989_v63, %v986_v5  ;;  %v6531_v13 = vrot.slane %v12493_v41, 5  ;;  %v6534_v6 = vrot.slane %v6425_v9, 5  ;;  %v1193_v42 = vld [vmem:[#allocation2 + $0x84] sm:$0xe]  ;;  %v12520_v9 = vld [vmem:[#allocation7 + $0x238] sm:$0xff]  }
 0x199   : > { %5119 = vrot.lane.b32.xlu0 %v12505_v32, %s10863_s23  ;;  %v1000_v19 = vor.u32 %v999_v10, %v995_v62  ;;  %v1005_v39 = vrot.slane %v1003_v8, 5  ;;  %v9670_v63 = vrot.slane %v4902_v48, 10  ;;  %v12523_v10 = vld [vmem:[#allocation2 + $0x8c] sm:$0x1]  ;;  %v1815_v8 = vpop.permute.xlu0 %1814  ;;  %v9445_v51 = vrot.slane %v1193_v42, 9  ;;  %10410 = vmatprep.subr.bf16.mxu0 %v12520_v9 }
 0x19a   : > { %v3732_v18 = vsel %vm1826_vm14, %v9569_v36, %v3527_v15  ;;  %v991_v35 = vrot.slane %v990_v49, 4  ;;  %v6532_v50 = vsel %vm11107_vm7, %v9760_v3, %v6531_v13  ;;  %v6533_v52 = vrot.slane %v6531_v13, 4  ;;  %v3009_v13 = vld [vmem:[#allocation2 + $0x74] sm:$0x1]  ;;  %v6216_v37 = vld [vmem:[#allocation2 + $0x6c] sm:$0xf] }
 0x19b   : > { %4043 = vmatmul.mubr.bf16.gmra.mxu1 %v3732_v18  ;;  %v1001_v5 = vrot.slane %v1000_v19, 4  ;;  %v5018_v15 = vrot.slane %v12507_v21, 6  ;;  %v5021_v36 = vrot.slane %v4438_v12, 6  ;;  %v1322_v3 = vrot.slane %v12515_v60, 5  ;;  %v2298_v38 = vld [vmem:[#allocation2 + $0x64] sm:$0xf] }
 0x19c   : > { %v996_v18 = vsel %vm11802_vm3, %v991_v35, %v995_v62  ;;  %v6535_v49 = vsel %vm11107_vm7, %v6533_v52, %v6534_v6  ;;  %v10682_v62 = vld [vmem:[#allocation7 + $0x190] sm:$0xff]   ;;  %v1325_v52 = vrot.slane %v12523_v10, 5  ;;  %vm10865_vm0 = vmmov 0  }
 0x19d   : > { %v1006_v48 = vsel %vm11802_vm3, %v1001_v5, %v1005_v39  ;;  %v9824_v12 = vcombine.low %v6532_v50, %v6535_v49  ;;  %v5019_v19 = vsel %vm11181_vm13, %v9670_v63, %v5018_v15  ;;  %v5020_v11 = vrot.slane %v5018_v15, 4  ;;  %v2299_v15 = vld [vmem:[#allocation2 + $0x68] sm:$0x3]  ;;  %10266 = vmatpush3.bf16.msra.mxu1 %v10682_v62 }
 0x19e   : > { %v9476_v35 = vcombine.low %v996_v18, %v1006_v48  ;;  %v1323_v6 = vsel %vm11107_vm7, %v9445_v51, %v1322_v3  ;;  %v1324_v42 = vrot.slane %v1322_v3, 4  ;;  %v3215_v50 = vsel %vm11802_vm3, %v11636_v29, %v11567_v44  ;;  %v12550_v44 = vpop.permute.xlu0 %1686 }
 0x19f   : > { %6856 = vrot.lane.b32.xlu1 %v9824_v12, %s10863_s23  ;;  %v5022_v39 = vsel %vm11181_vm13, %v5020_v11, %v5021_v36  ;;  %v3222_v5 = vshll.u32 %v3009_v13, 16  ;;  %v9792_v63 = vcombine.low %v6216_v37, %v12493_v41  ;;  %v2524_v3 = vshrl.u32 %v2297_v61, 16 }
 0x1a0   : > { %v1865_v51 = vsel %vm1826_vm14, %v9476_v35, %v12501_v55  ;;  %v9718_v18 = vcombine.low %v5019_v19, %v5022_v39  ;;  %v1326_v49 = vsel %vm11107_vm7, %v1324_v42, %v1325_v52  ;;  %v2527_v48 = vshll.u32 %v2297_v61, 16  ;;  %v4254_v55 = vld [vmem:[#allocation2 + $0xa4] sm:$0x1]  ;;  %v3689_v42 = vpop.permute.xlu1 %3688 }
 0x1a1   : > { %2188 = vmatmul.mubr.bf16.gmra.mxu0 %v1865_v51  ;;  %v9509_v11 = vcombine.low %v1323_v6, %v1326_v49  ;;  %v3224_v36 = vrot.slane %v3222_v5, 5  ;;  %v2533_v12 = vshrl.u32 %v2298_v38, 16  ;;  %v2526_v29 = vrot.slane %v2524_v3, 5  ;;  %v746_v6 = vld [vmem:[#allocation2 + $0x84] sm:$0xf] }
 0x1a2   : > { %5249 = vrot.lane.b32.xlu0 %v9718_v18, %s10863_s23  ;;  %v2536_v41 = vshll.u32 %v2298_v38, 16  ;;  %v2543_v13 = vshrl.u32 %v2299_v15, 16  ;;  %v2546_v37 = vshll.u32 %v2299_v15, 16  ;;  %v2529_v61 = vrot.slane %v2527_v48, 6 }
 0x1a3   : > { %v1933_v19 = vsel %vm1826_vm14, %v9509_v11, %v1815_v8  ;;  %v3225_v62 = vsel %vm11802_vm3, %v11648_v24, %v3224_v36  ;;  %6728 = vrot.lane.b32.xlu1 %v9792_v63, %s10863_s23  ;;  %v2535_v35 = vrot.slane %v2533_v12, 5  ;;  %v9654_v15 = vrot.slane %v4252_v30, 9  ;;  %v6426_v63 = vld [vmem:[#allocation2 + $0x78] sm:$0xe]  ;;  %v4903_v30 = vld [vmem:[#allocation2 + $0xa8] sm:$0xc] }
 0x1a4   : > { %2195 = vmatprep.mubr.bf16.mxu0 %v1933_v19  ;;  %v9602_v52 = vcombine.low %v3215_v50, %v3225_v62  ;;  %v2538_v39 = vrot.slane %v2536_v41, 6  ;;  %v2545_v5 = vrot.slane %v2543_v13, 5  ;;  %v2548_v38 = vrot.slane %v2546_v37, 6  ;;  %v12562_v41 = vld [vmem:[#allocation2 + $0x7c] sm:$0xf]  ;;  %v12564_v13 = vpop.permute.xlu0 %1816 }
 0x1a5   : > { %v2530_v51 = vor.u32 %v2529_v61, %v2526_v29  ;;  %v4394_v18 = vrot.slane %v12507_v21, 5  ;;  %v4397_v8 = vrot.slane %v4254_v55, 5  ;;  %v1008_v11 = vshrl.u32 %v746_v6, 16  ;;  %v6427_v29 = vld [vmem:[#allocation2 + $0x80] sm:$0x1] }
 0x1a6   : > { %v3800_v49 = vsel %vm1826_vm14, %v9602_v52, %v3689_v42  ;;  %v2539_v3 = vor.u32 %v2538_v39, %v2535_v35  ;;  %v2549_v24 = vor.u32 %v2548_v38, %v2545_v5  ;;  %v1011_v12 = vshll.u32 %v746_v6, 16  ;;  %v12568_v62 = vld [vmem:[#allocation2 + $0xac] sm:$0xf]  ;;  %v4439_v61 = vld [vmem:[#allocation2 + $0xb0] sm:$0x3]  ;;  %v3529_v39 = vpop.permute.xlu1 %3528 }
 0x1a7   : > { %4050 = vmatprep.mubr.bf16.mxu1 %v3800_v49  ;;  %v2531_v36 = vrot.slane %v2530_v51, 4  ;;  %v4395_v48 = vsel %vm11107_vm7, %v9654_v15, %v4394_v18  ;;  %v4396_v50 = vrot.slane %v4394_v18, 4  ;;  %v1010_v37 = vrot.slane %v1008_v11, 4  ;;  %v12579_v15 = vld [vmem:[#allocation2 + $0x94] sm:$0xf] }
 0x1a8   : > { %v2541_v21 = vrot.slane %v2539_v3, 4  ;;  %v1017_v55 = vshll.u32 %v12515_v60, 16  ;;  %v1021_v19 = vshrl.u32 %v12515_v60, 16  ;;  %v1013_v42 = vrot.slane %v1011_v12, 5 }
 0x1a9   : > { %v2540_v35 = vsel %vm12034_vm6, %v2531_v36, %v2539_v3  ;;  %v4398_v6 = vsel %vm11107_vm7, %v4396_v50, %v4397_v8  ;;  %v1027_v52 = vshll.u32 %v12523_v10, 16  ;;  %v9761_v3 = vrot.slane %v6426_v63, 9  ;;  %v1194_v36 = vld [vmem:[#allocation2 + $0x90] sm:$0xe] }
 0x1aa   : > { %v2550_v5 = vsel %vm12034_vm6, %v2541_v21, %v2549_v24  ;;  %v12577_v38 = vcombine.low %v4395_v48, %v4398_v6  ;;  %v1019_v51 = vrot.slane %v1017_v55, 5  ;;  %v1023_v60 = vrot.slane %v1021_v19, 4  ;;  %v12586_v19 = vld [vmem:[#allocation2 + $0x98] sm:$0x1] }
 0x1ab   : > { %v9570_v18 = vcombine.low %v2540_v35, %v2550_v5  ;;  %v1014_v49 = vor.u32 %v1013_v42, %v1010_v37  ;;  %v1029_v11 = vrot.slane %v1027_v52, 5  ;;  %v6538_v10 = vrot.slane %v12562_v41, 5  ;;  %v12588_v37 = vpop.permute.xlu0 %1688  ;;  %v6218_v5 = vld [vmem:[#allocation2 + $0x78] sm:$0xf] }
 0x1ac   : > { %15401 = vst [vmem:[#allocation49_spill] sm:$0xff] %v12577_v38  ;;  %5121 = vrot.lane.b32.xlu0 %v12577_v38, %s10863_s23  ;;  %v1024_v8 = vor.u32 %v1023_v60, %v1019_v51  ;;  %v6541_v50 = vrot.slane %v6427_v29, 5  ;;  %v9671_v12 = vrot.slane %v4903_v30, 10  ;;  %v5025_v21 = vrot.slane %v12568_v62, 6 }
 0x1ad   : > { %v3736_v24 = vsel %vm1826_vm14, %v9570_v18, %v3529_v39  ;;  %v1015_v48 = vrot.slane %v1014_v49, 4  ;;  %v5028_v55 = vrot.slane %v4439_v61, 6  ;;  %v6539_v35 = vsel %vm11107_vm7, %v9761_v3, %v6538_v10  ;;  %v3012_v39 = vld [vmem:[#allocation2 + $0x80] sm:$0x1]  ;;  %v15402_v3 = vld [vmem:[#allocation16_spill] sm:$0xff] }
 0x1ae   : > { %4051 = vmatmul.mubr.bf16.gmra.mxu1 %v3736_v24  ;;  %v1025_v63 = vrot.slane %v1024_v8, 4  ;;  %v6540_v6 = vrot.slane %v6538_v10, 4  ;;  %v9446_v42 = vrot.slane %v1194_v36, 9  ;;  %v5026_v30 = vsel %vm11181_vm13, %v9671_v12, %v5025_v21  ;;  %v2300_v36 = vld [vmem:[#allocation2 + $0x6c] sm:$0xe] }
 0x1af   : > { %v1020_v29 = vsel %vm11802_vm3, %v1015_v48, %v1019_v51  ;;  %v5027_v52 = vrot.slane %v5025_v21, 4  ;;  %v1329_v61 = vrot.slane %v12579_v15, 5  ;;  %v1332_v49 = vrot.slane %v12586_v19, 5  ;;  %v2301_v8 = vld [vmem:[#allocation2 + $0x70] sm:$0xf] }
 0x1b0   : > { %v1030_v60 = vsel %vm11802_vm3, %v1025_v63, %v1029_v11  ;;  %v6542_v18 = vsel %vm11107_vm7, %v6540_v6, %v6541_v50  ;;  %v3239_v51 = vsel %vm11802_vm3, %v15402_v3, %v11613_v43  ;;  %v2302_v48 = vld [vmem:[#allocation2 + $0x74] sm:$0x3]  ;;  %v3246_v63 = vshll.u32 %v3012_v39, 16  ;;  %v3691_v3 = vpop.permute.xlu1 %3690 }
 0x1b1   : > { %v9477_v10 = vcombine.low %v1020_v29, %v1030_v60  ;;  %v9825_v12 = vcombine.low %v6539_v35, %v6542_v18  ;;  %v5029_v24 = vsel %vm11181_vm13, %v5027_v52, %v5028_v55  ;;  %v1330_v11 = vsel %vm11107_vm7, %v9446_v42, %v1329_v61  ;;  %v12614_v60 = vpop.permute.xlu0 %1818  ;;  %v4257_v18 = vld [vmem:[#allocation2 + $0xb0] sm:$0x1] }
 0x1b2   : > { %v9719_v21 = vcombine.low %v5026_v30, %v5029_v24  ;;  %v1331_v50 = vrot.slane %v1329_v61, 4  ;;  %v9793_v6 = vcombine.low %v6218_v5, %v12562_v41  ;;  %v2552_v43 = vshrl.u32 %v2300_v36, 16  ;;  %v4255_v41 = vld [vmem:[#allocation2 + $0xa8] sm:$0xe] }
 0x1b3   : > { %v1869_v17 = vsel %vm1826_vm14, %v9477_v10, %v12550_v44  ;;  %6858 = vrot.lane.b32.xlu1 %v9825_v12, %s10863_s23  ;;  %v2555_v29 = vshll.u32 %v2300_v36, 16  ;;  %v2561_v35 = vshrl.u32 %v2301_v8, 16  ;;  %v3248_v42 = vrot.slane %v3246_v63, 5  ;;  %v15403_v36 = vld [vmem:[#allocation18_spill] sm:$0xff] }
 0x1b4   : > { %2196 = vmatmul.mubr.bf16.gmra.mxu0 %v1869_v17  ;;  %5251 = vrot.lane.b32.xlu0 %v9719_v21, %s10863_s23  ;;  %v1333_v55 = vsel %vm11107_vm7, %v1331_v50, %v1332_v49  ;;  %v2564_v30 = vshll.u32 %v2301_v8, 16  ;;  %v2571_v52 = vshrl.u32 %v2302_v48, 16  ;;  %v2554_v39 = vrot.slane %v2552_v43, 5  ;;  %v749_v21 = vld [vmem:[#allocation2 + $0x90] sm:$0xf] }
 0x1b5   : > { %v9510_v61 = vcombine.low %v1330_v11, %v1333_v55  ;;  %v2557_v44 = vrot.slane %v2555_v29, 6  ;;  %v2563_v5 = vrot.slane %v2561_v35, 5  ;;  %v3249_v10 = vsel %vm11802_vm3, %v15403_v36, %v3248_v42  ;;  %v12627_v36 = vpop.permute.xlu0 %1690 }
 0x1b6   : > { %v2566_v17 = vrot.slane %v2564_v30, 6  ;;  %v2573_v12 = vrot.slane %v2571_v52, 5  ;;  %v2574_v24 = vshll.u32 %v2302_v48, 16  ;;  %v9603_v8 = vcombine.low %v3239_v51, %v3249_v10  ;;  %v10685_v52 = vld [vmem:[#allocation7 + $0x1c8] sm:$0xff]   ;;  %v3531_v10 = vpop.permute.xlu1 %3530 }
 0x1b7   : > { %v1937_v49 = vsel %vm1826_vm14, %v9510_v61, %v12564_v13  ;;  %6730 = vrot.lane.b32.xlu1 %v9793_v6, %s10863_s23  ;;  %v2558_v11 = vor.u32 %v2557_v44, %v2554_v39  ;;  %v9655_v50 = vrot.slane %v4255_v41, 9  ;;  %v4401_v29 = vrot.slane %v12568_v62, 5  ;;  %v12631_v61 = vld [vmem:[#allocation2 + $0x88] sm:$0xf]  ;;  %v6428_v39 = vld [vmem:[#allocation2 + $0x84] sm:$0xe]  ;;  %10267 = vmatprep.subr.bf16.mxu1 %v10685_v52 }
 0x1b8   : > { %2203 = vmatprep.mubr.bf16.mxu0 %v1937_v49  ;;  %v2567_v63 = vor.u32 %v2566_v17, %v2563_v5  ;;  %v2576_v43 = vrot.slane %v2574_v24, 6  ;;  %v4404_v35 = vrot.slane %v4257_v18, 5  ;;  %v3804_v55 = vsel %vm1826_vm14, %v9603_v8, %v3691_v3  ;;  %v6429_v3 = vld [vmem:[#allocation2 + $0x8c] sm:$0x1]  ;;  %v12642_v49 = vld [vmem:[#allocation2 + $0xb8] sm:$0xf] }
 0x1b9   : > { %v2559_v42 = vrot.slane %v2558_v11, 4  ;;  %v1032_v30 = vshrl.u32 %v749_v21, 16  ;;  %v1035_v48 = vshll.u32 %v749_v21, 16  ;;  %4058 = vmatprep.mubr.bf16.mxu1 %v3804_v55  ;;  %v4402_v6 = vsel %vm11107_vm7, %v9655_v50, %v4401_v29  ;;  %v4904_v8 = vld [vmem:[#allocation2 + $0xb4] sm:$0xc] }
 0x1ba   : > { %v2569_v13 = vrot.slane %v2567_v63, 4  ;;  %v2577_v51 = vor.u32 %v2576_v43, %v2573_v12  ;;  %v4403_v41 = vrot.slane %v4401_v29, 4  ;;  %v1041_v18 = vshll.u32 %v12579_v15, 16  ;;  %v4440_v29 = vld [vmem:[#allocation2 + $0xbc] sm:$0x3] }
 0x1bb   : > { %v2568_v62 = vsel %vm12034_vm6, %v2559_v42, %v2567_v63  ;;  %v1034_v44 = vrot.slane %v1032_v30, 4  ;;  %v1037_v5 = vrot.slane %v1035_v48, 5  ;;  %v1045_v24 = vshrl.u32 %v12579_v15, 16  ;;  %v12646_v55 = vld [vmem:[#allocation2 + $0xa0] sm:$0xf]  ;;  %v10687_v42 = vld [vmem:[#allocation7 + $0x188] sm:$0xff]  }
 0x1bc   : > { %v2578_v17 = vsel %vm12034_vm6, %v2569_v13, %v2577_v51  ;;  %v4405_v12 = vsel %vm11107_vm7, %v4403_v41, %v4404_v35  ;;  %v1051_v21 = vshll.u32 %v12586_v19, 16  ;;  %v1043_v43 = vrot.slane %v1041_v18, 5  ;;  %v12649_v15 = vld [vmem:[#allocation2 + $0xa4] sm:$0x1]  ;;  %v1195_v19 = vld [vmem:[#allocation2 + $0x9c] sm:$0xe]  ;;  %10268 = vmatpush3.bf16.msra.mxu1 %v10687_v42 }
 0x1bd   : > { %v9571_v11 = vcombine.low %v2568_v62, %v2578_v17  ;;  %v12644_v50 = vcombine.low %v4402_v6, %v4405_v12  ;;  %v1038_v63 = vor.u32 %v1037_v5, %v1034_v44  ;;  %v1047_v30 = vrot.slane %v1045_v24, 4  ;;  %v3015_v62 = vld [vmem:[#allocation2 + $0x8c] sm:$0x1]  ;;  %v12654_v44 = vpop.permute.xlu0 %1820  ;;  %v6220_v12 = vld [vmem:[#allocation2 + $0x84] sm:$0xf] }
 0x1be   : > { %v1053_v48 = vrot.slane %v1051_v21, 5  ;;  %v9762_v52 = vrot.slane %v6428_v39, 9  ;;  %v6545_v35 = vrot.slane %v12631_v61, 5  ;;  %v6548_v6 = vrot.slane %v6429_v3, 5 }
 0x1bf   : > { %15404 = vst [vmem:[#allocation16_spill] sm:$0xff] %v12644_v50  ;;  %v3740_v13 = vsel %vm1826_vm14, %v9571_v11, %v3531_v10  ;;  %5123 = vrot.lane.b32.xlu0 %v12644_v50, %s10863_s23  ;;  %v1039_v51 = vrot.slane %v1038_v63, 4  ;;  %v9672_v41 = vrot.slane %v4904_v8, 10  ;;  %v1048_v5 = vor.u32 %v1047_v30, %v1043_v43 }
 0x1c0   : > { %4059 = vmatmul.mubr.bf16.gmra.mxu1 %v3740_v13  ;;  %v6546_v39 = vsel %vm11107_vm7, %v9762_v52, %v6545_v35  ;;  %v6547_v18 = vrot.slane %v6545_v35, 4  ;;  %v5032_v17 = vrot.slane %v12642_v49, 6  ;;  %v5035_v24 = vrot.slane %v4440_v29, 6 }
 0x1c1   : > { %v1044_v10 = vsel %vm11802_vm3, %v1039_v51, %v1043_v43  ;;  %v9447_v21 = vrot.slane %v1195_v19, 9  ;;  %v1336_v3 = vrot.slane %v12646_v55, 5  ;;  %v1049_v8 = vrot.slane %v1048_v5, 4  ;;  %v2303_v43 = vld [vmem:[#allocation2 + $0x78] sm:$0xe] }
 0x1c2   : > { %v6549_v11 = vsel %vm11107_vm7, %v6547_v18, %v6548_v6  ;;  %v5033_v63 = vsel %vm11181_vm13, %v9672_v41, %v5032_v17  ;;  %v5034_v42 = vrot.slane %v5032_v17, 4  ;;  %v1339_v13 = vrot.slane %v12649_v15, 5  ;;  %v15405_v51 = vld [vmem:[#allocation17_spill] sm:$0xff]  ;;  %v15406_v6 = vld [vmem:[#allocation19_spill] sm:$0xff]  ;;  %v2305_v18 = vld [vmem:[#allocation2 + $0x80] sm:$0x3] }
 0x1c3   : > { %v9826_v30 = vcombine.low %v6546_v39, %v6549_v11  ;;  %v1337_v52 = vsel %vm11107_vm7, %v9447_v21, %v1336_v3  ;;  %v1338_v35 = vrot.slane %v1336_v3, 4  ;;  %v1054_v29 = vsel %vm11802_vm3, %v1049_v8, %v1053_v48  ;;  %v2304_v39 = vld [vmem:[#allocation2 + $0x7c] sm:$0xf]  ;;  %v12681_v8 = vpop.permute.xlu0 %1692 }
 0x1c4   : > { %v5036_v19 = vsel %vm11181_vm13, %v5034_v42, %v5035_v24  ;;  %v3263_v41 = vsel %vm11802_vm3, %v15406_v6, %v15405_v51  ;;  %v3270_v5 = vshll.u32 %v3015_v62, 16  ;;  %v9478_v17 = vcombine.low %v1044_v10, %v1054_v29 }
 0x1c5   : > { %6860 = vrot.lane.b32.xlu1 %v9826_v30, %s10863_s23  ;;  %v9720_v21 = vcombine.low %v5033_v63, %v5036_v19  ;;  %v1340_v3 = vsel %vm11107_vm7, %v1338_v35, %v1339_v13  ;;  %v9794_v48 = vcombine.low %v6220_v12, %v12631_v61  ;;  %v2580_v42 = vshrl.u32 %v2303_v43, 16  ;;  %v4258_v63 = vld [vmem:[#allocation2 + $0xb4] sm:$0xe]  ;;  %v15407_v61 = vld [vmem:[#allocation21_spill] sm:$0xff] }
 0x1c6   : > { %v9511_v24 = vcombine.low %v1337_v52, %v1340_v3  ;;  %v3272_v11 = vrot.slane %v3270_v5, 5  ;;  %v2583_v33 = vshll.u32 %v2303_v43, 16  ;;  %v1873_v62 = vsel %vm1826_vm14, %v9478_v17, %v12588_v37  ;;  %v4260_v43 = vld [vmem:[#allocation2 + $0xbc] sm:$0x1] }
 0x1c7   : > { %5253 = vrot.lane.b32.xlu0 %v9720_v21, %s10863_s23  ;;  %v2589_v10 = vshrl.u32 %v2304_v39, 16  ;;  %v2592_v29 = vshll.u32 %v2304_v39, 16  ;;  %v2599_v30 = vshrl.u32 %v2305_v18, 16  ;;  %2204 = vmatmul.mubr.bf16.gmra.mxu0 %v1873_v62  ;;  %v2582_v52 = vrot.slane %v2580_v42, 5  ;;  %v752_v19 = vld [vmem:[#allocation2 + $0x9c] sm:$0xf]  ;;  %v3693_v39 = vpop.permute.xlu1 %3692 }
 0x1c8   : > { %v1941_v35 = vsel %vm1826_vm14, %v9511_v24, %v12614_v60  ;;  %v3273_v12 = vsel %vm11802_vm3, %v15407_v61, %v3272_v11  ;;  %v2585_v13 = vrot.slane %v2583_v33, 6  ;;  %v2602_v21 = vshll.u32 %v2305_v18, 16  ;;  %v10689_v24 = vld [vmem:[#allocation7 + $0x1c0] sm:$0xff]   ;;  %v12694_v61 = vpop.permute.xlu0 %1822 }
 0x1c9   : > { %2211 = vmatprep.mubr.bf16.mxu0 %v1941_v35  ;;  %v9604_v37 = vcombine.low %v3263_v41, %v3273_v12  ;;  %6732 = vrot.lane.b32.xlu1 %v9794_v48, %s10863_s23  ;;  %v2591_v51 = vrot.slane %v2589_v10, 5  ;;  %v2594_v6 = vrot.slane %v2592_v29, 6  ;;  %v2601_v5 = vrot.slane %v2599_v30, 5  ;;  %v12698_v30 = vld [vmem:[#allocation2 + $0x94] sm:$0xf] }
 0x1ca   : > { %v2586_v17 = vor.u32 %v2585_v13, %v2582_v52  ;;  %v9656_v3 = vrot.slane %v4258_v63, 9  ;;  %v4408_v60 = vrot.slane %v12642_v49, 5  ;;  %v4411_v33 = vrot.slane %v4260_v43, 5  ;;  %10269 = vmatprep.subr.bf16.mxu1 %v10689_v24  ;;  %v10691_v18 = vld [vmem:[#allocation7 + $0x180] sm:$0xff]  }
 0x1cb   : > { %v3808_v11 = vsel %vm1826_vm14, %v9604_v37, %v3693_v39  ;;  %v2595_v42 = vor.u32 %v2594_v6, %v2591_v51  ;;  %v1056_v62 = vshrl.u32 %v752_v19, 16  ;;  %v2604_v48 = vrot.slane %v2602_v21, 6  ;;  %v6430_v52 = vld [vmem:[#allocation2 + $0x90] sm:$0xe]  ;;  %v6431_v6 = vld [vmem:[#allocation2 + $0x98] sm:$0x1]  ;;  %10270 = vmatpush3.bf16.msra.mxu1 %v10691_v18  ;;  %v3533_v24 = vpop.permute.xlu1 %3532 }
 0x1cc   : > { %4066 = vmatprep.mubr.bf16.mxu1 %v3808_v11  ;;  %v2587_v41 = vrot.slane %v2586_v17, 4  ;;  %v4409_v10 = vsel %vm11107_vm7, %v9656_v3, %v4408_v60  ;;  %v4410_v29 = vrot.slane %v4408_v60, 4  ;;  %v1059_v35 = vshll.u32 %v752_v19, 16  ;;  %v12706_v39 = vld [vmem:[#allocation2 + $0xc4] sm:$0xf]  ;;  %10499 = vmatprep.subr.bf16.mxu1 %v12520_v9  ;;  %v12719_v9 = vpop.permute.xlu0 %1694 }
 0x1cd   : > { %v2597_v49 = vrot.slane %v2595_v42, 4  ;;  %v1058_v63 = vrot.slane %v1056_v62, 4  ;;  %v1065_v12 = vshll.u32 %v12646_v55, 16  ;;  %v2605_v43 = vor.u32 %v2604_v48, %v2601_v5  ;;  %v4905_v60 = vld [vmem:[#allocation2 + $0xc0] sm:$0xc] }
 0x1ce   : > { %v2596_v13 = vsel %vm12034_vm6, %v2587_v41, %v2595_v42  ;;  %v4412_v37 = vsel %vm11107_vm7, %v4410_v29, %v4411_v33  ;;  %v1069_v51 = vshrl.u32 %v12646_v55, 16  ;;  %v1061_v21 = vrot.slane %v1059_v35, 5  ;;  %v4441_v33 = vld [vmem:[#allocation2 + $0xc8] sm:$0x3] }
 0x1cf   : > { %v12708_v17 = vcombine.low %v4409_v10, %v4412_v37  ;;  %v1067_v19 = vrot.slane %v1065_v12, 5  ;;  %v1075_v3 = vshll.u32 %v12649_v15, 16  ;;  %v2606_v5 = vsel %vm12034_vm6, %v2597_v49, %v2605_v43  ;;  %v12717_v15 = vld [vmem:[#allocation2 + $0xac] sm:$0xf]  ;;  %v1196_v29 = vld [vmem:[#allocation2 + $0xa8] sm:$0xe] }
 0x1d0   : > { %v1071_v11 = vrot.slane %v1069_v51, 4  ;;  %v9763_v42 = vrot.slane %v6430_v52, 9  ;;  %v6552_v55 = vrot.slane %v12698_v30, 5  ;;  %v9572_v62 = vcombine.low %v2596_v13, %v2606_v5  ;;  %v757_v52 = vld [vmem:[#allocation2 + $0xb0] sm:$0x1] }
 0x1d1   : > { %15408 = vst [vmem:[#allocation18_spill] sm:$0xff] %v12708_v17  ;;  %5125 = vrot.lane.b32.xlu0 %v12708_v17, %s10863_s23  ;;  %v1062_v41 = vor.u32 %v1061_v21, %v1058_v63  ;;  %v1077_v48 = vrot.slane %v1075_v3, 5  ;;  %v6555_v10 = vrot.slane %v6431_v6, 5  ;;  %v9673_v12 = vrot.slane %v4905_v60, 10  ;;  %v6222_v51 = vld [vmem:[#allocation2 + $0x90] sm:$0xf] }
 0x1d2   : > { %v1072_v18 = vor.u32 %v1071_v11, %v1067_v19  ;;  %v6553_v49 = vsel %vm11107_vm7, %v9763_v42, %v6552_v55  ;;  %v6554_v35 = vrot.slane %v6552_v55, 4  ;;  %v3744_v13 = vsel %vm1826_vm14, %v9572_v62, %v3533_v24  ;;  %v4261_v11 = vld [vmem:[#allocation2 + $0xc0] sm:$0xe]  ;;  %v12732_v62 = vpop.permute.xlu1 %5227  ;;  %v6224_v17 = vld [vmem:[#allocation2 + $0x9c] sm:$0xf] }
 0x1d3   : > { %v1063_v43 = vrot.slane %v1062_v41, 4  ;;  %v5039_v37 = vrot.slane %v12706_v39, 6  ;;  %v5042_v63 = vrot.slane %v4441_v33, 6  ;;  %4067 = vmatmul.mubr.bf16.gmra.mxu1 %v3744_v13  ;;  %v9448_v3 = vrot.slane %v1196_v29, 9  ;;  %v4263_v33 = vld [vmem:[#allocation2 + $0xc8] sm:$0x1] }
 0x1d4   : > { %v1073_v6 = vrot.slane %v1072_v18, 4  ;;  %v6556_v21 = vsel %vm11107_vm7, %v6554_v35, %v6555_v10  ;;  %v1343_v5 = vrot.slane %v12717_v15, 5  ;;  %v755_v41 = vld [vmem:[#allocation2 + $0xa8] sm:$0xf]  ;;  %v1346_v35 = vrot.slane %v757_v52, 5 }
 0x1d5   : > { %v1068_v60 = vsel %vm11802_vm3, %v1063_v43, %v1067_v19  ;;  %v9827_v42 = vcombine.low %v6553_v49, %v6556_v21  ;;  %v5040_v24 = vsel %vm11181_vm13, %v9673_v12, %v5039_v37  ;;  %v5041_v55 = vrot.slane %v5039_v37, 4  ;;  %v12742_v43 = vpop.permute.xlu0 %1824 }
 0x1d6   : > { %v1078_v18 = vsel %vm11802_vm3, %v1073_v6, %v1077_v48  ;;  %v1344_v10 = vsel %vm11107_vm7, %v9448_v3, %v1343_v5  ;;  %v1345_v29 = vrot.slane %v1343_v5, 4  ;;  %v9795_v49 = vcombine.low %v6222_v51, %v12698_v30 }
 0x1d7   : > { %v9479_v13 = vcombine.low %v1068_v60, %v1078_v18  ;;  %6862 = vrot.lane.b32.xlu1 %v9827_v42, %s10863_s23  ;;  %v5043_v19 = vsel %vm11181_vm13, %v5041_v55, %v5042_v63  ;;  %v9657_v12 = vrot.slane %v4261_v11, 9  ;;  %v4415_v6 = vrot.slane %v12706_v39, 5  ;;  %v3018_v18 = vld [vmem:[#allocation2 + $0x98] sm:$0x1]  ;;  %v12749_v63 = vld [vmem:[#allocation2 + $0xa0] sm:$0xf] }
 0x1d8   : > { %v9721_v37 = vcombine.low %v5040_v24, %v5043_v19  ;;  %v1347_v48 = vsel %vm11107_vm7, %v1345_v29, %v1346_v35  ;;  %v4418_v21 = vrot.slane %v4263_v33, 5  ;;  %v1080_v60 = vshrl.u32 %v755_v41, 16  ;;  %v6432_v24 = vld [vmem:[#allocation2 + $0x9c] sm:$0xe]  ;;  %v6433_v29 = vld [vmem:[#allocation2 + $0xa4] sm:$0x1] }
 0x1d9   : > { %v1877_v3 = vsel %vm1826_vm14, %v9479_v13, %v12627_v36  ;;  %v9512_v5 = vcombine.low %v1344_v10, %v1347_v48  ;;  %v1083_v42 = vshll.u32 %v755_v41, 16  ;;  %v4416_v30 = vsel %vm11107_vm7, %v9657_v12, %v4415_v6  ;;  %v5100_v10 = vpop.permute.xlu1 %5099  ;;  %v15409_v12 = vld [vmem:[#allocation26_spill] sm:$0xff] }
 0x1da   : > { %2212 = vmatmul.mubr.bf16.gmra.mxu0 %v1877_v3  ;;  %5255 = vrot.lane.b32.xlu0 %v9721_v37, %s10863_s23  ;;  %v4417_v51 = vrot.slane %v4415_v6, 4  ;;  %v1089_v11 = vshll.u32 %v12717_v15, 16  ;;  %v1093_v39 = vshrl.u32 %v12717_v15, 16  ;;  %v1082_v55 = vrot.slane %v1080_v60, 4  ;;  %v12765_v37 = vld [vmem:[#allocation2 + $0xd0] sm:$0xf]  ;;  %v12773_v60 = vpop.permute.xlu0 %1696 }
 0x1db   : > { %v1945_v36 = vsel %vm1826_vm14, %v9512_v5, %v12654_v44  ;;  %6734 = vrot.lane.b32.xlu1 %v9795_v49, %s10863_s23  ;;  %v1085_v33 = vrot.slane %v1083_v42, 5  ;;  %v1099_v41 = vshll.u32 %v757_v52, 16  ;;  %v12763_v15 = vsel %vm1826_vm14, %v15409_v12, %v5100_v10  ;;  %v4906_v44 = vld [vmem:[#allocation2 + $0xcc] sm:$0xc]  ;;  %v15411_v52 = vld [vmem:[#allocation22_spill] sm:$0xff]  ;;  %v15412_v3 = vld [vmem:[#allocation24_spill] sm:$0xff] }
 0x1dc   : > { %2219 = vmatprep.mubr.bf16.mxu0 %v1945_v36  ;;  %v4419_v35 = vsel %vm11107_vm7, %v4417_v51, %v4418_v21  ;;  %v1091_v13 = vrot.slane %v1089_v11, 5  ;;  %v1095_v19 = vrot.slane %v1093_v39, 4  ;;  %v3287_v5 = vsel %vm11802_vm3, %v15412_v3, %v15411_v52  ;;  %v4442_v39 = vld [vmem:[#allocation2 + $0xd4] sm:$0x3]  ;;  %v2306_v3 = vld [vmem:[#allocation2 + $0x84] sm:$0xe] }
 0x1dd   : > { %v12767_v48 = vcombine.low %v4416_v30, %v4419_v35  ;;  %v1086_v49 = vor.u32 %v1085_v33, %v1082_v55  ;;  %v1101_v6 = vrot.slane %v1099_v41, 5  ;;  %v3294_v42 = vshll.u32 %v3018_v18, 16  ;;  %v1197_v41 = vld [vmem:[#allocation2 + $0xb4] sm:$0xe]  ;;  %v12781_v18 = vld [vmem:[#allocation2 + $0xb8] sm:$0xf] }
 0x1de   : > { %v1096_v21 = vor.u32 %v1095_v19, %v1091_v13  ;;  %v9764_v51 = vrot.slane %v6432_v24, 9  ;;  %v6559_v11 = vrot.slane %v12749_v63, 5  ;;  %v6562_v36 = vrot.slane %v6433_v29, 5  ;;  %v3695_v50 = vpop.permute.xlu0 %3694 }
 0x1df   : > { %15410 = vst [vmem:[#allocation17_spill] sm:$0xff] %v12767_v48  ;;  %5127 = vrot.lane.b32.xlu0 %v12767_v48, %s10863_s23  ;;  %v1087_v30 = vrot.slane %v1086_v49, 4  ;;  %v9674_v55 = vrot.slane %v4906_v44, 10  ;;  %v5046_v33 = vrot.slane %v12765_v37, 6  ;;  %v3296_v35 = vrot.slane %v3294_v42, 5  ;;  %v15413_v42 = vld [vmem:[#allocation25_spill] sm:$0xff] }
 0x1e0   : > { %v1097_v10 = vrot.slane %v1096_v21, 4  ;;  %v6560_v12 = vsel %vm11107_vm7, %v9764_v51, %v6559_v11  ;;  %v6561_v19 = vrot.slane %v6559_v11, 4  ;;  %v5049_v29 = vrot.slane %v4442_v39, 6  ;;  %v12787_v44 = vld [vmem:[#allocation2 + $0xbc] sm:$0x1] }
 0x1e1   : > { %v1092_v24 = vsel %vm11802_vm3, %v1087_v30, %v1091_v13  ;;  %v5047_v52 = vsel %vm11181_vm13, %v9674_v55, %v5046_v33  ;;  %v5048_v49 = vrot.slane %v5046_v33, 4  ;;  %v3297_v51 = vsel %vm11802_vm3, %v15413_v42, %v3296_v35  ;;  %v2307_v13 = vld [vmem:[#allocation2 + $0x88] sm:$0xf]  ;;  %v2308_v33 = vld [vmem:[#allocation2 + $0x8c] sm:$0x3] }
 0x1e2   : > { %v1102_v21 = vsel %vm11802_vm3, %v1097_v10, %v1101_v6  ;;  %v6563_v11 = vsel %vm11107_vm7, %v6561_v19, %v6562_v36  ;;  %v9449_v59 = vrot.slane %v1197_v41, 9  ;;  %v9605_v48 = vcombine.low %v3287_v5, %v3297_v51  ;;  %v4264_v42 = vld [vmem:[#allocation2 + $0xcc] sm:$0xe]  ;;  %v4266_v19 = vld [vmem:[#allocation2 + $0xd4] sm:$0x1] }
 0x1e3   : > { %v9480_v30 = vcombine.low %v1092_v24, %v1102_v21  ;;  %v9828_v55 = vcombine.low %v6560_v12, %v6563_v11  ;;  %v5050_v39 = vsel %vm11181_vm13, %v5048_v49, %v5049_v29  ;;  %v1350_v6 = vrot.slane %v12781_v18, 5 }
 0x1e4   : > { %v9722_v38 = vcombine.low %v5047_v52, %v5050_v39  ;;  %v1353_v10 = vrot.slane %v12787_v44, 5  ;;  %v2608_v35 = vshrl.u32 %v2306_v3, 16  ;;  %v3812_v41 = vsel %vm1826_vm14, %v9605_v48, %v3695_v50  ;;  %v758_v50 = vld [vmem:[#allocation2 + $0xb4] sm:$0xf] }
 0x1e5   : > { %v1881_v36 = vsel %vm1826_vm14, %v9480_v30, %v12681_v8  ;;  %6864 = vrot.lane.b32.xlu1 %v9828_v55, %s10863_s23  ;;  %v2611_v5 = vshll.u32 %v2306_v3, 16  ;;  %v2617_v12 = vshrl.u32 %v2307_v13, 16  ;;  %4074 = vmatprep.mubr.bf16.mxu1 %v3812_v41  ;;  %v1351_v24 = vsel %vm11107_vm7, %v9449_v59, %v1350_v6 }
 0x1e6   : > { %2220 = vmatmul.mubr.bf16.gmra.mxu0 %v1881_v36  ;;  %v1352_v52 = vrot.slane %v1350_v6, 4  ;;  %v2610_v49 = vrot.slane %v2608_v35, 5  ;;  %v2620_v29 = vshll.u32 %v2307_v13, 16  ;;  %5257 = vrot.lane.b32.xlu0 %v9722_v38, %s10863_s23  ;;  %v2627_v8 = vshrl.u32 %v2308_v33, 16 }
 0x1e7   : > { %v2613_v21 = vrot.slane %v2611_v5, 6  ;;  %v2619_v51 = vrot.slane %v2617_v12, 5  ;;  %v2630_v11 = vshll.u32 %v2308_v33, 16  ;;  %v9796_v30 = vcombine.low %v6224_v17, %v12749_v63 }
 0x1e8   : > { %v1354_v48 = vsel %vm11107_vm7, %v1352_v52, %v1353_v10  ;;  %v2622_v3 = vrot.slane %v2620_v29, 6  ;;  %v9658_v55 = vrot.slane %v4264_v42, 9  ;;  %v2629_v59 = vrot.slane %v2627_v8, 5  ;;  %v3021_v52 = vld [vmem:[#allocation2 + $0xa4] sm:$0x1]  ;;  %v3535_v8 = vpop.permute.xlu0 %3534 }
 0x1e9   : > { %v9513_v39 = vcombine.low %v1351_v24, %v1354_v48  ;;  %v2614_v36 = vor.u32 %v2613_v21, %v2610_v49  ;;  %v2632_v6 = vrot.slane %v2630_v11, 6  ;;  %6736 = vrot.lane.b32.xlu1 %v9796_v30, %s10863_s23  ;;  %v4422_v38 = vrot.slane %v12765_v37, 5  ;;  %v12816_v49 = vld [vmem:[#allocation2 + $0xac] sm:$0xf]  ;;  %v6434_v29 = vld [vmem:[#allocation2 + $0xa8] sm:$0xe] }
 0x1ea   : > { %v2623_v35 = vor.u32 %v2622_v3, %v2619_v51  ;;  %v4425_v13 = vrot.slane %v4266_v19, 5  ;;  %v1104_v41 = vshrl.u32 %v758_v50, 16  ;;  %v1107_v12 = vshll.u32 %v758_v50, 16  ;;  %v6435_v51 = vld [vmem:[#allocation2 + $0xb0] sm:$0x1]  ;;  %v15415_v30 = vld [vmem:[#allocation30_spill] sm:$0xff] }
 0x1eb   : > { %v1949_v33 = vsel %vm1826_vm14, %v9513_v39, %v12694_v61  ;;  %v2615_v5 = vrot.slane %v2614_v36, 4  ;;  %v2633_v10 = vor.u32 %v2632_v6, %v2629_v59  ;;  %v4423_v63 = vsel %vm11107_vm7, %v9658_v55, %v4422_v38  ;;  %v15414_v3 = vld [vmem:[#allocation28_spill] sm:$0xff]  ;;  %v12833_v6 = vld [vmem:[#allocation2 + $0xc4] sm:$0xf] }
 0x1ec   : > { %2227 = vmatprep.mubr.bf16.mxu0 %v1949_v33  ;;  %v2625_v17 = vrot.slane %v2623_v35, 4  ;;  %v4424_v42 = vrot.slane %v4422_v38, 4  ;;  %v1106_v24 = vrot.slane %v1104_v41, 4  ;;  %v1109_v19 = vrot.slane %v1107_v12, 5 }
 0x1ed   : > { %v2624_v37 = vsel %vm12034_vm6, %v2615_v5, %v2623_v35  ;;  %v1113_v61 = vshll.u32 %v12781_v18, 16  ;;  %v1117_v21 = vshrl.u32 %v12781_v18, 16  ;;  %v1123_v48 = vshll.u32 %v12787_v44, 16  ;;  %v1198_v35 = vld [vmem:[#allocation2 + $0xc0] sm:$0xe] }
 0x1ee   : > { %v2634_v11 = vsel %vm12034_vm6, %v2625_v17, %v2633_v10  ;;  %v4426_v50 = vsel %vm11107_vm7, %v4424_v42, %v4425_v13  ;;  %v3311_v55 = vsel %vm11802_vm3, %v15415_v30, %v15414_v3  ;;  %v1110_v59 = vor.u32 %v1109_v19, %v1106_v24  ;;  %v12835_v13 = vld [vmem:[#allocation2 + $0xc8] sm:$0x1]  ;;  %v2309_v19 = vld [vmem:[#allocation2 + $0x90] sm:$0xe] }
 0x1ef   : > { %v9573_v39 = vcombine.low %v2624_v37, %v2634_v11  ;;  %v12831_v36 = vcombine.low %v4423_v63, %v4426_v50  ;;  %v1115_v18 = vrot.slane %v1113_v61, 5  ;;  %v1119_v38 = vrot.slane %v1117_v21, 4  ;;  %v15417_v50 = vld [vmem:[#allocation33_spill] sm:$0xff] }
 0x1f0   : > { %v1125_v41 = vrot.slane %v1123_v48, 5  ;;  %v3318_v33 = vshll.u32 %v3021_v52, 16  ;;  %v9765_v5 = vrot.slane %v6434_v29, 9  ;;  %v1111_v10 = vrot.slane %v1110_v59, 4  ;;  %v2311_v59 = vld [vmem:[#allocation2 + $0x98] sm:$0x3] }
 0x1f1   : > { %15416 = vst [vmem:[#allocation19_spill] sm:$0xff] %v12831_v36  ;;  %v3748_v44 = vsel %vm1826_vm14, %v9573_v39, %v3535_v8  ;;  %5129 = vrot.lane.b32.xlu0 %v12831_v36, %s10863_s23  ;;  %v6566_v12 = vrot.slane %v12816_v49, 5  ;;  %v6569_v17 = vrot.slane %v6435_v51, 5  ;;  %v1120_v63 = vor.u32 %v1119_v38, %v1115_v18  ;;  %v2310_v8 = vld [vmem:[#allocation2 + $0x94] sm:$0xf]  ;;  %v3697_v38 = vpop.permute.xlu0 %3696 }
 0x1f2   : > { %4075 = vmatmul.mubr.bf16.gmra.mxu1 %v3748_v44  ;;  %v3320_v42 = vrot.slane %v3318_v33, 5  ;;  %v9450_v24 = vrot.slane %v1198_v35, 9  ;;  %v1357_v37 = vrot.slane %v12833_v6, 5  ;;  %v1116_v52 = vsel %vm11802_vm3, %v1111_v10, %v1115_v18  ;;  %v3033_v36 = vld [vmem:[#allocation2 + $0xd4] sm:$0x1] }
 0x1f3   : > { %v6567_v29 = vsel %vm11107_vm7, %v9765_v5, %v6566_v12  ;;  %v6568_v61 = vrot.slane %v6566_v12, 4  ;;  %v1360_v21 = vrot.slane %v12835_v13, 5  ;;  %v1121_v11 = vrot.slane %v1120_v63, 4  ;;  %v7887_v12 = vld [vmem:[#allocation2 + $0x30] sm:$0xc] }
 0x1f4   : > { %v3321_v51 = vsel %vm11802_vm3, %v15417_v50, %v3320_v42  ;;  %v1358_v48 = vsel %vm11107_vm7, %v9450_v24, %v1357_v37  ;;  %v1359_v3 = vrot.slane %v1357_v37, 4  ;;  %v2636_v18 = vshrl.u32 %v2309_v19, 16  ;;  %v7888_v63 = vld [vmem:[#allocation2 + $0x34] sm:$0xf] }
 0x1f5   : > { %v9606_v30 = vcombine.low %v3311_v55, %v3321_v51  ;;  %v6570_v39 = vsel %vm11107_vm7, %v6568_v61, %v6569_v17  ;;  %v2639_v35 = vshll.u32 %v2309_v19, 16  ;;  %v1126_v33 = vsel %vm11802_vm3, %v1121_v11, %v1125_v41  ;;  %v7889_v17 = vld [vmem:[#allocation2 + $0x38] sm:$0x3]  ;;  %v6226_v61 = vld [vmem:[#allocation2 + $0xa8] sm:$0xf] }
 0x1f6   : > { %v9829_v5 = vcombine.low %v6567_v29, %v6570_v39  ;;  %v1361_v44 = vsel %vm11107_vm7, %v1359_v3, %v1360_v21  ;;  %v2645_v10 = vshrl.u32 %v2310_v8, 16  ;;  %v9481_v42 = vcombine.low %v1116_v52, %v1126_v33  ;;  %v761_v11 = vld [vmem:[#allocation2 + $0xc0] sm:$0xf] }
 0x1f7   : > { %v3816_v55 = vsel %vm1826_vm14, %v9606_v30, %v3697_v38  ;;  %v9514_v24 = vcombine.low %v1358_v48, %v1361_v44  ;;  %v2638_v37 = vrot.slane %v2636_v18, 5  ;;  %v2641_v19 = vrot.slane %v2639_v35, 6 }
 0x1f8   : > { %4082 = vmatprep.mubr.bf16.mxu1 %v3816_v55  ;;  %6866 = vrot.lane.b32.xlu0 %v9829_v5, %s10863_s23  ;;  %v2647_v50 = vrot.slane %v2645_v10, 5  ;;  %v2648_v41 = vshll.u32 %v2310_v8, 16  ;;  %v2655_v29 = vshrl.u32 %v2311_v59, 16  ;;  %v1885_v21 = vsel %vm1826_vm14, %v9481_v42, %v12719_v9 }
 0x1f9   : > { %v1953_v52 = vsel %vm1826_vm14, %v9514_v24, %v12742_v43  ;;  %v2658_v51 = vshll.u32 %v2311_v59, 16  ;;  %v9851_v3 = vrot.slane %v7887_v12, 10  ;;  %2228 = vmatmul.mubr.bf16.gmra.mxu0 %v1885_v21  ;;  %v2642_v48 = vor.u32 %v2641_v19, %v2638_v37  ;;  %v3024_v43 = vld [vmem:[#allocation2 + $0xb0] sm:$0x1]  ;;  %v7890_v59 = vld [vmem:[#allocation2 + $0x3c] sm:$0xc] }
 0x1fa   : > { %v2650_v30 = vrot.slane %v2648_v41, 6  ;;  %v2657_v39 = vrot.slane %v2655_v29, 5  ;;  %v7985_v18 = vrot.slane %v7888_v63, 6  ;;  %2235 = vmatprep.mubr.bf16.mxu0 %v1953_v52  ;;  %v7988_v35 = vrot.slane %v7889_v17, 6  ;;  %v7891_v24 = vld [vmem:[#allocation2 + $0x40] sm:$0xf]  ;;  %v3537_v52 = vpop.permute.xlu0 %3536 }
 0x1fb   : > { %v2660_v38 = vrot.slane %v2658_v51, 6  ;;  %v9797_v8 = vcombine.low %v6226_v61, %v12816_v49  ;;  %v1128_v33 = vshrl.u32 %v761_v11, 16  ;;  %v2643_v5 = vrot.slane %v2642_v48, 4  ;;  %v7892_v19 = vld [vmem:[#allocation2 + $0x44] sm:$0x3]  ;;  %v15419_v48 = vld [vmem:[#allocation36_spill] sm:$0xff] }
 0x1fc   : > { %v2651_v44 = vor.u32 %v2650_v30, %v2647_v50  ;;  %v7986_v9 = vsel %vm11181_vm13, %v9851_v3, %v7985_v18  ;;  %v7987_v10 = vrot.slane %v7985_v18, 4  ;;  %v1131_v55 = vshll.u32 %v761_v11, 16  ;;  %v15418_v3 = vld [vmem:[#allocation34_spill] sm:$0xff]  ;;  %v12881_v18 = vld [vmem:[#allocation2 + $0xb8] sm:$0xf] }
 0x1fd   : > { %v2661_v12 = vor.u32 %v2660_v38, %v2657_v39  ;;  %6738 = vrot.lane.b32.xlu0 %v9797_v8, %s10863_s23  ;;  %v1130_v42 = vrot.slane %v1128_v33, 4  ;;  %v1137_v63 = vshll.u32 %v12833_v6, 16  ;;  %v1141_v61 = vshrl.u32 %v12833_v6, 16  ;;  %v6436_v6 = vld [vmem:[#allocation2 + $0xb4] sm:$0xe] }
 0x1fe   : > { %v2652_v49 = vsel %vm12034_vm6, %v2643_v5, %v2651_v44  ;;  %v2653_v37 = vrot.slane %v2651_v44, 4  ;;  %v7989_v17 = vsel %vm11181_vm13, %v7987_v10, %v7988_v35  ;;  %v1133_v41 = vrot.slane %v1131_v55, 5  ;;  %v6437_v10 = vld [vmem:[#allocation2 + $0xbc] sm:$0x1] }
 0x1ff   : > { %v9883_v50 = vcombine.low %v7986_v9, %v7989_v17  ;;  %v1139_v29 = vrot.slane %v1137_v63, 5  ;;  %v1147_v21 = vshll.u32 %v12835_v13, 16  ;;  %v1143_v51 = vrot.slane %v1141_v61, 4 }
 0x200   : > { %v2662_v11 = vsel %vm12034_vm6, %v2653_v37, %v2661_v12  ;;  %v3335_v30 = vsel %vm11802_vm3, %v15419_v48, %v15418_v3  ;;  %v3342_v39 = vshll.u32 %v3024_v43, 16  ;;  %v1134_v35 = vor.u32 %v1133_v41, %v1130_v42  ;;  %v2312_v37 = vld [vmem:[#allocation2 + $0x9c] sm:$0xe]  ;;  %v2314_v48 = vld [vmem:[#allocation2 + $0xa4] sm:$0x3] }
 0x201   : > { %v9574_v38 = vcombine.low %v2652_v49, %v2662_v11  ;;  %8191 = vrot.lane.b32.xlu1 %v9883_v50, %s10863_s23  ;;  %v1149_v8 = vrot.slane %v1147_v21, 5  ;;  %v9852_v13 = vrot.slane %v7890_v59, 10  ;;  %v1144_v33 = vor.u32 %v1143_v51, %v1139_v29  ;;  %v15420_v49 = vld [vmem:[#allocation37_spill] sm:$0xff]  ;;  %v2313_v21 = vld [vmem:[#allocation2 + $0xa0] sm:$0xf] }
 0x202   : > { %v3344_v5 = vrot.slane %v3342_v39, 5  ;;  %v7992_v44 = vrot.slane %v7891_v24, 6  ;;  %v7995_v9 = vrot.slane %v7892_v19, 6  ;;  %v1135_v55 = vrot.slane %v1134_v35, 4 }
 0x203   : > { %v3752_v12 = vsel %vm1826_vm14, %v9574_v38, %v3537_v52  ;;  %v9766_v63 = vrot.slane %v6436_v6, 9  ;;  %v6573_v43 = vrot.slane %v12881_v18, 5  ;;  %v1145_v17 = vrot.slane %v1144_v33, 4  ;;  %v3699_v52 = vpop.permute.xlu0 %3698 }
 0x204   : > { %4083 = vmatmul.mubr.bf16.gmra.mxu1 %v3752_v12  ;;  %v3345_v42 = vsel %vm11802_vm3, %v15420_v49, %v3344_v5  ;;  %v7993_v59 = vsel %vm11181_vm13, %v9852_v13, %v7992_v44  ;;  %v7994_v61 = vrot.slane %v7992_v44, 4  ;;  %v1140_v24 = vsel %vm11802_vm3, %v1135_v55, %v1139_v29  ;;  %v7893_v12 = vld [vmem:[#allocation2 + $0x48] sm:$0xc]  ;;  %v12905_v55 = vpop.permute.xlu1 %5229 }
 0x205   : > { %v9607_v19 = vcombine.low %v3335_v30, %v3345_v42  ;;  %v6574_v50 = vsel %vm11107_vm7, %v9766_v63, %v6573_v43  ;;  %v6575_v41 = vrot.slane %v6573_v43, 4  ;;  %v1150_v11 = vsel %vm11802_vm3, %v1145_v17, %v1149_v8  ;;  %v15421_v17 = vld [vmem:[#allocation23_spill] sm:$0xff] }
 0x206   : > { %v7996_v51 = vsel %vm11181_vm13, %v7994_v61, %v7995_v9  ;;  %v6576_v3 = vrot.slane %v6437_v10, 5  ;;  %v2664_v39 = vshrl.u32 %v2312_v37, 16  ;;  %v9482_v6 = vcombine.low %v1140_v24, %v1150_v11 }
 0x207   : > { %v3820_v38 = vsel %vm1826_vm14, %v9607_v19, %v3699_v52  ;;  %v9884_v29 = vcombine.low %v7993_v59, %v7996_v51  ;;  %v2667_v30 = vshll.u32 %v2312_v37, 16  ;;  %v2673_v33 = vshrl.u32 %v2313_v21, 16  ;;  %v7894_v59 = vld [vmem:[#allocation2 + $0x4c] sm:$0xf]  ;;  %v15424_v51 = vld [vmem:[#allocation20_spill] sm:$0xff] }
 0x208   : > { %4090 = vmatprep.mubr.bf16.mxu1 %v3820_v38  ;;  %v6577_v35 = vsel %vm11107_vm7, %v6575_v41, %v6576_v3  ;;  %v2666_v13 = vrot.slane %v2664_v39, 5  ;;  %v2676_v5 = vshll.u32 %v2313_v21, 16  ;;  %v1889_v8 = vsel %vm1826_vm14, %v9482_v6, %v12773_v60 }
 0x209   : > { %8193 = vrot.lane.b32.xlu1 %v9884_v29, %s10863_s23  ;;  %v9830_v44 = vcombine.low %v6574_v50, %v6577_v35  ;;  %v2669_v9 = vrot.slane %v2667_v30, 6  ;;  %v2683_v10 = vshrl.u32 %v2314_v48, 16  ;;  %2236 = vmatmul.mubr.bf16.gmra.mxu0 %v1889_v8  ;;  %v2675_v63 = vrot.slane %v2673_v33, 5  ;;  %v10705_v50 = vld [vmem:[#allocation2 + $0x1c] sm:$0xf] }
 0x20a   : > { %v2678_v43 = vrot.slane %v2676_v5, 6  ;;  %v2686_v37 = vshll.u32 %v2314_v48, 16  ;;  %v15422_v49 = vshrl.u32 %v15421_v17, 16  ;;  %v15423_v24 = vshll.u32 %v15421_v17, 16  ;;  %v7895_v48 = vld [vmem:[#allocation2 + $0x50] sm:$0x3] }
 0x20b   : > { %6868 = vrot.lane.b32.xlu0 %v9830_v44, %s10863_s23  ;;  %v2670_v61 = vor.u32 %v2669_v9, %v2666_v13  ;;  %v2685_v60 = vrot.slane %v2683_v10, 5  ;;  %v4453_v41 = vshrl.u32 %v10705_v50, 16  ;;  %v4456_v11 = vshll.u32 %v10705_v50, 16  ;;  %v6228_v13 = vld [vmem:[#allocation2 + $0xb4] sm:$0xf] }
 0x20c   : > { %v4446_v42 = vrot.slane %v15422_v49, 5  ;;  %v4449_v19 = vrot.slane %v15423_v24, 6  ;;  %v2679_v21 = vor.u32 %v2678_v43, %v2675_v63  ;;  %v2688_v52 = vrot.slane %v2686_v37, 6  ;;  %v3027_v37 = vld [vmem:[#allocation2 + $0xbc] sm:$0x1]  ;;  %v12918_v49 = vpop.permute.xlu1 %5101 }
 0x20d   : > { %v15425_v3 = vshrl.u32 %v15424_v51, 16  ;;  %v2671_v6 = vrot.slane %v2670_v61, 4  ;;  %v4455_v29 = vrot.slane %v4453_v41, 5  ;;  %v15426_v30 = vshll.u32 %v15424_v51, 16  ;;  %v7896_v17 = vld [vmem:[#allocation2 + $0x54] sm:$0xc] }
 0x20e   : > { %v4450_v38 = vor.u32 %v4449_v19, %v4446_v42  ;;  %v2681_v33 = vrot.slane %v2679_v21, 4  ;;  %v2689_v5 = vor.u32 %v2688_v52, %v2685_v60  ;;  %v4458_v8 = vrot.slane %v4456_v11, 6  ;;  %v3539_v42 = vpop.permute.xlu0 %3538  ;;  %v7897_v50 = vld [vmem:[#allocation2 + $0x58] sm:$0xf]  ;;  %v15428_v11 = vld [vmem:[#allocation42_spill] sm:$0xff] }
 0x20f   : > { %v4465_v39 = vrot.slane %v15425_v3, 5  ;;  %v4468_v35 = vrot.slane %v15426_v30, 6  ;;  %v9853_v44 = vrot.slane %v7893_v12, 10  ;;  %v2680_v9 = vsel %vm12034_vm6, %v2671_v6, %v2679_v21  ;;  %v7898_v12 = vld [vmem:[#allocation2 + $0x5c] sm:$0x3] }
 0x210   : > { %v4451_v10 = vrot.slane %v4450_v38, 4  ;;  %v7999_v43 = vrot.slane %v7894_v59, 6  ;;  %v2690_v61 = vsel %vm12034_vm6, %v2681_v33, %v2689_v5  ;;  %v4459_v24 = vor.u32 %v4458_v8, %v4455_v29  ;;  %v15427_v59 = vld [vmem:[#allocation40_spill] sm:$0xff]  ;;  %v6438_v3 = vld [vmem:[#allocation2 + $0xc0] sm:$0xe] }
 0x211   : > { %v4469_v63 = vor.u32 %v4468_v35, %v4465_v39  ;;  %v8002_v19 = vrot.slane %v7895_v48, 6  ;;  %v9798_v60 = vcombine.low %v6228_v13, %v12881_v18  ;;  %v9575_v41 = vcombine.low %v2680_v9, %v2690_v61  ;;  %v12932_v38 = vld [vmem:[#allocation2 + $0xc4] sm:$0xf]  ;;  %v6439_v33 = vld [vmem:[#allocation2 + $0xc8] sm:$0x1] }
 0x212   : > { %v8000_v21 = vsel %vm11181_vm13, %v9853_v44, %v7999_v43  ;;  %v8001_v52 = vrot.slane %v7999_v43, 4  ;;  %v3359_v51 = vsel %vm11802_vm3, %v15428_v11, %v15427_v59  ;;  %v4460_v39 = vsel %vm12034_vm6, %v4451_v10, %v4459_v24  ;;  %v2315_v5 = vld [vmem:[#allocation2 + $0xa8] sm:$0xe]  ;;  %v2316_v61 = vld [vmem:[#allocation2 + $0xac] sm:$0xf] }
 0x213   : > { %v4461_v6 = vrot.slane %v4459_v24, 4  ;;  %6740 = vrot.lane.b32.xlu0 %v9798_v60, %s10863_s23  ;;  %v3366_v18 = vshll.u32 %v3027_v37, 16  ;;  %v9854_v48 = vrot.slane %v7896_v17, 10  ;;  %v3756_v29 = vsel %vm1826_vm14, %v9575_v41, %v3539_v42  ;;  %v12942_v24 = vpop.f32.mrf.mxu0  ;;  %v15430_v60 = vld [vmem:[#allocation44_spill] sm:$0xff] }
 0x214   : > { %v8003_v30 = vsel %vm11181_vm13, %v8001_v52, %v8002_v19  ;;  %v8006_v35 = vrot.slane %v7897_v50, 6  ;;  %v8009_v13 = vrot.slane %v7898_v12, 6  ;;  %4091 = vmatmul.mubr.bf16.gmra.mxu1 %v3756_v29  ;;  %v9767_v10 = vrot.slane %v6438_v3, 9  ;;  %15429 = vst [vmem:[#allocation21_spill] sm:$0xff] %v12942_v24  ;;  %v12944_v19 = vpop.permute.xlu1 %5231  ;;  %v2317_v12 = vld [vmem:[#allocation2 + $0xb0] sm:$0x3] }
 0x215   : > { %v4470_v8 = vsel %vm12034_vm6, %v4461_v6, %v4469_v63  ;;  %v9885_v44 = vcombine.low %v8000_v21, %v8003_v30  ;;  %v3368_v9 = vrot.slane %v3366_v18, 5  ;;  %v6580_v42 = vrot.slane %v12932_v38, 5  ;;  %v3701_v6 = vpop.permute.xlu0 %3700 }
 0x216   : > { %v9691_v43 = vcombine.low %v4460_v39, %v4470_v8  ;;  %v8007_v37 = vsel %vm11181_vm13, %v9854_v48, %v8006_v35  ;;  %v8008_v17 = vrot.slane %v8006_v35, 4  ;;  %v6583_v50 = vrot.slane %v6439_v33, 5  ;;  %v12956_v39 = vld [vmem:[#allocation7 + $0x230] sm:$0xff]  }
 0x217   : > { %8195 = vrot.lane.b32.xlu1 %v9885_v44, %s10863_s23  ;;  %v3369_v63 = vsel %vm11802_vm3, %v15430_v60, %v3368_v9  ;;  %v2692_v41 = vshrl.u32 %v2315_v5, 16  ;;  %v2695_v21 = vshll.u32 %v2315_v5, 16  ;;  %v6581_v3 = vsel %vm11107_vm7, %v9767_v10, %v6580_v42  ;;  %v12960_v5 = vpop.f32.mrf.mxu0  ;;  %v15432_v10 = vld [vmem:[#allocation29_spill] sm:$0xff] }
 0x218   : > { %v5325_v52 = vsel %vm1826_vm14, %v9691_v43, %v12732_v62  ;;  %v9608_v59 = vcombine.low %v3359_v51, %v3369_v63  ;;  %v8010_v11 = vsel %vm11181_vm13, %v8008_v17, %v8009_v13  ;;  %v6582_v48 = vrot.slane %v6580_v42, 4  ;;  %15431 = vst [vmem:[#allocation26_spill] sm:$0xff] %v12960_v5  ;;  %v12962_v13 = vld [vmem:[#allocation7 + $0x238] sm:$0xff]   ;;  %v7900_v63 = vld [vmem:[#allocation2 + $0x64] sm:$0xf] }
 0x219   : > { %5547 = vmatprep.mubr.bf16.mxu0 %v5325_v52  ;;  %v9886_v18 = vcombine.low %v8007_v37, %v8010_v11  ;;  %v2694_v29 = vrot.slane %v2692_v41, 5  ;;  %v2697_v30 = vrot.slane %v2695_v21, 6  ;;  %v2701_v62 = vshrl.u32 %v2316_v61, 16  ;;  %v7899_v37 = vld [vmem:[#allocation2 + $0x60] sm:$0xc]  ;;  %v12971_v41 = vld [vmem:[#allocation7 + $0x228] sm:$0xff]   ;;  %v12973_v21 = vpop.permute.xlu1 %5103 }
 0x21a   : > { %5548 = vmatmul.mubr.bf16.vlgmr.msra.gmra.mxu0 %v12763_v15  ;;  %v3824_v35 = vsel %vm1826_vm14, %v9608_v59, %v3701_v6  ;;  %v2704_v51 = vshll.u32 %v2316_v61, 16  ;;  %v2711_v33 = vshrl.u32 %v2317_v12, 16  ;;  %v6584_v8 = vsel %vm11107_vm7, %v6582_v48, %v6583_v50  ;;  %v10707_v11 = vld [vmem:[#allocation2 + $0x28] sm:$0xf] }
 0x21b   : > { %10411 = vmatpush3.bf16.msra.mxu0 %v12962_v13  ;;  %4098 = vmatprep.mubr.bf16.mxu1 %v3824_v35  ;;  %v2698_v44 = vor.u32 %v2697_v30, %v2694_v29  ;;  %v2714_v9 = vshll.u32 %v2317_v12, 16  ;;  %v15433_v43 = vshrl.u32 %v15432_v10, 16  ;;  %v9831_v17 = vcombine.low %v6581_v3, %v6584_v8  ;;  %v7901_v48 = vld [vmem:[#allocation2 + $0x68] sm:$0x3]  ;;  %v12982_v8 = vpop.f32.mrf.mxu0 }
 0x21c   : > { %8197 = vrot.lane.b32.xlu1 %v9886_v18, %s10863_s23  ;;  %v2703_v42 = vrot.slane %v2701_v62, 5  ;;  %v2706_v61 = vrot.slane %v2704_v51, 6  ;;  %v2713_v60 = vrot.slane %v2711_v33, 5  ;;  %10412 = vmatprep.subr.bf16.mxu0 %v12956_v39  ;;  %v15434_v12 = vshll.u32 %v15432_v10, 16  ;;  %v15435_v29 = vld [vmem:[#allocation27_spill] sm:$0xff]  ;;  %15438 = vst [vmem:[#allocation22_spill] sm:$0xff] %v12982_v8 }
 0x21d   : > { %v4474_v15 = vrot.slane %v15433_v43, 5  ;;  %v2699_v50 = vrot.slane %v2698_v44, 4  ;;  %v2716_v52 = vrot.slane %v2714_v9, 6  ;;  %v4481_v6 = vshrl.u32 %v10707_v11, 16  ;;  %6870 = vrot.lane.b32.xlu0 %v9831_v17, %s10863_s23  ;;  %v6230_v33 = vld [vmem:[#allocation2 + $0xc0] sm:$0xf] }
 0x21e   : > { %v4477_v59 = vrot.slane %v15434_v12, 6  ;;  %v2707_v3 = vor.u32 %v2706_v61, %v2703_v42  ;;  %v4484_v18 = vshll.u32 %v10707_v11, 16  ;;  %v15436_v30 = vshrl.u32 %v15435_v29, 16  ;;  %v3030_v12 = vld [vmem:[#allocation2 + $0xc8] sm:$0x1] }
 0x21f   : > { %v15437_v62 = vshll.u32 %v15435_v29, 16  ;;  %v2717_v44 = vor.u32 %v2716_v52, %v2713_v60  ;;  %v4483_v10 = vrot.slane %v4481_v6, 5  ;;  %v9855_v43 = vrot.slane %v7899_v37, 10  ;;  %10413 = vmatpush3.bf16.msra.mxu0 %v12956_v39  ;;  %v12988_v29 = vld [vmem:[#allocation7 + $0x220] sm:$0xff]   ;;  %v3541_v52 = vpop.permute.xlu0 %3540 }
 0x220   : > { %v4493_v35 = vrot.slane %v15436_v30, 5  ;;  %v4478_v9 = vor.u32 %v4477_v59, %v4474_v15  ;;  %v2708_v17 = vsel %vm12034_vm6, %v2699_v50, %v2707_v3  ;;  %v2709_v42 = vrot.slane %v2707_v3, 4  ;;  %v7902_v30 = vld [vmem:[#allocation2 + $0x6c] sm:$0xc]  ;;  %10414 = vmatprep.subr.bf16.mxu0 %v12971_v41  ;;  %v7903_v37 = vld [vmem:[#allocation2 + $0x70] sm:$0xf] }
 0x221   : > { %v4496_v51 = vrot.slane %v15437_v62, 6  ;;  %v4486_v61 = vrot.slane %v4484_v18, 6  ;;  %v8013_v5 = vrot.slane %v7900_v63, 6  ;;  %v8016_v60 = vrot.slane %v7901_v48, 6  ;;  %v15439_v50 = vld [vmem:[#allocation31_spill] sm:$0xff]  ;;  %v13000_v63 = vpop.f32.mrf.mxu0  ;;  %v13002_v48 = vpop.permute.xlu1 %5233 }
 0x222   : > { %v4479_v62 = vrot.slane %v4478_v9, 4  ;;  %v9799_v15 = vcombine.low %v6230_v33, %v12932_v38  ;;  %v2718_v59 = vsel %vm12034_vm6, %v2709_v42, %v2717_v44  ;;  %v5265_v3 = vsel %vm1826_vm14, %v15439_v50, %v12918_v49  ;;  %15440 = vst [vmem:[#allocation24_spill] sm:$0xff] %v13000_v63  ;;  %v13007_v9 = vld [vmem:[#allocation2 + $0xd0] sm:$0xf]  ;;  %v6440_v42 = vld [vmem:[#allocation2 + $0xcc] sm:$0xe] }
 0x223   : > { %v4497_v11 = vor.u32 %v4496_v51, %v4493_v35  ;;  %v4487_v6 = vor.u32 %v4486_v61, %v4483_v10  ;;  %v3383_v18 = vsel %vm11802_vm3, %v12092_v7, %v12051_v27  ;;  %v7904_v35 = vld [vmem:[#allocation2 + $0x74] sm:$0x3]  ;;  %v9576_v38 = vcombine.low %v2708_v17, %v2718_v59  ;;  %10415 = vmatpush3.bf16.msra.mxu0 %v12971_v41  ;;  %v13013_v17 = vld [vmem:[#allocation7 + $0x218] sm:$0xff]   ;;  %v13022_v50 = vpop.f32.mrf.mxu0 }
 0x224   : > { %v8014_v51 = vsel %vm11181_vm13, %v9855_v43, %v8013_v5  ;;  %v8015_v33 = vrot.slane %v8013_v5, 4  ;;  %6742 = vrot.lane.b32.xlu0 %v9799_v15, %s10863_s23  ;;  %v3390_v44 = vshll.u32 %v3030_v12, 16  ;;  %v9856_v49 = vrot.slane %v7902_v30, 10  ;;  %10416 = vmatprep.subr.bf16.mxu0 %v12988_v29  ;;  %v6441_v15 = vld [vmem:[#allocation2 + $0xd4] sm:$0x1]  ;;  %15441 = vst [vmem:[#allocation25_spill] sm:$0xff] %v13022_v50 }
 0x225   : > { %v4488_v27 = vsel %vm12034_vm6, %v4479_v62, %v4487_v6  ;;  %v4489_v7 = vrot.slane %v4487_v6, 4  ;;  %v8020_v10 = vrot.slane %v7903_v37, 6  ;;  %v3760_v5 = vsel %vm1826_vm14, %v9576_v38, %v3541_v52  ;;  %v2318_v59 = vld [vmem:[#allocation2 + $0xb4] sm:$0xe]  ;;  %v2319_v38 = vld [vmem:[#allocation2 + $0xb8] sm:$0xf] }
 0x226   : > { %v8017_v43 = vsel %vm11181_vm13, %v8015_v33, %v8016_v60  ;;  %v3392_v12 = vrot.slane %v3390_v44, 5  ;;  %v8023_v61 = vrot.slane %v7904_v35, 6  ;;  %4099 = vmatmul.mubr.bf16.gmra.mxu1 %v3760_v5  ;;  %v9768_v52 = vrot.slane %v6440_v42, 9  ;;  %v2320_v44 = vld [vmem:[#allocation2 + $0xbc] sm:$0x3] }
 0x227   : > { %v4498_v62 = vsel %vm12034_vm6, %v4489_v7, %v4497_v11  ;;  %v9887_v30 = vcombine.low %v8014_v51, %v8017_v43  ;;  %v8021_v37 = vsel %vm11181_vm13, %v9856_v49, %v8020_v10  ;;  %v8022_v6 = vrot.slane %v8020_v10, 4  ;;  %10417 = vmatpush3.bf16.msra.mxu0 %v12988_v29  ;;  %v3703_v49 = vpop.permute.xlu0 %3702 }
 0x228   : > { %v9692_v24 = vcombine.low %v4488_v27, %v4498_v62  ;;  %v3393_v60 = vsel %vm11802_vm3, %v12115_v25, %v3392_v12  ;;  %v6587_v35 = vrot.slane %v13007_v9, 5  ;;  %v6590_v33 = vrot.slane %v6441_v15, 5  ;;  %10418 = vmatprep.subr.bf16.mxu0 %v13013_v17  ;;  %v13033_v27 = vpop.permute.xlu1 %5105  ;;  %v13042_v62 = vpop.f32.mrf.mxu0 }
 0x229   : > { %8199 = vrot.lane.b32.xlu1 %v9887_v30, %s10863_s23  ;;  %v9609_v11 = vcombine.low %v3383_v18, %v3393_v60  ;;  %v8024_v51 = vsel %vm11181_vm13, %v8022_v6, %v8023_v61  ;;  %v2720_v7 = vshrl.u32 %v2318_v59, 16  ;;  %v13039_v18 = vld [vmem:[#allocation7 + $0x210] sm:$0xff]   ;;  %v2723_v61 = vshll.u32 %v2318_v59, 16  ;;  %15442 = vst [vmem:[#allocation28_spill] sm:$0xff] %v13042_v62 }
 0x22a   : > { %v5329_v25 = vsel %vm1826_vm14, %v9692_v24, %v12905_v55  ;;  %v9888_v10 = vcombine.low %v8021_v37, %v8024_v51  ;;  %v6588_v42 = vsel %vm11107_vm7, %v9768_v52, %v6587_v35  ;;  %v6589_v5 = vrot.slane %v6587_v35, 4  ;;  %v15443_v35 = vld [vmem:[#allocation35_spill] sm:$0xff]  ;;  %v7907_v62 = vld [vmem:[#allocation2 + $0x80] sm:$0x3] }
 0x22b   : > { %5555 = vmatprep.mubr.bf16.mxu0 %v5329_v25  ;;  %v3828_v43 = vsel %vm1826_vm14, %v9609_v11, %v3703_v49  ;;  %v2722_v12 = vrot.slane %v2720_v7, 5  ;;  %v2729_v15 = vshrl.u32 %v2319_v38, 16  ;;  %v2732_v24 = vshll.u32 %v2319_v38, 16  ;;  %10419 = vmatpush3.bf16.msra.mxu0 %v13013_v17 }
 0x22c   : > { %5556 = vmatmul.mubr.bf16.gmra.mxu0 %v5265_v3  ;;  %4106 = vmatprep.mubr.bf16.mxu1 %v3828_v43  ;;  %v6591_v55 = vsel %vm11107_vm7, %v6589_v5, %v6590_v33  ;;  %v2739_v30 = vshrl.u32 %v2320_v44, 16  ;;  %v2742_v37 = vshll.u32 %v2320_v44, 16  ;;  %v2725_v60 = vrot.slane %v2723_v61, 6  ;;  %v7905_v33 = vld [vmem:[#allocation2 + $0x78] sm:$0xc]  ;;  %v15446_v5 = vld [vmem:[#allocation32_spill] sm:$0xff] }
 0x22d   : > { %8201 = vrot.lane.b32.xlu1 %v9888_v10, %s10863_s23  ;;  %v9832_v6 = vcombine.low %v6588_v42, %v6591_v55  ;;  %v2731_v52 = vrot.slane %v2729_v15, 5  ;;  %v15444_v11 = vshrl.u32 %v15443_v35, 16  ;;  %v2734_v59 = vrot.slane %v2732_v24, 6  ;;  %10420 = vmatprep.subr.bf16.mxu0 %v13039_v18  ;;  %v10708_v44 = vld [vmem:[#allocation2 + $0x34] sm:$0xf]  ;;  %v13056_v55 = vpop.f32.mrf.mxu0  ;;  %v13058_v24 = vpop.permute.xlu1 %5235 }
 0x22e   : > { %v2741_v7 = vrot.slane %v2739_v30, 5  ;;  %v2744_v3 = vrot.slane %v2742_v37, 6  ;;  %v15445_v25 = vshll.u32 %v15443_v35, 16  ;;  %v2726_v38 = vor.u32 %v2725_v60, %v2722_v12  ;;  %v7906_v15 = vld [vmem:[#allocation2 + $0x7c] sm:$0xf]  ;;  %15448 = vst [vmem:[#allocation30_spill] sm:$0xff] %v13056_v55 }
 0x22f   : > { %v4502_v51 = vrot.slane %v15444_v11, 5  ;;  %6872 = vrot.lane.b32.xlu0 %v9832_v6, %s10863_s23  ;;  %v4509_v10 = vshrl.u32 %v10708_v44, 16  ;;  %v4512_v42 = vshll.u32 %v10708_v44, 16  ;;  %v15447_v43 = vshrl.u32 %v15446_v5, 16  ;;  %v6232_v6 = vld [vmem:[#allocation2 + $0xcc] sm:$0xf]  ;;  %10421 = vmatpush3.bf16.msra.mxu0 %v13039_v18 }
 0x230   : > { %v4505_v49 = vrot.slane %v15445_v25, 6  ;;  %v2735_v30 = vor.u32 %v2734_v59, %v2731_v52  ;;  %v2745_v37 = vor.u32 %v2744_v3, %v2741_v7  ;;  %v15449_v11 = vshll.u32 %v15446_v5, 16  ;;  %v7908_v3 = vld [vmem:[#allocation2 + $0x84] sm:$0xc] }
 0x231   : > { %v4521_v61 = vrot.slane %v15447_v43, 5  ;;  %v2727_v12 = vrot.slane %v2726_v38, 4  ;;  %v4511_v60 = vrot.slane %v4509_v10, 5  ;;  %v4514_v50 = vrot.slane %v4512_v42, 6  ;;  %v13066_v38 = vpop.f32.mrf.mxu0  ;;  %v3543_v10 = vpop.permute.xlu0 %3542 }
 0x232   : > { %v4506_v35 = vor.u32 %v4505_v49, %v4502_v51  ;;  %v4524_v25 = vrot.slane %v15449_v11, 6  ;;  %v9857_v44 = vrot.slane %v7905_v33, 10  ;;  %v2737_v43 = vrot.slane %v2735_v30, 4  ;;  %v7909_v49 = vld [vmem:[#allocation2 + $0x88] sm:$0xf]  ;;  %15450 = vst [vmem:[#allocation33_spill] sm:$0xff] %v13066_v38 }
 0x233   : > { %v8027_v55 = vrot.slane %v7906_v15, 6  ;;  %v2736_v52 = vsel %vm12034_vm6, %v2727_v12, %v2735_v30  ;;  %v4515_v51 = vor.u32 %v4514_v50, %v4511_v60  ;;  %v8030_v59 = vrot.slane %v7907_v62, 6  ;;  %v7910_v50 = vld [vmem:[#allocation2 + $0x8c] sm:$0x3]  ;;  %v13075_v62 = vld [vmem:[#allocation2 + $0xdc] sm:$0xf] }
 0x234   : > { %v4507_v63 = vrot.slane %v4506_v35, 4  ;;  %v4525_v8 = vor.u32 %v4524_v25, %v4521_v61  ;;  %v9800_v7 = vcombine.low %v6232_v6, %v13007_v9  ;;  %v2746_v33 = vsel %vm12034_vm6, %v2737_v43, %v2745_v37  ;;  %v15451_v61 = vld [vmem:[#allocation38_spill] sm:$0xff]  ;;  %v13084_v25 = vpop.permute.xlu1 %5107 }
 0x235   : > { %v8028_v42 = vsel %vm11181_vm13, %v9857_v44, %v8027_v55  ;;  %v8029_v5 = vrot.slane %v8027_v55, 4  ;;  %v5269_v15 = vsel %vm1826_vm14, %v15451_v61, %v12973_v21  ;;  %v9577_v9 = vcombine.low %v2736_v52, %v2746_v33  ;;  %v6442_v55 = vld [vmem:[#allocation2 + $0xd8] sm:$0xe]  ;;  %v6443_v11 = vld [vmem:[#allocation2 + $0xe0] sm:$0x1] }
 0x236   : > { %v4516_v30 = vsel %vm12034_vm6, %v4507_v63, %v4515_v51  ;;  %v4517_v35 = vrot.slane %v4515_v51, 4  ;;  %6744 = vrot.lane.b32.xlu0 %v9800_v7, %s10863_s23  ;;  %v3407_v37 = vsel %vm11802_vm3, %v12209_v2, %v12157_v23  ;;  %v3414_v6 = vshll.u32 %v3033_v36, 16  ;;  %v2321_v44 = vld [vmem:[#allocation2 + $0xc0] sm:$0xe]  ;;  %v13091_v7 = vpop.f32.mrf.mxu0  ;;  %v6444_v38 = vld [vmem:[#allocation2 + $0xe4] sm:$0xe] }
 0x237   : > { %v8031_v21 = vsel %vm11181_vm13, %v8029_v5, %v8030_v59  ;;  %v9858_v12 = vrot.slane %v7908_v3, 10  ;;  %v8034_v60 = vrot.slane %v7909_v49, 6  ;;  %v3764_v63 = vsel %vm1826_vm14, %v9577_v9, %v3543_v10  ;;  %15452 = vst [vmem:[#allocation34_spill] sm:$0xff] %v13091_v7  ;;  %v2322_v10 = vld [vmem:[#allocation2 + $0xc4] sm:$0xf] }
 0x238   : > { %v4526_v43 = vsel %vm12034_vm6, %v4517_v35, %v4525_v8  ;;  %v9889_v52 = vcombine.low %v8028_v42, %v8031_v21  ;;  %v8037_v51 = vrot.slane %v7910_v50, 6  ;;  %4107 = vmatmul.mubr.bf16.gmra.mxu1 %v3764_v63  ;;  %v3416_v2 = vrot.slane %v3414_v6, 5  ;;  %v2323_v50 = vld [vmem:[#allocation2 + $0xc8] sm:$0x3]  ;;  %v13106_v21 = vpop.f32.mrf.mxu0  ;;  %v13108_v6 = vpop.permute.xlu1 %5237 }
 0x239   : > { %v9693_v23 = vcombine.low %v4516_v30, %v4526_v43  ;;  %v8035_v33 = vsel %vm11181_vm13, %v9858_v12, %v8034_v60  ;;  %v8036_v59 = vrot.slane %v8034_v60, 4  ;;  %v9769_v36 = vrot.slane %v6442_v55, 9  ;;  %15453 = vst [vmem:[#allocation36_spill] sm:$0xff] %v13106_v21 }
 0x23a   : > { %8203 = vrot.lane.b32.xlu1 %v9889_v52, %s10863_s23  ;;  %v6594_v3 = vrot.slane %v13075_v62, 5  ;;  %v6597_v49 = vrot.slane %v6443_v11, 5  ;;  %v2748_v5 = vshrl.u32 %v2321_v44, 16  ;;  %v3417_v42 = vsel %vm11802_vm3, %v12232_v57, %v3416_v2 }
 0x23b   : > { %v5333_v8 = vsel %vm1826_vm14, %v9693_v23, %v12944_v19  ;;  %v8038_v61 = vsel %vm11181_vm13, %v8036_v59, %v8037_v51  ;;  %v2751_v9 = vshll.u32 %v2321_v44, 16  ;;  %v9610_v30 = vcombine.low %v3407_v37, %v3417_v42  ;;  %v3705_v19 = vpop.permute.xlu0 %3704  ;;  %v7911_v42 = vld [vmem:[#allocation2 + $0x90] sm:$0xc] }
 0x23c   : > { %5563 = vmatprep.mubr.bf16.mxu0 %v5333_v8  ;;  %v9890_v35 = vcombine.low %v8035_v33, %v8038_v61  ;;  %v6595_v55 = vsel %vm11107_vm7, %v9769_v36, %v6594_v3  ;;  %v6596_v11 = vrot.slane %v6594_v3, 4  ;;  %v2750_v12 = vrot.slane %v2748_v5, 5  ;;  %v15454_v36 = vld [vmem:[#allocation41_spill] sm:$0xff]  ;;  %v13118_v61 = vpop.f32.mrf.mxu0 }
 0x23d   : > { %5564 = vmatmul.mubr.bf16.gmra.mxu0 %v5269_v15  ;;  %v2753_v57 = vrot.slane %v2751_v9, 6  ;;  %v2757_v60 = vshrl.u32 %v2322_v10, 16  ;;  %v2760_v63 = vshll.u32 %v2322_v10, 16  ;;  %v3832_v43 = vsel %vm1826_vm14, %v9610_v30, %v3705_v19  ;;  %15457 = vst [vmem:[#allocation37_spill] sm:$0xff] %v13118_v61  ;;  %v10709_v9 = vld [vmem:[#allocation2 + $0x40] sm:$0xf] }
 0x23e   : > { %8205 = vrot.lane.b32.xlu1 %v9890_v35, %s10863_s23  ;;  %v6598_v37 = vsel %vm11107_vm7, %v6596_v11, %v6597_v49  ;;  %v2767_v44 = vshrl.u32 %v2323_v50, 16  ;;  %v2770_v52 = vshll.u32 %v2323_v50, 16  ;;  %4114 = vmatprep.mubr.bf16.mxu1 %v3832_v43  ;;  %v15455_v3 = vshrl.u32 %v15454_v36, 16  ;;  %v5774_v61 = vld [vmem:[#allocation2 + $0x28] sm:$0xf] }
 0x23f   : > { %v9833_v51 = vcombine.low %v6595_v55, %v6598_v37  ;;  %v2754_v23 = vor.u32 %v2753_v57, %v2750_v12  ;;  %v2759_v2 = vrot.slane %v2757_v60, 5  ;;  %v2762_v33 = vrot.slane %v2760_v63, 6  ;;  %v7912_v55 = vld [vmem:[#allocation2 + $0x94] sm:$0xf]  ;;  %v15458_v12 = vld [vmem:[#allocation39_spill] sm:$0xff] }
 0x240   : > { %v2769_v59 = vrot.slane %v2767_v44, 5  ;;  %v2772_v15 = vrot.slane %v2770_v52, 6  ;;  %v4530_v5 = vrot.slane %v15455_v3, 5  ;;  %v15456_v10 = vshll.u32 %v15454_v36, 16  ;;  %v7913_v37 = vld [vmem:[#allocation2 + $0x98] sm:$0x3]  ;;  %v13125_v52 = vpop.permute.xlu1 %5109 }
 0x241   : > { %6874 = vrot.lane.b32.xlu0 %v9833_v51, %s10863_s23  ;;  %v2755_v49 = vrot.slane %v2754_v23, 4  ;;  %v2763_v50 = vor.u32 %v2762_v33, %v2759_v2  ;;  %v4537_v30 = vshrl.u32 %v10709_v9, 16  ;;  %v4540_v35 = vshll.u32 %v10709_v9, 16  ;;  %v6234_v44 = vld [vmem:[#allocation2 + $0xd8] sm:$0xf] }
 0x242   : > { %v4533_v8 = vrot.slane %v15456_v10, 6  ;;  %v2773_v11 = vor.u32 %v2772_v15, %v2769_v59  ;;  %v15459_v57 = vshrl.u32 %v15458_v12, 16  ;;  %v15460_v63 = vshll.u32 %v15458_v12, 16  ;;  %v13129_v10 = vpop.f32.mrf.mxu0 }
 0x243   : > { %v2764_v51 = vsel %vm12034_vm6, %v2755_v49, %v2763_v50  ;;  %v2765_v23 = vrot.slane %v2763_v50, 4  ;;  %v4539_v2 = vrot.slane %v4537_v30, 5  ;;  %v4542_v33 = vrot.slane %v4540_v35, 6  ;;  %15461 = vst [vmem:[#allocation23_spill] sm:$0xff] %v13129_v10  ;;  %v13134_v49 = vld [vmem:[#allocation7 + $0x208] sm:$0xff]   ;;  %v15462_v35 = vld [vmem:[#allocation43_spill] sm:$0xff] }
 0x244   : > { %v4534_v19 = vor.u32 %v4533_v8, %v4530_v5  ;;  %v4549_v60 = vrot.slane %v15459_v57, 5  ;;  %v4552_v43 = vrot.slane %v15460_v63, 6  ;;  %v9859_v59 = vrot.slane %v7911_v42, 10  ;;  %v5773_v5 = vld [vmem:[#allocation2 + $0x24] sm:$0xf]  ;;  %v3545_v8 = vpop.permute.xlu0 %3544  ;;  %10422 = vmatprep.subr.bf16.mxu0 %v13134_v49 }
 0x245   : > { %v8041_v15 = vrot.slane %v7912_v55, 6  ;;  %v2774_v9 = vsel %vm12034_vm6, %v2765_v23, %v2773_v11  ;;  %v4543_v12 = vor.u32 %v4542_v33, %v4539_v2  ;;  %v8044_v57 = vrot.slane %v7913_v37, 6  ;;  %v6238_v2 = vld [vmem:[#allocation2 + $0x24] sm:$0xe]  ;;  %v13148_v33 = vpop.f32.mrf.mxu0  ;;  %10423 = vmatpush3.bf16.msra.mxu0 %v13134_v49  ;;  %v13155_v10 = vld [vmem:[#allocation2 + $0xe8] sm:$0xf] }
 0x246   : > { %v4535_v36 = vrot.slane %v4534_v19, 4  ;;  %v4553_v3 = vor.u32 %v4552_v43, %v4549_v60  ;;  %v9801_v63 = vcombine.low %v6234_v44, %v13075_v62  ;;  %v9578_v50 = vcombine.low %v2764_v51, %v2774_v9  ;;  %v5775_v60 = vld [vmem:[#allocation2 + $0x2c] sm:$0x1]  ;;  %15463 = vst [vmem:[#allocation20_spill] sm:$0xff] %v13148_v33 }
 0x247   : > { %v8042_v30 = vsel %vm11181_vm13, %v9859_v59, %v8041_v15  ;;  %v8043_v42 = vrot.slane %v8041_v15, 4  ;;  %v5273_v55 = vsel %vm1826_vm14, %v15462_v35, %v13033_v27  ;;  %v4545_v11 = vrot.slane %v4543_v12, 4  ;;  %v7914_v27 = vld [vmem:[#allocation2 + $0x9c] sm:$0xc]  ;;  %v6847_v15 = vpop.permute.xlu1 %6846 }
 0x248   : > { %v4544_v19 = vsel %vm12034_vm6, %v4535_v36, %v4543_v12  ;;  %6746 = vrot.lane.b32.xlu0 %v9801_v63, %s10863_s23  ;;  %v5822_v62 = vshrl.u32 %v5773_v5, 16  ;;  %v5825_v43 = vshll.u32 %v5773_v5, 16  ;;  %v3768_v37 = vsel %vm1826_vm14, %v9578_v50, %v3545_v8  ;;  %v13150_v36 = vpop.f32.mrf.mxu1  ;;  %v7915_v12 = vld [vmem:[#allocation2 + $0xa0] sm:$0xf] }
 0x249   : > { %v8045_v44 = vsel %vm11181_vm13, %v8043_v42, %v8044_v57  ;;  %v5831_v51 = vshll.u32 %v5774_v61, 16  ;;  %v5835_v23 = vshrl.u32 %v5774_v61, 16  ;;  %15464 = vst [vmem:[#allocation40_spill] sm:$0xff] %v13150_v36  ;;  %4115 = vmatmul.mubr.bf16.gmra.mxu1 %v3768_v37  ;;  %v4554_v59 = vsel %vm12034_vm6, %v4545_v11, %v4553_v3  ;;  %v7916_v57 = vld [vmem:[#allocation2 + $0xa4] sm:$0x3] }
 0x24a   : > { %v9891_v5 = vcombine.low %v8042_v30, %v8045_v44  ;;  %v5824_v8 = vrot.slane %v5822_v62, 4  ;;  %v5827_v9 = vrot.slane %v5825_v43, 5  ;;  %v9694_v63 = vcombine.low %v4544_v19, %v4554_v59  ;;  %v13160_v43 = vpop.f32.mrf.mxu1  ;;  %v13162_v19 = vpop.f32.mrf.mxu0  ;;  %v6445_v59 = vld [vmem:[#allocation2 + $0xec] sm:$0x1] }
 0x24b   : > { %v5833_v50 = vrot.slane %v5831_v51, 5  ;;  %v5837_v42 = vrot.slane %v5835_v23, 4  ;;  %v5841_v35 = vshll.u32 %v5775_v60, 16  ;;  %v9739_v21 = vrot.slane %v6238_v2, 9  ;;  %15465 = vst [vmem:[#allocation42_spill] sm:$0xff] %v13160_v43  ;;  %15466 = vst [vmem:[#allocation44_spill] sm:$0xff] %v13162_v19 }
 0x24c   : > { %8207 = vrot.lane.b32.xlu1 %v9891_v5, %s10863_s23  ;;  %v5828_v33 = vor.u32 %v5827_v9, %v5824_v8  ;;  %v6304_v37 = vrot.slane %v5774_v61, 5  ;;  %v6307_v7 = vrot.slane %v5775_v60, 5  ;;  %v5337_v3 = vsel %vm1826_vm14, %v9694_v63, %v13002_v48  ;;  %v6719_v8 = vpop.permute.xlu1 %6718  ;;  %v13177_v63 = vpop.f32.mrf.mxu0  ;;  %v7921_v19 = vld [vmem:[#allocation2 + $0xb8] sm:$0xf] }
 0x24d   : > { %v5838_v30 = vor.u32 %v5837_v42, %v5833_v50  ;;  %v5843_v11 = vrot.slane %v5841_v35, 5  ;;  %v9860_v62 = vrot.slane %v7914_v27, 10  ;;  %5571 = vmatprep.mubr.bf16.mxu0 %v5337_v3  ;;  %v8048_v2 = vrot.slane %v7915_v12, 6  ;;  %15467 = vst [vmem:[#allocation29_spill] sm:$0xff] %v13177_v63  ;;  %v13179_v42 = vpop.f32.mrf.mxu1 }
 0x24e   : > { %v5829_v44 = vrot.slane %v5828_v33, 4  ;;  %v6305_v51 = vsel %vm11107_vm7, %v9739_v21, %v6304_v37  ;;  %v6306_v23 = vrot.slane %v6304_v37, 4  ;;  %5572 = vmatmul.mubr.bf16.gmra.mxu0 %v5273_v55  ;;  %v8051_v60 = vrot.slane %v7916_v57, 6  ;;  %v15468_v37 = vld [vmem:[#allocation46_spill] sm:$0xff] }
 0x24f   : > { %v5839_v61 = vrot.slane %v5838_v30, 4  ;;  %v9770_v5 = vrot.slane %v6444_v38, 9  ;;  %v6601_v48 = vrot.slane %v13155_v10, 5  ;;  %v8049_v33 = vsel %vm11181_vm13, %v9860_v62, %v8048_v2  ;;  %v7917_v62 = vld [vmem:[#allocation2 + $0xa8] sm:$0xc] }
 0x250   : > { %v5834_v27 = vsel %vm11802_vm3, %v5829_v44, %v5833_v50  ;;  %v6308_v9 = vsel %vm11107_vm7, %v6306_v23, %v6307_v7  ;;  %v8050_v21 = vrot.slane %v8048_v2, 4  ;;  %v6604_v35 = vrot.slane %v6445_v59, 5  ;;  %v10710_v2 = vld [vmem:[#allocation2 + $0x4c] sm:$0xf] }
 0x251   : > { %v5844_v55 = vsel %vm11802_vm3, %v5839_v61, %v5843_v11  ;;  %v9803_v12 = vcombine.low %v6305_v51, %v6308_v9  ;;  %v6602_v38 = vsel %vm11107_vm7, %v9770_v5, %v6601_v48  ;;  %v6603_v57 = vrot.slane %v6601_v48, 4  ;;  %v7918_v5 = vld [vmem:[#allocation2 + $0xac] sm:$0xf]  ;;  %v7919_v48 = vld [vmem:[#allocation2 + $0xb0] sm:$0x3]  ;;  %v15471_v9 = vld [vmem:[#allocation45_spill] sm:$0xff] }
 0x252   : > { %v9771_v50 = vcombine.low %v5834_v27, %v5844_v55  ;;  %v8052_v7 = vsel %vm11181_vm13, %v8050_v21, %v8051_v60  ;;  %v15469_v3 = vshrl.u32 %v15468_v37, 16  ;;  %v15470_v51 = vshll.u32 %v15468_v37, 16 }
 0x253   : > { %v6944_v11 = vsel %vm1826_vm14, %v9803_v12, %v6847_v15  ;;  %v9892_v44 = vcombine.low %v8049_v33, %v8052_v7  ;;  %v4565_v61 = vshrl.u32 %v10710_v2, 16  ;;  %v6605_v60 = vsel %vm11107_vm7, %v6603_v57, %v6604_v35  ;;  %v13193_v15 = vld [vmem:[#allocation2 + $0x38] sm:$0x1]  ;;  %v13200_v57 = vpop.f32.mrf.mxu0 }
 0x254   : > { %v4558_v30 = vrot.slane %v15469_v3, 5  ;;  %v4561_v23 = vrot.slane %v15470_v51, 6  ;;  %v6880_v27 = vsel %vm1826_vm14, %v9771_v50, %v6719_v8  ;;  %7166 = vmatprep.mubr.bf16.mxu1 %v6944_v11  ;;  %v4568_v59 = vshll.u32 %v10710_v2, 16  ;;  %v6236_v3 = vld [vmem:[#allocation2 + $0xe4] sm:$0xf]  ;;  %v13198_v11 = vpop.f32.mrf.mxu1  ;;  %15475 = vst [vmem:[#allocation31_spill] sm:$0xff] %v13200_v57 }
 0x255   : > { %v15472_v21 = vshrl.u32 %v15471_v9, 16  ;;  %8209 = vrot.lane.b32.xlu1 %v9892_v44, %s10863_s23  ;;  %v9834_v33 = vcombine.low %v6602_v38, %v6605_v60  ;;  %v4567_v7 = vrot.slane %v4565_v61, 5  ;;  %v15473_v37 = vshll.u32 %v15471_v9, 16  ;;  %7167 = vmatmul.mubr.bf16.vlgmr.msra.gmra.mxu1 %v6880_v27  ;;  %v6239_v8 = vld [vmem:[#allocation2 + $0x30] sm:$0xe]  ;;  %15474 = vst [vmem:[#allocation27_spill] sm:$0xff] %v13198_v11 }
 0x256   : > { %v4562_v12 = vor.u32 %v4561_v23, %v4558_v30  ;;  %v7920_v50 = vld [vmem:[#allocation2 + $0xb4] sm:$0xc]  ;;  %v4570_v35 = vrot.slane %v4568_v59, 6  ;;  %v9861_v2 = vrot.slane %v7917_v62, 10  ;;  %v8058_v63 = vrot.slane %v7919_v48, 6  ;;  %10507 = vmatpush3.bf16.msra.mxu1 %v12962_v13  ;;  %v15476_v23 = vld [vmem:[#allocation47_spill] sm:$0xff] }
 0x257   : > { %v4577_v55 = vrot.slane %v15472_v21, 5  ;;  %v4580_v51 = vrot.slane %v15473_v37, 6  ;;  %v8055_v21 = vrot.slane %v7918_v5, 6  ;;  %6876 = vrot.lane.b32.xlu0 %v9834_v33, %s10863_s23  ;;  %v9802_v44 = vcombine.low %v6236_v3, %v13155_v10  ;;  %v7922_v27 = vld [vmem:[#allocation2 + $0xbc] sm:$0x3]  ;;  %10500 = vmatprep.subr.bf16.mxu1 %v12956_v39  ;;  %v13215_v3 = vpop.f32.mrf.mxu0  ;;  %v13219_v33 = vpop.permute.xlu0 %5239 }
 0x258   : > { %v4563_v38 = vrot.slane %v4562_v12, 4  ;;  %v5277_v61 = vsel %vm1826_vm14, %v15476_v23, %v13084_v25  ;;  %v4571_v60 = vor.u32 %v4570_v35, %v4567_v7  ;;  %v13211_v48 = vld [vmem:[#allocation2 + $0x34] sm:$0xf]  ;;  %v9740_v13 = vrot.slane %v6239_v8, 9  ;;  %15477 = vst [vmem:[#allocation35_spill] sm:$0xff] %v13215_v3  ;;  %v13217_v25 = vpop.f32.mrf.mxu1 }
 0x259   : > { %v4581_v30 = vor.u32 %v4580_v51, %v4577_v55  ;;  %v8056_v62 = vsel %vm11181_vm13, %v9861_v2, %v8055_v21  ;;  %v8057_v5 = vrot.slane %v8055_v21, 4  ;;  %v6311_v59 = vrot.slane %v13211_v48, 5  ;;  %15478 = vst [vmem:[#allocation32_spill] sm:$0xff] %v13217_v25 }
 0x25a   : > { %v6314_v9 = vrot.slane %v13193_v15, 5  ;;  %v9862_v10 = vrot.slane %v7920_v50, 10  ;;  %v8062_v55 = vrot.slane %v7921_v19, 6  ;;  %v4572_v12 = vsel %vm12034_vm6, %v4563_v38, %v4571_v60  ;;  %10508 = vmatpush3.bf16.msra.mxu1 %v12956_v39 }
 0x25b   : > { %v4573_v7 = vrot.slane %v4571_v60, 4  ;;  %v8059_v37 = vsel %vm11181_vm13, %v8057_v5, %v8058_v63  ;;  %v8065_v51 = vrot.slane %v7922_v27, 6  ;;  %6748 = vrot.lane.b32.xlu0 %v9802_v44, %s10863_s23  ;;  %v6312_v19 = vsel %vm11107_vm7, %v9740_v13, %v6311_v59  ;;  %10501 = vmatprep.subr.bf16.mxu1 %v12971_v41  ;;  %v10711_v60 = vld [vmem:[#allocation2 + $0x58] sm:$0xf]  ;;  %v5776_v13 = vld [vmem:[#allocation2 + $0x30] sm:$0xf] }
 0x25c   : > { %v9893_v8 = vcombine.low %v8056_v62, %v8059_v37  ;;  %v6313_v50 = vrot.slane %v6311_v59, 4  ;;  %v8063_v35 = vsel %vm11181_vm13, %v9862_v10, %v8062_v55  ;;  %v8064_v21 = vrot.slane %v8062_v55, 4  ;;  %v13241_v59 = vpop.f32.mrf.mxu1  ;;  %v6849_v37 = vpop.permute.xlu1 %6848 }
 0x25d   : > { %v4582_v2 = vsel %vm12034_vm6, %v4573_v7, %v4581_v30  ;;  %v15479_v63 = vshrl.u32 %v12071_v14, 16  ;;  %v15480_v39 = vshll.u32 %v12071_v14, 16  ;;  %v4593_v62 = vshrl.u32 %v10711_v60, 16  ;;  %15481 = vst [vmem:[#allocation38_spill] sm:$0xff] %v13241_v59  ;;  %v13243_v30 = vpop.f32.mrf.mxu0 }
 0x25e   : > { %v9695_v44 = vcombine.low %v4572_v12, %v4582_v2  ;;  %8211 = vrot.lane.b32.xlu1 %v9893_v8, %s10863_s23  ;;  %v6315_v27 = vsel %vm11107_vm7, %v6313_v50, %v6314_v9  ;;  %v4596_v5 = vshll.u32 %v10711_v60, 16  ;;  %15482 = vst [vmem:[#allocation41_spill] sm:$0xff] %v13243_v30  ;;  %v8066_v55 = vsel %vm11181_vm13, %v8064_v21, %v8065_v51 }
 0x25f   : > { %v4586_v38 = vrot.slane %v15479_v63, 5  ;;  %v4589_v23 = vrot.slane %v15480_v39, 6  ;;  %v9804_v10 = vcombine.low %v6312_v19, %v6315_v27  ;;  %v15483_v12 = vshrl.u32 %v12055_v54, 16  ;;  %10509 = vmatpush3.bf16.msra.mxu1 %v12971_v41  ;;  %v7923_v63 = vld [vmem:[#allocation2 + $0xc0] sm:$0xc]  ;;  %v13253_v19 = vpop.permute.xlu0 %5111 }
 0x260   : > { %v5341_v9 = vsel %vm1826_vm14, %v9695_v44, %v13058_v24  ;;  %v9894_v8 = vcombine.low %v8063_v35, %v8066_v55  ;;  %v4595_v50 = vrot.slane %v4593_v62, 5  ;;  %v4598_v2 = vrot.slane %v4596_v5, 6  ;;  %v7924_v39 = vld [vmem:[#allocation2 + $0xc4] sm:$0xf]  ;;  %10502 = vmatprep.subr.bf16.mxu1 %v12988_v29  ;;  %v7925_v27 = vld [vmem:[#allocation2 + $0xc8] sm:$0x3]  ;;  %v13260_v5 = vpop.f32.mrf.mxu0  ;;  %v13262_v55 = vpop.f32.mrf.mxu1 }
 0x261   : > { %v4590_v14 = vor.u32 %v4589_v23, %v4586_v38  ;;  %v4605_v7 = vrot.slane %v15483_v12, 5  ;;  %5579 = vmatprep.mubr.bf16.mxu0 %v5341_v9  ;;  %v6948_v51 = vsel %vm1826_vm14, %v9804_v10, %v6849_v37  ;;  %v15484_v38 = vshll.u32 %v12055_v54, 16  ;;  %v7926_v62 = vld [vmem:[#allocation2 + $0xcc] sm:$0xc]  ;;  %15485 = vst [vmem:[#allocation39_spill] sm:$0xff] %v13260_v5  ;;  %15486 = vst [vmem:[#allocation43_spill] sm:$0xff] %v13262_v55 }
 0x262   : > { %v5846_v23 = vshrl.u32 %v5776_v13, 16  ;;  %5580 = vmatmul.mubr.bf16.gmra.mxu0 %v5277_v61  ;;  %7174 = vmatprep.mubr.bf16.mxu1 %v6948_v51  ;;  %v4599_v24 = vor.u32 %v4598_v2, %v4595_v50  ;;  %v5849_v35 = vshll.u32 %v5776_v13, 16  ;;  %v5855_v44 = vshll.u32 %v13211_v48, 16  ;;  %v7927_v61 = vld [vmem:[#allocation2 + $0xd0] sm:$0xf] }
 0x263   : > { %v4591_v21 = vrot.slane %v4590_v14, 4  ;;  %v4608_v41 = vrot.slane %v15484_v38, 6  ;;  %v5859_v60 = vshrl.u32 %v13211_v48, 16  ;;  %8213 = vrot.lane.b32.xlu1 %v9894_v8, %s10863_s23  ;;  %v5865_v14 = vshll.u32 %v13193_v15, 16  ;;  %10510 = vmatpush3.bf16.msra.mxu1 %v12988_v29  ;;  %v13272_v29 = vpop.f32.mrf.mxu0  ;;  %v6241_v5 = vld [vmem:[#allocation2 + $0x48] sm:$0xe] }
 0x264   : > { %v5848_v54 = vrot.slane %v5846_v23, 4  ;;  %v9863_v12 = vrot.slane %v7923_v63, 10  ;;  %v4601_v9 = vrot.slane %v4599_v24, 4  ;;  %v5851_v48 = vrot.slane %v5849_v35, 5  ;;  %10503 = vmatprep.subr.bf16.mxu1 %v13013_v17  ;;  %15487 = vst [vmem:[#allocation46_spill] sm:$0xff] %v13272_v29  ;;  %v13274_v23 = vpop.f32.mrf.mxu1 }
 0x265   : > { %v4609_v10 = vor.u32 %v4608_v41, %v4605_v7  ;;  %v4600_v13 = vsel %vm12034_vm6, %v4591_v21, %v4599_v24  ;;  %v5857_v37 = vrot.slane %v5855_v44, 5  ;;  %v5861_v50 = vrot.slane %v5859_v60, 4  ;;  %v7928_v7 = vld [vmem:[#allocation2 + $0xd4] sm:$0x3]  ;;  %15488 = vst [vmem:[#allocation45_spill] sm:$0xff] %v13274_v23  ;;  %v13278_v24 = vpop.permute.xlu0 %5241 }
 0x266   : > { %v5867_v2 = vrot.slane %v5865_v14, 5  ;;  %v8069_v51 = vrot.slane %v7924_v39, 6  ;;  %v8072_v8 = vrot.slane %v7925_v27, 6  ;;  %v5852_v63 = vor.u32 %v5851_v48, %v5848_v54  ;;  %v13276_v21 = vld [vmem:[#allocation7 + $0x200] sm:$0xff]   ;;  %v6240_v60 = vld [vmem:[#allocation2 + $0x3c] sm:$0xe] }
 0x267   : > { %v4610_v15 = vsel %vm12034_vm6, %v4601_v9, %v4609_v10  ;;  %v9864_v38 = vrot.slane %v7926_v62, 10  ;;  %v8076_v41 = vrot.slane %v7927_v61, 6  ;;  %v5862_v44 = vor.u32 %v5861_v50, %v5857_v37  ;;  %10511 = vmatpush3.bf16.msra.mxu1 %v13013_v17  ;;  %v13285_v61 = vld [vmem:[#allocation2 + $0x44] sm:$0x1]  ;;  %10424 = vmatprep.subr.bf16.mxu0 %v13276_v21  ;;  %v15489_v48 = vld [vmem:[#allocation48_spill] sm:$0xff] }
 0x268   : > { %v9696_v35 = vcombine.low %v4600_v13, %v4610_v15  ;;  %v8070_v39 = vsel %vm11181_vm13, %v9863_v12, %v8069_v51  ;;  %v8071_v27 = vrot.slane %v8069_v51, 4  ;;  %v5853_v10 = vrot.slane %v5852_v63, 4  ;;  %10504 = vmatprep.subr.bf16.mxu1 %v13039_v18  ;;  %v6721_v13 = vpop.permute.xlu1 %6720  ;;  %10425 = vmatpush3.bf16.msra.mxu0 %v13276_v21  ;;  %v5780_v63 = vld [vmem:[#allocation2 + $0x40] sm:$0xf]  ;;  %v7932_v29 = vld [vmem:[#allocation2 + $0xe4] sm:$0xc] }
 0x269   : > { %v8077_v62 = vsel %vm11181_vm13, %v9864_v38, %v8076_v41  ;;  %v8078_v54 = vrot.slane %v8076_v41, 4  ;;  %v8079_v14 = vrot.slane %v7928_v7, 6  ;;  %v5863_v9 = vrot.slane %v5862_v44, 4  ;;  %v13301_v38 = vpop.f32.mrf.mxu0  ;;  %v13303_v41 = vpop.f32.mrf.mxu1 }
 0x26a   : > { %v5345_v12 = vsel %vm1826_vm14, %v9696_v35, %v13108_v6  ;;  %v8073_v17 = vsel %vm11181_vm13, %v8071_v27, %v8072_v8  ;;  %v5281_v50 = vsel %vm1826_vm14, %v15489_v48, %v13125_v52  ;;  %v5858_v51 = vsel %vm11802_vm3, %v5853_v10, %v5857_v37  ;;  %15490 = vst [vmem:[#allocation47_spill] sm:$0xff] %v13301_v38 }
 0x26b   : > { %5587 = vmatprep.mubr.bf16.mxu0 %v5345_v12  ;;  %v9895_v7 = vcombine.low %v8070_v39, %v8073_v17  ;;  %v8080_v15 = vsel %vm11181_vm13, %v8078_v54, %v8079_v14  ;;  %v9741_v6 = vrot.slane %v6240_v60, 9  ;;  %15491 = vst [vmem:[#allocation48_spill] sm:$0xff] %v13303_v41  ;;  %v5868_v8 = vsel %vm11802_vm3, %v5863_v9, %v5867_v2  ;;  %v10712_v54 = vld [vmem:[#allocation2 + $0x64] sm:$0xf]  ;;  %v5779_v12 = vld [vmem:[#allocation2 + $0x3c] sm:$0xf]  ;;  %v13315_v2 = vpop.permute.xlu0 %5113 }
 0x26c   : > { %v9896_v52 = vcombine.low %v8077_v62, %v8080_v15  ;;  %5588 = vmatmul.mubr.bf16.gmra.mxu0 %v5281_v50  ;;  %v6318_v35 = vrot.slane %v5780_v63, 5  ;;  %v6321_v44 = vrot.slane %v13285_v61, 5  ;;  %10512 = vmatpush3.bf16.msra.mxu1 %v13039_v18  ;;  %v9772_v37 = vcombine.low %v5858_v51, %v5868_v8  ;;  %v13325_v8 = vpop.f32.mrf.mxu1  ;;  %v7415_v41 = vld [vmem:[#allocation2 + $0x84] sm:$0xe] }
 0x26d   : > { %8215 = vrot.lane.b32.xlu0 %v9895_v7, %s10863_s23  ;;  %v15492_v39 = vshrl.u32 %v12191_v16, 16  ;;  %v15493_v60 = vshll.u32 %v12191_v16, 16  ;;  %v4621_v14 = vshrl.u32 %v10712_v54, 16  ;;  %10505 = vmatprep.subr.bf16.mxu1 %v13134_v49  ;;  %v4624_v9 = vshll.u32 %v10712_v54, 16  ;;  %15496 = vst [vmem:[#allocation50_spill] sm:$0xff] %v13325_v8 }
 0x26e   : > { %8217 = vrot.lane.b32.xlu1 %v9896_v52, %s10863_s23  ;;  %v6319_v18 = vsel %vm11107_vm7, %v9741_v6, %v6318_v35  ;;  %v6320_v62 = vrot.slane %v6318_v35, 4  ;;  %v15494_v17 = vshrl.u32 %v12153_v22, 16  ;;  %v6884_v16 = vsel %vm1826_vm14, %v9772_v37, %v6721_v13  ;;  %v6851_v52 = vpop.permute.xlu1 %6850 }
 0x26f   : > { %v4614_v27 = vrot.slane %v15492_v39, 5  ;;  %v4617_v10 = vrot.slane %v15493_v60, 6  ;;  %v4623_v51 = vrot.slane %v4621_v14, 5  ;;  %v15495_v7 = vshll.u32 %v12153_v22, 16  ;;  %v13327_v39 = vpop.f32.mrf.mxu0  ;;  %7175 = vmatmul.mubr.bf16.gmra.mxu1 %v6884_v16  ;;  %v7931_v22 = vld [vmem:[#allocation2 + $0xe0] sm:$0x3] }
 0x270   : > { %v4633_v48 = vrot.slane %v15494_v17, 5  ;;  %15497 = vst [vmem:[#allocation51_spill] sm:$0xff] %v13327_v39  ;;  %v6322_v6 = vsel %vm11107_vm7, %v6320_v62, %v6321_v44  ;;  %v4626_v35 = vrot.slane %v4624_v9, 6  ;;  %v5870_v60 = vshrl.u32 %v5779_v12, 16  ;;  %v7929_v17 = vld [vmem:[#allocation2 + $0xd8] sm:$0xc]  ;;  %10513 = vmatpush3.bf16.msra.mxu1 %v13134_v49 }
 0x271   : > { %v4618_v50 = vor.u32 %v4617_v10, %v4614_v27  ;;  %v4636_v15 = vrot.slane %v15495_v7, 6  ;;  %v5873_v54 = vshll.u32 %v5779_v12, 16  ;;  %v9805_v38 = vcombine.low %v6319_v18, %v6322_v6  ;;  %v7930_v10 = vld [vmem:[#allocation2 + $0xdc] sm:$0xf]  ;;  %10506 = vmatprep.subr.bf16.mxu1 %v13276_v21  ;;  %v7933_v9 = vld [vmem:[#allocation2 + $0xe8] sm:$0xf] }
 0x272   : > { %v5879_v27 = vshll.u32 %v5780_v63, 16  ;;  %v4627_v14 = vor.u32 %v4626_v35, %v4623_v51  ;;  %v5872_v7 = vrot.slane %v5870_v60, 4  ;;  %v5883_v16 = vshrl.u32 %v5780_v63, 16  ;;  %v7934_v35 = vld [vmem:[#allocation2 + $0xec] sm:$0x3] }
 0x273   : > { %v4619_v13 = vrot.slane %v4618_v50, 4  ;;  %v4637_v37 = vor.u32 %v4636_v15, %v4633_v48  ;;  %v5875_v39 = vrot.slane %v5873_v54, 5  ;;  %v6952_v44 = vsel %vm1826_vm14, %v9805_v38, %v6851_v52  ;;  %v13335_v48 = vpop.f32.mrf.mxu0  ;;  %v13337_v50 = vpop.f32.mrf.mxu1 }
 0x274   : > { %v5881_v62 = vrot.slane %v5879_v27, 5  ;;  %v5889_v12 = vshll.u32 %v13285_v61, 16  ;;  %v9865_v18 = vrot.slane %v7929_v17, 10  ;;  %15498 = vst [vmem:[#allocation52_spill] sm:$0xff] %v13335_v48  ;;  %15499 = vst [vmem:[#allocation53_spill] sm:$0xff] %v13337_v50  ;;  %v13339_v15 = vpop.permute.xlu0 %5243  ;;  %7182 = vmatprep.mubr.bf16.mxu1 %v6952_v44  ;;  %v4629_v63 = vrot.slane %v4627_v14, 4  ;;  %10514 = vmatpush3.bf16.msra.mxu1 %v13276_v21  ;;  %v6723_v54 = vpop.permute.xlu1 %6722 }
 0x275   : > { %v4628_v49 = vsel %vm12034_vm6, %v4619_v13, %v4627_v14  ;;  %v5876_v51 = vor.u32 %v5875_v39, %v5872_v7  ;;  %v5885_v6 = vrot.slane %v5883_v16, 4  ;;  %v8083_v52 = vrot.slane %v7930_v10, 6  ;;  %v13348_v7 = vpop.f32.mrf.mxu1  ;;  %v13350_v10 = vpop.f32.mrf.mxu0  ;;  %v13356_v16 = vld [vmem:[#allocation2 + $0x50] sm:$0x1] }
 0x276   : > { %v5891_v38 = vrot.slane %v5889_v12, 5  ;;  %v8086_v60 = vrot.slane %v7931_v22, 6  ;;  %v9866_v61 = vrot.slane %v7932_v29, 10  ;;  %v4638_v17 = vsel %vm12034_vm6, %v4629_v63, %v4637_v37  ;;  %15500 = vst [vmem:[#allocation54_spill] sm:$0xff] %v13348_v7  ;;  %15501 = vst [vmem:[#allocation55_spill] sm:$0xff] %v13350_v10 }
 0x277   : > { %v5877_v27 = vrot.slane %v5876_v51, 4  ;;  %v5886_v48 = vor.u32 %v5885_v6, %v5881_v62  ;;  %v8090_v44 = vrot.slane %v7933_v9, 6  ;;  %v9697_v30 = vcombine.low %v4628_v49, %v4638_v17  ;;  %v5783_v49 = vld [vmem:[#allocation2 + $0x4c] sm:$0xf] }
 0x278   : > { %v8084_v39 = vsel %vm11181_vm13, %v9865_v18, %v8083_v52  ;;  %v8085_v13 = vrot.slane %v8083_v52, 4  ;;  %v8093_v14 = vrot.slane %v7934_v35, 6  ;;  %v5285_v9 = vsel %vm1826_vm14, %v12226_v26, %v13253_v19  ;;  %v6853_v17 = vpop.permute.xlu1 %6852 }
 0x279   : > { %v5882_v29 = vsel %vm11802_vm3, %v5877_v27, %v5881_v62  ;;  %v5887_v21 = vrot.slane %v5886_v48, 4  ;;  %v8091_v37 = vsel %vm11181_vm13, %v9866_v61, %v8090_v44  ;;  %v8092_v22 = vrot.slane %v8090_v44, 4  ;;  %v13365_v62 = vpop.permute.xlu0 %5115  ;;  %v13376_v61 = vpop.f32.mrf.mxu1 }
 0x27a   : > { %v5349_v12 = vsel %vm1826_vm14, %v9697_v30, %v13219_v33  ;;  %v8087_v18 = vsel %vm11181_vm13, %v8085_v13, %v8086_v60  ;;  %v9742_v63 = vrot.slane %v6241_v5, 9  ;;  %v6325_v33 = vrot.slane %v5783_v49, 5  ;;  %v5782_v5 = vld [vmem:[#allocation2 + $0x48] sm:$0xf]  ;;  %v13374_v60 = vpop.f32.mrf.mxu0  ;;  %15504 = vst [vmem:[#allocation57_spill] sm:$0xff] %v13376_v61 }
 0x27b   : > { %5595 = vmatprep.mubr.bf16.mxu0 %v5349_v12  ;;  %v5892_v48 = vsel %vm11802_vm3, %v5887_v21, %v5891_v38  ;;  %v9897_v51 = vcombine.low %v8084_v39, %v8087_v18  ;;  %v8094_v6 = vsel %vm11181_vm13, %v8092_v22, %v8093_v14  ;;  %v6328_v52 = vrot.slane %v13356_v16, 5  ;;  %15503 = vst [vmem:[#allocation56_spill] sm:$0xff] %v13374_v60  ;;  %v10713_v39 = vld [vmem:[#allocation2 + $0x70] sm:$0xf] }
 0x27c   : > { %v9773_v30 = vcombine.low %v5882_v29, %v5892_v48  ;;  %v9898_v35 = vcombine.low %v8091_v37, %v8094_v6  ;;  %5596 = vmatmul.mubr.bf16.gmra.mxu0 %v5285_v9  ;;  %v15502_v26 = vshrl.u32 %v12263_v56, 16  ;;  %v6326_v28 = vsel %vm11107_vm7, %v9742_v63, %v6325_v33 }
 0x27d   : > { %8219 = vrot.lane.b32.xlu0 %v9897_v51, %s10863_s23  ;;  %v6327_v38 = vrot.slane %v6325_v33, 4  ;;  %v15505_v27 = vshll.u32 %v12263_v56, 16  ;;  %v4649_v13 = vshrl.u32 %v10713_v39, 16  ;;  %v4652_v29 = vshll.u32 %v10713_v39, 16  ;;  %v6242_v33 = vld [vmem:[#allocation2 + $0x54] sm:$0xe] }
 0x27e   : > { %v4642_v19 = vrot.slane %v15502_v26, 5  ;;  %v6888_v14 = vsel %vm1826_vm14, %v9773_v30, %v6723_v54  ;;  %8221 = vrot.lane.b32.xlu1 %v9898_v35, %s10863_s23  ;;  %v15506_v21 = vshrl.u32 %v12230_v20, 16  ;;  %v15507_v22 = vshll.u32 %v12230_v20, 16  ;;  %v13391_v30 = vpop.f32.mrf.mxu1  ;;  %v13393_v35 = vpop.f32.mrf.mxu0 }
 0x27f   : > { %v4645_v44 = vrot.slane %v15505_v27, 6  ;;  %7183 = vmatmul.mubr.bf16.gmra.mxu1 %v6888_v14  ;;  %v6329_v18 = vsel %vm11107_vm7, %v6327_v38, %v6328_v52  ;;  %v4651_v56 = vrot.slane %v4649_v13, 5  ;;  %v5894_v63 = vshrl.u32 %v5782_v5, 16  ;;  %15508 = vst [vmem:[#allocation58_spill] sm:$0xff] %v13391_v30  ;;  %15509 = vst [vmem:[#allocation59_spill] sm:$0xff] %v13393_v35  ;;  %v13395_v26 = vpop.permute.xlu0 %5245 }
 0x280   : > { %v4661_v37 = vrot.slane %v15506_v21, 5  ;;  %v4664_v12 = vrot.slane %v15507_v22, 6  ;;  %v9806_v48 = vcombine.low %v6326_v28, %v6329_v18  ;;  %v4654_v51 = vrot.slane %v4652_v29, 6  ;;  %v5786_v18 = vld [vmem:[#allocation2 + $0x58] sm:$0xf] }
 0x281   : > { %v4646_v9 = vor.u32 %v4645_v44, %v4642_v19  ;;  %v5897_v54 = vshll.u32 %v5782_v5, 16  ;;  %v5896_v27 = vrot.slane %v5894_v63, 4  ;;  %v5903_v39 = vshll.u32 %v5783_v49, 16  ;;  %v13399_v44 = vld [vmem:[#allocation2 + $0x5c] sm:$0x1]  ;;  %v6725_v5 = vpop.permute.xlu1 %6724 }
 0x282   : > { %v4665_v6 = vor.u32 %v4664_v12, %v4661_v37  ;;  %v5907_v14 = vshrl.u32 %v5783_v49, 16  ;;  %v6956_v52 = vsel %vm1826_vm14, %v9806_v48, %v6853_v17  ;;  %v4655_v19 = vor.u32 %v4654_v51, %v4651_v56  ;;  %v6243_v35 = vld [vmem:[#allocation2 + $0x60] sm:$0xe] }
 0x283   : > { %v4647_v20 = vrot.slane %v4646_v9, 4  ;;  %v5899_v38 = vrot.slane %v5897_v54, 5  ;;  %v5913_v28 = vshll.u32 %v13356_v16, 16  ;;  %7190 = vmatprep.mubr.bf16.mxu1 %v6956_v52  ;;  %v5905_v13 = vrot.slane %v5903_v39, 5  ;;  %v13406_v9 = vpop.f32.mrf.mxu0  ;;  %v13408_v16 = vpop.f32.mrf.mxu1 }
 0x284   : > { %v5909_v29 = vrot.slane %v5907_v14, 4  ;;  %v5289_v21 = vsel %vm1826_vm14, %v12300_v53, %v13315_v2  ;;  %v9743_v37 = vrot.slane %v6242_v33, 9  ;;  %v4657_v22 = vrot.slane %v4655_v19, 4  ;;  %15510 = vst [vmem:[#allocation60_spill] sm:$0xff] %v13406_v9  ;;  %15511 = vst [vmem:[#allocation61_spill] sm:$0xff] %v13408_v16  ;;  %v13417_v14 = vpop.permute.xlu0 %5117 }
 0x285   : > { %v4656_v49 = vsel %vm12034_vm6, %v4647_v20, %v4655_v19  ;;  %v5900_v17 = vor.u32 %v5899_v38, %v5896_v27  ;;  %v5915_v12 = vrot.slane %v5913_v28, 5  ;;  %v6332_v63 = vrot.slane %v5786_v18, 5  ;;  %v10714_v27 = vld [vmem:[#allocation2 + $0x7c] sm:$0xf] }
 0x286   : > { %v5910_v56 = vor.u32 %v5909_v29, %v5905_v13  ;;  %v6335_v48 = vrot.slane %v13399_v44, 5  ;;  %v15512_v51 = vshrl.u32 %v12338_v0, 16  ;;  %v4666_v53 = vsel %vm12034_vm6, %v4657_v22, %v4665_v6  ;;  %v5785_v22 = vld [vmem:[#allocation2 + $0x54] sm:$0xf]  ;;  %v7405_v16 = vld [vmem:[#allocation2 + $0x5c] sm:$0x3] }
 0x287   : > { %v5901_v2 = vrot.slane %v5900_v17, 4  ;;  %v15513_v33 = vshll.u32 %v12338_v0, 16  ;;  %v4677_v39 = vshrl.u32 %v10714_v27, 16  ;;  %v9698_v52 = vcombine.low %v4656_v49, %v4666_v53  ;;  %v13423_v17 = vpop.f32.mrf.mxu1  ;;  %v13425_v0 = vpop.f32.mrf.mxu0 }
 0x288   : > { %v4670_v54 = vrot.slane %v15512_v51, 5  ;;  %v5911_v19 = vrot.slane %v5910_v56, 4  ;;  %v6333_v38 = vsel %vm11107_vm7, %v9743_v37, %v6332_v63  ;;  %v6334_v28 = vrot.slane %v6332_v63, 4  ;;  %15514 = vst [vmem:[#allocation62_spill] sm:$0xff] %v13423_v17  ;;  %15515 = vst [vmem:[#allocation63_spill] sm:$0xff] %v13425_v0  ;;  %v6855_v56 = vpop.permute.xlu1 %6854 }
 0x289   : > { %v4673_v20 = vrot.slane %v15513_v33, 6  ;;  %v5906_v29 = vsel %vm11802_vm3, %v5901_v2, %v5905_v13  ;;  %v4679_v9 = vrot.slane %v4677_v39, 5  ;;  %v4680_v6 = vshll.u32 %v10714_v27, 16 }
 0x28a   : > { %v5353_v33 = vsel %vm1826_vm14, %v9698_v52, %v13278_v24  ;;  %v5916_v49 = vsel %vm11802_vm3, %v5911_v19, %v5915_v12  ;;  %v6336_v37 = vsel %vm11107_vm7, %v6334_v28, %v6335_v48  ;;  %v15516_v13 = vshrl.u32 %v12303_v46, 16 }
 0x28b   : > { %v4674_v51 = vor.u32 %v4673_v20, %v4670_v54  ;;  %5603 = vmatprep.mubr.bf16.mxu0 %v5353_v33  ;;  %v9774_v54 = vcombine.low %v5906_v29, %v5916_v49  ;;  %v9807_v53 = vcombine.low %v6333_v38, %v6336_v37  ;;  %v4682_v20 = vrot.slane %v4680_v6, 6  ;;  %v13441_v29 = vpop.f32.mrf.mxu1  ;;  %v13443_v38 = vpop.permute.xlu0 %5247  ;;  %v13450_v49 = vld [vmem:[#allocation2 + $0x90] sm:$0xe] }
 0x28c   : > { %v4689_v63 = vrot.slane %v15516_v13, 5  ;;  %5604 = vmatmul.mubr.bf16.gmra.mxu0 %v5289_v21  ;;  %v15517_v27 = vshll.u32 %v12303_v46, 16  ;;  %v5918_v24 = vshrl.u32 %v5785_v22, 16  ;;  %v5921_v52 = vshll.u32 %v5785_v22, 16  ;;  %v13439_v13 = vpop.f32.mrf.mxu0  ;;  %15519 = vst [vmem:[#allocation65_spill] sm:$0xff] %v13441_v29  ;;  %v6727_v37 = vpop.permute.xlu1 %6726 }
 0x28d   : > { %v4675_v2 = vrot.slane %v4674_v51, 4  ;;  %v5927_v0 = vshll.u32 %v5786_v18, 16  ;;  %v6892_v12 = vsel %vm1826_vm14, %v9774_v54, %v6725_v5  ;;  %v6960_v19 = vsel %vm1826_vm14, %v9807_v53, %v6855_v56  ;;  %15518 = vst [vmem:[#allocation64_spill] sm:$0xff] %v13439_v13 }
 0x28e   : > { %v4692_v39 = vrot.slane %v15517_v27, 6  ;;  %v4683_v48 = vor.u32 %v4682_v20, %v4679_v9  ;;  %v5931_v28 = vshrl.u32 %v5786_v18, 16  ;;  %7191 = vmatmul.mubr.bf16.gmra.mxu1 %v6892_v12  ;;  %v5920_v46 = vrot.slane %v5918_v24, 4  ;;  %v13448_v9 = vld [vmem:[#allocation2 + $0x68] sm:$0x1]  ;;  %v13460_v24 = vpop.f32.mrf.mxu0 }
 0x28f   : > { %v5923_v51 = vrot.slane %v5921_v52, 5  ;;  %v5929_v6 = vrot.slane %v5927_v0, 5  ;;  %7198 = vmatprep.mubr.bf16.mxu1 %v6960_v19  ;;  %v5937_v18 = vshll.u32 %v13399_v44, 16  ;;  %v5293_v0 = vsel %vm1826_vm14, %v12367_v4, %v13365_v62  ;;  %15521 = vst [vmem:[#allocation67_spill] sm:$0xff] %v13460_v24 }
 0x290   : > { %v4693_v21 = vor.u32 %v4692_v39, %v4689_v63  ;;  %v4684_v5 = vsel %vm12034_vm6, %v4675_v2, %v4683_v48  ;;  %v4685_v22 = vrot.slane %v4683_v48, 4  ;;  %v5933_v33 = vrot.slane %v5931_v28, 4  ;;  %v5789_v63 = vld [vmem:[#allocation2 + $0x64] sm:$0xf]  ;;  %v13458_v39 = vpop.f32.mrf.mxu1 }
 0x291   : > { %v5924_v54 = vor.u32 %v5923_v51, %v5920_v46  ;;  %v9744_v53 = vrot.slane %v6243_v35, 9  ;;  %v5939_v27 = vrot.slane %v5937_v18, 5  ;;  %v6339_v44 = vrot.slane %v5789_v63, 5  ;;  %15520 = vst [vmem:[#allocation66_spill] sm:$0xff] %v13458_v39  ;;  %v13469_v51 = vpop.permute.xlu0 %5119 }
 0x292   : > { %v4694_v2 = vsel %vm12034_vm6, %v4685_v22, %v4693_v21  ;;  %v5934_v20 = vor.u32 %v5933_v33, %v5929_v6  ;;  %v6342_v19 = vrot.slane %v13448_v9, 5  ;;  %v15522_v48 = vshrl.u32 %v12407_v40, 16  ;;  %v10716_v33 = vld [vmem:[#allocation2 + $0x88] sm:$0xf] }
 0x293   : > { %v9699_v52 = vcombine.low %v4684_v5, %v4694_v2  ;;  %v5925_v12 = vrot.slane %v5924_v54, 4  ;;  %v6340_v62 = vsel %vm11107_vm7, %v9744_v53, %v6339_v44  ;;  %v6341_v35 = vrot.slane %v6339_v44, 4  ;;  %v5788_v2 = vld [vmem:[#allocation2 + $0x60] sm:$0xf] }
 0x294   : > { %v4698_v28 = vrot.slane %v15522_v48, 5  ;;  %v5935_v4 = vrot.slane %v5934_v20, 4  ;;  %v15523_v21 = vshll.u32 %v12407_v40, 16  ;;  %v4705_v18 = vshrl.u32 %v10716_v33, 16 }
 0x295   : > { %v5357_v22 = vsel %vm1826_vm14, %v9699_v52, %v13339_v15  ;;  %v5930_v5 = vsel %vm11802_vm3, %v5925_v12, %v5929_v6  ;;  %v4708_v54 = vshll.u32 %v10716_v33, 16  ;;  %v6343_v40 = vsel %vm11107_vm7, %v6341_v35, %v6342_v19  ;;  %v13483_v15 = vpop.f32.mrf.mxu1  ;;  %v6857_v52 = vpop.permute.xlu1 %6856 }
 0x296   : > { %v4701_v46 = vrot.slane %v15523_v21, 6  ;;  %5611 = vmatprep.mubr.bf16.mxu0 %v5357_v22  ;;  %v5940_v53 = vsel %vm11802_vm3, %v5935_v4, %v5939_v27  ;;  %v15524_v44 = vshrl.u32 %v12371_v45, 16  ;;  %v13481_v21 = vpop.f32.mrf.mxu0  ;;  %15526 = vst [vmem:[#allocation69_spill] sm:$0xff] %v13483_v15  ;;  %v9808_v12 = vcombine.low %v6340_v62, %v6343_v40 }
 0x297   : > { %15525 = vst [vmem:[#allocation68_spill] sm:$0xff] %v13481_v21  ;;  %v9775_v6 = vcombine.low %v5930_v5, %v5940_v53  ;;  %5612 = vmatmul.mubr.bf16.gmra.mxu0 %v5293_v0  ;;  %v4707_v33 = vrot.slane %v4705_v18, 5  ;;  %v4710_v22 = vrot.slane %v4708_v54, 6  ;;  %v15527_v27 = vshll.u32 %v12371_v45, 16  ;;  %v13489_v62 = vpop.f32.mrf.mxu1  ;;  %v13493_v54 = vpop.permute.xlu0 %5249 }
 0x298   : > { %v4702_v20 = vor.u32 %v4701_v46, %v4698_v28  ;;  %v4717_v48 = vrot.slane %v15524_v44, 5  ;;  %v5942_v24 = vshrl.u32 %v5788_v2, 16  ;;  %v5945_v19 = vshll.u32 %v5788_v2, 16  ;;  %15528 = vst [vmem:[#allocation70_spill] sm:$0xff] %v13489_v62  ;;  %v13491_v18 = vpop.f32.mrf.mxu0 }
 0x299   : > { %v4720_v4 = vrot.slane %v15527_v27, 6  ;;  %v6896_v28 = vsel %vm1826_vm14, %v9775_v6, %v6727_v37  ;;  %v6964_v35 = vsel %vm1826_vm14, %v9808_v12, %v6857_v52  ;;  %v4711_v46 = vor.u32 %v4710_v22, %v4707_v33  ;;  %15529 = vst [vmem:[#allocation71_spill] sm:$0xff] %v13491_v18  ;;  %v10717_v6 = vld [vmem:[#allocation2 + $0x98] sm:$0x3]  ;;  %v6729_v33 = vpop.permute.xlu1 %6728 }
 0x29a   : > { %v4703_v56 = vrot.slane %v4702_v20, 4  ;;  %v5951_v44 = vshll.u32 %v5789_v63, 16  ;;  %7199 = vmatmul.mubr.bf16.gmra.mxu1 %v6896_v28  ;;  %v5944_v5 = vrot.slane %v5942_v24, 4  ;;  %v5947_v53 = vrot.slane %v5945_v19, 5  ;;  %v6244_v20 = vld [vmem:[#allocation2 + $0x6c] sm:$0xe] }
 0x29b   : > { %v4721_v21 = vor.u32 %v4720_v4, %v4717_v48  ;;  %v5955_v0 = vshrl.u32 %v5789_v63, 16  ;;  %7206 = vmatprep.mubr.bf16.mxu1 %v6964_v35  ;;  %v4713_v37 = vrot.slane %v4711_v46, 4  ;;  %v5961_v40 = vshll.u32 %v13448_v9, 16  ;;  %v13498_v63 = vld [vmem:[#allocation2 + $0x74] sm:$0x1] }
 0x29c   : > { %v4712_v45 = vsel %vm12034_vm6, %v4703_v56, %v4711_v46  ;;  %v5953_v2 = vrot.slane %v5951_v44, 5  ;;  %v4743_v48 = vshrl.u32 %v10717_v6, 16  ;;  %v5948_v24 = vor.u32 %v5947_v53, %v5944_v5  ;;  %v5792_v28 = vld [vmem:[#allocation2 + $0x70] sm:$0xf]  ;;  %v13505_v46 = vpop.f32.mrf.mxu0  ;;  %v13507_v44 = vpop.f32.mrf.mxu1 }
 0x29d   : > { %v5957_v52 = vrot.slane %v5955_v0, 4  ;;  %v4746_v12 = vshll.u32 %v10717_v6, 16  ;;  %v4722_v22 = vsel %vm12034_vm6, %v4713_v37, %v4721_v21  ;;  %v5963_v27 = vrot.slane %v5961_v40, 5  ;;  %15530 = vst [vmem:[#allocation72_spill] sm:$0xff] %v13505_v46  ;;  %15531 = vst [vmem:[#allocation73_spill] sm:$0xff] %v13507_v44 }
 0x29e   : > { %v5297_v56 = vsel %vm1826_vm14, %v12438_v58, %v13417_v14  ;;  %v9700_v4 = vcombine.low %v4712_v45, %v4722_v22  ;;  %v5949_v19 = vrot.slane %v5948_v24, 4  ;;  %v9745_v35 = vrot.slane %v6244_v20, 9  ;;  %v10718_v20 = vld [vmem:[#allocation2 + $0x94] sm:$0xf]  ;;  %v13518_v24 = vpop.permute.xlu0 %5121 }
 0x29f   : > { %v5958_v9 = vor.u32 %v5957_v52, %v5953_v2  ;;  %v6346_v5 = vrot.slane %v5792_v28, 5  ;;  %v6349_v53 = vrot.slane %v13498_v63, 5  ;;  %v15532_v0 = vshrl.u32 %v12476_v31, 16 }
 0x2a0   : > { %v15533_v37 = vshll.u32 %v13450_v49, 16  ;;  %v5361_v58 = vsel %vm1826_vm14, %v9700_v4, %v13395_v26  ;;  %v5954_v14 = vsel %vm11802_vm3, %v5949_v19, %v5953_v2  ;;  %v4733_v6 = vshrl.u32 %v10718_v20, 16  ;;  %v5791_v49 = vld [vmem:[#allocation2 + $0x6c] sm:$0xf]  ;;  %v13524_v19 = vpop.f32.mrf.mxu1 }
 0x2a1   : > { %v4726_v21 = vrot.slane %v15532_v0, 5  ;;  %v5959_v45 = vrot.slane %v5958_v9, 4  ;;  %5619 = vmatprep.mubr.bf16.mxu0 %v5361_v58  ;;  %v6347_v52 = vsel %vm11107_vm7, %v9745_v35, %v6346_v5  ;;  %v6348_v31 = vrot.slane %v6346_v5, 4  ;;  %15534 = vst [vmem:[#allocation74_spill] sm:$0xff] %v13524_v19  ;;  %v13526_v9 = vpop.f32.mrf.mxu0  ;;  %v6859_v58 = vpop.permute.xlu1 %6858 }
 0x2a2   : > { %v4729_v40 = vrot.slane %v15533_v37, 6  ;;  %v4736_v0 = vshll.u32 %v10718_v20, 16  ;;  %5620 = vmatmul.mubr.bf16.gmra.mxu0 %v5297_v56  ;;  %v4735_v26 = vrot.slane %v4733_v6, 5  ;;  %v4745_v4 = vrot.slane %v4743_v48, 5  ;;  %15535 = vst [vmem:[#allocation75_spill] sm:$0xff] %v13526_v9 }
 0x2a3   : > { %v5964_v37 = vsel %vm11802_vm3, %v5959_v45, %v5963_v27  ;;  %v4748_v2 = vrot.slane %v4746_v12, 6  ;;  %v6350_v35 = vsel %vm11107_vm7, %v6348_v31, %v6349_v53  ;;  %v5966_v18 = vshrl.u32 %v5791_v49, 16  ;;  %v13533_v9 = vpop.f32.mrf.mxu0  ;;  %v13535_v53 = vpop.f32.mrf.mxu1 }
 0x2a4   : > { %v4730_v22 = vor.u32 %v4729_v40, %v4726_v21  ;;  %v9776_v46 = vcombine.low %v5954_v14, %v5964_v37  ;;  %v4738_v21 = vrot.slane %v4736_v0, 6  ;;  %v9809_v40 = vcombine.low %v6347_v52, %v6350_v35  ;;  %15536 = vst [vmem:[#allocation76_spill] sm:$0xff] %v13533_v9  ;;  %15537 = vst [vmem:[#allocation77_spill] sm:$0xff] %v13535_v53  ;;  %v13537_v52 = vpop.permute.xlu0 %5251  ;;  %v10719_v0 = vld [vmem:[#allocation2 + $0xa4] sm:$0x3] }
 0x2a5   : > { %v4749_v20 = vor.u32 %v4748_v2, %v4745_v4  ;;  %v5969_v13 = vshll.u32 %v5791_v49, 16  ;;  %v5975_v48 = vshll.u32 %v5792_v28, 16  ;;  %v5979_v12 = vshrl.u32 %v5792_v28, 16 }
 0x2a6   : > { %v4731_v5 = vrot.slane %v4730_v22, 4  ;;  %v6900_v27 = vsel %vm1826_vm14, %v9776_v46, %v6729_v33  ;;  %v4739_v56 = vor.u32 %v4738_v21, %v4735_v26  ;;  %v6968_v45 = vsel %vm1826_vm14, %v9809_v40, %v6859_v58  ;;  %v6245_v22 = vld [vmem:[#allocation2 + $0x78] sm:$0xe]  ;;  %v13541_v26 = vld [vmem:[#allocation2 + $0x80] sm:$0x1] }
 0x2a7   : > { %7207 = vmatmul.mubr.bf16.gmra.mxu1 %v6900_v27  ;;  %v5968_v6 = vrot.slane %v5966_v18, 4  ;;  %v5971_v14 = vrot.slane %v5969_v13, 5  ;;  %v5985_v37 = vshll.u32 %v13498_v63, 16  ;;  %v5977_v31 = vrot.slane %v5975_v48, 5  ;;  %v6731_v63 = vpop.permute.xlu1 %6730  ;;  %v13548_v48 = vpop.f32.mrf.mxu1 }
 0x2a8   : > { %7214 = vmatprep.mubr.bf16.mxu1 %v6968_v45  ;;  %v4740_v33 = vsel %vm12034_vm6, %v4731_v5, %v4739_v56  ;;  %v4741_v46 = vrot.slane %v4739_v56, 4  ;;  %v5981_v28 = vrot.slane %v5979_v12, 4  ;;  %v4771_v49 = vshrl.u32 %v10719_v0, 16  ;;  %v5795_v5 = vld [vmem:[#allocation2 + $0x7c] sm:$0xf]  ;;  %15538 = vst [vmem:[#allocation78_spill] sm:$0xff] %v13548_v48  ;;  %v13550_v12 = vpop.f32.mrf.mxu0 }
 0x2a9   : > { %v4774_v18 = vshll.u32 %v10719_v0, 16  ;;  %v5972_v13 = vor.u32 %v5971_v14, %v5968_v6  ;;  %v5987_v58 = vrot.slane %v5985_v37, 5  ;;  %v5301_v35 = vsel %vm1826_vm14, %v12505_v32, %v13469_v51  ;;  %15539 = vst [vmem:[#allocation79_spill] sm:$0xff] %v13550_v12  ;;  %v10720_v14 = vld [vmem:[#allocation2 + $0x9c] sm:$0xe] }
 0x2aa   : > { %v4750_v4 = vsel %vm12034_vm6, %v4741_v46, %v4749_v20  ;;  %v5982_v2 = vor.u32 %v5981_v28, %v5977_v31  ;;  %v9746_v27 = vrot.slane %v6245_v22, 9  ;;  %v6353_v56 = vrot.slane %v5795_v5, 5  ;;  %v13559_v28 = vpop.permute.xlu0 %5123 }
 0x2ab   : > { %v9701_v21 = vcombine.low %v4740_v33, %v4750_v4  ;;  %v5973_v40 = vrot.slane %v5972_v13, 4  ;;  %v6356_v6 = vrot.slane %v13541_v26, 5  ;;  %v4752_v20 = vshrl.u32 %v10720_v14, 16  ;;  %v10721_v4 = vld [vmem:[#allocation2 + $0xa0] sm:$0xf] }
 0x2ac   : > { %v5983_v45 = vrot.slane %v5982_v2, 4  ;;  %v4755_v46 = vshll.u32 %v10720_v14, 16  ;;  %v6354_v51 = vsel %vm11107_vm7, %v9746_v27, %v6353_v56  ;;  %v6355_v33 = vrot.slane %v6353_v56, 4  ;;  %v5794_v14 = vld [vmem:[#allocation2 + $0x78] sm:$0xf]  ;;  %v13567_v27 = vpop.f32.mrf.mxu1 }
 0x2ad   : > { %v5365_v37 = vsel %vm1826_vm14, %v9701_v21, %v13443_v38  ;;  %v5978_v32 = vsel %vm11802_vm3, %v5973_v40, %v5977_v31  ;;  %v4754_v0 = vrot.slane %v4752_v20, 5  ;;  %v4761_v2 = vshrl.u32 %v10721_v4, 16  ;;  %v13565_v40 = vpop.f32.mrf.mxu0  ;;  %15541 = vst [vmem:[#allocation81_spill] sm:$0xff] %v13567_v27  ;;  %v6861_v20 = vpop.permute.xlu1 %6860 }
 0x2ae   : > { %5627 = vmatprep.mubr.bf16.mxu0 %v5365_v37  ;;  %v5988_v22 = vsel %vm11802_vm3, %v5983_v45, %v5987_v58  ;;  %v4757_v13 = vrot.slane %v4755_v46, 6  ;;  %v6357_v38 = vsel %vm11107_vm7, %v6355_v33, %v6356_v6  ;;  %v4764_v31 = vshll.u32 %v10721_v4, 16  ;;  %15540 = vst [vmem:[#allocation80_spill] sm:$0xff] %v13565_v40 }
 0x2af   : > { %v9777_v12 = vcombine.low %v5978_v32, %v5988_v22  ;;  %5628 = vmatmul.mubr.bf16.gmra.mxu0 %v5301_v35  ;;  %v4773_v21 = vrot.slane %v4771_v49, 5  ;;  %v9810_v56 = vcombine.low %v6354_v51, %v6357_v38  ;;  %v4763_v9 = vrot.slane %v4761_v2, 5  ;;  %v6246_v2 = vld [vmem:[#allocation2 + $0x84] sm:$0xe] }
 0x2b0   : > { %v4758_v37 = vor.u32 %v4757_v13, %v4754_v0  ;;  %v4776_v58 = vrot.slane %v4774_v18, 6  ;;  %v4766_v46 = vrot.slane %v4764_v31, 6  ;;  %v5990_v60 = vshrl.u32 %v5794_v14, 16  ;;  %v13571_v0 = vpop.f32.mrf.mxu1  ;;  %v13573_v18 = vpop.f32.mrf.mxu0 }
 0x2b1   : > { %v6904_v45 = vsel %vm1826_vm14, %v9777_v12, %v6731_v63  ;;  %v5993_v32 = vshll.u32 %v5794_v14, 16  ;;  %v6972_v35 = vsel %vm1826_vm14, %v9810_v56, %v6861_v20  ;;  %v5999_v49 = vshll.u32 %v5795_v5, 16  ;;  %15542 = vst [vmem:[#allocation82_spill] sm:$0xff] %v13571_v0  ;;  %15543 = vst [vmem:[#allocation83_spill] sm:$0xff] %v13573_v18  ;;  %v13575_v63 = vpop.permute.xlu0 %5253 }
 0x2b2   : > { %7215 = vmatmul.mubr.bf16.gmra.mxu1 %v6904_v45  ;;  %v4759_v6 = vrot.slane %v4758_v37, 4  ;;  %v4777_v33 = vor.u32 %v4776_v58, %v4773_v21  ;;  %v4767_v22 = vor.u32 %v4766_v46, %v4763_v9  ;;  %v5992_v4 = vrot.slane %v5990_v60, 4  ;;  %v13580_v9 = vld [vmem:[#allocation2 + $0x8c] sm:$0x1]  ;;  %v5798_v58 = vld [vmem:[#allocation2 + $0x88] sm:$0xf]  ;;  %v13584_v20 = vpop.f32.mrf.mxu0  ;;  %v6733_v46 = vpop.permute.xlu1 %6732 }
 0x2b3   : > { %7222 = vmatprep.mubr.bf16.mxu1 %v6972_v35  ;;  %v5995_v40 = vrot.slane %v5993_v32, 5  ;;  %v6003_v51 = vshrl.u32 %v5795_v5, 16  ;;  %v6001_v12 = vrot.slane %v5999_v49, 5  ;;  %v6009_v13 = vshll.u32 %v13541_v26, 16  ;;  %15544 = vst [vmem:[#allocation84_spill] sm:$0xff] %v13584_v20  ;;  %v13586_v26 = vpop.f32.mrf.mxu1  ;;  %v15546_v35 = vld [vmem:[#allocation49_spill] sm:$0xff] }
 0x2b4   : > { %v4768_v14 = vsel %vm12034_vm6, %v4759_v6, %v4767_v22  ;;  %v4769_v38 = vrot.slane %v4767_v22, 4  ;;  %v9747_v45 = vrot.slane %v6246_v2, 9  ;;  %15545 = vst [vmem:[#allocation85_spill] sm:$0xff] %v13586_v26  ;;  %v6360_v6 = vrot.slane %v5798_v58, 5  ;;  %v13604_v20 = vpop.f32.mrf.mxu0 }
 0x2b5   : > { %v5996_v31 = vor.u32 %v5995_v40, %v5992_v4  ;;  %v6005_v21 = vrot.slane %v6003_v51, 4  ;;  %v6011_v60 = vrot.slane %v6009_v13, 5  ;;  %v5305_v40 = vsel %vm1826_vm14, %v15546_v35, %v13518_v24  ;;  %v10722_v4 = vld [vmem:[#allocation2 + $0xa8] sm:$0xe]  ;;  %v13594_v2 = vpop.permute.xlu0 %5125  ;;  %v10723_v24 = vld [vmem:[#allocation2 + $0xac] sm:$0xf] }
 0x2b6   : > { %v4778_v5 = vsel %vm12034_vm6, %v4769_v38, %v4777_v33  ;;  %v6363_v49 = vrot.slane %v13580_v9, 5  ;;  %v4780_v51 = vshrl.u32 %v10722_v4, 16  ;;  %v4783_v13 = vshll.u32 %v10722_v4, 16  ;;  %v5797_v35 = vld [vmem:[#allocation2 + $0x84] sm:$0xf]  ;;  %v13602_v4 = vpop.f32.mrf.mxu1  ;;  %15548 = vst [vmem:[#allocation86_spill] sm:$0xff] %v13604_v20 }
 0x2b7   : > { %v5997_v56 = vrot.slane %v5996_v31, 4  ;;  %v6006_v37 = vor.u32 %v6005_v21, %v6001_v12  ;;  %v9702_v32 = vcombine.low %v4768_v14, %v4778_v5  ;;  %v6361_v14 = vsel %vm11107_vm7, %v9747_v45, %v6360_v6  ;;  %15547 = vst [vmem:[#allocation49_spill] sm:$0xff] %v13602_v4 }
 0x2b8   : > { %v6362_v31 = vrot.slane %v6360_v6, 4  ;;  %v4789_v21 = vshrl.u32 %v10723_v24, 16  ;;  %v6017_v4 = vshll.u32 %v5797_v35, 16  ;;  %v7574_v30 = vshll.u32 %v7405_v16, 16 }
 0x2b9   : > { %v6002_v33 = vsel %vm11802_vm3, %v5997_v56, %v6001_v12  ;;  %v6007_v22 = vrot.slane %v6006_v37, 4  ;;  %v5369_v38 = vsel %vm1826_vm14, %v9702_v32, %v13493_v54  ;;  %v4782_v12 = vrot.slane %v4780_v51, 5  ;;  %v10724_v32 = vld [vmem:[#allocation2 + $0xb0] sm:$0x3]  ;;  %v6863_v51 = vpop.permute.xlu1 %6862 }
 0x2ba   : > { %5635 = vmatprep.mubr.bf16.mxu0 %v5369_v38  ;;  %v4785_v56 = vrot.slane %v4783_v13, 6  ;;  %v4792_v37 = vshll.u32 %v10723_v24, 16  ;;  %v6364_v54 = vsel %vm11107_vm7, %v6362_v31, %v6363_v49  ;;  %v4791_v45 = vrot.slane %v4789_v21, 5  ;;  %v13610_v49 = vpop.f32.mrf.mxu0  ;;  %v13612_v31 = vpop.f32.mrf.mxu1 }
 0x2bb   : > { %v6012_v5 = vsel %vm11802_vm3, %v6007_v22, %v6011_v60  ;;  %5636 = vmatmul.mubr.bf16.gmra.mxu0 %v5305_v40  ;;  %v4799_v6 = vshrl.u32 %v10724_v32, 16  ;;  %v9811_v38 = vcombine.low %v6361_v14, %v6364_v54  ;;  %v4802_v60 = vshll.u32 %v10724_v32, 16  ;;  %15549 = vst [vmem:[#allocation87_spill] sm:$0xff] %v13610_v49  ;;  %15550 = vst [vmem:[#allocation88_spill] sm:$0xff] %v13612_v31  ;;  %v13614_v14 = vpop.permute.xlu0 %5255  ;;  %v6247_v32 = vld [vmem:[#allocation2 + $0x90] sm:$0xe] }
 0x2bc   : > { %v9778_v18 = vcombine.low %v6002_v33, %v6012_v5  ;;  %v4786_v26 = vor.u32 %v4785_v56, %v4782_v12  ;;  %v4794_v0 = vrot.slane %v4792_v37, 6  ;;  %v6014_v24 = vshrl.u32 %v5797_v35, 16  ;;  %v10727_v49 = vld [vmem:[#allocation2 + $0xbc] sm:$0x3] }
 0x2bd   : > { %v4801_v13 = vrot.slane %v4799_v6, 5  ;;  %v6976_v33 = vsel %vm1826_vm14, %v9811_v38, %v6863_v51  ;;  %v4804_v20 = vrot.slane %v4802_v60, 6  ;;  %v6019_v12 = vrot.slane %v6017_v4, 5  ;;  %v13621_v38 = vpop.f32.mrf.mxu1  ;;  %v13623_v60 = vpop.f32.mrf.mxu0 }
 0x2be   : > { %v6908_v22 = vsel %vm1826_vm14, %v9778_v18, %v6733_v46  ;;  %v4787_v40 = vrot.slane %v4786_v26, 4  ;;  %v4795_v5 = vor.u32 %v4794_v0, %v4791_v45  ;;  %v6016_v21 = vrot.slane %v6014_v24, 4  ;;  %15551 = vst [vmem:[#allocation89_spill] sm:$0xff] %v13621_v38  ;;  %15552 = vst [vmem:[#allocation90_spill] sm:$0xff] %v13623_v60  ;;  %v13625_v24 = vld [vmem:[#allocation2 + $0x98] sm:$0x1] }
 0x2bf   : > { %7223 = vmatmul.mubr.bf16.gmra.mxu1 %v6908_v22  ;;  %v6023_v18 = vshll.u32 %v5798_v58, 16  ;;  %v6027_v46 = vshrl.u32 %v5798_v58, 16  ;;  %v4805_v35 = vor.u32 %v4804_v20, %v4801_v13  ;;  %v6033_v26 = vshll.u32 %v13580_v9, 16  ;;  %v15553_v20 = vld [vmem:[#allocation16_spill] sm:$0xff] }
 0x2c0   : > { %7230 = vmatprep.mubr.bf16.mxu1 %v6976_v33  ;;  %v4796_v56 = vsel %vm12034_vm6, %v4787_v40, %v4795_v5  ;;  %v4797_v37 = vrot.slane %v4795_v5, 4  ;;  %v6020_v0 = vor.u32 %v6019_v12, %v6016_v21  ;;  %v5309_v9 = vsel %vm1826_vm14, %v15553_v20, %v13559_v28  ;;  %v5801_v13 = vld [vmem:[#allocation2 + $0x94] sm:$0xf]  ;;  %v6735_v40 = vpop.permute.xlu1 %6734  ;;  %v13630_v5 = vpop.permute.xlu0 %5127  ;;  %v10726_v28 = vld [vmem:[#allocation2 + $0xb8] sm:$0xf] }
 0x2c1   : > { %v6025_v54 = vrot.slane %v6023_v18, 5  ;;  %v6029_v45 = vrot.slane %v6027_v46, 4  ;;  %v6035_v51 = vrot.slane %v6033_v26, 5  ;;  %v9748_v33 = vrot.slane %v6247_v32, 9  ;;  %v13639_v32 = vpop.f32.mrf.mxu1 }
 0x2c2   : > { %v4806_v6 = vsel %vm12034_vm6, %v4797_v37, %v4805_v35  ;;  %v6021_v58 = vrot.slane %v6020_v0, 4  ;;  %v6367_v46 = vrot.slane %v5801_v13, 5  ;;  %v10725_v37 = vld [vmem:[#allocation2 + $0xb4] sm:$0xe]  ;;  %v4817_v0 = vshrl.u32 %v10726_v28, 16  ;;  %15555 = vst [vmem:[#allocation91_spill] sm:$0xff] %v13639_v32 }
 0x2c3   : > { %v9703_v4 = vcombine.low %v4796_v56, %v4806_v6  ;;  %v6030_v22 = vor.u32 %v6029_v45, %v6025_v54  ;;  %v6370_v56 = vrot.slane %v13625_v24, 5  ;;  %v4808_v35 = vshrl.u32 %v10725_v37, 16  ;;  %v13637_v45 = vpop.f32.mrf.mxu0 }
 0x2c4   : > { %v6026_v12 = vsel %vm11802_vm3, %v6021_v58, %v6025_v54  ;;  %v4811_v26 = vshll.u32 %v10725_v37, 16  ;;  %15554 = vst [vmem:[#allocation16_spill] sm:$0xff] %v13637_v45  ;;  %v6368_v54 = vsel %vm11107_vm7, %v9748_v33, %v6367_v46  ;;  %v6369_v6 = vrot.slane %v6367_v46, 4  ;;  %v5800_v58 = vld [vmem:[#allocation2 + $0x90] sm:$0xf]  ;;  %v13648_v33 = vpop.f32.mrf.mxu1 }
 0x2c5   : > { %v5373_v21 = vsel %vm1826_vm14, %v9703_v4, %v13537_v52  ;;  %v6031_v18 = vrot.slane %v6030_v22, 4  ;;  %v4820_v4 = vshll.u32 %v10726_v28, 16  ;;  %v4810_v20 = vrot.slane %v4808_v35, 5  ;;  %15556 = vst [vmem:[#allocation92_spill] sm:$0xff] %v13648_v33  ;;  %v13650_v46 = vpop.f32.mrf.mxu0  ;;  %v13652_v35 = vpop.permute.xlu0 %5257 }
 0x2c6   : > { %5643 = vmatprep.mubr.bf16.mxu0 %v5373_v21  ;;  %v4813_v21 = vrot.slane %v4811_v26, 6  ;;  %v4819_v37 = vrot.slane %v4817_v0, 5  ;;  %v6371_v60 = vsel %vm11107_vm7, %v6369_v6, %v6370_v56  ;;  %v4827_v32 = vshrl.u32 %v10727_v49, 16  ;;  %15557 = vst [vmem:[#allocation93_spill] sm:$0xff] %v13650_v46 }
 0x2c7   : > { %v6036_v52 = vsel %vm11802_vm3, %v6031_v18, %v6035_v51  ;;  %5644 = vmatmul.mubr.bf16.gmra.mxu0 %v5309_v9  ;;  %v4822_v45 = vrot.slane %v4820_v4, 6  ;;  %v4830_v38 = vshll.u32 %v10727_v49, 16  ;;  %v9812_v9 = vcombine.low %v6368_v54, %v6371_v60 }
 0x2c8   : > { %v9779_v22 = vcombine.low %v6026_v12, %v6036_v52  ;;  %v4814_v18 = vor.u32 %v4813_v21, %v4810_v20  ;;  %v6038_v31 = vshrl.u32 %v5800_v58, 16  ;;  %v6865_v12 = vpop.permute.xlu1 %6864  ;;  %v4829_v28 = vrot.slane %v4827_v32, 5  ;;  %v13658_v32 = vpop.f32.mrf.mxu0 }
 0x2c9   : > { %v4823_v26 = vor.u32 %v4822_v45, %v4819_v37  ;;  %v4832_v56 = vrot.slane %v4830_v38, 6  ;;  %v6041_v0 = vshll.u32 %v5800_v58, 16  ;;  %v6980_v52 = vsel %vm1826_vm14, %v9812_v9, %v6865_v12  ;;  %v6248_v45 = vld [vmem:[#allocation2 + $0x9c] sm:$0xe]  ;;  %15558 = vst [vmem:[#allocation94_spill] sm:$0xff] %v13658_v32  ;;  %v13660_v38 = vpop.f32.mrf.mxu1 }
 0x2ca   : > { %v6912_v51 = vsel %vm1826_vm14, %v9779_v22, %v6735_v40  ;;  %v4815_v49 = vrot.slane %v4814_v18, 4  ;;  %v6040_v6 = vrot.slane %v6038_v31, 4  ;;  %v6047_v40 = vshll.u32 %v5801_v13, 16  ;;  %15559 = vst [vmem:[#allocation95_spill] sm:$0xff] %v13660_v38  ;;  %v13664_v9 = vld [vmem:[#allocation2 + $0xa4] sm:$0x1] }
 0x2cb   : > { %7231 = vmatmul.mubr.bf16.gmra.mxu1 %v6912_v51  ;;  %v4825_v60 = vrot.slane %v4823_v26, 4  ;;  %v4833_v54 = vor.u32 %v4832_v56, %v4829_v28  ;;  %v6043_v4 = vrot.slane %v6041_v0, 5  ;;  %v6051_v22 = vshrl.u32 %v5801_v13, 16  ;;  %v15560_v13 = vld [vmem:[#allocation18_spill] sm:$0xff]  ;;  %v10730_v32 = vld [vmem:[#allocation2 + $0xc8] sm:$0x3] }
 0x2cc   : > { %7238 = vmatprep.mubr.bf16.mxu1 %v6980_v52  ;;  %v4824_v20 = vsel %vm12034_vm6, %v4815_v49, %v4823_v26  ;;  %v6049_v21 = vrot.slane %v6047_v40, 5  ;;  %v6057_v51 = vshll.u32 %v13625_v24, 16  ;;  %v5313_v18 = vsel %vm1826_vm14, %v15560_v13, %v13594_v2  ;;  %v13669_v26 = vpop.permute.xlu0 %5129  ;;  %v5804_v0 = vld [vmem:[#allocation2 + $0xa0] sm:$0xf]  ;;  %v6737_v13 = vpop.permute.xlu1 %6736 }
 0x2cd   : > { %v4834_v31 = vsel %vm12034_vm6, %v4825_v60, %v4833_v54  ;;  %v6044_v58 = vor.u32 %v6043_v4, %v6040_v6  ;;  %v6053_v37 = vrot.slane %v6051_v22, 4  ;;  %v9749_v52 = vrot.slane %v6248_v45, 9  ;;  %v13674_v60 = vpop.f32.mrf.mxu1  ;;  %v13676_v54 = vpop.f32.mrf.mxu0  ;;  %v10728_v22 = vld [vmem:[#allocation2 + $0xc0] sm:$0xe] }
 0x2ce   : > { %v9704_v12 = vcombine.low %v4824_v20, %v4834_v31  ;;  %v6059_v56 = vrot.slane %v6057_v51, 5  ;;  %v6374_v40 = vrot.slane %v5804_v0, 5  ;;  %v6377_v6 = vrot.slane %v13664_v9, 5  ;;  %15561 = vst [vmem:[#allocation18_spill] sm:$0xff] %v13674_v60  ;;  %15562 = vst [vmem:[#allocation96_spill] sm:$0xff] %v13676_v54 }
 0x2cf   : > { %v6045_v24 = vrot.slane %v6044_v58, 4  ;;  %v6054_v28 = vor.u32 %v6053_v37, %v6049_v21  ;;  %v4836_v20 = vshrl.u32 %v10728_v22, 16  ;;  %v4839_v51 = vshll.u32 %v10728_v22, 16  ;;  %v10729_v31 = vld [vmem:[#allocation2 + $0xc4] sm:$0xf] }
 0x2d0   : > { %v5377_v49 = vsel %vm1826_vm14, %v9704_v12, %v13575_v63  ;;  %v6375_v45 = vsel %vm11107_vm7, %v9749_v52, %v6374_v40  ;;  %v6376_v63 = vrot.slane %v6374_v40, 4  ;;  %v4845_v58 = vshrl.u32 %v10729_v31, 16  ;;  %v13686_v52 = vpop.f32.mrf.mxu0  ;;  %v13688_v40 = vpop.f32.mrf.mxu1 }
 0x2d1   : > { %5651 = vmatprep.mubr.bf16.mxu0 %v5377_v49  ;;  %v6050_v2 = vsel %vm11802_vm3, %v6045_v24, %v6049_v21  ;;  %v6055_v4 = vrot.slane %v6054_v28, 4  ;;  %v4848_v37 = vshll.u32 %v10729_v31, 16  ;;  %v4838_v49 = vrot.slane %v4836_v20, 5  ;;  %v5803_v24 = vld [vmem:[#allocation2 + $0x9c] sm:$0xf]  ;;  %15563 = vst [vmem:[#allocation97_spill] sm:$0xff] %v13686_v52 }
 0x2d2   : > { %5652 = vmatmul.mubr.bf16.gmra.mxu0 %v5313_v18  ;;  %v4841_v54 = vrot.slane %v4839_v51, 6  ;;  %v4855_v21 = vshrl.u32 %v10730_v32, 16  ;;  %v6378_v18 = vsel %vm11107_vm7, %v6376_v63, %v6377_v6  ;;  %v4847_v22 = vrot.slane %v4845_v58, 5  ;;  %15564 = vst [vmem:[#allocation98_spill] sm:$0xff] %v13688_v40 }
 0x2d3   : > { %v6060_v12 = vsel %vm11802_vm3, %v6055_v4, %v6059_v56  ;;  %v4850_v46 = vrot.slane %v4848_v37, 6  ;;  %v9813_v31 = vcombine.low %v6375_v45, %v6378_v18  ;;  %v4858_v33 = vshll.u32 %v10730_v32, 16  ;;  %v6867_v4 = vpop.permute.xlu0 %6866  ;;  %v13694_v32 = vpop.f32.mrf.mxu1 }
 0x2d4   : > { %v9780_v28 = vcombine.low %v6050_v2, %v6060_v12  ;;  %v4842_v60 = vor.u32 %v4841_v54, %v4838_v49  ;;  %v4857_v38 = vrot.slane %v4855_v21, 5  ;;  %v6062_v51 = vshrl.u32 %v5803_v24, 16  ;;  %v7394_v54 = vld [vmem:[#allocation2 + $0x30] sm:$0xe]  ;;  %v13692_v49 = vpop.f32.mrf.mxu0  ;;  %15566 = vst [vmem:[#allocation100_spill] sm:$0xff] %v13694_v32 }
 0x2d5   : > { %v4851_v20 = vor.u32 %v4850_v46, %v4847_v22  ;;  %v6065_v27 = vshll.u32 %v5803_v24, 16  ;;  %v6984_v2 = vsel %vm1826_vm14, %v9813_v31, %v6867_v4  ;;  %v4860_v63 = vrot.slane %v4858_v33, 6  ;;  %15565 = vst [vmem:[#allocation99_spill] sm:$0xff] %v13692_v49 }
 0x2d6   : > { %v6916_v56 = vsel %vm1826_vm14, %v9780_v28, %v6737_v13  ;;  %v4843_v6 = vrot.slane %v4842_v60, 4  ;;  %v6071_v58 = vshll.u32 %v5804_v0, 16  ;;  %v6064_v12 = vrot.slane %v6062_v51, 4  ;;  %v7395_v28 = vld [vmem:[#allocation2 + $0x34] sm:$0xf]  ;;  %v13701_v51 = vpop.f32.mrf.mxu0 }
 0x2d7   : > { %7239 = vmatmul.mubr.bf16.gmra.mxu1 %v6916_v56  ;;  %v4853_v37 = vrot.slane %v4851_v20, 4  ;;  %v6067_v52 = vrot.slane %v6065_v27, 5  ;;  %v6075_v45 = vshrl.u32 %v5804_v0, 16  ;;  %v4861_v13 = vor.u32 %v4860_v63, %v4857_v38  ;;  %15567 = vst [vmem:[#allocation101_spill] sm:$0xff] %v13701_v51  ;;  %v15569_v38 = vld [vmem:[#allocation17_spill] sm:$0xff] }
 0x2d8   : > { %7246 = vmatprep.mubr.bf16.mxu1 %v6984_v2  ;;  %v4852_v46 = vsel %vm12034_vm6, %v4843_v6, %v4851_v20  ;;  %v6073_v21 = vrot.slane %v6071_v58, 5  ;;  %v6081_v24 = vshll.u32 %v13664_v9, 16  ;;  %v7468_v27 = vshrl.u32 %v7394_v54, 16  ;;  %v13703_v2 = vpop.f32.mrf.mxu1  ;;  %v7396_v58 = vld [vmem:[#allocation2 + $0x38] sm:$0x3] }
 0x2d9   : > { %v6068_v60 = vor.u32 %v6067_v52, %v6064_v12  ;;  %v6077_v33 = vrot.slane %v6075_v45, 4  ;;  %v4862_v18 = vsel %vm12034_vm6, %v4853_v37, %v4861_v13  ;;  %v7471_v0 = vshll.u32 %v7394_v54, 16  ;;  %15568 = vst [vmem:[#allocation102_spill] sm:$0xff] %v13703_v2  ;;  %v6739_v12 = vpop.permute.xlu0 %6738  ;;  %v6249_v13 = vld [vmem:[#allocation2 + $0xa8] sm:$0xe] }
 0x2da   : > { %v9705_v22 = vcombine.low %v4852_v46, %v4862_v18  ;;  %v6083_v4 = vrot.slane %v6081_v24, 5  ;;  %v5317_v9 = vsel %vm1826_vm14, %v15569_v38, %v13630_v5  ;;  %v7477_v52 = vshrl.u32 %v7395_v28, 16  ;;  %v13716_v46 = vld [vmem:[#allocation2 + $0xb0] sm:$0x1]  ;;  %v13722_v24 = vpop.f32.mrf.mxu0 }
 0x2db   : > { %v6069_v31 = vrot.slane %v6068_v60, 4  ;;  %v6078_v56 = vor.u32 %v6077_v33, %v6073_v21  ;;  %v7480_v37 = vshll.u32 %v7395_v28, 16  ;;  %v13712_v45 = vrot.slane %v7468_v27, 5  ;;  %15571 = vst [vmem:[#allocation103_spill] sm:$0xff] %v13722_v24  ;;  %v5807_v28 = vld [vmem:[#allocation2 + $0xac] sm:$0xf] }
 0x2dc   : > { %v5381_v20 = vsel %vm1826_vm14, %v9705_v22, %v13614_v14  ;;  %v13714_v54 = vrot.slane %v7471_v0, 6  ;;  %v13720_v14 = vpop.f32.mrf.mxu1  ;;  %v7479_v60 = vrot.slane %v7477_v52, 5  ;;  %v7487_v33 = vshrl.u32 %v7396_v58, 16  ;;  %v10733_v24 = vld [vmem:[#allocation2 + $0xd4] sm:$0x3] }
 0x2dd   : > { %v6074_v6 = vsel %vm11802_vm3, %v6069_v31, %v6073_v21  ;;  %v6079_v63 = vrot.slane %v6078_v56, 4  ;;  %5659 = vmatprep.mubr.bf16.mxu0 %v5381_v20  ;;  %15570 = vst [vmem:[#allocation17_spill] sm:$0xff] %v13720_v14  ;;  %v7482_v18 = vrot.slane %v7480_v37, 6  ;;  %v9750_v27 = vrot.slane %v6249_v13, 9  ;;  %v10731_v20 = vld [vmem:[#allocation2 + $0xcc] sm:$0xe]  ;;  %v6869_v51 = vpop.permute.xlu0 %6868 }
 0x2de   : > { %5660 = vmatmul.mubr.bf16.gmra.mxu0 %v5317_v9  ;;  %v6381_v22 = vrot.slane %v5807_v28, 5  ;;  %v6384_v0 = vrot.slane %v13716_v46, 5  ;;  %v7474_v56 = vor.u32 %v13714_v54, %v13712_v45  ;;  %v4864_v52 = vshrl.u32 %v10731_v20, 16  ;;  %v13732_v37 = vpop.f32.mrf.mxu1 }
 0x2df   : > { %v6084_v5 = vsel %vm11802_vm3, %v6079_v63, %v6083_v4  ;;  %v7490_v4 = vshll.u32 %v7396_v58, 16  ;;  %v13730_v63 = vpop.f32.mrf.mxu0  ;;  %15573 = vst [vmem:[#allocation105_spill] sm:$0xff] %v13732_v37  ;;  %v13734_v13 = vrot.slane %v7487_v33, 5  ;;  %v4883_v45 = vshrl.u32 %v10733_v24, 16  ;;  %v5806_v58 = vld [vmem:[#allocation2 + $0xa8] sm:$0xf] }
 0x2e0   : > { %v9781_v21 = vcombine.low %v6074_v6, %v6084_v5  ;;  %v6382_v38 = vsel %vm11107_vm7, %v9750_v27, %v6381_v22  ;;  %v6383_v9 = vrot.slane %v6381_v22, 4  ;;  %v4867_v6 = vshll.u32 %v10731_v20, 16  ;;  %15572 = vst [vmem:[#allocation104_spill] sm:$0xff] %v13730_v63  ;;  %v10732_v5 = vld [vmem:[#allocation2 + $0xd0] sm:$0xf]  ;;  %v13742_v2 = vpop.f32.mrf.mxu1 }
 0x2e1   : > { %v13736_v54 = vor.u32 %v7482_v18, %v7479_v60  ;;  %v4866_v22 = vrot.slane %v4864_v52, 5  ;;  %v7492_v20 = vrot.slane %v7490_v4, 6  ;;  %v4885_v32 = vrot.slane %v4883_v45, 5  ;;  %15575 = vst [vmem:[#allocation107_spill] sm:$0xff] %v13742_v2 }
 0x2e2   : > { %v6920_v31 = vsel %vm1826_vm14, %v9781_v21, %v6739_v12  ;;  %v4873_v12 = vshrl.u32 %v10732_v5, 16  ;;  %v4876_v21 = vshll.u32 %v10732_v5, 16  ;;  %v6385_v27 = vsel %vm11107_vm7, %v6383_v9, %v6384_v0  ;;  %v13740_v5 = vpop.f32.mrf.mxu0 }
 0x2e3   : > { %7247 = vmatmul.mubr.bf16.gmra.mxu1 %v6920_v31  ;;  %v4869_v31 = vrot.slane %v4867_v6, 6  ;;  %v9814_v63 = vcombine.low %v6382_v38, %v6385_v27  ;;  %v4886_v40 = vshll.u32 %v10733_v24, 16  ;;  %v6086_v14 = vshrl.u32 %v5806_v58, 16  ;;  %15574 = vst [vmem:[#allocation106_spill] sm:$0xff] %v13740_v5 }
 0x2e4   : > { %v4875_v49 = vrot.slane %v4873_v12, 5  ;;  %v4878_v37 = vrot.slane %v4876_v21, 6  ;;  %v6089_v10 = vshll.u32 %v5806_v58, 16  ;;  %v6095_v0 = vshll.u32 %v5807_v28, 16  ;;  %v13745_v6 = vpop.f32.mrf.mxu0  ;;  %v13747_v12 = vpop.f32.mrf.mxu1 }
 0x2e5   : > { %v4870_v33 = vor.u32 %v4869_v31, %v4866_v22  ;;  %v6988_v60 = vsel %vm1826_vm14, %v9814_v63, %v6869_v51  ;;  %v4888_v4 = vrot.slane %v4886_v40, 6  ;;  %v6088_v52 = vrot.slane %v6086_v14, 4  ;;  %15576 = vst [vmem:[#allocation108_spill] sm:$0xff] %v13745_v6  ;;  %15577 = vst [vmem:[#allocation109_spill] sm:$0xff] %v13747_v12  ;;  %v7400_v22 = vld [vmem:[#allocation2 + $0x48] sm:$0xe] }
 0x2e6   : > { %v4879_v18 = vor.u32 %v4878_v37, %v4875_v49  ;;  %7254 = vmatprep.mubr.bf16.mxu1 %v6988_v60  ;;  %v6099_v38 = vshrl.u32 %v5807_v28, 16  ;;  %v6091_v21 = vrot.slane %v6089_v10, 5  ;;  %v6097_v45 = vrot.slane %v6095_v0, 5  ;;  %v13752_v37 = vpop.f32.mrf.mxu0  ;;  %v13754_v40 = vpop.f32.mrf.mxu1 }
 0x2e7   : > { %v4871_v9 = vrot.slane %v4870_v33, 4  ;;  %v6105_v27 = vshll.u32 %v13716_v46, 16  ;;  %v7475_v31 = vrot.slane %v7474_v56, 4  ;;  %v4889_v51 = vor.u32 %v4888_v4, %v4885_v32  ;;  %15578 = vst [vmem:[#allocation110_spill] sm:$0xff] %v13752_v37  ;;  %15579 = vst [vmem:[#allocation111_spill] sm:$0xff] %v13754_v40 }
 0x2e8   : > { %v4881_v24 = vrot.slane %v4879_v18, 4  ;;  %v6101_v63 = vrot.slane %v6099_v38, 4  ;;  %v7485_v14 = vrot.slane %v13736_v54, 4  ;;  %v7493_v28 = vor.u32 %v7492_v20, %v13734_v13  ;;  %v13760_v0 = vpop.f32.mrf.mxu0  ;;  %v13762_v32 = vpop.f32.mrf.mxu1  ;;  %v7401_v4 = vld [vmem:[#allocation2 + $0x4c] sm:$0xf] }
 0x2e9   : > { %v4880_v49 = vsel %vm12034_vm6, %v4871_v9, %v4879_v18  ;;  %v6092_v58 = vor.u32 %v6091_v21, %v6088_v52  ;;  %v6107_v10 = vrot.slane %v6105_v27, 5  ;;  %v7524_v56 = vshrl.u32 %v7400_v22, 16  ;;  %15580 = vst [vmem:[#allocation112_spill] sm:$0xff] %v13760_v0  ;;  %15581 = vst [vmem:[#allocation113_spill] sm:$0xff] %v13762_v32  ;;  %v15582_v38 = vld [vmem:[#allocation19_spill] sm:$0xff] }
 0x2ea   : > { %v4890_v46 = vsel %vm12034_vm6, %v4881_v24, %v4889_v51  ;;  %v6102_v33 = vor.u32 %v6101_v63, %v6097_v45  ;;  %v7527_v60 = vshll.u32 %v7400_v22, 16  ;;  %v5321_v37 = vsel %vm1826_vm14, %v15582_v38, %v13669_v26  ;;  %v13767_v20 = vpop.f32.mrf.mxu0  ;;  %v5809_v22 = vld [vmem:[#allocation2 + $0xb4] sm:$0xf]  ;;  %v13778_v51 = vpop.f32.mrf.mxu1 }
 0x2eb   : > { %v9706_v18 = vcombine.low %v4880_v49, %v4890_v46  ;;  %v6093_v9 = vrot.slane %v6092_v58, 4  ;;  %15583 = vst [vmem:[#allocation19_spill] sm:$0xff] %v13767_v20  ;;  %v7484_v52 = vsel %vm12034_vm6, %v7475_v31, %v13736_v54  ;;  %v7494_v24 = vsel %vm12034_vm6, %v7485_v14, %v7493_v28  ;;  %v5810_v49 = vld [vmem:[#allocation2 + $0xb8] sm:$0xf]  ;;  %15584 = vst [vmem:[#allocation114_spill] sm:$0xff] %v13778_v51  ;;  %v6741_v26 = vpop.permute.xlu0 %6740 }
 0x2ec   : > { %v6103_v13 = vrot.slane %v6102_v33, 4  ;;  %v13782_v58 = vld [vmem:[#allocation2 + $0x50] sm:$0x3]  ;;  %v13784_v54 = vrot.slane %v7524_v56, 5  ;;  %v13786_v31 = vrot.slane %v7527_v60, 6  ;;  %v7533_v14 = vshrl.u32 %v7401_v4, 16 }
 0x2ed   : > { %v5385_v21 = vsel %vm1826_vm14, %v9706_v18, %v13652_v35  ;;  %v6098_v27 = vsel %vm11802_vm3, %v6093_v9, %v6097_v45  ;;  %v13788_v35 = vpop.f32.mrf.mxu0  ;;  %v13790_v45 = vpop.f32.mrf.mxu1  ;;  %v13792_v46 = vcombine.low %v7484_v52, %v7494_v24  ;;  %v5811_v33 = vld [vmem:[#allocation2 + $0xbc] sm:$0x1]  ;;  %v6110_v18 = vshrl.u32 %v5809_v22, 16  ;;  %v6250_v38 = vld [vmem:[#allocation2 + $0xb4] sm:$0xe] }
 0x2ee   : > { %5667 = vmatprep.mubr.bf16.mxu0 %v5385_v21  ;;  %v6108_v63 = vsel %vm11802_vm3, %v6103_v13, %v6107_v10  ;;  %15585 = vst [vmem:[#allocation115_spill] sm:$0xff] %v13788_v35  ;;  %15586 = vst [vmem:[#allocation116_spill] sm:$0xff] %v13790_v45  ;;  %v6113_v9 = vshll.u32 %v5809_v22, 16  ;;  %v7536_v13 = vshll.u32 %v7401_v4, 16  ;;  %v7543_v60 = vshrl.u32 %v13782_v58, 16 }
 0x2ef   : > { %v9782_v28 = vcombine.low %v6098_v27, %v6108_v63  ;;  %5668 = vmatmul.mubr.bf16.gmra.mxu0 %v5321_v37  ;;  %v13794_v10 = vpop.f32.mrf.mxu0  ;;  %v6119_v21 = vshll.u32 %v5810_v49, 16  ;;  %v13798_v51 = vpop.f32.mrf.mxu1  ;;  %v13802_v52 = vrot.slane %v7533_v14, 5  ;;  %v6112_v24 = vrot.slane %v6110_v18, 4  ;;  %v7391_v22 = vld [vmem:[#allocation2 + $0x24] sm:$0xe] }
 0x2f0   : > { %15587 = vst [vmem:[#allocation117_spill] sm:$0xff] %v13794_v10  ;;  %15588 = vst [vmem:[#allocation118_spill] sm:$0xff] %v13798_v51  ;;  %v6115_v27 = vrot.slane %v6113_v9, 5  ;;  %v6123_v10 = vshrl.u32 %v5810_v49, 16  ;;  %v9751_v4 = vrot.slane %v6250_v38, 9  ;;  %v7546_v35 = vshll.u32 %v13782_v58, 16  ;;  %v6871_v9 = vpop.permute.xlu0 %6870 }
 0x2f1   : > { %v6924_v56 = vsel %vm1826_vm14, %v9782_v28, %v6741_v26  ;;  %v13804_v63 = vpop.f32.mrf.mxu0  ;;  %v6121_v45 = vrot.slane %v6119_v21, 5  ;;  %v6129_v26 = vshll.u32 %v5811_v33, 16  ;;  %v13806_v28 = vpop.f32.mrf.mxu1  ;;  %v6391_v32 = vrot.slane %v5811_v33, 5  ;;  %v7392_v20 = vld [vmem:[#allocation2 + $0x28] sm:$0xf] }
 0x2f2   : > { %7255 = vmatmul.mubr.bf16.gmra.mxu1 %v6924_v56  ;;  %15589 = vst [vmem:[#allocation119_spill] sm:$0xff] %v13804_v63  ;;  %15590 = vst [vmem:[#allocation120_spill] sm:$0xff] %v13806_v28  ;;  %v6116_v51 = vor.u32 %v6115_v27, %v6112_v24  ;;  %v6388_v56 = vrot.slane %v5810_v49, 5  ;;  %v7538_v14 = vrot.slane %v7536_v13, 6  ;;  %v13811_v18 = vrot.slane %v7543_v60, 5 }
 0x2f3   : > { %v13809_v37 = vpop.f32.mrf.mxu0  ;;  %v6125_v0 = vrot.slane %v6123_v10, 4  ;;  %v7440_v63 = vshrl.u32 %v7391_v22, 16  ;;  %v13813_v21 = vpop.f32.mrf.mxu1  ;;  %v7393_v58 = vld [vmem:[#allocation2 + $0x2c] sm:$0x3]  ;;  %v7443_v24 = vshll.u32 %v7391_v22, 16  ;;  %v6131_v27 = vrot.slane %v6129_v26, 5 }
 0x2f4   : > { %15591 = vst [vmem:[#allocation121_spill] sm:$0xff] %v13809_v37  ;;  %15592 = vst [vmem:[#allocation122_spill] sm:$0xff] %v13813_v21  ;;  %v6117_v6 = vrot.slane %v6116_v51, 4  ;;  %v6389_v38 = vsel %vm11107_vm7, %v9751_v4, %v6388_v56  ;;  %v6390_v28 = vrot.slane %v6388_v56, 4  ;;  %v7449_v13 = vshrl.u32 %v7392_v20, 16 }
 0x2f5   : > { %v13817_v49 = vpop.f32.mrf.mxu0  ;;  %v6126_v33 = vor.u32 %v6125_v0, %v6121_v45  ;;  %v7442_v37 = vrot.slane %v7440_v63, 5  ;;  %v13819_v60 = vpop.f32.mrf.mxu1  ;;  %v7445_v21 = vrot.slane %v7443_v24, 6  ;;  %v7452_v5 = vshll.u32 %v7392_v20, 16  ;;  %v7406_v4 = vld [vmem:[#allocation2 + $0x60] sm:$0xe] }
 0x2f6   : > { %15593 = vst [vmem:[#allocation123_spill] sm:$0xff] %v13817_v49  ;;  %15594 = vst [vmem:[#allocation124_spill] sm:$0xff] %v13819_v60  ;;  %v6122_v10 = vsel %vm11802_vm3, %v6117_v6, %v6121_v45  ;;  %v6392_v51 = vsel %vm11107_vm7, %v6390_v28, %v6391_v32  ;;  %v7451_v49 = vrot.slane %v7449_v13, 5  ;;  %v7459_v0 = vshrl.u32 %v7393_v58, 16  ;;  %v8192_v63 = vpop.permute.xlu1 %8191  ;;  %v7407_v45 = vld [vmem:[#allocation2 + $0x64] sm:$0xf]  ;;  %v6743_v20 = vpop.permute.xlu0 %6742 }
 0x2f7   : > { %v13825_v56 = vpop.f32.mrf.mxu0  ;;  %v6127_v22 = vrot.slane %v6126_v33, 4  ;;  %v9815_v40 = vcombine.low %v6389_v38, %v6392_v51  ;;  %v13827_v26 = vpop.f32.mrf.mxu1  ;;  %v13829_v12 = vrot.slane %v7546_v35, 6  ;;  %v7446_v60 = vor.u32 %v7445_v21, %v7442_v37 }
 0x2f8   : > { %15595 = vst [vmem:[#allocation125_spill] sm:$0xff] %v13825_v56  ;;  %15596 = vst [vmem:[#allocation126_spill] sm:$0xff] %v13827_v26  ;;  %v7454_v2 = vrot.slane %v7452_v5, 6  ;;  %v7462_v6 = vshll.u32 %v7393_v58, 16  ;;  %v7461_v38 = vrot.slane %v7459_v0, 5  ;;  %v7580_v24 = vshrl.u32 %v7406_v4, 16 }
 0x2f9   : > { %v13831_v48 = vpop.f32.mrf.mxu0  ;;  %v6132_v32 = vsel %vm11802_vm3, %v6127_v22, %v6131_v27  ;;  %v6992_v28 = vsel %vm1826_vm14, %v9815_v40, %v6871_v9  ;;  %v13836_v33 = vpop.f32.mrf.mxu1  ;;  %v7447_v35 = vrot.slane %v7446_v60, 4  ;;  %v7408_v5 = vld [vmem:[#allocation2 + $0x68] sm:$0x3]  ;;  %v13841_v58 = vor.u32 %v7538_v14, %v13802_v52  ;;  %v5812_v52 = vld [vmem:[#allocation2 + $0xc0] sm:$0xf] }
 0x2fa   : > { %15597 = vst [vmem:[#allocation127_spill] sm:$0xff] %v13831_v48  ;;  %15598 = vst [vmem:[#allocation128_spill] sm:$0xff] %v13836_v33  ;;  %v9783_v13 = vcombine.low %v6122_v10, %v6132_v32  ;;  %7262 = vmatprep.mubr.bf16.mxu1 %v6992_v28  ;;  %v7455_v51 = vor.u32 %v7454_v2, %v7451_v49  ;;  %v7464_v37 = vrot.slane %v7462_v6, 6  ;;  %v7582_v48 = vrot.slane %v7580_v24, 5 }
 0x2fb   : > { %v13838_v21 = vpop.f32.mrf.mxu0  ;;  %v7583_v27 = vshll.u32 %v7406_v4, 16  ;;  %v7589_v22 = vshrl.u32 %v7407_v45, 16  ;;  %v13843_v26 = vpop.f32.mrf.mxu1  ;;  %v7592_v0 = vshll.u32 %v7407_v45, 16  ;;  %v7599_v6 = vshrl.u32 %v7408_v5, 16 }
 0x2fc   : > { %15599 = vst [vmem:[#allocation129_spill] sm:$0xff] %v13838_v21  ;;  %15600 = vst [vmem:[#allocation130_spill] sm:$0xff] %v13843_v26  ;;  %v6928_v40 = vsel %vm1826_vm14, %v9783_v13, %v6743_v20  ;;  %v7456_v9 = vsel %vm12034_vm6, %v7447_v35, %v7455_v51  ;;  %v7457_v10 = vrot.slane %v7455_v51, 4  ;;  %v7465_v60 = vor.u32 %v7464_v37, %v7461_v38  ;;  %v8194_v13 = vpop.permute.xlu1 %8193 }
 0x2fd   : > { %v13848_v2 = vpop.f32.mrf.mxu0  ;;  %7263 = vmatmul.mubr.bf16.gmra.mxu1 %v6928_v40  ;;  %v7585_v49 = vrot.slane %v7583_v27, 6  ;;  %v13850_v14 = vpop.f32.mrf.mxu1  ;;  %v15603_v4 = vor.u32 %v13786_v31, %v13784_v54  ;;  %v7549_v20 = vor.u32 %v13829_v12, %v13811_v18  ;;  %v7602_v38 = vshll.u32 %v7408_v5, 16  ;;  %v5813_v27 = vld [vmem:[#allocation2 + $0xc4] sm:$0xf]  ;;  %v5814_v12 = vld [vmem:[#allocation2 + $0xc8] sm:$0x1] }
 0x2fe   : > { %15601 = vst [vmem:[#allocation131_spill] sm:$0xff] %v13848_v2  ;;  %15602 = vst [vmem:[#allocation132_spill] sm:$0xff] %v13850_v14  ;;  %v7466_v28 = vsel %vm12034_vm6, %v7457_v10, %v7465_v60  ;;  %v7541_v45 = vrot.slane %v13841_v58, 4  ;;  %v7591_v51 = vrot.slane %v7589_v22, 5  ;;  %v7594_v37 = vrot.slane %v7592_v0, 6 }
 0x2ff   : > { %v13855_v32 = vrot.slane %v15603_v4, 4  ;;  %v13861_v24 = vpop.f32.mrf.mxu0  ;;  %v9867_v35 = vcombine.low %v7456_v9, %v7466_v28  ;;  %v13864_v40 = vpop.f32.mrf.mxu1  ;;  %v8229_v54 = vsel %vm1826_vm14, %v13792_v46, %v8194_v13  ;;  %v7586_v31 = vor.u32 %v7585_v49, %v7582_v48  ;;  %v6251_v22 = vld [vmem:[#allocation2 + $0xc0] sm:$0xe]  ;;  %v7421_v2 = vld [vmem:[#allocation2 + $0x9c] sm:$0xe] }
 0x300   : > { %15604 = vst [vmem:[#allocation133_spill] sm:$0xff] %v13861_v24  ;;  %15605 = vst [vmem:[#allocation134_spill] sm:$0xff] %v13864_v40  ;;  %v6134_v18 = vshrl.u32 %v5812_v52, 16  ;;  %v13871_v10 = vrot.slane %v7599_v6, 5  ;;  %v13873_v60 = vrot.slane %v7602_v38, 6  ;;  %v6137_v9 = vshll.u32 %v5812_v52, 16 }
 0x301   : > { %v13868_v4 = vpop.f32.mrf.mxu0  ;;  %v8225_v5 = vsel %vm1826_vm14, %v9867_v35, %v8192_v63  ;;  %v13875_v0 = vpop.f32.mrf.mxu1  ;;  %v6143_v49 = vshll.u32 %v5813_v27, 16  ;;  %v6147_v28 = vshrl.u32 %v5813_v27, 16  ;;  %v7550_v63 = vsel %vm12034_vm6, %v7541_v45, %v7549_v20  ;;  %v7397_v35 = vld [vmem:[#allocation2 + $0x3c] sm:$0xe]  ;;  %v7398_v14 = vld [vmem:[#allocation2 + $0x40] sm:$0xf] }
 0x302   : > { %15606 = vst [vmem:[#allocation135_spill] sm:$0xff] %v13868_v4  ;;  %15607 = vst [vmem:[#allocation136_spill] sm:$0xff] %v13875_v0  ;;  %10426 = vmatprep.mubr.bf16.mxu0 %v8225_v5  ;;  %v6136_v48 = vrot.slane %v6134_v18, 4  ;;  %v13885_v6 = vor.u32 %v7594_v37, %v7591_v51  ;;  %v6139_v52 = vrot.slane %v6137_v9, 5  ;;  %v6153_v38 = vshll.u32 %v5814_v12, 16  ;;  %v6873_v0 = vpop.permute.xlu0 %6872 }
 0x303   : > { %v13881_v13 = vpop.f32.mrf.mxu0  ;;  %10427 = vmatmul.mubr.bf16.vlgmr.msra.gmra.mxu0 %v8229_v54  ;;  %v13887_v21 = vpop.f32.mrf.mxu1  ;;  %v6145_v40 = vrot.slane %v6143_v49, 5  ;;  %v6149_v46 = vrot.slane %v6147_v28, 4  ;;  %v9752_v5 = vrot.slane %v6251_v22, 9  ;;  %v6395_v18 = vrot.slane %v5813_v27, 5 }
 0x304   : > { %15608 = vst [vmem:[#allocation137_spill] sm:$0xff] %v13881_v13  ;;  %15609 = vst [vmem:[#allocation138_spill] sm:$0xff] %v13887_v21  ;;  %v13891_v33 = vrot.slane %v7586_v31, 4  ;;  %v7605_v20 = vor.u32 %v13873_v60, %v13871_v10  ;;  %v6140_v45 = vor.u32 %v6139_v52, %v6136_v48  ;;  %v6398_v51 = vrot.slane %v5814_v12, 5  ;;  %v7399_v21 = vld [vmem:[#allocation2 + $0x44] sm:$0x3]  ;;  %v8196_v52 = vpop.permute.xlu1 %8195 }
 0x305   : > { %v13889_v26 = vpop.f32.mrf.mxu0  ;;  %v13895_v37 = vpop.f32.mrf.mxu1  ;;  %v6150_v54 = vor.u32 %v6149_v46, %v6145_v40  ;;  %v6155_v9 = vrot.slane %v6153_v38, 5  ;;  %v6396_v49 = vsel %vm11107_vm7, %v9752_v5, %v6395_v18  ;;  %v6397_v28 = vrot.slane %v6395_v18, 4 }
 0x306   : > { %15610 = vst [vmem:[#allocation139_spill] sm:$0xff] %v13889_v26  ;;  %15611 = vst [vmem:[#allocation140_spill] sm:$0xff] %v13895_v37  ;;  %v6141_v27 = vrot.slane %v6140_v45, 4  ;;  %v7496_v56 = vshrl.u32 %v7397_v35, 16  ;;  %v7499_v31 = vshll.u32 %v7397_v35, 16  ;;  %v7505_v53 = vshrl.u32 %v7398_v14, 16  ;;  %v6745_v37 = vpop.permute.xlu0 %6744 }
 0x307   : > { %v13899_v22 = vpop.f32.mrf.mxu0  ;;  %v13901_v19 = vpop.f32.mrf.mxu1  ;;  %v7597_v10 = vrot.slane %v13885_v6, 4  ;;  %v6151_v12 = vrot.slane %v6150_v54, 4  ;;  %v6399_v60 = vsel %vm11107_vm7, %v6397_v28, %v6398_v51  ;;  %v7508_v46 = vshll.u32 %v7398_v14, 16 }
 0x308   : > { %15612 = vst [vmem:[#allocation141_spill] sm:$0xff] %v13899_v22  ;;  %15613 = vst [vmem:[#allocation142_spill] sm:$0xff] %v13901_v19  ;;  %v6146_v38 = vsel %vm11802_vm3, %v6141_v27, %v6145_v40  ;;  %v9816_v5 = vcombine.low %v6396_v49, %v6399_v60  ;;  %v7498_v18 = vrot.slane %v7496_v56, 5  ;;  %v7501_v45 = vrot.slane %v7499_v31, 6  ;;  %v7412_v27 = vld [vmem:[#allocation2 + $0x78] sm:$0xe] }
 0x309   : > { %v13906_v48 = vpop.f32.mrf.mxu0  ;;  %v13910_v35 = vpop.f32.mrf.mxu1  ;;  %v6156_v19 = vsel %vm11802_vm3, %v6151_v12, %v6155_v9  ;;  %v7507_v54 = vrot.slane %v7505_v53, 5  ;;  %v7510_v44 = vrot.slane %v7508_v46, 6  ;;  %v7515_v62 = vshrl.u32 %v7399_v21, 16  ;;  %v7413_v60 = vld [vmem:[#allocation2 + $0x7c] sm:$0xf] }
 0x30a   : > { %15614 = vst [vmem:[#allocation143_spill] sm:$0xff] %v13906_v48  ;;  %15615 = vst [vmem:[#allocation144_spill] sm:$0xff] %v13910_v35  ;;  %v9784_v14 = vcombine.low %v6146_v38, %v6156_v19  ;;  %v6996_v28 = vsel %vm1826_vm14, %v9816_v5, %v6873_v0  ;;  %v7502_v15 = vor.u32 %v7501_v45, %v7498_v18  ;;  %v7518_v3 = vshll.u32 %v7399_v21, 16  ;;  %v5815_v18 = vld [vmem:[#allocation2 + $0xcc] sm:$0xf] }
 0x30b   : > { %v13914_v51 = vpop.f32.mrf.mxu0  ;;  %v13917_v40 = vpop.f32.mrf.mxu1  ;;  %7270 = vmatprep.mubr.bf16.mxu1 %v6996_v28  ;;  %v7511_v56 = vor.u32 %v7510_v44, %v7507_v54  ;;  %v7517_v49 = vrot.slane %v7515_v62, 5  ;;  %v15620_v19 = vsel %vm12034_vm6, %v13855_v32, %v13841_v58  ;;  %v7596_v62 = vsel %vm12034_vm6, %v13891_v33, %v13885_v6  ;;  %v5816_v6 = vld [vmem:[#allocation2 + $0xd0] sm:$0xf]  ;;  %v5817_v28 = vld [vmem:[#allocation2 + $0xd4] sm:$0x1] }
 0x30c   : > { %15616 = vst [vmem:[#allocation145_spill] sm:$0xff] %v13914_v51  ;;  %15617 = vst [vmem:[#allocation146_spill] sm:$0xff] %v13917_v40  ;;  %v6932_v9 = vsel %vm1826_vm14, %v9784_v14, %v6745_v37  ;;  %v7503_v53 = vrot.slane %v7502_v15, 4  ;;  %v7520_v12 = vrot.slane %v7518_v3, 6  ;;  %v9870_v21 = vcombine.low %v15620_v19, %v7550_v63  ;;  %v8198_v32 = vpop.permute.xlu1 %8197  ;;  %v13948_v14 = vld [vmem:[#allocation2 + $0x80] sm:$0x3] }
 0x30d   : > { %v13919_v31 = vpop.f32.mrf.mxu0  ;;  %v13922_v46 = vpop.f32.mrf.mxu1  ;;  %v7606_v44 = vsel %vm12034_vm6, %v7597_v10, %v7605_v20  ;;  %7271 = vmatmul.mubr.bf16.gmra.mxu1 %v6932_v9  ;;  %v7513_v15 = vrot.slane %v7511_v56, 4  ;;  %v7636_v38 = vshrl.u32 %v7412_v27, 16  ;;  %v7639_v5 = vshll.u32 %v7412_v27, 16 }
 0x30e   : > { %15618 = vst [vmem:[#allocation147_spill] sm:$0xff] %v13919_v31  ;;  %15619 = vst [vmem:[#allocation148_spill] sm:$0xff] %v13922_v46  ;;  %v7512_v0 = vsel %vm12034_vm6, %v7503_v53, %v7511_v56  ;;  %v7521_v37 = vor.u32 %v7520_v12, %v7517_v49  ;;  %v7645_v63 = vshrl.u32 %v7413_v60, 16  ;;  %v8237_v20 = vsel %vm1826_vm14, %v9870_v21, %v8198_v32  ;;  %v6252_v12 = vld [vmem:[#allocation2 + $0xcc] sm:$0xe] }
 0x30f   : > { %v13935_v3 = vpop.f32.mrf.mxu0  ;;  %v13939_v58 = vpop.f32.mrf.mxu1  ;;  %v13946_v10 = vcombine.low %v7596_v62, %v7606_v44  ;;  %v13952_v49 = vrot.slane %v7636_v38, 5  ;;  %v13954_v27 = vrot.slane %v7639_v5, 6  ;;  %v7648_v9 = vshll.u32 %v7413_v60, 16  ;;  %v7403_v60 = vld [vmem:[#allocation2 + $0x54] sm:$0xe] }
 0x310   : > { %15621 = vst [vmem:[#allocation149_spill] sm:$0xff] %v13935_v3  ;;  %15622 = vst [vmem:[#allocation150_spill] sm:$0xff] %v13939_v58  ;;  %v7522_v33 = vsel %vm12034_vm6, %v7513_v15, %v7521_v37  ;;  %v6158_v53 = vshrl.u32 %v5815_v18, 16  ;;  %v13959_v21 = vrot.slane %v7645_v63, 5  ;;  %v6161_v62 = vshll.u32 %v5815_v18, 16 }
 0x311   : > { %v13941_v45 = vpop.f32.mrf.mxu0  ;;  %v9869_v54 = vcombine.low %v7512_v0, %v7522_v33  ;;  %v13956_v19 = vpop.f32.mrf.mxu1  ;;  %v6167_v44 = vshll.u32 %v5816_v6, 16  ;;  %v7655_v37 = vshrl.u32 %v13948_v14, 16  ;;  %v7658_v38 = vshll.u32 %v13948_v14, 16  ;;  %v7404_v14 = vld [vmem:[#allocation2 + $0x58] sm:$0xf] }
 0x312   : > { %15623 = vst [vmem:[#allocation151_spill] sm:$0xff] %v13941_v45  ;;  %15625 = vst [vmem:[#allocation153_spill] sm:$0xff] %v13956_v19  ;;  %v6160_v5 = vrot.slane %v6158_v53, 4  ;;  %v6171_v32 = vshrl.u32 %v5816_v6, 16  ;;  %v13965_v33 = vpop.permute.xlu1 %8199  ;;  %v6163_v19 = vrot.slane %v6161_v62, 5  ;;  %v9753_v63 = vrot.slane %v6252_v12, 9 }
 0x313   : > { %v13950_v56 = vpop.f32.mrf.mxu0  ;;  %v8233_v15 = vsel %vm1826_vm14, %v9869_v54, %v8196_v52  ;;  %v6169_v58 = vrot.slane %v6167_v44, 5  ;;  %v6177_v52 = vshll.u32 %v5817_v28, 16  ;;  %v6402_v40 = vrot.slane %v5816_v6, 5  ;;  %v13971_v53 = vpop.f32.mrf.mxu1 }
 0x314   : > { %15624 = vst [vmem:[#allocation152_spill] sm:$0xff] %v13950_v56  ;;  %10430 = vmatprep.mubr.bf16.mxu0 %v8233_v15  ;;  %v6875_v15 = vpop.permute.xlu0 %6874  ;;  %v6173_v46 = vrot.slane %v6171_v32, 4  ;;  %v6405_v35 = vrot.slane %v5817_v28, 5  ;;  %15628 = vst [vmem:[#allocation156_spill] sm:$0xff] %v13971_v53  ;;  %v7650_v39 = vrot.slane %v7648_v9, 6  ;;  %v6164_v29 = vor.u32 %v6163_v19, %v6160_v5 }
 0x315   : > { %v13961_v0 = vpop.f32.mrf.mxu0  ;;  %10431 = vmatmul.mubr.bf16.gmra.mxu0 %v8237_v20  ;;  %v6179_v57 = vrot.slane %v6177_v52, 5  ;;  %v7552_v20 = vshrl.u32 %v7403_v60, 16  ;;  %v6403_v12 = vsel %vm11107_vm7, %v9753_v63, %v6402_v40  ;;  %v6404_v17 = vrot.slane %v6402_v40, 4 }
 0x316   : > { %15626 = vst [vmem:[#allocation154_spill] sm:$0xff] %v13961_v0  ;;  %v6174_v44 = vor.u32 %v6173_v46, %v6169_v58  ;;  %v7555_v18 = vshll.u32 %v7403_v60, 16  ;;  %v6165_v6 = vrot.slane %v6164_v29, 4  ;;  %v7561_v32 = vshrl.u32 %v7404_v14, 16  ;;  %v13983_v46 = vpop.f32.mrf.mxu1  ;;  %v8202_v53 = vpop.permute.xlu1 %8201  ;;  %v7418_v29 = vld [vmem:[#allocation2 + $0x90] sm:$0xe] }
 0x317   : > { %v13967_v54 = vpop.f32.mrf.mxu0  ;;  %v7554_v28 = vrot.slane %v7552_v20, 5  ;;  %v6406_v19 = vsel %vm11107_vm7, %v6404_v17, %v6405_v35  ;;  %v7564_v52 = vshll.u32 %v7404_v14, 16  ;;  %15631 = vst [vmem:[#allocation159_spill] sm:$0xff] %v13983_v46  ;;  %v7571_v63 = vshrl.u32 %v7405_v16, 16  ;;  %v7419_v17 = vld [vmem:[#allocation2 + $0x94] sm:$0xf] }
 0x318   : > { %15627 = vst [vmem:[#allocation155_spill] sm:$0xff] %v13967_v54  ;;  %v13977_v54 = vrot.slane %v7655_v37, 5  ;;  %v6175_v9 = vrot.slane %v6174_v44, 4  ;;  %v7557_v5 = vrot.slane %v7555_v18, 6  ;;  %v6170_v40 = vsel %vm11802_vm3, %v6165_v6, %v6169_v58  ;;  %v13992_v45 = vpop.f32.mrf.mxu1 }
 0x319   : > { %v13973_v62 = vpop.f32.mrf.mxu0  ;;  %v9817_v60 = vcombine.low %v6403_v12, %v6406_v19  ;;  %v7563_v37 = vrot.slane %v7561_v32, 5  ;;  %v7660_v35 = vrot.slane %v7658_v38, 6  ;;  %v7573_v61 = vrot.slane %v7571_v63, 5  ;;  %v7420_v32 = vld [vmem:[#allocation2 + $0x98] sm:$0x3]  ;;  %15633 = vst [vmem:[#allocation161_spill] sm:$0xff] %v13992_v45 }
 0x31a   : > { %15629 = vst [vmem:[#allocation157_spill] sm:$0xff] %v13973_v62  ;;  %v6180_v20 = vsel %vm11802_vm3, %v6175_v9, %v6179_v57  ;;  %v7558_v44 = vor.u32 %v7557_v5, %v7554_v28  ;;  %v7566_v62 = vrot.slane %v7564_v52, 6  ;;  %v7576_v6 = vrot.slane %v7574_v30, 6  ;;  %v14002_v52 = vpop.permute.xlu1 %8203 }
 0x31b   : > { %v13979_v0 = vpop.f32.mrf.mxu0  ;;  %v9785_v18 = vcombine.low %v6170_v40, %v6180_v20  ;;  %v7000_v14 = vsel %vm1826_vm14, %v9817_v60, %v6875_v15  ;;  %v7692_v19 = vshrl.u32 %v7418_v29, 16  ;;  %v13995_v57 = vor.u32 %v7650_v39, %v13959_v21  ;;  %v5818_v39 = vld [vmem:[#allocation2 + $0xd8] sm:$0xf] }
 0x31c   : > { %15630 = vst [vmem:[#allocation158_spill] sm:$0xff] %v13979_v0  ;;  %v6747_v0 = vpop.permute.xlu0 %6746  ;;  %7278 = vmatprep.mubr.bf16.mxu1 %v7000_v14  ;;  %v7559_v58 = vrot.slane %v7558_v44, 4  ;;  %v7567_v12 = vor.u32 %v7566_v62, %v7563_v37  ;;  %v7695_v38 = vshll.u32 %v7418_v29, 16  ;;  %v7701_v28 = vshrl.u32 %v7419_v17, 16  ;;  %v14014_v44 = vpop.f32.mrf.mxu1 }
 0x31d   : > { %v6936_v16 = vsel %vm1826_vm14, %v9785_v18, %v6747_v0  ;;  %v7577_v62 = vor.u32 %v7576_v6, %v7573_v61  ;;  %v7694_v30 = vrot.slane %v7692_v19, 5  ;;  %v7704_v60 = vshll.u32 %v7419_v17, 16  ;;  %15637 = vst [vmem:[#allocation164_spill] sm:$0xff] %v14014_v44  ;;  %v5820_v19 = vld [vmem:[#allocation2 + $0xe0] sm:$0x1] }
 0x31e   : > { %7279 = vmatmul.mubr.bf16.gmra.mxu1 %v6936_v16  ;;  %v7568_v15 = vsel %vm12034_vm6, %v7559_v58, %v7567_v12  ;;  %v7569_v5 = vrot.slane %v7567_v12, 4  ;;  %v7697_v40 = vrot.slane %v7695_v38, 6  ;;  %v7711_v37 = vshrl.u32 %v7420_v32, 16  ;;  %v5819_v12 = vld [vmem:[#allocation2 + $0xdc] sm:$0xf] }
 0x31f   : > { %v15636_v0 = vor.u32 %v13954_v27, %v13952_v49  ;;  %v7661_v29 = vor.u32 %v7660_v35, %v13977_v54  ;;  %v7714_v61 = vshll.u32 %v7420_v32, 16  ;;  %v7653_v18 = vrot.slane %v13995_v57, 4  ;;  %v7435_v44 = vld [vmem:[#allocation2 + $0xd4] sm:$0x3] }
 0x320   : > { %v7578_v20 = vsel %vm12034_vm6, %v7569_v5, %v7577_v62  ;;  %v7703_v14 = vrot.slane %v7701_v28, 5  ;;  %v7706_v58 = vrot.slane %v7704_v60, 6  ;;  %v8245_v49 = vsel %vm1826_vm14, %v13946_v10, %v8202_v53  ;;  %v6253_v5 = vld [vmem:[#allocation2 + $0xd8] sm:$0xe]  ;;  %v14027_v10 = vpop.f32.mrf.mxu1  ;;  %v7410_v28 = vld [vmem:[#allocation2 + $0x70] sm:$0xf] }
 0x321   : > { %v14009_v63 = vrot.slane %v15636_v0, 4  ;;  %v9871_v17 = vcombine.low %v7568_v15, %v7578_v20  ;;  %v7698_v27 = vor.u32 %v7697_v40, %v7694_v30  ;;  %v6182_v54 = vshrl.u32 %v5818_v39, 16  ;;  %15639 = vst [vmem:[#allocation166_spill] sm:$0xff] %v14027_v10  ;;  %v14033_v30 = vpop.permute.xlu1 %8205  ;;  %v7409_v0 = vld [vmem:[#allocation2 + $0x6c] sm:$0xe]  ;;  %v6877_v20 = vpop.permute.xlu0 %6876 }
 0x322   : > { %v13990_v56 = vpop.f32.mrf.mxu0  ;;  %v7713_v32 = vrot.slane %v7711_v37, 5  ;;  %v7716_v16 = vrot.slane %v7714_v61, 6  ;;  %v6185_v38 = vshll.u32 %v5818_v39, 16  ;;  %v6191_v62 = vshll.u32 %v5819_v12, 16 }
 0x323   : > { %15632 = vst [vmem:[#allocation160_spill] sm:$0xff] %v13990_v56  ;;  %v8241_v35 = vsel %vm1826_vm14, %v9871_v17, %v13965_v33  ;;  %v6184_v15 = vrot.slane %v6182_v54, 4  ;;  %v6195_v60 = vshrl.u32 %v5819_v12, 16  ;;  %v7662_v33 = vsel %vm12034_vm6, %v7653_v18, %v7661_v29 }
 0x324   : > { %v13998_v9 = vpop.f32.mrf.mxu0  ;;  %10434 = vmatprep.mubr.bf16.mxu0 %v8241_v35  ;;  %v7707_v40 = vor.u32 %v7706_v58, %v7703_v14  ;;  %v6187_v37 = vrot.slane %v6185_v38, 5  ;;  %v6201_v39 = vshll.u32 %v5820_v19, 16  ;;  %v6193_v61 = vrot.slane %v6191_v62, 5  ;;  %v7411_v62 = vld [vmem:[#allocation2 + $0x74] sm:$0x3] }
 0x325   : > { %15634 = vst [vmem:[#allocation162_spill] sm:$0xff] %v13998_v9  ;;  %10435 = vmatmul.mubr.bf16.gmra.mxu0 %v8245_v49  ;;  %v6197_v17 = vrot.slane %v6195_v60, 4  ;;  %v9754_v54 = vrot.slane %v6253_v5, 9  ;;  %v6409_v35 = vrot.slane %v5819_v12, 5  ;;  %v6412_v56 = vrot.slane %v5820_v19, 5 }
 0x326   : > { %v14004_v21 = vpop.f32.mrf.mxu0  ;;  %v6188_v9 = vor.u32 %v6187_v37, %v6184_v15  ;;  %v6203_v18 = vrot.slane %v6201_v39, 5  ;;  %v7608_v60 = vshrl.u32 %v7409_v0, 16  ;;  %v7611_v5 = vshll.u32 %v7409_v0, 16  ;;  %v14045_v15 = vpop.permute.xlu1 %8207 }
 0x327   : > { %15635 = vst [vmem:[#allocation163_spill] sm:$0xff] %v14004_v21  ;;  %v7717_v21 = vor.u32 %v7716_v16, %v7713_v32  ;;  %v6198_v29 = vor.u32 %v6197_v17, %v6193_v61  ;;  %v6410_v14 = vsel %vm11107_vm7, %v9754_v54, %v6409_v35  ;;  %v6411_v58 = vrot.slane %v6409_v35, 4  ;;  %v6749_v35 = vpop.permute.xlu0 %6748 }
 0x328   : > { %v14017_v6 = vpop.f32.mrf.mxu0  ;;  %v6189_v38 = vrot.slane %v6188_v9, 4  ;;  %v7617_v12 = vshrl.u32 %v7410_v28, 16  ;;  %v7709_v31 = vrot.slane %v7707_v40, 4  ;;  %v7620_v32 = vshll.u32 %v7410_v28, 16 }
 0x329   : > { %15638 = vst [vmem:[#allocation165_spill] sm:$0xff] %v14017_v6  ;;  %v7699_v6 = vrot.slane %v7698_v27, 4  ;;  %v6199_v27 = vrot.slane %v6198_v29, 4  ;;  %v6413_v19 = vsel %vm11107_vm7, %v6411_v58, %v6412_v56  ;;  %v7610_v17 = vrot.slane %v7608_v60, 5 }
 0x32a   : > { %v6194_v37 = vsel %vm11802_vm3, %v6189_v38, %v6193_v61  ;;  %v9818_v39 = vcombine.low %v6410_v14, %v6413_v19  ;;  %v7613_v9 = vrot.slane %v7611_v5, 6  ;;  %v7619_v29 = vrot.slane %v7617_v12, 5 }
 0x32b   : > { %v6204_v0 = vsel %vm11802_vm3, %v6199_v27, %v6203_v18  ;;  %v7622_v1 = vrot.slane %v7620_v32, 6  ;;  %v7627_v56 = vshrl.u32 %v7411_v62, 16  ;;  %v7630_v50 = vshll.u32 %v7411_v62, 16  ;;  %v7424_v27 = vld [vmem:[#allocation2 + $0xa8] sm:$0xe] }
 0x32c   : > { %v14029_v53 = vpop.f32.mrf.mxu0  ;;  %v9786_v28 = vcombine.low %v6194_v37, %v6204_v0  ;;  %v7004_v58 = vsel %vm1826_vm14, %v9818_v39, %v6877_v20  ;;  %v7614_v7 = vor.u32 %v7613_v9, %v7610_v17  ;;  %v7708_v61 = vsel %vm12034_vm6, %v7699_v6, %v7707_v40  ;;  %v8210_v40 = vpop.permute.xlu1 %8209  ;;  %v14070_v37 = vld [vmem:[#allocation2 + $0xac] sm:$0xf]  ;;  %v7431_v0 = vld [vmem:[#allocation2 + $0xc4] sm:$0xf] }
 0x32d   : > { %v7718_v14 = vsel %vm12034_vm6, %v7709_v31, %v7717_v21  ;;  %7286 = vmatprep.mubr.bf16.mxu1 %v7004_v58  ;;  %v7623_v38 = vor.u32 %v7622_v1, %v7619_v29  ;;  %v7629_v60 = vrot.slane %v7627_v56, 5  ;;  %v7632_v12 = vrot.slane %v7630_v50, 6  ;;  %v7430_v50 = vld [vmem:[#allocation2 + $0xc0] sm:$0xe]  ;;  %v7432_v56 = vld [vmem:[#allocation2 + $0xc8] sm:$0x3] }
 0x32e   : > { %v14035_v3 = vpop.f32.mrf.mxu0  ;;  %v6940_v18 = vsel %vm1826_vm14, %v9786_v28, %v6749_v35  ;;  %v7615_v5 = vrot.slane %v7614_v7, 4  ;;  %v15640_v6 = vsel %vm12034_vm6, %v14009_v63, %v13995_v57  ;;  %v9876_v21 = vcombine.low %v7708_v61, %v7718_v14  ;;  %v7427_v58 = vld [vmem:[#allocation2 + $0xb4] sm:$0xe]  ;;  %v14086_v14 = vld [vmem:[#allocation2 + $0xb0] sm:$0x3] }
 0x32f   : > { %v14039_v49 = vpop.f32.mrf.mxu1  ;;  %7287 = vmatmul.mubr.bf16.gmra.mxu1 %v6940_v18  ;;  %v7625_v20 = vrot.slane %v7623_v38, 4  ;;  %v9874_v31 = vcombine.low %v15640_v6, %v7662_v33  ;;  %v7633_v32 = vor.u32 %v7632_v12, %v7629_v60  ;;  %v7748_v7 = vshrl.u32 %v7424_v27, 16 }
 0x330   : > { %v14049_v54 = vpop.f32.mrf.mxu0  ;;  %v7624_v62 = vsel %vm12034_vm6, %v7615_v5, %v7623_v38  ;;  %v7751_v9 = vshll.u32 %v7424_v27, 16  ;;  %v7757_v63 = vshrl.u32 %v14070_v37, 16  ;;  %v7804_v33 = vshrl.u32 %v7430_v50, 16 }
 0x331   : > { %v14043_v16 = vpop.f32.mrf.mxu1  ;;  %v7634_v17 = vsel %vm12034_vm6, %v7625_v20, %v7633_v32  ;;  %v8253_v29 = vsel %vm1826_vm14, %v9874_v31, %v14033_v30  ;;  %v14082_v1 = vsel %vm1826_vm14, %v9876_v21, %v8210_v40  ;;  %v7807_v28 = vshll.u32 %v7430_v50, 16  ;;  %v14094_v30 = vpop.permute.xlu1 %8211  ;;  %v7428_v32 = vld [vmem:[#allocation2 + $0xb8] sm:$0xf] }
 0x332   : > { %v14061_v19 = vpop.f32.mrf.mxu0  ;;  %v9873_v57 = vcombine.low %v7624_v62, %v7634_v17  ;;  %v14088_v38 = vrot.slane %v7748_v7, 5  ;;  %v7806_v60 = vrot.slane %v7804_v33, 5  ;;  %v7813_v18 = vshrl.u32 %v7431_v0, 16 }
 0x333   : > { %v14058_v47 = vpop.f32.mrf.mxu1  ;;  %v14096_v27 = vrot.slane %v7751_v9, 6  ;;  %v7760_v20 = vshll.u32 %v14070_v37, 16  ;;  %v7809_v6 = vrot.slane %v7807_v28, 6  ;;  %v7816_v31 = vshll.u32 %v7431_v0, 16  ;;  %v7429_v28 = vld [vmem:[#allocation2 + $0xbc] sm:$0x3] }
 0x334   : > { %v8249_v61 = vsel %vm1826_vm14, %v9873_v57, %v14002_v52  ;;  %v14099_v52 = vrot.slane %v7757_v63, 5  ;;  %v7815_v21 = vrot.slane %v7813_v18, 5  ;;  %v7823_v40 = vshrl.u32 %v7432_v56, 16 }
 0x335   : > { %v14072_v39 = vpop.f32.mrf.mxu1  ;;  %10438 = vmatprep.mubr.bf16.mxu0 %v8249_v61  ;;  %v7826_v62 = vshll.u32 %v7432_v56, 16  ;;  %v7767_v7 = vshrl.u32 %v14086_v14, 16  ;;  %v7810_v17 = vor.u32 %v7809_v6, %v7806_v60  ;;  %v7818_v57 = vrot.slane %v7816_v31, 6  ;;  %v7416_v31 = vld [vmem:[#allocation2 + $0x88] sm:$0xf] }
 0x336   : > { %10439 = vmatmul.mubr.bf16.gmra.mxu0 %v8253_v29  ;;  %v7776_v33 = vshrl.u32 %v7427_v58, 16  ;;  %v7770_v9 = vshll.u32 %v14086_v14, 16  ;;  %v7825_v61 = vrot.slane %v7823_v40, 5  ;;  %v7779_v0 = vshll.u32 %v7427_v58, 16  ;;  %v14111_v14 = vpop.permute.xlu1 %8213 }
 0x337   : > { %v7828_v37 = vrot.slane %v7826_v62, 6  ;;  %v7811_v29 = vrot.slane %v7810_v17, 4  ;;  %v7819_v18 = vor.u32 %v7818_v57, %v7815_v21  ;;  %v7785_v56 = vshrl.u32 %v7428_v32, 16 }
 0x338   : > { %v7778_v8 = vrot.slane %v7776_v33, 5  ;;  %v7754_v51 = vor.u32 %v14096_v27, %v14088_v38  ;;  %v7781_v60 = vrot.slane %v7779_v0, 6  ;;  %v7788_v6 = vshll.u32 %v7428_v32, 16 }
 0x339   : > { %v7829_v48 = vor.u32 %v7828_v37, %v7825_v61  ;;  %v7820_v58 = vsel %vm12034_vm6, %v7811_v29, %v7819_v18  ;;  %v7821_v40 = vrot.slane %v7819_v18, 4  ;;  %v7787_v62 = vrot.slane %v7785_v56, 5  ;;  %v7417_v29 = vld [vmem:[#allocation2 + $0x8c] sm:$0x3] }
 0x33a   : > { %v7795_v21 = vshrl.u32 %v7429_v28, 16  ;;  %v7782_v17 = vor.u32 %v7781_v60, %v7778_v8  ;;  %v7790_v57 = vrot.slane %v7788_v6, 6  ;;  %v7798_v33 = vshll.u32 %v7429_v28, 16 }
 0x33b   : > { %v7664_v55 = vshrl.u32 %v7415_v41, 16  ;;  %v7830_v38 = vsel %vm12034_vm6, %v7821_v40, %v7829_v48  ;;  %v7667_v32 = vshll.u32 %v7415_v41, 16  ;;  %v7673_v61 = vshrl.u32 %v7416_v31, 16  ;;  %v8216_v41 = vpop.permute.xlu0 %8215 }
 0x33c   : > { %v14076_v35 = vpop.f32.mrf.mxu0  ;;  %v7797_v27 = vrot.slane %v7795_v21, 5  ;;  %v7762_v37 = vrot.slane %v7760_v20, 6  ;;  %v7783_v0 = vrot.slane %v7782_v17, 4  ;;  %v7791_v26 = vor.u32 %v7790_v57, %v7787_v62  ;;  %v8218_v20 = vpop.permute.xlu1 %8217 }
 0x33d   : > { %v7800_v45 = vrot.slane %v7798_v33, 6  ;;  %v7666_v56 = vrot.slane %v7664_v55, 5  ;;  %v7669_v8 = vrot.slane %v7667_v32, 6  ;;  %v7675_v60 = vrot.slane %v7673_v61, 5  ;;  %v7436_v33 = vld [vmem:[#allocation2 + $0xd8] sm:$0xe] }
 0x33e   : > { %v14092_v12 = vpop.f32.mrf.mxu0  ;;  %v7676_v28 = vshll.u32 %v7416_v31, 16  ;;  %v9880_v6 = vcombine.low %v7820_v58, %v7830_v38  ;;  %v7792_v46 = vsel %vm12034_vm6, %v7783_v0, %v7791_v26  ;;  %v7793_v59 = vrot.slane %v7791_v26, 4  ;;  %v7437_v0 = vld [vmem:[#allocation2 + $0xdc] sm:$0xf] }
 0x33f   : > { %v14090_v5 = vpop.f32.mrf.mxu1  ;;  %v7801_v48 = vor.u32 %v7800_v45, %v7797_v27  ;;  %v7670_v21 = vor.u32 %v7669_v8, %v7666_v56  ;;  %v7683_v17 = vshrl.u32 %v7417_v29, 16  ;;  %v7686_v57 = vshll.u32 %v7417_v29, 16 }
 0x340   : > { %v14105_v63 = vpop.f32.mrf.mxu0  ;;  %v7678_v62 = vrot.slane %v7676_v28, 6  ;;  %v14125_v25 = vrot.slane %v7754_v51, 4  ;;  %v14127_v55 = vrot.slane %v7767_v7, 5  ;;  %v14129_v31 = vrot.slane %v7770_v9, 6  ;;  %v7438_v9 = vld [vmem:[#allocation2 + $0xe0] sm:$0x3] }
 0x341   : > { %v14101_v50 = vpop.f32.mrf.mxu1  ;;  %v7802_v58 = vsel %vm12034_vm6, %v7793_v59, %v7801_v48  ;;  %v7671_v27 = vrot.slane %v7670_v21, 4  ;;  %v7685_v61 = vrot.slane %v7683_v17, 5  ;;  %v14138_v29 = vor.u32 %v7762_v37, %v14099_v52  ;;  %v7433_v21 = vld [vmem:[#allocation2 + $0xcc] sm:$0xe] }
 0x342   : > { %v14115_v22 = vpop.f32.mrf.mxu0  ;;  %v9879_v38 = vcombine.low %v7792_v46, %v7802_v58  ;;  %v7679_v32 = vor.u32 %v7678_v62, %v7675_v60  ;;  %v8277_v51 = vsel %vm1826_vm14, %v9880_v6, %v8218_v20  ;;  %v7688_v7 = vrot.slane %v7686_v57, 6 }
 0x343   : > { %v14109_v23 = vpop.f32.mrf.mxu1  ;;  %v7860_v56 = vshrl.u32 %v7436_v33, 16  ;;  %v7863_v48 = vshll.u32 %v7436_v33, 16  ;;  %v7869_v62 = vshrl.u32 %v7437_v0, 16  ;;  %v7872_v6 = vshll.u32 %v7437_v0, 16 }
 0x344   : > { %v8273_v28 = vsel %vm1826_vm14, %v9879_v38, %v8216_v41  ;;  %v7680_v46 = vsel %vm12034_vm6, %v7671_v27, %v7679_v32  ;;  %v7681_v60 = vrot.slane %v7679_v32, 4  ;;  %v7689_v52 = vor.u32 %v7688_v7, %v7685_v61  ;;  %v7434_v38 = vld [vmem:[#allocation2 + $0xd0] sm:$0xf] }
 0x345   : > { %v14119_v18 = vpop.f32.mrf.mxu1  ;;  %10450 = vmatprep.mubr.bf16.mxu1 %v8273_v28  ;;  %v7862_v37 = vrot.slane %v7860_v56, 5  ;;  %v7865_v57 = vrot.slane %v7863_v48, 6  ;;  %v7879_v58 = vshrl.u32 %v7438_v9, 16  ;;  %v7882_v41 = vshll.u32 %v7438_v9, 16 }
 0x346   : > { %10451 = vmatmul.mubr.bf16.vlgmr.msra.gmra.mxu1 %v8277_v51  ;;  %v7690_v27 = vsel %vm12034_vm6, %v7681_v60, %v7689_v52  ;;  %v7871_v33 = vrot.slane %v7869_v62, 5  ;;  %v7874_v32 = vrot.slane %v7872_v6, 6  ;;  %v7832_v28 = vshrl.u32 %v7433_v21, 16 }
 0x347   : > { %v9875_v7 = vcombine.low %v7680_v46, %v7690_v27  ;;  %v7866_v0 = vor.u32 %v7865_v57, %v7862_v37  ;;  %v7881_v56 = vrot.slane %v7879_v58, 5  ;;  %v7884_v10 = vrot.slane %v7882_v41, 6 }
 0x348   : > { %v7875_v24 = vor.u32 %v7874_v32, %v7871_v33  ;;  %v7834_v17 = vrot.slane %v7832_v28, 5  ;;  %v7835_v51 = vshll.u32 %v7433_v21, 16  ;;  %v7841_v48 = vshrl.u32 %v7434_v38, 16 }
 0x349   : > { %v8257_v60 = vsel %vm1826_vm14, %v9875_v7, %v14045_v15  ;;  %v7867_v52 = vrot.slane %v7866_v0, 4  ;;  %v7885_v62 = vor.u32 %v7884_v10, %v7881_v56  ;;  %v7844_v6 = vshll.u32 %v7434_v38, 16  ;;  %v7422_v15 = vld [vmem:[#allocation2 + $0xa0] sm:$0xf]  ;;  %v7423_v7 = vld [vmem:[#allocation2 + $0xa4] sm:$0x3] }
 0x34a   : > { %10442 = vmatprep.mubr.bf16.mxu0 %v8257_v60  ;;  %v7877_v13 = vrot.slane %v7875_v24, 4  ;;  %v7837_v46 = vrot.slane %v7835_v51, 6  ;;  %v7843_v37 = vrot.slane %v7841_v48, 5  ;;  %v7851_v57 = vshrl.u32 %v7435_v44, 16 }
 0x34b   : > { %10443 = vmatmul.mubr.bf16.gmra.mxu0 %v14082_v1  ;;  %v7876_v21 = vsel %vm12034_vm6, %v7867_v52, %v7875_v24  ;;  %v7846_v27 = vrot.slane %v7844_v6, 6  ;;  %v7854_v33 = vshll.u32 %v7435_v44, 16  ;;  %v7720_v32 = vshrl.u32 %v7421_v2, 16 }
 0x34c   : > { %v14123_v40 = vpop.f32.mrf.mxu0  ;;  %v7886_v10 = vsel %vm12034_vm6, %v7877_v13, %v7885_v62  ;;  %v7838_v38 = vor.u32 %v7837_v46, %v7834_v17  ;;  %v7853_v28 = vrot.slane %v7851_v57, 5  ;;  %v7723_v0 = vshll.u32 %v7421_v2, 16  ;;  %v8222_v46 = vpop.permute.xlu1 %8221 }
 0x34d   : > { %v7765_v51 = vrot.slane %v14138_v29, 4  ;;  %v7847_v48 = vor.u32 %v7846_v27, %v7843_v37  ;;  %v7856_v1 = vrot.slane %v7854_v33, 6  ;;  %v7722_v60 = vrot.slane %v7720_v32, 5  ;;  %v8220_v33 = vpop.permute.xlu0 %8219 }
 0x34e   : > { %v14133_v26 = vpop.f32.mrf.mxu1  ;;  %v14135_v45 = vpop.f32.mrf.mxu0  ;;  %v7839_v4 = vrot.slane %v7838_v38, 4  ;;  %v7725_v24 = vrot.slane %v7723_v0, 6  ;;  %v7729_v52 = vshrl.u32 %v7422_v15, 16  ;;  %v7732_v44 = vshll.u32 %v7422_v15, 16 }
 0x34f   : > { %v9882_v43 = vcombine.low %v7876_v21, %v7886_v10  ;;  %v7849_v36 = vrot.slane %v7847_v48, 4  ;;  %v7857_v13 = vor.u32 %v7856_v1, %v7853_v28  ;;  %v7739_v17 = vshrl.u32 %v7423_v7, 16 }
 0x350   : > { %v14141_v8 = vpop.f32.mrf.mxu1  ;;  %v14143_v59 = vpop.f32.mrf.mxu0  ;;  %v7848_v2 = vsel %vm12034_vm6, %v7839_v4, %v7847_v48  ;;  %v7726_v57 = vor.u32 %v7725_v24, %v7722_v60  ;;  %v7731_v11 = vrot.slane %v7729_v52, 5  ;;  %v7734_v37 = vrot.slane %v7732_v44, 6 }
 0x351   : > { %v7764_v27 = vsel %vm12034_vm6, %v14125_v25, %v14138_v29  ;;  %v7858_v21 = vsel %vm12034_vm6, %v7849_v36, %v7857_v13  ;;  %v7741_v15 = vrot.slane %v7739_v17, 5  ;;  %v7742_v32 = vshll.u32 %v7423_v7, 16 }
 0x352   : > { %v14148_v20 = vpop.f32.mrf.mxu0  ;;  %v14154_v61 = vpop.f32.mrf.mxu1  ;;  %v15641_v10 = vor.u32 %v14129_v31, %v14127_v55  ;;  %v9881_v38 = vcombine.low %v7848_v2, %v7858_v21  ;;  %v7727_v28 = vrot.slane %v7726_v57, 4  ;;  %v7735_v0 = vor.u32 %v7734_v37, %v7731_v11 }
 0x353   : > { %v8285_v1 = vsel %vm1826_vm14, %v9882_v43, %v8222_v46  ;;  %v7744_v25 = vrot.slane %v7742_v32, 6  ;;  %v14207_v34 = vadd.f32 %v14043_v16, %v14039_v49  ;;  %v14225_v21 = vadd.f32 %v14101_v50, %v14090_v5 }
 0x354   : > { %v14160_v58 = vpop.f32.mrf.mxu1  ;;  %v7774_v4 = vsel %vm12034_vm6, %v7765_v51, %v15641_v10  ;;  %v8281_v60 = vsel %vm1826_vm14, %v9881_v38, %v8220_v33  ;;  %v7737_v36 = vrot.slane %v7735_v0, 4  ;;  %v7736_v55 = vsel %vm12034_vm6, %v7727_v28, %v7735_v0 }
 0x355   : > { %v9878_v24 = vcombine.low %v7764_v27, %v7774_v4  ;;  %10454 = vmatprep.mubr.bf16.mxu1 %v8281_v60  ;;  %v7745_v31 = vor.u32 %v7744_v25, %v7741_v15  ;;  %v14211_v27 = vadd.f32 %v14035_v3, %v14029_v53  ;;  %v14229_v49 = vadd.f32 %v14092_v12, %v14076_v35 }
 0x356   : > { %10455 = vmatmul.mubr.bf16.gmra.mxu1 %v8285_v1  ;;  %v14233_v3 = vadd.f32 %v14119_v18, %v14109_v23  ;;  %v14237_v16 = vadd.f32 %v14115_v22, %v14105_v63  ;;  %v14253_v23 = vadd.f32 %v14148_v20, %v14143_v59  ;;  %vm8885_vm2 = vcmask 261120  }
 0x357   : > { %v14156_v9 = vpop.f32.mrf.mxu0  ;;  %v7746_v11 = vsel %vm12034_vm6, %v7737_v36, %v7745_v31  ;;  %v8269_v44 = vsel %vm1826_vm14, %v9878_v24, %v14111_v14  ;;  %v14219_v14 = vadd.f32 %v14061_v19, %v14049_v54  ;;  %v14241_v54 = vadd.f32 %v14141_v8, %v14133_v26 }
 0x358   : > { %v9877_v43 = vcombine.low %v7736_v55, %v7746_v11  ;;  %v14249_v19 = vadd.f32 %v14160_v58, %v14154_v61 }
 0x359   : > { %v14162_v41 = vpop.f32.mrf.mxu0 }
 0x35a   : > { %v14172_v6 = vpop.f32.mrf.mxu1  ;;  %v8265_v13 = vsel %vm1826_vm14, %v9877_v43, %v14094_v30  ;;  %v14215_v30 = vadd.f32 %v14072_v39, %v14058_v47  ;;  %v14245_v47 = vadd.f32 %v14135_v45, %v14123_v40  ;;  %v14257_v22 = vadd.f32 %v14162_v41, %v14156_v9 }
 0x35b   : > { %v14169_v56 = vpop.f32.mrf.mxu0  ;;  %10446 = vmatprep.mubr.bf16.mxu0 %v8265_v13 }
 0x35c   : > { %v14187_v48 = vpop.f32.mrf.mxu1  ;;  %10447 = vmatmul.mubr.bf16.gmra.mxu0 %v8269_v44 }
 0x35d   : > { %v10211_v62 = vpop.f32.mrf.mxu0 }
 0x35e   : > { %v14193_v51 = vpop.f32.mrf.mxu1  ;;  %v14262_v35 = vadd.f32 %v10211_v62, %v14169_v56 }
 0x360   : > { %v14201_v17 = vpop.f32.mrf.mxu1  ;;  %15642 = vst [vmem:[#allocation167_spill] sm:$0xff] %v14262_v35  ;;  %v15686_v35 = vld [vmem:[#allocation25_spill] sm:$0xff] }
 0x362   : > { %v10213_v29 = vpop.f32.mrf.mxu0 }
 0x364   : > { %v10214_v7 = vpop.f32.mrf.mxu0 }
 0x365   : > { %v14264_v12 = vadd.f32 %v10214_v7, %v10213_v29 }
 0x366   : > { %v10216_v52 = vpop.f32.mrf.mxu0 }
 0x367   : > { %v14203_v2 = vpop.f32.mrf.mxu1  ;;  %15643 = vst [vmem:[#allocation168_spill] sm:$0xff] %v14264_v12 }
 0x368   : > { %v10217_v46 = vpop.f32.mrf.mxu0 }
 0x369   : > { %v14221_v33 = vpop.f32.mrf.mxu1  ;;  %v14266_v50 = vadd.f32 %v10217_v46, %v10216_v52 }
 0x36b   : > { %v14259_v39 = vpop.f32.mrf.mxu1  ;;  %15644 = vst [vmem:[#allocation169_spill] sm:$0xff] %v14266_v50  ;;  %v15683_v50 = vld [vmem:[#allocation38_spill] sm:$0xff] }
 0x36d   : > { %v14270_v18 = vpop.f32.mrf.mxu1 }
 0x36f   : > { %v10219_v57 = vpop.f32.mrf.mxu0 }
 0x371   : > { %v10220_v37 = vpop.f32.mrf.mxu0 }
 0x372   : > { %v14268_v63 = vadd.f32 %v10220_v37, %v10219_v57  ;;  %v14274_v45 = vpop.f32.mrf.mxu1 }
 0x373   : > { %v10222_v53 = vpop.f32.mrf.mxu0 }
 0x374   : > { %15645 = vst [vmem:[#allocation170_spill] sm:$0xff] %v14268_v63  ;;  %v14278_v61 = vpop.f32.mrf.mxu1  ;;  %v15677_v63 = vld [vmem:[#allocation131_spill] sm:$0xff] }
 0x375   : > { %v10223_v5 = vpop.f32.mrf.mxu0 }
 0x376   : > { %v14272_v40 = vadd.f32 %v10223_v5, %v10222_v53  ;;  %v14282_v41 = vpop.f32.mrf.mxu1 }
 0x378   : > { %15646 = vst [vmem:[#allocation171_spill] sm:$0xff] %v14272_v40  ;;  %v14284_v62 = vpop.f32.mrf.mxu1 }
 0x37b   : > { %v10225_v26 = vpop.f32.mrf.mxu0 }
 0x37d   : > { %v10226_v8 = vpop.f32.mrf.mxu0 }
 0x37e   : > { %v14276_v59 = vadd.f32 %v10226_v8, %v10225_v26 }
 0x37f   : > { %v10228_v20 = vpop.f32.mrf.mxu0  ;;  %v14288_v4 = vpop.f32.mrf.mxu1 }
 0x380   : > { %15647 = vst [vmem:[#allocation172_spill] sm:$0xff] %v14276_v59 }
 0x381   : > { %v10229_v9 = vpop.f32.mrf.mxu0  ;;  %v14292_v0 = vpop.f32.mrf.mxu1 }
 0x382   : > { %v14280_v58 = vadd.f32 %v10229_v9, %v10228_v20 }
 0x383   : > { %v14294_v25 = vpop.f32.mrf.mxu1 }
 0x384   : > { %15648 = vst [vmem:[#allocation173_spill] sm:$0xff] %v14280_v58 }
 0x385   : > { %v14298_v24 = vpop.f32.mrf.mxu1 }
 0x387   : > { %v10231_v56 = vpop.f32.mrf.mxu0 }
 0x389   : > { %v10232_v15 = vpop.f32.mrf.mxu0 }
 0x38a   : > { %v14286_v32 = vadd.f32 %v10232_v15, %v10231_v56 }
 0x38b   : > { %v10234_v10 = vpop.f32.mrf.mxu0  ;;  %v14302_v7 = vpop.f32.mrf.mxu1 }
 0x38c   : > { %15649 = vst [vmem:[#allocation174_spill] sm:$0xff] %v14286_v32  ;;  %v15674_v32 = vld [vmem:[#allocation137_spill] sm:$0xff] }
 0x38d   : > { %v10235_v38 = vpop.f32.mrf.mxu0  ;;  %v14304_v11 = vpop.f32.mrf.mxu1 }
 0x38e   : > { %v14290_v28 = vadd.f32 %v10235_v38, %v10234_v10 }
 0x38f   : > { %v14306_v44 = vpop.f32.mrf.mxu1 }
 0x390   : > { %15650 = vst [vmem:[#allocation175_spill] sm:$0xff] %v14290_v28  ;;  %15653 = vst [vmem:[#allocation178_spill] sm:$0xff] %v14306_v44  ;;  %v15673_v28 = vld [vmem:[#allocation135_spill] sm:$0xff]  ;;  %v15695_v44 = vld [vmem:[#allocation145_spill] sm:$0xff] }
 0x391   : > { %v14310_v37 = vpop.f32.mrf.mxu1 }
 0x392   : > { %v10237_v1 = vpop.f32.mrf.mxu0  ;;  %15655 = vst [vmem:[#allocation180_spill] sm:$0xff] %v14310_v37  ;;  %v15694_v37 = vld [vmem:[#allocation143_spill] sm:$0xff] }
 0x394   : > { %v10238_v29 = vpop.f32.mrf.mxu0 }
 0x395   : > { %v14296_v60 = vadd.f32 %v10238_v29, %v10237_v1 }
 0x396   : > { %v10240_v36 = vpop.f32.mrf.mxu0 }
 0x397   : > { %15651 = vst [vmem:[#allocation176_spill] sm:$0xff] %v14296_v60  ;;  %v14314_v5 = vpop.f32.mrf.mxu1 }
 0x398   : > { %v10241_v55 = vpop.f32.mrf.mxu0 }
 0x399   : > { %v14300_v31 = vadd.f32 %v10241_v55, %v10240_v36  ;;  %v14316_v26 = vpop.f32.mrf.mxu1 }
 0x39b   : > { %15652 = vst [vmem:[#allocation177_spill] sm:$0xff] %v14300_v31  ;;  %v14318_v8 = vpop.f32.mrf.mxu1  ;;  %v15671_v31 = vld [vmem:[#allocation40_spill] sm:$0xff] }
 0x39c   : > { %15657 = vst [vmem:[#allocation182_spill] sm:$0xff] %v14318_v8 }
 0x39d   : > { %v14322_v15 = vpop.f32.mrf.mxu1 }
 0x39e   : > { %v10243_v52 = vpop.f32.mrf.mxu0  ;;  %15659 = vst [vmem:[#allocation184_spill] sm:$0xff] %v14322_v15  ;;  %v15684_v15 = vld [vmem:[#allocation159_spill] sm:$0xff] }
 0x3a0   : > { %v10244_v43 = vpop.f32.mrf.mxu0 }
 0x3a1   : > { %v14308_v13 = vadd.f32 %v10244_v43, %v10243_v52 }
 0x3a2   : > { %v10246_v46 = vpop.f32.mrf.mxu0 }
 0x3a3   : > { %15654 = vst [vmem:[#allocation179_spill] sm:$0xff] %v14308_v13  ;;  %v14324_v10 = vpop.f32.mrf.mxu1 }
 0x3a4   : > { %v10247_v57 = vpop.f32.mrf.mxu0  ;;  %15660 = vst [vmem:[#allocation185_spill] sm:$0xff] %v14324_v10 }
 0x3a5   : > { %v14312_v53 = vadd.f32 %v10247_v57, %v10246_v46  ;;  %v14326_v38 = vpop.f32.mrf.mxu1  ;;  %v15667_v57 = vld [vmem:[#allocation27_spill] sm:$0xff] }
 0x3a6   : > { %15661 = vst [vmem:[#allocation186_spill] sm:$0xff] %v14326_v38 }
 0x3a7   : > { %15656 = vst [vmem:[#allocation181_spill] sm:$0xff] %v14312_v53  ;;  %v14330_v29 = vpop.f32.mrf.mxu1  ;;  %v15670_v53 = vld [vmem:[#allocation24_spill] sm:$0xff] }
 0x3a8   : > { %15663 = vst [vmem:[#allocation188_spill] sm:$0xff] %v14330_v29  ;;  %v15676_v29 = vld [vmem:[#allocation26_spill] sm:$0xff] }
 0x3a9   : > { %v14334_v55 = vpop.f32.mrf.mxu1 }
 0x3aa   : > { %15665 = vst [vmem:[#allocation190_spill] sm:$0xff] %v14334_v55  ;;  %v15675_v55 = vld [vmem:[#allocation21_spill] sm:$0xff] }
 0x3ab   : > { %v9937_v58 = vadd.f32 %v15676_v29, %v15675_v55  ;;  %v15687_v29 = vld [vmem:[#allocation28_spill] sm:$0xff] }
 0x3af   : > { %v10249_v20 = vpop.f32.mrf.mxu0 }
 0x3b1   : > { %v10250_v9 = vpop.f32.mrf.mxu0 }
 0x3b2   : > { %v14320_v56 = vadd.f32 %v10250_v9, %v10249_v20  ;;  %v14336_v43 = vpop.f32.mrf.mxu1  ;;  %v10052_v20 = vadd.f32 %v15667_v57, %v13179_v42  ;;  %v15679_v42 = vld [vmem:[#allocation164_spill] sm:$0xff]  ;;  %v15680_v57 = vld [vmem:[#allocation166_spill] sm:$0xff] }
 0x3b3   : > { %v14328_v1 = vpop.f32.mrf.mxu0  ;;  %15666 = vst [vmem:[#allocation191_spill] sm:$0xff] %v14336_v43  ;;  %v15678_v43 = vld [vmem:[#allocation133_spill] sm:$0xff] }
 0x3b4   : > { %15658 = vst [vmem:[#allocation183_spill] sm:$0xff] %v14320_v56  ;;  %15662 = vst [vmem:[#allocation187_spill] sm:$0xff] %v14328_v1  ;;  %v14340_v9 = vpop.f32.mrf.mxu1  ;;  %v15669_v56 = vld [vmem:[#allocation22_spill] sm:$0xff]  ;;  %v10161_v38 = vadd.f32 %v15678_v43, %v15677_v63  ;;  %v15689_v63 = vld [vmem:[#allocation141_spill] sm:$0xff] }
 0x3b5   : > { %v14332_v36 = vpop.f32.mrf.mxu0  ;;  %15668 = vst [vmem:[#allocation27_spill] sm:$0xff] %v14340_v9  ;;  %v9940_v13 = vadd.f32 %v15670_v53, %v15669_v56  ;;  %v15672_v1 = vld [vmem:[#allocation42_spill] sm:$0xff]  ;;  %v10276_v9 = vadd.f32 %v15680_v57, %v15679_v42  ;;  %v15682_v56 = vld [vmem:[#allocation32_spill] sm:$0xff] }
 0x3b6   : > { %15664 = vst [vmem:[#allocation189_spill] sm:$0xff] %v14332_v36  ;;  %v10049_v60 = vadd.f32 %v15672_v1, %v15671_v31  ;;  %v10164_v36 = vadd.f32 %v15674_v32, %v15673_v28  ;;  %v14354_v10 = vpop.f32.mrf.mxu1  ;;  %v10055_v31 = vadd.f32 %v15683_v50, %v15682_v56  ;;  %v15685_v32 = vld [vmem:[#allocation161_spill] sm:$0xff] }
 0x3b7   : > { %v4156_v59 = vadd.f32 %v10052_v20, %v9940_v13  ;;  %15681 = vst [vmem:[#allocation22_spill] sm:$0xff] %v14354_v10  ;;  %v10273_v28 = vadd.f32 %v15685_v32, %v15684_v15  ;;  %v9943_v13 = vadd.f32 %v15687_v29, %v15686_v35  ;;  %v15688_v20 = vld [vmem:[#allocation139_spill] sm:$0xff]  ;;  %v15693_v56 = vld [vmem:[#allocation33_spill] sm:$0xff]  ;;  %v10170_v35 = vadd.f32 %v15695_v44, %v15694_v37  ;;  %v15697_v29 = vld [vmem:[#allocation50_spill] sm:$0xff] }
 0x3b8   : > { %v4155_v53 = vadd.f32 %v10049_v60, %v9937_v58  ;;  %v10167_v43 = vadd.f32 %v15689_v63, %v15688_v20  ;;  %v14364_v42 = vpop.f32.mrf.mxu1  ;;  %v15690_v58 = vld [vmem:[#allocation43_spill] sm:$0xff]  ;;  %v15691_v60 = vld [vmem:[#allocation45_spill] sm:$0xff]  ;;  %v15698_v37 = vld [vmem:[#allocation34_spill] sm:$0xff] }
 0x3b9   : > { %v5709_v1 = vadd.f32 %v10164_v36, %v4156_v59  ;;  %v4157_v57 = vadd.f32 %v10055_v31, %v9943_v13  ;;  %v10058_v10 = vadd.f32 %v15691_v60, %v15690_v58  ;;  %v15692_v36 = vld [vmem:[#allocation30_spill] sm:$0xff]  ;;  %v8801_v44 = vld [vmem:[%s15241_s4 + $0x38] sm:$0xff]  ;;  %v15702_v58 = vld [vmem:[#allocation147_spill] sm:$0xff] }
 0x3ba   : > { %v5708_v55 = vadd.f32 %v10161_v38, %v4155_v53  ;;  %v9946_v15 = vadd.f32 %v15693_v56, %v15692_v36  ;;  %v15696_v53 = vld [vmem:[#allocation48_spill] sm:$0xff]  ;;  %v14379_v31 = vld [vmem:[%s15239_s2] ss:$0 sm:$0xff]  ;;  %v15703_v60 = vld [vmem:[#allocation149_spill] sm:$0xff] }
 0x3bb   : > { %v7328_v12 = vadd.f32 %v10276_v9, %v5709_v1  ;;  %v5710_v32 = vadd.f32 %v10167_v43, %v4157_v57  ;;  %v10061_v20 = vadd.f32 %v15697_v29, %v15696_v53  ;;  %v15701_v63 = vld [vmem:[#allocation54_spill] sm:$0xff]  ;;  %v15296_v57 = vmov 0.0   ;;  %v15706_v29 = vld [vmem:[#allocation151_spill] sm:$0xff] }
 0x3bc   : > { %v7327_v50 = vadd.f32 %v10273_v28, %v5708_v55  ;;  %v4158_v1 = vadd.f32 %v10058_v10, %v9946_v15  ;;  %v15700_v55 = vld [vmem:[#allocation53_spill] sm:$0xff]  ;;  %10458 = vmatprep.subr.mxu1 %v15296_v57 }
 0x3bd   : > { %v14374_v9 = vpop.f32.mrf.mxu1  ;;  %v10064_v43 = vadd.f32 %v15701_v63, %v15700_v55  ;;  %10459 = vmatpush3.msra.mxu1 %v8801_v44  ;;  %v15704_v15 = vld [vmem:[#allocation37_spill] sm:$0xff] }
 0x3be   : > { %v5711_v10 = vadd.f32 %v10170_v35, %v4158_v1  ;;  %v14408_v35 = vld [vmem:[%s15240_s3] ss:$0 sm:$0xff]  ;;  %10460 = vmatprep.subr.mxu1 %v15296_v57 }
 0x3bf   : > { %v14403_v55 = vpop.f32.mrf.mxu1 }
 0x3c0   : > { %v7330_v1 = vadd.f32 %v14215_v30, %v5711_v10  ;;  %v15712_v10 = vld [vmem:[#allocation58_spill] sm:$0xff] }
 0x3c3   : > { %v10428_v52 = vpop.f32.mrf.mxu0 }
 0x3c5   : > { %v8385_v46 = vpop.f32.mrf.mxu0 }
 0x3c6   : > { %v8544_v38 = vadd.f32 %v8385_v46, %v7327_v50  ;;  %v15699_v46 = vld [vmem:[#allocation36_spill] sm:$0xff]  ;;  %v10173_v50 = vadd.f32 %v15703_v60, %v15702_v58  ;;  %v8798_v58 = vld [vmem:[%s15241_s4 + $0x20] sm:$0xff] }
 0x3c7   : > { %v10429_v40 = vpop.f32.mrf.mxu0  ;;  %v9949_v13 = vadd.f32 %v15699_v46, %v15698_v37  ;;  %v15707_v37 = vld [vmem:[#allocation152_spill] sm:$0xff] }
 0x3c8   : > { %v8647_v36 = vmul.f32 %v14379_v31, %v8544_v38  ;;  %v10176_v46 = vadd.f32 %v15707_v37, %v15706_v29  ;;  %v8547_v30 = vadd.f32 %v10429_v40, %v7330_v1  ;;  %v15714_v40 = vld [vmem:[#allocation44_spill] sm:$0xff]  ;;  %v15715_v29 = vld [vmem:[#allocation154_spill] sm:$0xff]  ;;  %v15716_v37 = vld [vmem:[#allocation155_spill] sm:$0xff] }
 0x3c9   : > { %v8388_v8 = vpop.f32.mrf.mxu0  ;;  %v4159_v38 = vadd.f32 %v10061_v20, %v9949_v13  ;;  %v14428_v13 = vpop.f32.mrf.mxu1  ;;  %v8796_v1 = vld [vmem:[%s15241_s4 + $0x10] sm:$0xff] }
 0x3ca   : > { %v8545_v59 = vadd.f32 %v8388_v8, %v7328_v12  ;;  %v7329_v12 = vadd.f32 %v14207_v34, %v5710_v32  ;;  %v8800_v34 = vld [vmem:[%s15241_s4 + $0x30] sm:$0xff]  ;;  %v15705_v32 = vld [vmem:[#allocation23_spill] sm:$0xff]  ;;  %v14426_v20 = vadd.f32 %v14408_v35, %v8647_v36  ;;  %15710 = vst [vmem:[#allocation42_spill] sm:$0xff] %v14428_v13 }
 0x3cb   : > { %v9952_v53 = vadd.f32 %v15705_v32, %v15704_v15  ;;  %10461 = vmatpush3.msra.mxu1 %v8800_v34  ;;  %v5712_v60 = vadd.f32 %v10173_v50, %v4159_v38  ;;  %v15711_v34 = vld [vmem:[#allocation57_spill] sm:$0xff]  ;;  %v15713_v36 = vld [vmem:[#allocation20_spill] sm:$0xff] }
 0x3cc   : > { %v8648_v8 = vmul.f32 %v14379_v31, %v8545_v59  ;;  %v8546_v59 = vadd.f32 %v10428_v52, %v7329_v12  ;;  %v8799_v52 = vld [vmem:[%s15241_s4 + $0x28] sm:$0xff]  ;;  %10462 = vmatprep.subr.mxu1 %v15296_v57  ;;  %15709 = vst [vmem:[#allocation40_spill] sm:$0xff] %v14426_v20  ;;  %v10067_v32 = vadd.f32 %v15712_v10, %v15711_v34  ;;  %v14452_v34 = vpop.f32.mrf.mxu1  ;;  %v15719_v10 = vld [vmem:[#allocation61_spill] sm:$0xff] }
 0x3cd   : > { %v4160_v44 = vadd.f32 %v10064_v43, %v9952_v53  ;;  %10463 = vmatpush3.msra.mxu1 %v8799_v52  ;;  %v8797_v43 = vld [vmem:[%s15241_s4 + $0x18] sm:$0xff]  ;;  %v9955_v53 = vadd.f32 %v15714_v40, %v15713_v36  ;;  %15718 = vst [vmem:[#allocation137_spill] sm:$0xff] %v14452_v34  ;;  %v15720_v36 = vld [vmem:[#allocation62_spill] sm:$0xff]  ;;  %v15725_v34 = vmov 0.0  }
 0x3ce   : > { %v14416_v12 = vadd.f32 %v14408_v35, %v8648_v8  ;;  %v8649_v15 = vmul.f32 %v14379_v31, %v8546_v59  ;;  %10464 = vmatprep.subr.mxu1 %v15296_v57  ;;  %v7331_v59 = vadd.f32 %v14225_v21, %v5712_v60  ;;  %v15299_v21 = vmax.f32 %v14426_v20, 0.0  ;;  %10474 = vmatprep.mubr.msk.f32.mxu1 %vm10865_vm0, %v15725_v34 }
 0x3cf   : > { %v5713_v8 = vadd.f32 %v10176_v46, %v4160_v44  ;;  %10465 = vmatpush3.msra.mxu1 %v8798_v58  ;;  %v10179_v46 = vadd.f32 %v15716_v37, %v15715_v29  ;;  %v8650_v58 = vmul.f32 %v14379_v31, %v8547_v30  ;;  %v10070_v40 = vadd.f32 %v15720_v36, %v15719_v10  ;;  %v15723_v29 = vld [vmem:[#allocation157_spill] sm:$0xff]  ;;  %v15724_v37 = vld [vmem:[#allocation158_spill] sm:$0xff] }
 0x3d0   : > { %15708 = vst [vmem:[#allocation24_spill] sm:$0xff] %v14416_v12  ;;  %v15298_v50 = vmax.f32 %v14416_v12, 0.0  ;;  %10466 = vmatprep.subr.mxu1 %v15296_v57  ;;  %v14448_v44 = vadd.f32 %v14408_v35, %v8649_v15  ;;  %v15726_v36 = vld [vmem:[#allocation65_spill] sm:$0xff] }
 0x3d1   : > { %v7332_v52 = vadd.f32 %v14233_v3, %v5713_v8  ;;  %10467 = vmatpush3.msra.mxu1 %v8797_v43  ;;  %v8795_v3 = vld [vmem:[%s15241_s4 + $0x8] sm:$0xff]  ;;  %v4161_v8 = vadd.f32 %v10067_v32, %v9955_v53  ;;  %v14471_v53 = vadd.f32 %v14408_v35, %v8650_v58 }
 0x3d2   : > { %15717 = vst [vmem:[#allocation135_spill] sm:$0xff] %v14448_v44  ;;  %10468 = vmatprep.subr.mxu1 %v15296_v57  ;;  %v8750_v15 = vadd.f32 %v15298_v50, %v15299_v21  ;;  %v15722_v43 = vld [vmem:[#allocation31_spill] sm:$0xff]  ;;  %v10182_v57 = vadd.f32 %v15724_v37, %v15723_v29  ;;  %v15302_v32 = vmax.f32 %v14448_v44, 0.0  ;;  %v15729_v29 = vld [vmem:[#allocation41_spill] sm:$0xff]  ;;  %v15732_v21 = vld [vmem:[#allocation160_spill] sm:$0xff] }
 0x3d3   : > { %10469 = vmatpush3.msra.mxu1 %v8796_v1  ;;  %v5714_v13 = vadd.f32 %v10179_v46, %v4161_v8  ;;  %v14476_v1 = vpop.f32.mrf.mxu1  ;;  %v15728_v58 = vld [vmem:[#allocation35_spill] sm:$0xff]  ;;  %v15314_v20 = vmax.f32 %v14471_v53, 0.0 }
 0x3d4   : > { %10470 = vmatprep.subr.mxu1 %v15725_v34  ;;  %v9961_v37 = vadd.f32 %v15729_v29, %v15728_v58  ;;  %v15736_v58 = vld [vmem:[#allocation163_spill] sm:$0xff]  ;;  %v15737_v29 = vld [vmem:[#allocation165_spill] sm:$0xff] }
 0x3d5   : > { %v14383_v28 = vpop.f32.mrf.mxu0  ;;  %10471 = vmatpush3.msra.mxu1 %v8795_v3  ;;  %v7333_v46 = vadd.f32 %v14241_v54, %v5714_v13  ;;  %v15731_v3 = vld [vmem:[#allocation70_spill] sm:$0xff]  ;;  %v15734_v13 = vld [vmem:[#allocation39_spill] sm:$0xff]  ;;  %v10188_v44 = vadd.f32 %v15737_v29, %v15736_v58 }
 0x3d6   : > { %10472 = vmatprep.subr.mxu1 %v15725_v34 }
 0x3d7   : > { %v8401_v56 = vpop.f32.mrf.mxu0 }
 0x3d8   : > { %v8548_v60 = vadd.f32 %v8401_v56, %v7331_v59  ;;  %v15721_v56 = vld [vmem:[#allocation29_spill] sm:$0xff] }
 0x3d9   : > { %v14418_v63 = vpop.f32.mrf.mxu0  ;;  %v9958_v59 = vadd.f32 %v15722_v43, %v15721_v56  ;;  %v8751_v43 = vadd.f32 %v8750_v15, %v15302_v32 }
 0x3da   : > { %v8651_v10 = vmul.f32 %v14379_v31, %v8548_v60  ;;  %v15730_v60 = vld [vmem:[#allocation69_spill] sm:$0xff] }
 0x3db   : > { %v8404_v38 = vpop.f32.mrf.mxu0  ;;  %v4162_v56 = vadd.f32 %v10070_v40, %v9958_v59  ;;  %v10076_v50 = vadd.f32 %v15731_v3, %v15730_v60  ;;  %v8550_v40 = vadd.f32 %v14383_v28, %v7333_v46  ;;  %v14498_v60 = vpop.f32.mrf.mxu1 }
 0x3dc   : > { %v8549_v30 = vadd.f32 %v8404_v38, %v7332_v52  ;;  %v15727_v52 = vld [vmem:[#allocation66_spill] sm:$0xff]  ;;  %v14492_v15 = vadd.f32 %v14408_v35, %v8651_v10 }
 0x3dd   : > { %v10073_v38 = vadd.f32 %v15727_v52, %v15726_v36  ;;  %v15733_v36 = vld [vmem:[#allocation162_spill] sm:$0xff]  ;;  %v5715_v12 = vadd.f32 %v10182_v57, %v4162_v56  ;;  %v10297_v57 = vadd.f32 %v14187_v48, %v14172_v6 }
 0x3de   : > { %v8652_v8 = vmul.f32 %v14379_v31, %v8549_v30  ;;  %v10185_v52 = vadd.f32 %v15733_v36, %v15732_v21  ;;  %v15735_v30 = vld [vmem:[#allocation46_spill] sm:$0xff]  ;;  %v8752_v21 = vadd.f32 %v8751_v43, %v15314_v20  ;;  %v15312_v36 = vmax.f32 %v14492_v15, 0.0  ;;  %v15808_v20 = vld [vmem:[#allocation167_spill] sm:$0xff] }
 0x3df   : > { %v9964_v59 = vadd.f32 %v15735_v30, %v15734_v13  ;;  %v4163_v32 = vadd.f32 %v10073_v38, %v9961_v37  ;;  %v7334_v28 = vadd.f32 %v14249_v19, %v5715_v12  ;;  %v10300_v38 = vadd.f32 %v14201_v17, %v14193_v51  ;;  %v15739_v13 = vld [vmem:[#allocation73_spill] sm:$0xff]  ;;  %v15740_v43 = vld [vmem:[#allocation74_spill] sm:$0xff]  ;;  %v14515_v19 = vpop.f32.mrf.mxu1  ;;  %v15741_v51 = vld [vmem:[#allocation47_spill] sm:$0xff] }
 0x3e0   : > { %v14506_v10 = vadd.f32 %v14408_v35, %v8652_v8  ;;  %v8653_v37 = vmul.f32 %v14379_v31, %v8550_v40  ;;  %v10079_v30 = vadd.f32 %v15740_v43, %v15739_v13  ;;  %v15742_v17 = vld [vmem:[#allocation51_spill] sm:$0xff]  ;;  %v15745_v13 = vld [vmem:[#allocation78_spill] sm:$0xff] }
 0x3e1   : > { %v4164_v46 = vadd.f32 %v10076_v50, %v9964_v59  ;;  %v5716_v3 = vadd.f32 %v10185_v52, %v4163_v32  ;;  %v8551_v6 = vadd.f32 %v14418_v63, %v7334_v28  ;;  %v8753_v50 = vadd.f32 %v8752_v21, %v15312_v36  ;;  %v15744_v28 = vld [vmem:[#allocation77_spill] sm:$0xff]  ;;  %v15802_v36 = vld [vmem:[#allocation168_spill] sm:$0xff] }
 0x3e2   : > { %15738 = vst [vmem:[#allocation21_spill] sm:$0xff] %v14506_v10  ;;  %v15311_v32 = vmax.f32 %v14506_v10, 0.0  ;;  %v9967_v52 = vadd.f32 %v15742_v17, %v15741_v51  ;;  %v14523_v59 = vadd.f32 %v14408_v35, %v8653_v37  ;;  %v15746_v51 = vld [vmem:[#allocation52_spill] sm:$0xff]  ;;  %v15747_v37 = vld [vmem:[#allocation55_spill] sm:$0xff] }
 0x3e3   : > { %v5717_v12 = vadd.f32 %v10188_v44, %v4164_v46  ;;  %v7335_v8 = vadd.f32 %v10297_v57, %v5716_v3  ;;  %v8654_v63 = vmul.f32 %v14379_v31, %v8551_v6  ;;  %v10082_v44 = vadd.f32 %v15745_v13, %v15744_v28  ;;  %v14528_v46 = vpop.f32.mrf.mxu1  ;;  %v15751_v28 = vld [vmem:[#allocation56_spill] sm:$0xff]  ;;  %v15844_v10 = vld [vmem:[#allocation27_spill] sm:$0xff] }
 0x3e4   : > { %15743 = vst [vmem:[#allocation26_spill] sm:$0xff] %v14523_v59  ;;  %v4165_v21 = vadd.f32 %v10079_v30, %v9967_v52  ;;  %v10303_v57 = vadd.f32 %v14221_v33, %v14203_v2  ;;  %v8754_v3 = vadd.f32 %v8753_v50, %v15311_v32  ;;  %v9970_v17 = vadd.f32 %v15747_v37, %v15746_v51  ;;  %v15750_v52 = vld [vmem:[#allocation82_spill] sm:$0xff]  ;;  %v15800_v32 = vld [vmem:[#allocation109_spill] sm:$0xff] }
 0x3e5   : > { %v10436_v54 = vpop.f32.mrf.mxu0  ;;  %v7336_v29 = vadd.f32 %v10300_v38, %v5717_v12  ;;  %v14539_v38 = vadd.f32 %v14408_v35, %v8654_v63  ;;  %v14544_v33 = vpop.f32.mrf.mxu1  ;;  %v10306_v50 = vadd.f32 %v14270_v18, %v14259_v39  ;;  %v15752_v63 = vld [vmem:[#allocation59_spill] sm:$0xff]  ;;  %v15756_v39 = vld [vmem:[#allocation60_spill] sm:$0xff] }
 0x3e6   : > { %v5718_v6 = vadd.f32 %v14211_v27, %v4165_v21  ;;  %v4166_v30 = vadd.f32 %v10082_v44, %v9970_v17  ;;  %v9973_v13 = vadd.f32 %v15752_v63, %v15751_v28  ;;  %v15753_v21 = vld [vmem:[#allocation85_spill] sm:$0xff]  ;;  %v15757_v18 = vld [vmem:[#allocation63_spill] sm:$0xff] }
 0x3e7   : > { %v8417_v56 = vpop.f32.mrf.mxu0  ;;  %15748 = vst [vmem:[#allocation131_spill] sm:$0xff] %v14539_v38  ;;  %v15309_v37 = vmax.f32 %v14539_v38, 0.0  ;;  %v15842_v38 = vld [vmem:[#allocation186_spill] sm:$0xff] }
 0x3e8   : > { %v8552_v58 = vadd.f32 %v8417_v56, %v7335_v8  ;;  %v15310_v56 = vmax.f32 %v14523_v59, 0.0  ;;  %v15749_v8 = vld [vmem:[#allocation81_spill] sm:$0xff]  ;;  %v7337_v27 = vadd.f32 %v10303_v57, %v5718_v6  ;;  %v5719_v51 = vadd.f32 %v14219_v14, %v4166_v30  ;;  %v14562_v6 = vpop.f32.mrf.mxu1 }
 0x3e9   : > { %v10437_v48 = vpop.f32.mrf.mxu0  ;;  %v10085_v2 = vadd.f32 %v15750_v52, %v15749_v8 }
 0x3ea   : > { %v8655_v12 = vmul.f32 %v14379_v31, %v8552_v58  ;;  %v15754_v58 = vld [vmem:[#allocation49_spill] sm:$0xff]  ;;  %v8554_v17 = vadd.f32 %v10436_v54, %v7337_v27  ;;  %v7338_v28 = vadd.f32 %v10306_v50, %v5719_v51  ;;  %v10312_v27 = vadd.f32 %v14284_v62, %v14282_v41  ;;  %v15761_v41 = vld [vmem:[#allocation64_spill] sm:$0xff]  ;;  %v15762_v62 = vld [vmem:[#allocation67_spill] sm:$0xff] }
 0x3eb   : > { %v8420_v40 = vpop.f32.mrf.mxu0  ;;  %v10088_v44 = vadd.f32 %v15754_v58, %v15753_v21  ;;  %v4167_v57 = vadd.f32 %v10085_v2, %v9973_v13  ;;  %v9979_v51 = vadd.f32 %v15762_v62, %v15761_v41  ;;  %v15767_v41 = vld [vmem:[#allocation71_spill] sm:$0xff] }
 0x3ec   : > { %v8553_v43 = vadd.f32 %v8420_v40, %v7336_v29  ;;  %v8755_v40 = vadd.f32 %v8754_v3, %v15310_v56  ;;  %v14558_v8 = vadd.f32 %v14408_v35, %v8655_v12  ;;  %v9976_v3 = vadd.f32 %v15757_v18, %v15756_v39 }
 0x3ed   : > { %v5720_v12 = vadd.f32 %v14229_v49, %v4167_v57  ;;  %v8657_v2 = vmul.f32 %v14379_v31, %v8554_v17  ;;  %v8555_v13 = vadd.f32 %v10437_v48, %v7338_v28  ;;  %v15764_v57 = vld [vmem:[#allocation91_spill] sm:$0xff]  ;;  %v15765_v28 = vld [vmem:[#allocation92_spill] sm:$0xff] }
 0x3ee   : > { %v8656_v29 = vmul.f32 %v14379_v31, %v8553_v43  ;;  %15755 = vst [vmem:[#allocation133_spill] sm:$0xff] %v14558_v8  ;;  %v10309_v43 = vadd.f32 %v14278_v61, %v14274_v45  ;;  %v8756_v52 = vadd.f32 %v8755_v40, %v15309_v37  ;;  %v4168_v54 = vadd.f32 %v10088_v44, %v9976_v3  ;;  %v15759_v45 = vld [vmem:[#allocation88_spill] sm:$0xff]  ;;  %v15760_v61 = vld [vmem:[#allocation89_spill] sm:$0xff]  ;;  %v14578_v40 = vpop.f32.mrf.mxu1 }
 0x3ef   : > { %v15308_v63 = vmax.f32 %v14558_v8, 0.0  ;;  %v10091_v21 = vadd.f32 %v15760_v61, %v15759_v45  ;;  %v14587_v48 = vadd.f32 %v14408_v35, %v8657_v2  ;;  %v8658_v39 = vmul.f32 %v14379_v31, %v8555_v13  ;;  %v15766_v2 = vld [vmem:[#allocation68_spill] sm:$0xff] }
 0x3f0   : > { %v14569_v14 = vadd.f32 %v14408_v35, %v8656_v29  ;;  %v5721_v29 = vadd.f32 %v14237_v16, %v4168_v54  ;;  %v7339_v44 = vadd.f32 %v10309_v43, %v5720_v12  ;;  %v10094_v16 = vadd.f32 %v15765_v28, %v15764_v57  ;;  %v14592_v54 = vpop.f32.mrf.mxu1 }
 0x3f1   : > { %v8757_v49 = vadd.f32 %v8756_v52, %v15308_v63  ;;  %15763 = vst [vmem:[#allocation166_spill] sm:$0xff] %v14587_v48  ;;  %v4169_v45 = vadd.f32 %v10091_v21, %v9979_v51  ;;  %v10315_v43 = vadd.f32 %v14292_v0, %v14288_v4  ;;  %v9982_v62 = vadd.f32 %v15767_v41, %v15766_v2  ;;  %v15793_v63 = vld [vmem:[#allocation99_spill] sm:$0xff] }
 0x3f2   : > { %15758 = vst [vmem:[#allocation164_spill] sm:$0xff] %v14569_v14  ;;  %v15307_v58 = vmax.f32 %v14569_v14, 0.0  ;;  %v7340_v3 = vadd.f32 %v10312_v27, %v5721_v29  ;;  %v15305_v27 = vmax.f32 %v14587_v48, 0.0  ;;  %v10318_v4 = vadd.f32 %v14298_v24, %v14294_v25  ;;  %v15814_v48 = vld [vmem:[#allocation114_spill] sm:$0xff] }
 0x3f3   : > { %v5722_v13 = vadd.f32 %v14245_v47, %v4169_v45  ;;  %v4170_v21 = vadd.f32 %v10094_v16, %v9982_v62  ;;  %v15771_v16 = vld [vmem:[#allocation95_spill] sm:$0xff]  ;;  %v15775_v62 = vld [vmem:[#allocation76_spill] sm:$0xff] }
 0x3f4   : > { %v8758_v12 = vadd.f32 %v8757_v49, %v15307_v58  ;;  %v15788_v58 = vld [vmem:[#allocation16_spill] sm:$0xff] }
 0x3f5   : > { %v7341_v49 = vadd.f32 %v10315_v43, %v5722_v13  ;;  %v5723_v47 = vadd.f32 %v14253_v23, %v4170_v21  ;;  %v15776_v13 = vld [vmem:[#allocation79_spill] sm:$0xff]  ;;  %v15777_v21 = vld [vmem:[#allocation102_spill] sm:$0xff] }
 0x3f6   : > { %v10440_v30 = vpop.f32.mrf.mxu0  ;;  %v8759_v0 = vadd.f32 %v8758_v12, %v15305_v27  ;;  %v15773_v12 = vld [vmem:[#allocation72_spill] sm:$0xff]  ;;  %v15785_v27 = vld [vmem:[#allocation87_spill] sm:$0xff] }
 0x3f7   : > { %v7342_v25 = vadd.f32 %v10318_v4, %v5723_v47  ;;  %v15778_v4 = vld [vmem:[#allocation17_spill] sm:$0xff]  ;;  %v15779_v47 = vld [vmem:[#allocation80_spill] sm:$0xff] }
 0x3f8   : > { %v8433_v50 = vpop.f32.mrf.mxu0 }
 0x3f9   : > { %v8556_v18 = vadd.f32 %v8433_v50, %v7339_v44  ;;  %v14603_v50 = vadd.f32 %v14408_v35, %v8658_v39  ;;  %v14606_v44 = vpop.f32.mrf.mxu1  ;;  %v8558_v39 = vadd.f32 %v10440_v30, %v7341_v49 }
 0x3fa   : > { %v10441_v17 = vpop.f32.mrf.mxu0 }
 0x3fb   : > { %15768 = vst [vmem:[#allocation32_spill] sm:$0xff] %v14603_v50  ;;  %v8659_v29 = vmul.f32 %v14379_v31, %v8556_v18  ;;  %v14618_v18 = vpop.f32.mrf.mxu1  ;;  %v8661_v23 = vmul.f32 %v14379_v31, %v8558_v39  ;;  %v8559_v30 = vadd.f32 %v10441_v17, %v7342_v25  ;;  %v15780_v39 = vld [vmem:[#allocation83_spill] sm:$0xff]  ;;  %v15781_v25 = vld [vmem:[#allocation98_spill] sm:$0xff] }
 0x3fc   : > { %v8436_v52 = vpop.f32.mrf.mxu0 }
 0x3fd   : > { %v8557_v61 = vadd.f32 %v8436_v52, %v7340_v3  ;;  %v15304_v3 = vmax.f32 %v14603_v50, 0.0  ;;  %v14616_v57 = vadd.f32 %v14408_v35, %v8659_v29  ;;  %v15772_v52 = vld [vmem:[#allocation18_spill] sm:$0xff]  ;;  %v14631_v41 = vpop.f32.mrf.mxu1  ;;  %v9988_v29 = vadd.f32 %v15776_v13, %v15775_v62  ;;  %v15812_v50 = vld [vmem:[#allocation19_spill] sm:$0xff] }
 0x3fe   : > { %v10097_v45 = vadd.f32 %v15772_v52, %v15771_v16  ;;  %v9991_v16 = vadd.f32 %v15780_v39, %v15779_v47  ;;  %v15782_v52 = vld [vmem:[#allocation100_spill] sm:$0xff]  ;;  %v15784_v62 = vld [vmem:[#allocation86_spill] sm:$0xff]  ;;  %v15789_v47 = vld [vmem:[#allocation93_spill] sm:$0xff] }
 0x3ff   : > { %v8660_v51 = vmul.f32 %v14379_v31, %v8557_v61  ;;  %15769 = vst [vmem:[#allocation38_spill] sm:$0xff] %v14616_v57  ;;  %v8760_v28 = vadd.f32 %v8759_v0, %v15304_v3  ;;  %v15306_v43 = vmax.f32 %v14616_v57, 0.0  ;;  %v15774_v61 = vld [vmem:[#allocation75_spill] sm:$0xff]  ;;  %v10103_v0 = vadd.f32 %v15778_v4, %v15777_v21  ;;  %v15783_v3 = vld [vmem:[#allocation84_spill] sm:$0xff]  ;;  %v15786_v21 = vld [vmem:[#allocation90_spill] sm:$0xff] }
 0x400   : > { %v9985_v2 = vadd.f32 %v15774_v61, %v15773_v12  ;;  %v10100_v12 = vadd.f32 %v15782_v52, %v15781_v25  ;;  %v10321_v61 = vadd.f32 %v14304_v11, %v14302_v7  ;;  %v9994_v13 = vadd.f32 %v15784_v62, %v15783_v3  ;;  %v15791_v39 = vld [vmem:[#allocation96_spill] sm:$0xff]  ;;  %v15792_v52 = vld [vmem:[#allocation97_spill] sm:$0xff]  ;;  %v14661_v3 = vpop.f32.mrf.mxu1 }
 0x401   : > { %v14623_v24 = vadd.f32 %v14408_v35, %v8660_v51  ;;  %v8761_v49 = vadd.f32 %v8760_v28, %v15306_v43  ;;  %v9997_v4 = vadd.f32 %v15786_v21, %v15785_v27  ;;  %v14651_v28 = vadd.f32 %v14408_v35, %v8661_v23  ;;  %v15794_v27 = vld [vmem:[#allocation105_spill] sm:$0xff]  ;;  %v15795_v21 = vld [vmem:[#allocation107_spill] sm:$0xff]  ;;  %v15811_v57 = vld [vmem:[#allocation112_spill] sm:$0xff] }
 0x402   : > { %v4171_v17 = vadd.f32 %v10097_v45, %v9985_v2  ;;  %v8662_v43 = vmul.f32 %v14379_v31, %v8559_v30  ;;  %v10000_v45 = vadd.f32 %v15789_v47, %v15788_v58  ;;  %v15790_v2 = vld [vmem:[#allocation94_spill] sm:$0xff]  ;;  %v10006_v7 = vadd.f32 %v15793_v63, %v15792_v52  ;;  %v15799_v52 = vld [vmem:[#allocation180_spill] sm:$0xff] }
 0x403   : > { %15770 = vst [vmem:[#allocation159_spill] sm:$0xff] %v14623_v24  ;;  %v15313_v51 = vmax.f32 %v14623_v24, 0.0  ;;  %15787 = vst [vmem:[#allocation161_spill] sm:$0xff] %v14651_v28  ;;  %v10003_v25 = vadd.f32 %v15791_v39, %v15790_v2  ;;  %v4173_v62 = vadd.f32 %v10103_v0, %v9991_v16  ;;  %v10106_v23 = vadd.f32 %v15795_v21, %v15794_v27  ;;  %v15796_v2 = vld [vmem:[#allocation101_spill] sm:$0xff]  ;;  %v15797_v39 = vld [vmem:[#allocation103_spill] sm:$0xff] }
 0x404   : > { %v5724_v11 = vadd.f32 %v14257_v22, %v4171_v17  ;;  %v10327_v30 = vadd.f32 %v14316_v26, %v14314_v5  ;;  %v4172_v37 = vadd.f32 %v10100_v12, %v9988_v29  ;;  %v10009_v56 = vadd.f32 %v15797_v39, %v15796_v2  ;;  %v15798_v63 = vld [vmem:[#allocation178_spill] sm:$0xff]  ;;  %v15801_v0 = vld [vmem:[#allocation111_spill] sm:$0xff] }
 0x405   : > { %v8762_v58 = vadd.f32 %v8761_v49, %v15313_v51  ;;  %v10324_v22 = vadd.f32 %v15799_v52, %v15798_v63  ;;  %v10109_v16 = vadd.f32 %v15801_v0, %v15800_v32  ;;  %v5726_v27 = vadd.f32 %v15802_v36, %v4173_v62  ;;  %v15804_v49 = vld [vmem:[#allocation104_spill] sm:$0xff]  ;;  %v15805_v29 = vld [vmem:[#allocation106_spill] sm:$0xff] }
 0x406   : > { %v7343_v17 = vadd.f32 %v10321_v61, %v5724_v11  ;;  %v15319_v21 = vmax.f32 %v14651_v28, 0.0  ;;  %v14678_v5 = vadd.f32 %v14408_v35, %v8662_v43  ;;  %v10012_v12 = vadd.f32 %v15805_v29, %v15804_v49  ;;  %v15806_v51 = vld [vmem:[#allocation108_spill] sm:$0xff]  ;;  %v15807_v2 = vld [vmem:[#allocation110_spill] sm:$0xff]  ;;  %v14685_v61 = vpop.f32.mrf.mxu1  ;;  %v15813_v29 = vld [vmem:[#allocation113_spill] sm:$0xff] }
 0x407   : > { %v10015_v39 = vadd.f32 %v15807_v2, %v15806_v51  ;;  %v5725_v63 = vadd.f32 %v15808_v20, %v4172_v37  ;;  %v4174_v32 = vadd.f32 %v10106_v23, %v9994_v13  ;;  %v15809_v52 = vld [vmem:[#allocation182_spill] sm:$0xff]  ;;  %v15810_v36 = vld [vmem:[#allocation184_spill] sm:$0xff]  ;;  %v7345_v0 = vadd.f32 %v10327_v30, %v5726_v27  ;;  %v15818_v27 = vld [vmem:[#allocation119_spill] sm:$0xff] }
 0x408   : > { %15803 = vst [vmem:[#allocation25_spill] sm:$0xff] %v14678_v5  ;;  %v10330_v62 = vadd.f32 %v15810_v36, %v15809_v52  ;;  %v8763_v43 = vadd.f32 %v8762_v58, %v15319_v21  ;;  %v10018_v49 = vadd.f32 %v15812_v50, %v15811_v57  ;;  %v10112_v51 = vadd.f32 %v15814_v48, %v15813_v29  ;;  %v15816_v36 = vld [vmem:[#allocation115_spill] sm:$0xff]  ;;  %v15817_v58 = vld [vmem:[#allocation117_spill] sm:$0xff]  ;;  %v14702_v50 = vpop.f32.mrf.mxu1 }
 0x409   : > { %v7344_v37 = vadd.f32 %v10324_v22, %v5725_v63  ;;  %v4175_v2 = vadd.f32 %v10109_v16, %v9997_v4  ;;  %v15323_v23 = vmax.f32 %v14678_v5, 0.0  ;;  %v10021_v30 = vadd.f32 %v15817_v58, %v15816_v36  ;;  %v15819_v21 = vld [vmem:[#allocation121_spill] sm:$0xff]  ;;  %v15820_v22 = vld [vmem:[#allocation116_spill] sm:$0xff]  ;;  %v15821_v4 = vld [vmem:[#allocation118_spill] sm:$0xff] }
 0x40a   : > { %v10024_v28 = vadd.f32 %v15819_v21, %v15818_v27  ;;  %v10115_v16 = vadd.f32 %v15821_v4, %v15820_v22  ;;  %v15822_v63 = vld [vmem:[#allocation120_spill] sm:$0xff]  ;;  %v4176_v29 = vadd.f32 %v10112_v51, %v10000_v45  ;;  %v15825_v36 = vld [vmem:[#allocation125_spill] sm:$0xff]  ;;  %v15827_v27 = vld [vmem:[#allocation126_spill] sm:$0xff] }
 0x40b   : > { %v10444_v47 = vpop.f32.mrf.mxu0  ;;  %v15826_v58 = vld [vmem:[#allocation124_spill] sm:$0xff]  ;;  %v15833_v51 = vld [vmem:[#allocation138_spill] sm:$0xff] }
 0x40c   : > { %v10121_v14 = vadd.f32 %v15827_v27, %v15826_v58  ;;  %v15832_v45 = vld [vmem:[#allocation136_spill] sm:$0xff]  ;;  %v14728_v58 = vpop.f32.mrf.mxu1  ;;  %v4177_v27 = vadd.f32 %v10115_v16, %v10003_v25  ;;  %v15840_v5 = vld [vmem:[#allocation146_spill] sm:$0xff] }
 0x40d   : > { %v8449_v26 = vpop.f32.mrf.mxu0 }
 0x40e   : > { %v8560_v11 = vadd.f32 %v8449_v26, %v7343_v17  ;;  %v15815_v17 = vld [vmem:[#allocation169_spill] sm:$0xff]  ;;  %v8562_v26 = vadd.f32 %v10444_v47, %v7345_v0  ;;  %v8764_v47 = vadd.f32 %v8763_v43, %v15323_v23  ;;  %v15831_v43 = vld [vmem:[#allocation134_spill] sm:$0xff] }
 0x40f   : > { %v10445_v24 = vpop.f32.mrf.mxu0  ;;  %v5727_v13 = vadd.f32 %v15815_v17, %v4174_v32  ;;  %v15824_v17 = vld [vmem:[#allocation123_spill] sm:$0xff] }
 0x410   : > { %v8663_v20 = vmul.f32 %v14379_v31, %v8560_v11  ;;  %v15823_v11 = vld [vmem:[#allocation122_spill] sm:$0xff]  ;;  %v10027_v21 = vadd.f32 %v15825_v36, %v15824_v17  ;;  %v8665_v22 = vmul.f32 %v14379_v31, %v8562_v26  ;;  %v15834_v17 = vld [vmem:[#allocation140_spill] sm:$0xff]  ;;  %v15836_v26 = vld [vmem:[#allocation127_spill] sm:$0xff] }
 0x411   : > { %v8452_v52 = vpop.f32.mrf.mxu0  ;;  %v10118_v32 = vadd.f32 %v15823_v11, %v15822_v63  ;;  %v7346_v0 = vadd.f32 %v10330_v62, %v5727_v13  ;;  %v15830_v11 = vld [vmem:[#allocation132_spill] sm:$0xff]  ;;  %v10130_v13 = vadd.f32 %v15833_v51, %v15832_v45  ;;  %v15835_v36 = vld [vmem:[#allocation142_spill] sm:$0xff]  ;;  %v15841_v51 = vld [vmem:[#allocation185_spill] sm:$0xff] }
 0x412   : > { %v14705_v48 = vadd.f32 %v14408_v35, %v8663_v20  ;;  %v8561_v57 = vadd.f32 %v8452_v52, %v7344_v37  ;;  %v15828_v37 = vld [vmem:[#allocation128_spill] sm:$0xff]  ;;  %v15829_v52 = vld [vmem:[#allocation130_spill] sm:$0xff]  ;;  %v10127_v62 = vadd.f32 %v15831_v43, %v15830_v11  ;;  %v10133_v23 = vadd.f32 %v15835_v36, %v15834_v17 }
 0x413   : > { %v10124_v8 = vadd.f32 %v15829_v52, %v15828_v37  ;;  %v8563_v63 = vadd.f32 %v10445_v24, %v7346_v0  ;;  %v4178_v37 = vadd.f32 %v10118_v32, %v10006_v7  ;;  %v15837_v52 = vld [vmem:[#allocation129_spill] sm:$0xff]  ;;  %v4179_v11 = vadd.f32 %v10121_v14, %v10009_v56  ;;  %v15839_v43 = vld [vmem:[#allocation144_spill] sm:$0xff]  ;;  %v15845_v14 = vld [vmem:[#allocation170_spill] sm:$0xff] }
 0x414   : > { %v8664_v20 = vmul.f32 %v14379_v31, %v8561_v57  ;;  %v10030_v4 = vadd.f32 %v15837_v52, %v15836_v26  ;;  %v15838_v24 = vmax.f32 %v14705_v48, 0.0  ;;  %v10136_v45 = vadd.f32 %v15840_v5, %v15839_v43  ;;  %v8484_v5 = vpop.f32.mrf.mxu1  ;;  %v15846_v52 = vld [vmem:[#allocation148_spill] sm:$0xff] }
 0x415   : > { %v10333_v17 = vadd.f32 %v15842_v38, %v15841_v51  ;;  %v4180_v59 = vadd.f32 %v10124_v8, %v10012_v12  ;;  %v14745_v7 = vadd.f32 %v14408_v35, %v8665_v22  ;;  %v8666_v16 = vmul.f32 %v14379_v31, %v8563_v63  ;;  %v15848_v43 = vld [vmem:[#allocation172_spill] sm:$0xff]  ;;  %v15849_v8 = vld [vmem:[#allocation22_spill] sm:$0xff] }
 0x416   : > { %v14731_v57 = vadd.f32 %v14408_v35, %v8664_v20  ;;  %v8765_v0 = vadd.f32 %v8764_v47, %v15838_v24  ;;  %v15843_v20 = vld [vmem:[#allocation191_spill] sm:$0xff]  ;;  %v4181_v32 = vadd.f32 %v10127_v62, %v10015_v39  ;;  %v4182_v47 = vadd.f32 %v10130_v13, %v10018_v49  ;;  %v15847_v24 = vld [vmem:[#allocation150_spill] sm:$0xff] }
 0x417   : > { %v10339_v25 = vadd.f32 %v15844_v10, %v15843_v20  ;;  %v4183_v56 = vadd.f32 %v10133_v23, %v10021_v30  ;;  %v5728_v26 = vadd.f32 %v15845_v14, %v4175_v2  ;;  %v10139_v38 = vadd.f32 %v15847_v24, %v15846_v52  ;;  %v15850_v20 = vld [vmem:[#allocation173_spill] sm:$0xff]  ;;  %v15851_v23 = vld [vmem:[#allocation188_spill] sm:$0xff]  ;;  %v15852_v30 = vld [vmem:[#allocation190_spill] sm:$0xff] }
 0x418   : > { %v15328_v36 = vmax.f32 %v14731_v57, 0.0  ;;  %v5730_v51 = vadd.f32 %v15848_v43, %v4177_v27  ;;  %v10342_v12 = vadd.f32 %v14364_v42, %v15849_v8  ;;  %v4184_v22 = vadd.f32 %v10136_v45, %v10024_v28  ;;  %v15853_v14 = vld [vmem:[#allocation153_spill] sm:$0xff]  ;;  %v15854_v52 = vld [vmem:[#allocation156_spill] sm:$0xff]  ;;  %v15855_v28 = vld [vmem:[#allocation171_spill] sm:$0xff] }
 0x419   : > { %v5731_v63 = vadd.f32 %v15850_v20, %v4178_v37  ;;  %v10345_v39 = vadd.f32 %v14403_v55, %v14374_v9  ;;  %v7347_v2 = vadd.f32 %v10333_v17, %v5728_v26  ;;  %v10336_v62 = vadd.f32 %v15852_v30, %v15851_v23  ;;  %v15856_v37 = vld [vmem:[#allocation174_spill] sm:$0xff]  ;;  %v15858_v9 = vld [vmem:[#allocation137_spill] sm:$0xff]  ;;  %v14771_v17 = vpop.f32.mrf.mxu1 }
 0x41a   : > { %v8766_v10 = vadd.f32 %v8765_v0, %v15328_v36  ;;  %v8736_v13 = vmax.f32 %v14745_v7, 0.0  ;;  %v14763_v27 = vadd.f32 %v14408_v35, %v8666_v16  ;;  %v7349_v42 = vadd.f32 %v10339_v25, %v5730_v51  ;;  %v15857_v43 = vld [vmem:[#allocation42_spill] sm:$0xff]  ;;  %v15859_v51 = vld [vmem:[#allocation175_spill] sm:$0xff] }
 0x41b   : > { %v10142_v0 = vadd.f32 %v15854_v52, %v15853_v14  ;;  %v5729_v45 = vadd.f32 %v15855_v28, %v4176_v29  ;;  %v5732_v24 = vadd.f32 %v15856_v37, %v4179_v11  ;;  %v10348_v55 = vadd.f32 %v15858_v9, %v15857_v43  ;;  %v15860_v9 = vld [vmem:[#allocation176_spill] sm:$0xff] }
 0x41c   : > { %v10448_v49 = vpop.f32.mrf.mxu0  ;;  %v8767_v8 = vadd.f32 %v8766_v10, %v8736_v13  ;;  %v7350_v23 = vadd.f32 %v10342_v12, %v5731_v63  ;;  %v4185_v25 = vadd.f32 %v10139_v38, %v10027_v21  ;;  %v5733_v30 = vadd.f32 %v15859_v51, %v4180_v59  ;;  %v8497_v59 = vpop.f32.mrf.mxu1 }
 0x41d   : > { %v8566_v20 = vadd.f32 %v10448_v49, %v7349_v42  ;;  %v10351_v29 = vadd.f32 %v14498_v60, %v14476_v1  ;;  %v7351_v14 = vadd.f32 %v10345_v39, %v5732_v24  ;;  %v8737_v52 = vmax.f32 %v14763_v27, 0.0  ;;  %v15862_v24 = vld [vmem:[#allocation179_spill] sm:$0xff]  ;;  %v15877_v27 = vld [vmem:[#allocation21_spill] sm:$0xff] }
 0x41e   : > { %v8465_v26 = vpop.f32.mrf.mxu0  ;;  %v7348_v43 = vadd.f32 %v10336_v62, %v5729_v45  ;;  %v5734_v36 = vadd.f32 %v15860_v9, %v4181_v32  ;;  %v10354_v10 = vadd.f32 %v14528_v46, %v14515_v19  ;;  %v7352_v38 = vadd.f32 %v10348_v55, %v5733_v30 }
 0x41f   : > { %v8564_v16 = vadd.f32 %v8465_v26, %v7347_v2  ;;  %v8568_v21 = vadd.f32 %v14702_v50, %v7351_v14  ;;  %v8669_v1 = vmul.f32 %v14379_v31, %v8566_v20  ;;  %v8768_v63 = vadd.f32 %v8767_v8, %v8737_v52  ;;  %v15861_v2 = vld [vmem:[#allocation177_spill] sm:$0xff]  ;;  %v15864_v20 = vld [vmem:[#allocation187_spill] sm:$0xff] }
 0x420   : > { %v10449_v11 = vpop.f32.mrf.mxu0  ;;  %v4186_v49 = vadd.f32 %v10142_v0, %v10030_v4  ;;  %v5735_v32 = vadd.f32 %v15861_v2, %v4182_v47  ;;  %v10357_v19 = vadd.f32 %v14562_v6, %v14544_v33  ;;  %v7353_v46 = vadd.f32 %v10351_v29, %v5734_v36  ;;  %v10457_v47 = vpop.f32.mrf.mxu1  ;;  %v15866_v14 = vld [vmem:[#allocation183_spill] sm:$0xff] }
 0x421   : > { %v8667_v28 = vmul.f32 %v14379_v31, %v8564_v16  ;;  %v8567_v37 = vadd.f32 %v10449_v11, %v7350_v23  ;;  %v8569_v50 = vadd.f32 %v8484_v5, %v7352_v38  ;;  %v5736_v55 = vadd.f32 %v15862_v24, %v4183_v56  ;;  %v15863_v5 = vld [vmem:[#allocation181_spill] sm:$0xff] }
 0x422   : > { %v8468_v12 = vpop.f32.mrf.mxu0  ;;  %v10360_v26 = vadd.f32 %v14592_v54, %v14578_v40  ;;  %v8570_v4 = vadd.f32 %v14685_v61, %v7353_v46  ;;  %v7354_v0 = vadd.f32 %v10354_v10, %v5735_v32  ;;  %v8671_v8 = vmul.f32 %v14379_v31, %v8568_v21  ;;  %v15865_v16 = vld [vmem:[#allocation189_spill] sm:$0xff] }
 0x423   : > { %v14786_v60 = vadd.f32 %v14408_v35, %v8667_v28  ;;  %v8565_v39 = vadd.f32 %v8468_v12, %v7348_v43  ;;  %v8670_v42 = vmul.f32 %v14379_v31, %v8567_v37  ;;  %v14802_v33 = vadd.f32 %v14408_v35, %v8669_v1  ;;  %v8500_v43 = vpop.f32.mrf.mxu1 }
 0x424   : > { %v5737_v56 = vadd.f32 %v15863_v5, %v4184_v22  ;;  %v10254_v40 = vadd.f32 %v15865_v16, %v15864_v20  ;;  %v10363_v54 = vadd.f32 %v14618_v18, %v14606_v44  ;;  %v8571_v61 = vadd.f32 %v14728_v58, %v7354_v0 }
 0x425   : > { %v8738_v62 = vmax.f32 %v14786_v60, 0.0  ;;  %v8668_v45 = vmul.f32 %v14379_v31, %v8565_v39  ;;  %v8672_v23 = vmul.f32 %v14379_v31, %v8569_v50  ;;  %v7355_v51 = vadd.f32 %v10357_v19, %v5736_v55  ;;  %v15879_v60 = vld [vmem:[#allocation26_spill] sm:$0xff] }
 0x426   : > { %v14817_v30 = vadd.f32 %v14408_v35, %v8670_v42  ;;  %v5738_v11 = vadd.f32 %v15866_v14, %v4185_v25  ;;  %v10366_v22 = vadd.f32 %v14661_v3, %v14631_v41  ;;  %v8673_v28 = vmul.f32 %v14379_v31, %v8570_v4 }
 0x427   : > { %v8769_v6 = vadd.f32 %v8768_v63, %v8738_v62  ;;  %v14807_v36 = vadd.f32 %v14408_v35, %v8668_v45  ;;  %v7356_v37 = vadd.f32 %v10360_v26, %v5737_v56  ;;  %v14825_v44 = vadd.f32 %v14408_v35, %v8671_v8 }
 0x428   : > { %v8572_v18 = vadd.f32 %v8497_v59, %v7355_v51  ;;  %v8740_v58 = vmax.f32 %v14802_v33, 0.0  ;;  %v5739_v10 = vadd.f32 %v10254_v40, %v4186_v49  ;;  %v8674_v21 = vmul.f32 %v14379_v31, %v8571_v61  ;;  %v8794_v51 = vld [vmem:[%s15241_s4] sm:$0xff] }
 0x429   : > { %v8739_v29 = vmax.f32 %v14807_v36, 0.0  ;;  %v7357_v25 = vadd.f32 %v10363_v54, %v5738_v11  ;;  %v14832_v38 = vadd.f32 %v14408_v35, %v8672_v23  ;;  %v8573_v41 = vadd.f32 %v8500_v43, %v7356_v37  ;;  %10473 = vmatpush3.msra.mxu1 %v8794_v51 }
 0x42a   : > { %v8741_v3 = vmax.f32 %v14817_v30, 0.0  ;;  %v14838_v59 = vadd.f32 %v14408_v35, %v8673_v28  ;;  %v7358_v1 = vadd.f32 %v10366_v22, %v5739_v10  ;;  %v8742_v63 = vmax.f32 %v14825_v44, 0.0  ;;  %10477 = vmatprep.subr.mxu1 %v15725_v34  ;;  %v8883_v10 = vld [vmem:[%s15244_s7 + $0x18] sm:$0xff] }
 0x42b   : > { %v8770_v9 = vadd.f32 %v8769_v6, %v8739_v29  ;;  %v8574_v39 = vadd.f32 %v14771_v17, %v7357_v25  ;;  %v8675_v49 = vmul.f32 %v14379_v31, %v8572_v18  ;;  %v14846_v32 = vadd.f32 %v14408_v35, %v8674_v21  ;;  %v8882_v21 = vld [vmem:[%s15244_s7 + $0x10] sm:$0xff]  ;;  %v8881_v25 = vld [vmem:[%s15244_s7 + $0x8] sm:$0xff] }
 0x42c   : > { %v8743_v19 = vmax.f32 %v14832_v38, 0.0  ;;  %v8575_v46 = vadd.f32 %v10457_v47, %v7358_v1  ;;  %v8676_v50 = vmul.f32 %v14379_v31, %v8573_v41  ;;  %v8744_v45 = vmax.f32 %v14838_v59, 0.0  ;;  %v8880_v41 = vld [vmem:[%s15244_s7] sm:$0xff] }
 0x42d   : > { %v8771_v12 = vadd.f32 %v8770_v9, %v8740_v58  ;;  %v8677_v17 = vmul.f32 %v14379_v31, %v8574_v39  ;;  %v14855_v24 = vadd.f32 %v14408_v35, %v8675_v49  ;;  %v8745_v26 = vmax.f32 %v14846_v32, 0.0  ;;  %v8877_v39 = vld [vmem:[%s15243_s6] sm:$0x1] }
 0x42e   : > { %v8678_v4 = vmul.f32 %v14379_v31, %v8575_v46  ;;  %v14862_v0 = vadd.f32 %v14408_v35, %v8676_v50 }
 0x42f   : > { %v8772_v2 = vadd.f32 %v8771_v12, %v8741_v3  ;;  %v14867_v8 = vadd.f32 %v14408_v35, %v8677_v17  ;;  %v8746_v6 = vmax.f32 %v14855_v24, 0.0  ;;  %v8875_v12 = vld [vmem:[%s15242_s5] sm:$0x1]  ;;  %v8961_v17 = vld [vmem:[%s15246_s9 + $0x10] sm:$0xff] }
 0x430   : > { %v14873_v56 = vadd.f32 %v14408_v35, %v8678_v4  ;;  %v8747_v20 = vmax.f32 %v14862_v0, 0.0  ;;  %v8959_v4 = vld [vmem:[%s15246_s9] sm:$0xff] }
 0x431   : > { %v8773_v42 = vadd.f32 %v8772_v2, %v8742_v63  ;;  %v8748_v16 = vmax.f32 %v14867_v8, 0.0 }
 0x432   : > { %v8749_v54 = vmax.f32 %v14873_v56, 0.0 }
 0x433   : > { %v8774_v55 = vadd.f32 %v8773_v42, %v8743_v19  ;;  %v8962_v42 = vld [vmem:[%s15246_s9 + $0x18] sm:$0xff] }
 0x435   : > { %v8775_v47 = vadd.f32 %v8774_v55, %v8744_v45  ;;  %v8960_v55 = vld [vmem:[%s15246_s9 + $0x8] sm:$0xff] }
 0x437   : > { %v8776_v5 = vadd.f32 %v8775_v47, %v8745_v26 }
 0x439   : > { %v8777_v31 = vadd.f32 %v8776_v5, %v8746_v6 }
 0x43b   : > { %v8778_v40 = vadd.f32 %v8777_v31, %v8747_v20  ;;  %v8884_v31 = vld [vmem:[%s15245_s8] sm:$0x1] }
 0x43d   : > { %v8779_v61 = vadd.f32 %v8778_v40, %v8748_v16  ;;  %v8963_v40 = vld [vmem:[%s15247_s10] sm:$0x1] }
 0x43f   : > { %v8780_v23 = vadd.f32 %v8779_v61, %v8749_v54 }
 0x441   : > { %v8781_v35 = vrot.slane %v8780_v23, 4 }
 0x443   : > { %v8782_v14 = vadd.f32 %v8781_v35, %v8780_v23 }
 0x445   : > { %v8783_v11 = vrot.slane %v8782_v14, 2 }
 0x447   : > { %v8784_v22 = vadd.f32 %v8783_v11, %v8782_v14 }
 0x449   : > { %v8785_v28 = vrot.slane %v8784_v22, 1 }
 0x44b   : > { %v8786_v37 = vadd.f32 %v8785_v28, %v8784_v22 }
 0x44d   : > { %v8788_v43 = vmul.f32 0.00390625, %v8786_v37 }
 0x44f   : > { %8790 = vrot.lane.b32.xlu0 %v8788_v43, %s10863_s23 }
 0x4c1   : > { %v8791_v18 = vpop.permute.xlu0 %8790 }
 0x4c2   : > { %v8793_v9 = vadd.f32 %v8791_v18, %v8788_v43 }
 0x4c4   : > { %10475 = vmatmul.mubr.msk.f32.vlgmr.msra.gmra.mxu1 %vm1826_vm14, %v8793_v9 }
 0x4c5   : > { %10478 = vmatpush3.msra.mxu1 %v8883_v10  ;;  %10485 = vmatprep.mubr.msk.f32.mxu1 %vm10865_vm0, %v15725_v34 }
 0x4c6   : > { %10479 = vmatprep.subr.mxu1 %v15725_v34 }
 0x4c7   : > { %10480 = vmatpush3.msra.mxu1 %v8882_v21 }
 0x4c8   : > { %10481 = vmatprep.subr.mxu1 %v15725_v34 }
 0x4c9   : > { %10482 = vmatpush3.msra.mxu1 %v8881_v25  ;;  %v9051_v25 = vlaneseq }
 0x4ca   : > { %10483 = vmatprep.subr.mxu1 %v15725_v34 }
 0x4cb   : > { %10484 = vmatpush3.msra.mxu1 %v8880_v41  ;;  %v9052_v41 = vshrl.u32 %v9051_v25, 7 }
 0x4cc   : > { %10488 = vmatprep.subr.mxu1 %v15725_v34 }
 0x584   : > { %v8871_v1 = vpop.f32.mrf.mxu1 }
 0x585   : > { %v8876_v49 = vmul.f32 %v8875_v12, %v8871_v1  ;;  %v9053_v12 = vsub.s32 0, %v9052_v41 }
 0x586   : > { %v10476_v2 = vpop.f32.mrf.mxu1 }
 0x587   : > { %v8878_v46 = vadd.f32 %v8877_v39, %v8876_v49  ;;  %v15867_v2 = vld [vmem:[#allocation40_spill] sm:$0xff] }
 0x589   : > { %v8879_v50 = vmax.f32 %v8878_v46, 0.0  ;;  %v15868_v46 = vmax.f32 %v15867_v2, 0.0 }
 0x58b   : > { %10486 = vmatmul.mubr.msk.f32.vlgmr.msra.gmra.mxu1 %vm8885_vm2, %v8879_v50 }
 0x58c   : > { %10489 = vmatpush3.msra.mxu1 %v8962_v42  ;;  %10496 = vmatprep.mubr.msk.f32.mxu1 %vm10865_vm0, %v15725_v34  ;;  %v15869_v42 = vld [vmem:[#allocation24_spill] sm:$0xff] }
 0x58d   : > { %10490 = vmatprep.subr.mxu1 %v15725_v34 }
 0x58e   : > { %10491 = vmatpush3.msra.mxu1 %v8961_v17  ;;  %v15870_v17 = vmax.f32 %v15869_v42, 0.0 }
 0x58f   : > { %10492 = vmatprep.subr.mxu1 %v15725_v34 }
 0x590   : > { %10493 = vmatpush3.msra.mxu1 %v8960_v55 }
 0x591   : > { %10494 = vmatprep.subr.mxu1 %v15725_v34 }
 0x592   : > { %10495 = vmatpush3.msra.mxu1 %v8959_v4  ;;  %v15871_v4 = vmax.f32 %v14731_v57, 0.0  ;;  %v15875_v57 = vmax.f32 %v14471_v53, 0.0 }
 0x593   : > { %10497 = vmatmul.mubr.msk.f32.vlgmr.msra.gmra.mxu1 %vm8885_vm2, %v8879_v50 }
 0x64b   : > { %v8955_v47 = vpop.f32.mrf.mxu1 }
 0x64c   : > { %v8956_v23 = vadd.f32 %v8955_v47, %v8884_v31 }
 0x64d   : > { %v10487_v5 = vpop.f32.mrf.mxu1 }
 0x64e   : > { %v15872_v5 = vmax.f32 %v14705_v48, 0.0 }
 0x653   : > { %v9030_v61 = vpop.f32.mrf.mxu1 }
 0x654   : > { %v9031_v35 = vadd.f32 %v9030_v61, %v8963_v40  ;;  %v15873_v61 = vld [vmem:[#allocation135_spill] sm:$0xff] }
 0x655   : > { %v10498_v51 = vpop.f32.mrf.mxu1 }
 0x656   : > { %v9034_v14 = vmax.f32 %v8956_v23, %v9031_v35 }
 0x658   : > { %v9035_v11 = vsub.f32 %v8956_v23, %v9034_v14  ;;  %v9038_v22 = vsub.f32 %v9031_v35, %v9034_v14  ;;  %v15874_v23 = vmax.f32 %v15873_v61, 0.0 }
 0x65a   : > { %v9036_v34 = vmul.f32 1.442695, %v9035_v11  ;;  %v9039_v28 = vmul.f32 1.442695, %v9038_v22 }
 0x65c   : > { %10699 = vpow2.f32 %v9036_v34 }
 0x65d   : > { %10701 = vpow2.f32 %v9039_v28 }
 0x669   : > { %v10700_v37 = vpop.eup %10699 }
 0x66a   : > { %v10702_v43 = vpop.eup %10701 }
 0x66b   : > { %v9041_v18 = vadd.f32 %v10702_v43, %v10700_v37 }
 0x66d   : > { %10703 = vrcp.f32 %v9041_v18 }
 0x67a   : > { %v10704_v9 = vpop.eup %10703 }
 0x67b   : > { %v9045_v10 = vmul.f32 %v10704_v9, %v10702_v43  ;;  %v9044_v21 = vmul.f32 %v10704_v9, %v10700_v37 }
 0x67d   : > { %9047 = vrot.lane.b32.xlu1 %v9045_v10, %s10863_s23 }
 0x6ef   : > { %v9048_v1 = vpop.permute.xlu1 %9047 }
 0x6f0   : > { %v9050_v39 = vsel %vm1826_vm14, %v9044_v21, %v9048_v1 }
 0x6f1   : > { %v9054_v49 = vrot.slane %v9050_v39, %v9053_v12 }
 0x6f3   : > { %v14945_v50 = vmul.f32 %v9054_v49, %v15868_v46  ;;  %v14949_v55 = vmul.f32 %v9054_v49, %v15870_v17  ;;  %v14957_v47 = vmul.f32 %v9054_v49, %v15871_v4  ;;  %v14961_v31 = vmul.f32 %v9054_v49, %v15872_v5 }
 0x6f4   : > { %v14969_v40 = vmul.f32 %v9054_v49, %v8736_v13  ;;  %v14973_v35 = vmul.f32 %v9054_v49, %v15874_v23  ;;  %v14981_v48 = vmul.f32 %v9054_v49, %v8737_v52  ;;  %v14985_v51 = vmul.f32 %v9054_v49, %v15875_v57 }
 0x6f5   : > { %9121 = vrot.lane.b32.xlu1 %v14949_v55, %s10863_s23  ;;  %9119 = vrot.lane.b32.xlu0 %v14945_v50, %s10863_s23  ;;  %v14993_v7 = vmul.f32 %v9054_v49, %v8738_v62  ;;  %v15876_v13 = vmax.f32 %v14492_v15, 0.0  ;;  %v15005_v53 = vmul.f32 %v9054_v49, %v8739_v29  ;;  %v15878_v52 = vmax.f32 %v15877_v27, 0.0  ;;  %v15881_v29 = vld [vmem:[#allocation131_spill] sm:$0xff] }
 0x6f6   : > { %v15017_v15 = vmul.f32 %v9054_v49, %v8740_v58  ;;  %v15880_v62 = vmax.f32 %v15879_v60, 0.0  ;;  %v15029_v36 = vmul.f32 %v9054_v49, %v8741_v3  ;;  %v15882_v34 = vmax.f32 %v15881_v29, 0.0  ;;  %v15883_v58 = vld [vmem:[#allocation133_spill] sm:$0xff]  ;;  %v15885_v3 = vld [vmem:[#allocation164_spill] sm:$0xff] }
 0x6f7   : > { %v14997_v14 = vmul.f32 %v9054_v49, %v15876_v13  ;;  %v15009_v11 = vmul.f32 %v9054_v49, %v15878_v52  ;;  %v15041_v33 = vmul.f32 %v9054_v49, %v8742_v63  ;;  %v15884_v37 = vmax.f32 %v15883_v58, 0.0  ;;  %v15887_v63 = vld [vmem:[#allocation166_spill] sm:$0xff] }
 0x6f8   : > { %v15021_v22 = vmul.f32 %v9054_v49, %v15880_v62  ;;  %v15033_v28 = vmul.f32 %v9054_v49, %v15882_v34  ;;  %v15053_v30 = vmul.f32 %v9054_v49, %v8743_v19  ;;  %v15886_v18 = vmax.f32 %v15885_v3, 0.0  ;;  %v15889_v19 = vld [vmem:[#allocation32_spill] sm:$0xff] }
 0x6f9   : > { %9153 = vrot.lane.b32.xlu1 %v14957_v47, %s10863_s23  ;;  %9151 = vrot.lane.b32.xlu0 %v14961_v31, %s10863_s23  ;;  %v15045_v43 = vmul.f32 %v9054_v49, %v15884_v37  ;;  %v15065_v44 = vmul.f32 %v9054_v49, %v8744_v45  ;;  %v15888_v10 = vmax.f32 %v15887_v63, 0.0  ;;  %v15077_v38 = vmul.f32 %v9054_v49, %v8745_v26  ;;  %v15891_v45 = vld [vmem:[#allocation38_spill] sm:$0xff]  ;;  %v15893_v26 = vld [vmem:[#allocation159_spill] sm:$0xff] }
 0x6fa   : > { %v15057_v9 = vmul.f32 %v9054_v49, %v15886_v18  ;;  %v15890_v25 = vmax.f32 %v15889_v19, 0.0  ;;  %v15089_v59 = vmul.f32 %v9054_v49, %v8746_v6  ;;  %v15892_v12 = vmax.f32 %v15891_v45, 0.0  ;;  %v15895_v6 = vld [vmem:[#allocation161_spill] sm:$0xff] }
 0x6fb   : > { %v15069_v21 = vmul.f32 %v9054_v49, %v15888_v10  ;;  %v15101_v32 = vmul.f32 %v9054_v49, %v8747_v20  ;;  %v15894_v39 = vmax.f32 %v15893_v26, 0.0  ;;  %v15113_v24 = vmul.f32 %v9054_v49, %v8748_v16  ;;  %v15897_v20 = vld [vmem:[#allocation25_spill] sm:$0xff] }
 0x6fc   : > { %v15081_v41 = vmul.f32 %v9054_v49, %v15890_v25  ;;  %v15093_v1 = vmul.f32 %v9054_v49, %v15892_v12  ;;  %v15896_v46 = vmax.f32 %v15895_v6, 0.0  ;;  %v15125_v0 = vmul.f32 %v9054_v49, %v8749_v54 }
 0x6fd   : > { %9155 = vrot.lane.b32.xlu1 %v14969_v40, %s10863_s23  ;;  %9123 = vrot.lane.b32.xlu0 %v14973_v35, %s10863_s23  ;;  %v15105_v2 = vmul.f32 %v9054_v49, %v15894_v39  ;;  %v15898_v17 = vmax.f32 %v15897_v20, 0.0 }
 0x6fe   : > { %v15117_v42 = vmul.f32 %v9054_v49, %v15896_v46 }
 0x6ff   : > { %v15129_v4 = vmul.f32 %v9054_v49, %v15898_v17 }
 0x701   : > { %9157 = vrot.lane.b32.xlu1 %v14981_v48, %s10863_s23  ;;  %9125 = vrot.lane.b32.xlu0 %v14985_v51, %s10863_s23 }
 0x705   : > { %9159 = vrot.lane.b32.xlu1 %v14993_v7, %s10863_s23  ;;  %9127 = vrot.lane.b32.xlu0 %v14997_v14, %s10863_s23 }
 0x709   : > { %9161 = vrot.lane.b32.xlu1 %v15005_v53, %s10863_s23  ;;  %9129 = vrot.lane.b32.xlu0 %v15009_v11, %s10863_s23 }
 0x70d   : > { %9163 = vrot.lane.b32.xlu1 %v15017_v15, %s10863_s23  ;;  %9131 = vrot.lane.b32.xlu0 %v15021_v22, %s10863_s23 }
 0x711   : > { %9165 = vrot.lane.b32.xlu1 %v15029_v36, %s10863_s23  ;;  %9133 = vrot.lane.b32.xlu0 %v15033_v28, %s10863_s23 }
 0x715   : > { %9167 = vrot.lane.b32.xlu1 %v15041_v33, %s10863_s23  ;;  %9135 = vrot.lane.b32.xlu0 %v15045_v43, %s10863_s23 }
 0x719   : > { %9169 = vrot.lane.b32.xlu1 %v15053_v30, %s10863_s23  ;;  %9137 = vrot.lane.b32.xlu0 %v15057_v9, %s10863_s23 }
 0x71d   : > { %9171 = vrot.lane.b32.xlu1 %v15065_v44, %s10863_s23  ;;  %9139 = vrot.lane.b32.xlu0 %v15069_v21, %s10863_s23 }
 0x721   : > { %9173 = vrot.lane.b32.xlu1 %v15077_v38, %s10863_s23  ;;  %9141 = vrot.lane.b32.xlu0 %v15081_v41, %s10863_s23 }
 0x725   : > { %9175 = vrot.lane.b32.xlu1 %v15089_v59, %s10863_s23  ;;  %9143 = vrot.lane.b32.xlu0 %v15093_v1, %s10863_s23 }
 0x729   : > { %9177 = vrot.lane.b32.xlu1 %v15101_v32, %s10863_s23  ;;  %9145 = vrot.lane.b32.xlu0 %v15105_v2, %s10863_s23 }
 0x72d   : > { %9179 = vrot.lane.b32.xlu1 %v15113_v24, %s10863_s23  ;;  %9147 = vrot.lane.b32.xlu0 %v15117_v42, %s10863_s23 }
 0x731   : > { %9181 = vrot.lane.b32.xlu1 %v15125_v0, %s10863_s23  ;;  %9149 = vrot.lane.b32.xlu0 %v15129_v4, %s10863_s23  ;;  %s15169_s23 = scalar_lea.vmem [#allocation9], %s9432_s1  ;;  %s9918_s1 = sshll.u32 %s10950_s21, 11 }
 0x732   : > { %s9341_s14 = sshll.u32 %s15169_s23, 4  ;;  %s15191_s25 = scalar_lea.hbm %s15899_s12, %s9918_s1  ;;  %s15193_s14 = int_to_ptr.vmem [resolvable:$true] %s9341_s14 }
 0x733   : > { %s10788_s30 = scalar_lea.vmem %s15193_s14, 2048  ;;  %s10866_s21 = smov [#allocation9]  }
 0x734   : > { %p10789_p3 = scmp.ne.s32.totalorder %s15193_s14, %s10788_s30  ;;  %s10792_s22 = sshll.u32 %s10866_s21, 4  ;;  %s10793_s22 = int_to_ptr.vmem [resolvable:$false] %s10792_s22 }
 0x735   : > { %s10794_s29 = scalar_lea.vmem %s10793_s22, 4096  ;;  %p10795_p10 = scmp.lt.s32.totalorder %s15193_s14, %s10793_s22 }
 0x736   : > { %p10790_p7 = pnand %p10789_p3, %p15900_p11  ;;  %p10796_p12 = scmp.lt.s32.totalorder %s10794_s29, %s10788_s30 }
 0x738   : > { %p10791_p9 = pneg %p10790_p7  ;;  %p10797_p13 = por %p10796_p12, %p10795_p10 }
 0x73a   : > { %p10798_p0 = pnand %p10797_p13, %p10791_p9 }
 0x767   : > { %v9122_v8 = vpop.permute.xlu1 %9121  ;;  %v9120_v16 = vpop.permute.xlu0 %9119 }
 0x768   : > { %v9215_v5 = vadd.f32 %v9120_v16, %v14945_v50  ;;  %v9216_v56 = vadd.f32 %v9122_v8, %v14949_v55 }
 0x76a   : > { %9247 = vxpose.xlu0.b32.start [1/16] (narrow) %v9215_v5, 64 }
 0x76b   : > { %v9154_v61 = vpop.permute.xlu1 %9153  ;;  %v9152_v23 = vpop.permute.xlu0 %9151 }
 0x76c   : > { %v9231_v54 = vadd.f32 %v9152_v23, %v14961_v31  ;;  %v9232_v13 = vadd.f32 %v9154_v61, %v14957_v47 }
 0x76e   : > { %9248 = vxpose.xlu0.b32.cont [2/16] (narrow) %v9216_v56, 64  ;;  %9279 = vxpose.xlu1.b32.start [1/16] (narrow) %v9231_v54, 64 }
 0x76f   : > { %v9156_v49 = vpop.permute.xlu1 %9155  ;;  %v9124_v57 = vpop.permute.xlu0 %9123 }
 0x770   : > { %v9217_v27 = vadd.f32 %v9124_v57, %v14973_v35  ;;  %v9233_v50 = vadd.f32 %v9156_v49, %v14969_v40 }
 0x772   : > { %9280 = vxpose.xlu1.b32.cont [2/16] (narrow) %v9232_v13, 64  ;;  %9249 = vxpose.xlu0.b32.cont [3/16] (narrow) %v9217_v27, 64 }
 0x773   : > { %v9158_v52 = vpop.permute.xlu1 %9157  ;;  %v9126_v60 = vpop.permute.xlu0 %9125 }
 0x774   : > { %v9218_v62 = vadd.f32 %v9126_v60, %v14985_v51  ;;  %v9234_v29 = vadd.f32 %v9158_v52, %v14981_v48 }
 0x776   : > { %9281 = vxpose.xlu1.b32.cont [3/16] (narrow) %v9233_v50, 64  ;;  %9250 = vxpose.xlu0.b32.cont [4/16] (narrow) %v9218_v62, 64 }
 0x777   : > { %v9160_v55 = vpop.permute.xlu1 %9159  ;;  %v9128_v31 = vpop.permute.xlu0 %9127 }
 0x778   : > { %v9219_v34 = vadd.f32 %v9128_v31, %v14997_v14  ;;  %v9235_v58 = vadd.f32 %v9160_v55, %v14993_v7 }
 0x77a   : > { %9282 = vxpose.xlu1.b32.cont [4/16] (narrow) %v9234_v29, 64  ;;  %9251 = vxpose.xlu0.b32.cont [5/16] (narrow) %v9219_v34, 64 }
 0x77b   : > { %v9162_v47 = vpop.permute.xlu1 %9161  ;;  %v9130_v35 = vpop.permute.xlu0 %9129 }
 0x77c   : > { %v9220_v37 = vadd.f32 %v9130_v35, %v15009_v11  ;;  %v9236_v3 = vadd.f32 %v9162_v47, %v15005_v53 }
 0x77e   : > { %9283 = vxpose.xlu1.b32.cont [5/16] (narrow) %v9235_v58, 64  ;;  %9252 = vxpose.xlu0.b32.cont [6/16] (narrow) %v9220_v37, 64 }
 0x77f   : > { %v9164_v40 = vpop.permute.xlu1 %9163  ;;  %v9132_v51 = vpop.permute.xlu0 %9131 }
 0x780   : > { %v9221_v18 = vadd.f32 %v9132_v51, %v15021_v22  ;;  %v9237_v63 = vadd.f32 %v9164_v40, %v15017_v15 }
 0x782   : > { %9284 = vxpose.xlu1.b32.cont [6/16] (narrow) %v9236_v3, 64  ;;  %9253 = vxpose.xlu0.b32.cont [7/16] (narrow) %v9221_v18, 64 }
 0x783   : > { %v9166_v48 = vpop.permute.xlu1 %9165  ;;  %v9134_v14 = vpop.permute.xlu0 %9133 }
 0x784   : > { %v9222_v10 = vadd.f32 %v9134_v14, %v15033_v28  ;;  %v9238_v19 = vadd.f32 %v9166_v48, %v15029_v36 }
 0x786   : > { %9285 = vxpose.xlu1.b32.cont [7/16] (narrow) %v9237_v63, 64  ;;  %9254 = vxpose.xlu0.b32.cont [8/16] (narrow) %v9222_v10, 64 }
 0x787   : > { %v9168_v7 = vpop.permute.xlu1 %9167  ;;  %v9136_v11 = vpop.permute.xlu0 %9135 }
 0x788   : > { %v9223_v25 = vadd.f32 %v9136_v11, %v15045_v43  ;;  %v9239_v45 = vadd.f32 %v9168_v7, %v15041_v33 }
 0x78a   : > { %9286 = vxpose.xlu1.b32.cont [8/16] (narrow) %v9238_v19, 64  ;;  %9255 = vxpose.xlu0.b32.cont [9/16] (narrow) %v9223_v25, 64 }
 0x78b   : > { %v9170_v53 = vpop.permute.xlu1 %9169  ;;  %v9138_v22 = vpop.permute.xlu0 %9137 }
 0x78c   : > { %v9224_v12 = vadd.f32 %v9138_v22, %v15057_v9  ;;  %v9240_v26 = vadd.f32 %v9170_v53, %v15053_v30 }
 0x78e   : > { %9287 = vxpose.xlu1.b32.cont [9/16] (narrow) %v9239_v45, 64  ;;  %9256 = vxpose.xlu0.b32.cont [10/16] (narrow) %v9224_v12, 64 }
 0x78f   : > { %v9172_v15 = vpop.permute.xlu1 %9171  ;;  %v9140_v28 = vpop.permute.xlu0 %9139 }
 0x790   : > { %v9225_v39 = vadd.f32 %v9140_v28, %v15069_v21  ;;  %v9241_v6 = vadd.f32 %v9172_v15, %v15065_v44 }
 0x792   : > { %9288 = vxpose.xlu1.b32.cont [10/16] (narrow) %v9240_v26, 64  ;;  %9257 = vxpose.xlu0.b32.cont [11/16] (narrow) %v9225_v39, 64 }
 0x793   : > { %v9174_v36 = vpop.permute.xlu1 %9173  ;;  %v9142_v43 = vpop.permute.xlu0 %9141 }
 0x794   : > { %v9226_v46 = vadd.f32 %v9142_v43, %v15081_v41  ;;  %v9242_v20 = vadd.f32 %v9174_v36, %v15077_v38 }
 0x796   : > { %9289 = vxpose.xlu1.b32.cont [11/16] (narrow) %v9241_v6, 64  ;;  %9258 = vxpose.xlu0.b32.cont [12/16] (narrow) %v9226_v46, 64 }
 0x797   : > { %v9176_v33 = vpop.permute.xlu1 %9175  ;;  %v9144_v9 = vpop.permute.xlu0 %9143 }
 0x798   : > { %v9227_v17 = vadd.f32 %v9144_v9, %v15093_v1  ;;  %v9243_v8 = vadd.f32 %v9176_v33, %v15089_v59 }
 0x79a   : > { %9290 = vxpose.xlu1.b32.cont [12/16] (narrow) %v9242_v20, 64  ;;  %9259 = vxpose.xlu0.b32.cont [13/16] (narrow) %v9227_v17, 64 }
 0x79b   : > { %v9178_v30 = vpop.permute.xlu1 %9177  ;;  %v9146_v21 = vpop.permute.xlu0 %9145 }
 0x79c   : > { %v9228_v16 = vadd.f32 %v9146_v21, %v15105_v2  ;;  %v9244_v5 = vadd.f32 %v9178_v30, %v15101_v32 }
 0x79e   : > { %9291 = vxpose.xlu1.b32.cont [13/16] (narrow) %v9243_v8, 64  ;;  %9260 = vxpose.xlu0.b32.cont [14/16] (narrow) %v9228_v16, 64 }
 0x79f   : > { %v9180_v44 = vpop.permute.xlu1 %9179  ;;  %v9148_v41 = vpop.permute.xlu0 %9147 }
 0x7a0   : > { %v9229_v61 = vadd.f32 %v9148_v41, %v15117_v42  ;;  %v9245_v1 = vadd.f32 %v9180_v44, %v15113_v24 }
 0x7a2   : > { %9292 = vxpose.xlu1.b32.cont [14/16] (narrow) %v9244_v5, 64  ;;  %9261 = vxpose.xlu0.b32.cont [15/16] (narrow) %v9229_v61, 64 }
 0x7a3   : > { %v9150_v38 = vpop.permute.xlu0 %9149  ;;  %v9182_v56 = vpop.permute.xlu1 %9181 }
 0x7a4   : > { %v9230_v23 = vadd.f32 %v9150_v38, %v15129_v4  ;;  %v9246_v59 = vadd.f32 %v9182_v56, %v15125_v0 }
 0x7a6   : > { %9293 = vxpose.xlu1.b32.cont [15/16] (narrow) %v9245_v1, 64  ;;  %9262 = vxpose.xlu0.b32.end [16/16] (narrow) %v9230_v23, 64 }
 0x7aa   : > { %9294 = vxpose.xlu1.b32.end [16/16] (narrow) %v9246_v59, 64 }
 0x7e6   : > { %v9263_v2 = vpop.trf.xlu0 }
 0x7e7   : > { %9311 = vst [vmem:[%s15169_s23] sm:$0xff] %v9263_v2 }
 0x7ea   : > { %v9295_v32 = vpop.trf.xlu1  ;;  %v9264_v24 = vpop.trf.xlu0 }
 0x7eb   : > { %9312 = vst [vmem:[%s15169_s23 + $0x8] sm:$0xff] %v9295_v32  ;;  %9313 = vst [vmem:[%s15169_s23 + $0x10] sm:$0xff] %v9264_v24 }
 0x7ee   : > { %v9296_v42 = vpop.trf.xlu1  ;;  %v9265_v0 = vpop.trf.xlu0 }
 0x7ef   : > { %9314 = vst [vmem:[%s15169_s23 + $0x18] sm:$0xff] %v9296_v42  ;;  %9315 = vst [vmem:[%s15169_s23 + $0x20] sm:$0xff] %v9265_v0 }
 0x7f2   : > { %v9297_v4 = vpop.trf.xlu1  ;;  %v9266_v54 = vpop.trf.xlu0 }
 0x7f3   : > { %9316 = vst [vmem:[%s15169_s23 + $0x28] sm:$0xff] %v9297_v4  ;;  %9317 = vst [vmem:[%s15169_s23 + $0x30] sm:$0xff] %v9266_v54 }
 0x7f6   : > { %v9298_v49 = vpop.trf.xlu1  ;;  %v9267_v57 = vpop.trf.xlu0 }
 0x7f7   : > { %9318 = vst [vmem:[%s15169_s23 + $0x38] sm:$0xff] %v9298_v49  ;;  %9319 = vst [vmem:[%s15169_s23 + $0x40] sm:$0xff] %v9267_v57 }
 0x7fa   : > { %v9299_v13 = vpop.trf.xlu1  ;;  %v9268_v27 = vpop.trf.xlu0 }
 0x7fb   : > { %9320 = vst [vmem:[%s15169_s23 + $0x48] sm:$0xff] %v9299_v13  ;;  %9321 = vst [vmem:[%s15169_s23 + $0x50] sm:$0xff] %v9268_v27 }
 0x7fe   : > { %v9300_v52 = vpop.trf.xlu1  ;;  %v9269_v60 = vpop.trf.xlu0 }
 0x7ff   : > { %9322 = vst [vmem:[%s15169_s23 + $0x58] sm:$0xff] %v9300_v52  ;;  %9323 = vst [vmem:[%s15169_s23 + $0x60] sm:$0xff] %v9269_v60 }
 0x802   : > { %v9301_v50 = vpop.trf.xlu1  ;;  %v9270_v62 = vpop.trf.xlu0 }
 0x803   : > { %9324 = vst [vmem:[%s15169_s23 + $0x68] sm:$0xff] %v9301_v50  ;;  %9325 = vst [vmem:[%s15169_s23 + $0x70] sm:$0xff] %v9270_v62 }
 0x806   : > { %v9302_v55 = vpop.trf.xlu1 }
 0x807   : > { %9326 = vst [vmem:[%s15169_s23 + $0x78] sm:$0xff] %v9302_v55 }
 0x808   : > { %10801 = shalt.err (!%p10798_p0)
}
 0x809   : > { %s10802_s27 = scalar_lea.hbm %s15191_s25, 2048  ;;  %s10806_s23 = scalar_lea.hbm %s15899_s12, 4096 }
 0x80a   : > { %p10803_p5 = scmp.ne.s32.totalorder %s15191_s25, %s10802_s27  ;;  %p10807_p4 = scmp.lt.s32.totalorder %s15191_s25, %s15899_s12 }
 0x80b   : > { %p10808_p6 = scmp.lt.s32.totalorder %s10806_s23, %s10802_s27 }
 0x80c   : > { %p10804_p2 = pnand %p10803_p5, %p15900_p11 }
 0x80d   : > { %p10809_p8 = por %p10808_p6, %p10807_p4 }
 0x80e   : > { %p10805_p1 = pneg %p10804_p2 }
 0x810   : > { %p10810_p3 = pnand %p10809_p8, %p10805_p1 }
 0x812   : > { %10813 = shalt.err (!%p10810_p3)
}
 0x813   : > { %s10867_s24 = smov 256   ;;  %s10868_s30 = smov 16  }
 0x814   : > { %10521 = dma.vmem_to_hbm [thread:$0]  (%p15900_p11), %s15193_s14, 2048, %s15191_s25, %s9328_s16, %s10867_s24, %s10867_s24, %s10868_s30  }
 0x815 PF: > { %s15901_s21 = sld [smem:[#allocation13_spill]]  ;;  %p15904_p9 = scmp.ge.s32.totalorder %s10856_s20, 2 }
 0x816   : > { %s15902_s22 = sld [smem:[#allocation14_spill]] }
 0x81b   : > { %s9356_s29 = sand.u32 1, %s15901_s21  }
 0x81c   : > { %p15903_p7 = scmp.ne.s32.totalorder %s15902_s22, 0  ;;  %s9357_s27 = scalar_lea.sflag [#allocation6], %s9356_s29 }
 0x81e   : > { %p10532_p10 = pnand %p15904_p9, %p15903_p7 }
 0x820   : > { %p10533_p12 = pneg %p10532_p10 }
 0x822   : > { %10839 = dma.done.wait (%p10533_p12), %s9357_s27, 2048  }
 0x823   : > { %10841 = vsyncadd (%p10533_p12), %s9357_s27, 4294965248  ;;  %s15905_s20 = sld [smem:[#allocation15_spill]]  ;;  %s15906_s17 = smov %s10848_s18 }
 0x824   : > { %s15907_s18 = smov %s10852_s19  ;;  %s15908_s19 = smov %s11003_s26 }
 0x829   : > { %p25_p13 = scmp.ge.s32.totalorder %s15905_s20, 4  }
 0x82b   :  { %27 = sbr.rel (!%p25_p13) target bundleno = 9 (0x9), region = 118 }
 0x830   :  { %9362 = vsyncpa [#allocation5], 1 }
 0x831   :  { %9364 = vsyncpa [#allocation5 + $0x1], 1 }
 0x832   :  { %9365 = vsyncpa [#allocation8], 1 }
 0x833   :  { %9366 = vsyncpa [#allocation6], 1 }
 0x834   :  { %9368 = vsyncpa [#allocation6 + $0x1], 1 }

</bundles_post_ra>
